<compile_context>
chip_gen: v7x
topology: tpu7x:2x2x1
jax: 0.10.0
libtpu: 0.0.40
codegen_flags: <defaults>
</compile_context>

<pallas_src>
import jax
import jax.numpy as jnp
from jax import lax
from jax.experimental import pallas as pl
from jax.experimental.pallas import tpu as pltpu


def _round_up(x, m):
    return (x + m - 1) // m * m


def _resblock_kernel(x_ref, w1_ref, w2_ref, sb_ref, o_ref, pad_ref):
    """One image per grid step.

    x_ref  : (H, W, Cp)       unpadded input, f32 (Cp = lane-padded channels)
    w1_ref : (9*Cp, Cp)       conv1 weight, im2col layout (kh,kw,ci)->co, bf16
    w2_ref : (9*Cp, Cp)       conv2 weight, same layout, bf16
    sb_ref : (4, Cp)          rows = [bn1 scale, bn1 shift, bn2 scale, bn2 shift]
    o_ref  : (H*W, Cp)        output, f32 (lane-dense slab)
    pad_ref: (H+2, W+2, Cp)   bf16 VMEM scratch holding the spatially padded
                              conv input (reused for conv1 and conv2)
    """
    H, W, Cp = x_ref.shape
    HW = H * W

    x_f32 = x_ref[...]                               # (H, W, Cp) f32
    xb = x_f32.astype(jnp.bfloat16)                  # bf16 MXU input

    # ---- stage padded conv1 input in VMEM scratch ------------------------
    # Zero only the thin border strips (the interior is rewritten each step),
    # then write the interior.  This avoids re-zeroing the whole scratch and
    # is safe under "parallel" grid sharding (every step fully initializes
    # the region it reads).
    zrow = jnp.zeros((1, W + 2, Cp), jnp.bfloat16)
    zcol = jnp.zeros((H, 1, Cp), jnp.bfloat16)
    pad_ref[0:1, :, :] = zrow
    pad_ref[H + 1:H + 2, :, :] = zrow
    pad_ref[1:1 + H, 0:1, :] = zcol
    pad_ref[1:1 + H, W + 1:W + 2, :] = zcol
    pad_ref[1:1 + H, 1:1 + W, :] = xb

    def conv3x3(w_ref):
        # im2col: gather the 9 shifted taps, concatenate along the
        # contraction axis, and do ONE K=9*Cp MXU matmul (f32 accumulate).
        taps = [
            pad_ref[dh:dh + H, dw:dw + W, :].reshape(HW, Cp)
            for dh in range(3) for dw in range(3)
        ]
        patch = jnp.concatenate(taps, axis=-1)       # (HW, 9*Cp) bf16
        return jnp.dot(patch, w_ref[...],
                       preferred_element_type=jnp.float32)  # (HW, Cp) f32

    # ---- conv1 -> bn1 (folded) -> relu -----------------------------------
    h1 = jnp.maximum(conv3x3(w1_ref) * sb_ref[0:1, :] + sb_ref[1:2, :], 0.0)

    # ---- re-stage padded h1 for conv2 (border is still zero) -------------
    pad_ref[1:1 + H, 1:1 + W, :] = h1.astype(jnp.bfloat16).reshape(H, W, Cp)

    # ---- conv2 -> bn2 (folded) -> +identity -> relu -----------------------
    h2 = conv3x3(w2_ref) * sb_ref[2:3, :] + sb_ref[3:4, :]
    identity = x_f32.reshape(HW, Cp)
    o_ref[...] = jnp.maximum(h2 + identity, 0.0)


def resblock_forward(x_nchw, params, eps=1e-5):
    """Pallas ResBlock forward. x_nchw: (N, C, H, W) -> (N, C, H, W)."""
    N, C, H, W = x_nchw.shape
    Cp = _round_up(C, 128)          # lane-dense channel dim (last dim = lanes)

    # NCHW -> NHWC; pad channels to Cp (zero weights/scales make the padded
    # channels exactly zero all the way through, so they are sliced off at
    # the end).  No spatially padded HBM copy is made (halo is built in-VMEM).
    x = jnp.transpose(x_nchw, (0, 2, 3, 1)).astype(jnp.float32)
    if Cp != C:
        x = jnp.pad(x, ((0, 0), (0, 0), (0, 0), (0, Cp - C)))

    def prep_weight(w_oihw):
        w = jnp.transpose(w_oihw, (2, 3, 1, 0))                  # OIHW -> HWIO
        w = jnp.pad(w, ((0, 0), (0, 0), (0, Cp - C), (0, Cp - C)))
        return w.reshape(9 * Cp, Cp).astype(jnp.bfloat16)        # im2col layout

    def fold(conv_b, gamma, beta, mean, var):
        scale = gamma * lax.rsqrt(var + eps)
        shift = beta + (conv_b - mean) * scale
        return jnp.pad(scale, (0, Cp - C)), jnp.pad(shift, (0, Cp - C))

    w1 = prep_weight(params["conv1_w"])
    w2 = prep_weight(params["conv2_w"])
    s1, b1 = fold(params["conv1_b"], params["bn1_g"], params["bn1_b"],
                  params["bn1_m"], params["bn1_v"])
    s2, b2 = fold(params["conv2_b"], params["bn2_g"], params["bn2_b"],
                  params["bn2_m"], params["bn2_v"])
    sb = jnp.stack([s1, b1, s2, b2]).astype(jnp.float32)         # (4, Cp)

    grid_spec = pltpu.PrefetchScalarGridSpec(
        num_scalar_prefetch=0,
        grid=(N,),
        in_specs=[
            pl.BlockSpec((pl.Squeezed(), H, W, Cp), lambda n: (n, 0, 0, 0)),
            pl.BlockSpec((9 * Cp, Cp), lambda n: (0, 0)),
            pl.BlockSpec((9 * Cp, Cp), lambda n: (0, 0)),
            pl.BlockSpec((4, Cp), lambda n: (0, 0)),
        ],
        out_specs=pl.BlockSpec((pl.Squeezed(), H * W, Cp),
                               lambda n: (n, 0, 0)),
        scratch_shapes=[pltpu.VMEM((H + 2, W + 2, Cp), jnp.bfloat16)],
    )

    y = pl.pallas_call(
        _resblock_kernel,
        out_shape=jax.ShapeDtypeStruct((N, H * W, Cp), jnp.float32),
        grid_spec=grid_spec,
        compiler_params=pltpu.CompilerParams(
            dimension_semantics=("parallel",)),
    )(x, w1, w2, sb)

    y = y.reshape(N, H, W, Cp)[..., :C]
    return jnp.transpose(y, (0, 3, 1, 2))            # back to NCHW


def resblock_reference(x_nchw, params, eps=1e-5):
    """Pure-JAX f32 reference (NCHW, mirrors the PyTorch module in eval mode)."""
    x = x_nchw.astype(jnp.float32)

    def conv(inp, w, b):
        out = lax.conv_general_dilated(
            inp, w, window_strides=(1, 1), padding="SAME",
            dimension_numbers=("NCHW", "OIHW", "NCHW"))
        return out + b.reshape(1, -1, 1, 1)

    def bn(inp, g, be, m, v):
        inv = g.reshape(1, -1, 1, 1) * lax.rsqrt(v.reshape(1, -1, 1, 1) + eps)
        return (inp - m.reshape(1, -1, 1, 1)) * inv + be.reshape(1, -1, 1, 1)

    h = jax.nn.relu(bn(conv(x, params["conv1_w"], params["conv1_b"]),
                       params["bn1_g"], params["bn1_b"],
                       params["bn1_m"], params["bn1_v"]))
    h = bn(conv(h, params["conv2_w"], params["conv2_b"]),
           params["bn2_g"], params["bn2_b"], params["bn2_m"], params["bn2_v"])
    return jax.nn.relu(h + x)


def init_params(key, channels):
    ks = jax.random.split(key, 10)
    fan_in = channels * 3 * 3
    bound = 1.0 / jnp.sqrt(fan_in)
    return {
        "conv1_w": jax.random.uniform(ks[0], (channels, channels, 3, 3),
                                      jnp.float32, -bound, bound),
        "conv1_b": jax.random.uniform(ks[1], (channels,), jnp.float32,
                                      -bound, bound),
        "conv2_w": jax.random.uniform(ks[2], (channels, channels, 3, 3),
                                      jnp.float32, -bound, bound),
        "conv2_b": jax.random.uniform(ks[3], (channels,), jnp.float32,
                                      -bound, bound),
        "bn1_g": 1.0 + 0.1 * jax.random.normal(ks[4], (channels,), jnp.float32),
        "bn1_b": 0.05 * jax.random.normal(ks[5], (channels,), jnp.float32),
        "bn1_m": 0.1 * jax.random.normal(ks[6], (channels,), jnp.float32),
        "bn1_v": jax.random.uniform(ks[7], (channels,), jnp.float32, 0.5, 1.5),
        "bn2_g": 1.0 + 0.1 * jax.random.normal(ks[8], (channels,), jnp.float32),
        "bn2_b": 0.05 * jax.random.normal(ks[9], (channels,), jnp.float32),
        "bn2_m": jnp.zeros((channels,), jnp.float32),
        "bn2_v": jnp.ones((channels,), jnp.float32),
    }


if __name__ == "__main__":
    N, C, H, W = 2, 4, 16, 16
    key = jax.random.PRNGKey(0)
    k_x, k_p = jax.random.split(key)
    x = jax.random.normal(k_x, (N, C, H, W), jnp.float32)
    params = init_params(k_p, C)

    out = jax.jit(resblock_forward)(x, params)
    out = jax.block_until_ready(out)

    ref = resblock_reference(x, params)
    assert out.shape == (N, C, H, W)
    # bf16 MXU inputs (f32 accumulation) -> tolerance loosened accordingly.
    assert jnp.allclose(out, ref, atol=5e-2, rtol=5e-2), (
        f"max abs err = {jnp.max(jnp.abs(out - ref))}")
    print("KERNEL_OK")
</pallas_src>

<mosaic_0001>
module attributes {stable_mosaic.version = 11 : i64} {
  func.func @_resblock_kernel(%arg0: i32, %arg1: memref<1x16x16x128xf32, #tpu.memory_space<vmem>>, %arg2: memref<1152x128xbf16, #tpu.memory_space<vmem>>, %arg3: memref<1152x128xbf16, #tpu.memory_space<vmem>>, %arg4: memref<4x128xf32, #tpu.memory_space<vmem>>, %arg5: memref<1x256x128xf32, #tpu.memory_space<vmem>>, %arg6: memref<18x18x128xbf16, #tpu.memory_space<vmem>>) attributes {dimension_semantics = [#tpu.dimension_semantics<parallel>], iteration_bounds = array<i64: 2>, scalar_prefetch = 0 : i64, scratch_operands = 1 : i64, tpu.core_type = #tpu.core_type<tc>, window_params = [{transform_indices = @transform_0, window_bounds = array<i64: 1, 16, 16, 128>}, {pipeline_mode = #tpu.pipeline_mode<synchronous>, transform_indices = @transform_1, window_bounds = array<i64: 1152, 128>}, {pipeline_mode = #tpu.pipeline_mode<synchronous>, transform_indices = @transform_2, window_bounds = array<i64: 1152, 128>}, {pipeline_mode = #tpu.pipeline_mode<synchronous>, transform_indices = @transform_3, window_bounds = array<i64: 4, 128>}, {transform_indices = @transform_4, window_bounds = array<i64: 1, 256, 128>}]} {
    %c0 = arith.constant 0 : index
    %c0_0 = arith.constant 0 : index
    %c0_1 = arith.constant 0 : index
    %c0_2 = arith.constant 0 : index
    %0 = vector.load %arg1[%c0, %c0_0, %c0_1, %c0_2] : memref<1x16x16x128xf32, #tpu.memory_space<vmem>>, vector<1x16x16x128xf32>
    %1 = vector.shape_cast %0 : vector<1x16x16x128xf32> to vector<16x16x128xf32>
    %2 = arith.truncf %1 : vector<16x16x128xf32> to vector<16x16x128xbf16>
    %cst = arith.constant 0.000000e+00 : bf16
    %3 = vector.broadcast %cst : bf16 to vector<1x18x128xbf16>
    %cst_3 = arith.constant 0.000000e+00 : bf16
    %4 = vector.broadcast %cst_3 : bf16 to vector<16x1x128xbf16>
    %c0_4 = arith.constant 0 : index
    %c0_5 = arith.constant 0 : index
    %c0_6 = arith.constant 0 : index
    %5 = vector.load %arg6[%c0_4, %c0_5, %c0_6] : memref<18x18x128xbf16, #tpu.memory_space<vmem>>, vector<1x18x128xbf16>
    tpu.vector_store %arg6[%c0_4, %c0_5, %c0_6], %3 {strides = array<i32>} : memref<18x18x128xbf16, #tpu.memory_space<vmem>>, vector<1x18x128xbf16>,
    %c17 = arith.constant 17 : index
    %c0_7 = arith.constant 0 : index
    %c0_8 = arith.constant 0 : index
    %6 = vector.load %arg6[%c17, %c0_7, %c0_8] : memref<18x18x128xbf16, #tpu.memory_space<vmem>>, vector<1x18x128xbf16>
    tpu.vector_store %arg6[%c17, %c0_7, %c0_8], %3 {strides = array<i32>} : memref<18x18x128xbf16, #tpu.memory_space<vmem>>, vector<1x18x128xbf16>,
    %c1 = arith.constant 1 : index
    %c0_9 = arith.constant 0 : index
    %c0_10 = arith.constant 0 : index
    %7 = vector.load %arg6[%c1, %c0_9, %c0_10] : memref<18x18x128xbf16, #tpu.memory_space<vmem>>, vector<16x1x128xbf16>
    tpu.vector_store %arg6[%c1, %c0_9, %c0_10], %4 {strides = array<i32>} : memref<18x18x128xbf16, #tpu.memory_space<vmem>>, vector<16x1x128xbf16>,
    %c1_11 = arith.constant 1 : index
    %c17_12 = arith.constant 17 : index
    %c0_13 = arith.constant 0 : index
    %8 = vector.load %arg6[%c1_11, %c17_12, %c0_13] : memref<18x18x128xbf16, #tpu.memory_space<vmem>>, vector<16x1x128xbf16>
    tpu.vector_store %arg6[%c1_11, %c17_12, %c0_13], %4 {strides = array<i32>} : memref<18x18x128xbf16, #tpu.memory_space<vmem>>, vector<16x1x128xbf16>,
    %c1_14 = arith.constant 1 : index
    %c1_15 = arith.constant 1 : index
    %c0_16 = arith.constant 0 : index
    %9 = vector.load %arg6[%c1_14, %c1_15, %c0_16] : memref<18x18x128xbf16, #tpu.memory_space<vmem>>, vector<16x16x128xbf16>
    tpu.vector_store %arg6[%c1_14, %c1_15, %c0_16], %2 {strides = array<i32>} : memref<18x18x128xbf16, #tpu.memory_space<vmem>>, vector<16x16x128xbf16>,
    %c0_17 = arith.constant 0 : index
    %c0_18 = arith.constant 0 : index
    %c0_19 = arith.constant 0 : index
    %10 = vector.load %arg6[%c0_17, %c0_18, %c0_19] : memref<18x18x128xbf16, #tpu.memory_space<vmem>>, vector<16x16x128xbf16>
    %11 = vector.shape_cast %10 : vector<16x16x128xbf16> to vector<256x128xbf16>
    %c0_20 = arith.constant 0 : index
    %c1_21 = arith.constant 1 : index
    %c0_22 = arith.constant 0 : index
    %12 = vector.load %arg6[%c0_20, %c1_21, %c0_22] : memref<18x18x128xbf16, #tpu.memory_space<vmem>>, vector<16x16x128xbf16>
    %13 = vector.shape_cast %12 : vector<16x16x128xbf16> to vector<256x128xbf16>
    %c0_23 = arith.constant 0 : index
    %c2 = arith.constant 2 : index
    %c0_24 = arith.constant 0 : index
    %14 = vector.load %arg6[%c0_23, %c2, %c0_24] : memref<18x18x128xbf16, #tpu.memory_space<vmem>>, vector<16x16x128xbf16>
    %15 = vector.shape_cast %14 : vector<16x16x128xbf16> to vector<256x128xbf16>
    %c1_25 = arith.constant 1 : index
    %c0_26 = arith.constant 0 : index
    %c0_27 = arith.constant 0 : index
    %16 = vector.load %arg6[%c1_25, %c0_26, %c0_27] : memref<18x18x128xbf16, #tpu.memory_space<vmem>>, vector<16x16x128xbf16>
    %17 = vector.shape_cast %16 : vector<16x16x128xbf16> to vector<256x128xbf16>
    %c1_28 = arith.constant 1 : index
    %c1_29 = arith.constant 1 : index
    %c0_30 = arith.constant 0 : index
    %18 = vector.load %arg6[%c1_28, %c1_29, %c0_30] : memref<18x18x128xbf16, #tpu.memory_space<vmem>>, vector<16x16x128xbf16>
    %19 = vector.shape_cast %18 : vector<16x16x128xbf16> to vector<256x128xbf16>
    %c1_31 = arith.constant 1 : index
    %c2_32 = arith.constant 2 : index
    %c0_33 = arith.constant 0 : index
    %20 = vector.load %arg6[%c1_31, %c2_32, %c0_33] : memref<18x18x128xbf16, #tpu.memory_space<vmem>>, vector<16x16x128xbf16>
    %21 = vector.shape_cast %20 : vector<16x16x128xbf16> to vector<256x128xbf16>
    %c2_34 = arith.constant 2 : index
    %c0_35 = arith.constant 0 : index
    %c0_36 = arith.constant 0 : index
    %22 = vector.load %arg6[%c2_34, %c0_35, %c0_36] : memref<18x18x128xbf16, #tpu.memory_space<vmem>>, vector<16x16x128xbf16>
    %23 = vector.shape_cast %22 : vector<16x16x128xbf16> to vector<256x128xbf16>
    %c2_37 = arith.constant 2 : index
    %c1_38 = arith.constant 1 : index
    %c0_39 = arith.constant 0 : index
    %24 = vector.load %arg6[%c2_37, %c1_38, %c0_39] : memref<18x18x128xbf16, #tpu.memory_space<vmem>>, vector<16x16x128xbf16>
    %25 = vector.shape_cast %24 : vector<16x16x128xbf16> to vector<256x128xbf16>
    %c2_40 = arith.constant 2 : index
    %c2_41 = arith.constant 2 : index
    %c0_42 = arith.constant 0 : index
    %26 = vector.load %arg6[%c2_40, %c2_41, %c0_42] : memref<18x18x128xbf16, #tpu.memory_space<vmem>>, vector<16x16x128xbf16>
    %27 = vector.shape_cast %26 : vector<16x16x128xbf16> to vector<256x128xbf16>
    %28 = tpu.concatenate %11, %13, %15, %17, %19, %21, %23, %25, %27 in 1 : vector<256x128xbf16>, vector<256x128xbf16>, vector<256x128xbf16>, vector<256x128xbf16>, vector<256x128xbf16>, vector<256x128xbf16>, vector<256x128xbf16>, vector<256x128xbf16>, vector<256x128xbf16> -> vector<256x1152xbf16>
    %c0_43 = arith.constant 0 : index
    %c0_44 = arith.constant 0 : index
    %29 = vector.load %arg2[%c0_43, %c0_44] : memref<1152x128xbf16, #tpu.memory_space<vmem>>, vector<1152x128xbf16>
    %cst_45 = arith.constant dense<0.000000e+00> : vector<256x128xf32>
    %30 = tpu.matmul %28, %29, %cst_45 {dimension_numbers = #tpu.dot_dimension_numbers<[1], [0], [0], [1], [0, 0, 1, 1], [], []>} : vector<256x1152xbf16>, vector<1152x128xbf16>, vector<256x128xf32> -> vector<256x128xf32>
    %c0_46 = arith.constant 0 : index
    %c0_47 = arith.constant 0 : index
    %31 = vector.load %arg4[%c0_46, %c0_47] : memref<4x128xf32, #tpu.memory_space<vmem>>, vector<1x128xf32>
    %32 = vector.broadcast %31 : vector<1x128xf32> to vector<256x128xf32>
    %33 = arith.mulf %30, %32 : vector<256x128xf32>
    %c1_48 = arith.constant 1 : index
    %c0_49 = arith.constant 0 : index
    %34 = vector.load %arg4[%c1_48, %c0_49] : memref<4x128xf32, #tpu.memory_space<vmem>>, vector<1x128xf32>
    %35 = vector.broadcast %34 : vector<1x128xf32> to vector<256x128xf32>
    %36 = arith.addf %33, %35 : vector<256x128xf32>
    %cst_50 = arith.constant 0.000000e+00 : f32
    %37 = vector.broadcast %cst_50 : f32 to vector<256x128xf32>
    %38 = arith.maximumf %36, %37 : vector<256x128xf32>
    %39 = arith.truncf %38 : vector<256x128xf32> to vector<256x128xbf16>
    %40 = vector.shape_cast %39 : vector<256x128xbf16> to vector<16x16x128xbf16>
    %c1_51 = arith.constant 1 : index
    %c1_52 = arith.constant 1 : index
    %c0_53 = arith.constant 0 : index
    %41 = vector.load %arg6[%c1_51, %c1_52, %c0_53] : memref<18x18x128xbf16, #tpu.memory_space<vmem>>, vector<16x16x128xbf16>
    tpu.vector_store %arg6[%c1_51, %c1_52, %c0_53], %40 {strides = array<i32>} : memref<18x18x128xbf16, #tpu.memory_space<vmem>>, vector<16x16x128xbf16>,
    %c0_54 = arith.constant 0 : index
    %c0_55 = arith.constant 0 : index
    %c0_56 = arith.constant 0 : index
    %42 = vector.load %arg6[%c0_54, %c0_55, %c0_56] : memref<18x18x128xbf16, #tpu.memory_space<vmem>>, vector<16x16x128xbf16>
    %43 = vector.shape_cast %42 : vector<16x16x128xbf16> to vector<256x128xbf16>
    %c0_57 = arith.constant 0 : index
    %c1_58 = arith.constant 1 : index
    %c0_59 = arith.constant 0 : index
    %44 = vector.load %arg6[%c0_57, %c1_58, %c0_59] : memref<18x18x128xbf16, #tpu.memory_space<vmem>>, vector<16x16x128xbf16>
    %45 = vector.shape_cast %44 : vector<16x16x128xbf16> to vector<256x128xbf16>
    %c0_60 = arith.constant 0 : index
    %c2_61 = arith.constant 2 : index
    %c0_62 = arith.constant 0 : index
    %46 = vector.load %arg6[%c0_60, %c2_61, %c0_62] : memref<18x18x128xbf16, #tpu.memory_space<vmem>>, vector<16x16x128xbf16>
    %47 = vector.shape_cast %46 : vector<16x16x128xbf16> to vector<256x128xbf16>
    %c1_63 = arith.constant 1 : index
    %c0_64 = arith.constant 0 : index
    %c0_65 = arith.constant 0 : index
    %48 = vector.load %arg6[%c1_63, %c0_64, %c0_65] : memref<18x18x128xbf16, #tpu.memory_space<vmem>>, vector<16x16x128xbf16>
    %49 = vector.shape_cast %48 : vector<16x16x128xbf16> to vector<256x128xbf16>
    %c1_66 = arith.constant 1 : index
    %c1_67 = arith.constant 1 : index
    %c0_68 = arith.constant 0 : index
    %50 = vector.load %arg6[%c1_66, %c1_67, %c0_68] : memref<18x18x128xbf16, #tpu.memory_space<vmem>>, vector<16x16x128xbf16>
    %51 = vector.shape_cast %50 : vector<16x16x128xbf16> to vector<256x128xbf16>
    %c1_69 = arith.constant 1 : index
    %c2_70 = arith.constant 2 : index
    %c0_71 = arith.constant 0 : index
    %52 = vector.load %arg6[%c1_69, %c2_70, %c0_71] : memref<18x18x128xbf16, #tpu.memory_space<vmem>>, vector<16x16x128xbf16>
    %53 = vector.shape_cast %52 : vector<16x16x128xbf16> to vector<256x128xbf16>
    %c2_72 = arith.constant 2 : index
    %c0_73 = arith.constant 0 : index
    %c0_74 = arith.constant 0 : index
    %54 = vector.load %arg6[%c2_72, %c0_73, %c0_74] : memref<18x18x128xbf16, #tpu.memory_space<vmem>>, vector<16x16x128xbf16>
    %55 = vector.shape_cast %54 : vector<16x16x128xbf16> to vector<256x128xbf16>
    %c2_75 = arith.constant 2 : index
    %c1_76 = arith.constant 1 : index
    %c0_77 = arith.constant 0 : index
    %56 = vector.load %arg6[%c2_75, %c1_76, %c0_77] : memref<18x18x128xbf16, #tpu.memory_space<vmem>>, vector<16x16x128xbf16>
    %57 = vector.shape_cast %56 : vector<16x16x128xbf16> to vector<256x128xbf16>
    %c2_78 = arith.constant 2 : index
    %c2_79 = arith.constant 2 : index
    %c0_80 = arith.constant 0 : index
    %58 = vector.load %arg6[%c2_78, %c2_79, %c0_80] : memref<18x18x128xbf16, #tpu.memory_space<vmem>>, vector<16x16x128xbf16>
    %59 = vector.shape_cast %58 : vector<16x16x128xbf16> to vector<256x128xbf16>
    %60 = tpu.concatenate %43, %45, %47, %49, %51, %53, %55, %57, %59 in 1 : vector<256x128xbf16>, vector<256x128xbf16>, vector<256x128xbf16>, vector<256x128xbf16>, vector<256x128xbf16>, vector<256x128xbf16>, vector<256x128xbf16>, vector<256x128xbf16>, vector<256x128xbf16> -> vector<256x1152xbf16>
    %c0_81 = arith.constant 0 : index
    %c0_82 = arith.constant 0 : index
    %61 = vector.load %arg3[%c0_81, %c0_82] : memref<1152x128xbf16, #tpu.memory_space<vmem>>, vector<1152x128xbf16>
    %cst_83 = arith.constant dense<0.000000e+00> : vector<256x128xf32>
    %62 = tpu.matmul %60, %61, %cst_83 {dimension_numbers = #tpu.dot_dimension_numbers<[1], [0], [0], [1], [0, 0, 1, 1], [], []>} : vector<256x1152xbf16>, vector<1152x128xbf16>, vector<256x128xf32> -> vector<256x128xf32>
    %c2_84 = arith.constant 2 : index
    %c0_85 = arith.constant 0 : index
    %63 = vector.load %arg4[%c2_84, %c0_85] : memref<4x128xf32, #tpu.memory_space<vmem>>, vector<1x128xf32>
    %64 = vector.broadcast %63 : vector<1x128xf32> to vector<256x128xf32>
    %65 = arith.mulf %62, %64 : vector<256x128xf32>
    %c3 = arith.constant 3 : index
    %c0_86 = arith.constant 0 : index
    %66 = vector.load %arg4[%c3, %c0_86] : memref<4x128xf32, #tpu.memory_space<vmem>>, vector<1x128xf32>
    %67 = vector.broadcast %66 : vector<1x128xf32> to vector<256x128xf32>
    %68 = arith.addf %65, %67 : vector<256x128xf32>
    %69 = vector.shape_cast %1 : vector<16x16x128xf32> to vector<256x128xf32>
    %70 = arith.addf %68, %69 : vector<256x128xf32>
    %cst_87 = arith.constant 0.000000e+00 : f32
    %71 = vector.broadcast %cst_87 : f32 to vector<256x128xf32>
    %72 = arith.maximumf %70, %71 : vector<256x128xf32>
    %c0_88 = arith.constant 0 : index
    %c0_89 = arith.constant 0 : index
    %c0_90 = arith.constant 0 : index
    %73 = vector.load %arg5[%c0_88, %c0_89, %c0_90] : memref<1x256x128xf32, #tpu.memory_space<vmem>>, vector<1x256x128xf32>
    %74 = vector.shape_cast %73 : vector<1x256x128xf32> to vector<256x128xf32>
    %75 = vector.shape_cast %72 : vector<256x128xf32> to vector<1x256x128xf32>
    tpu.vector_store %arg5[%c0_88, %c0_89, %c0_90], %75 {strides = array<i32>} : memref<1x256x128xf32, #tpu.memory_space<vmem>>, vector<1x256x128xf32>,
    return
  }
  func.func @transform_0(%arg0: i32) -> (i32, i32, i32, i32) {
    %c0_i32 = arith.constant 0 : i32
    %c0_i32_0 = arith.constant 0 : i32
    %c0_i32_1 = arith.constant 0 : i32
    %c0_i32_2 = arith.constant 0 : i32
    return %arg0, %c0_i32, %c0_i32_0, %c0_i32_1 : i32, i32, i32, i32
  }
  func.func @transform_1(%arg0: i32) -> (i32, i32) {
    %c0_i32 = arith.constant 0 : i32
    %c0_i32_0 = arith.constant 0 : i32
    %c0_i32_1 = arith.constant 0 : i32
    return %c0_i32, %c0_i32_0 : i32, i32
  }
  func.func @transform_2(%arg0: i32) -> (i32, i32) {
    %c0_i32 = arith.constant 0 : i32
    %c0_i32_0 = arith.constant 0 : i32
    %c0_i32_1 = arith.constant 0 : i32
    return %c0_i32, %c0_i32_0 : i32, i32
  }
  func.func @transform_3(%arg0: i32) -> (i32, i32) {
    %c0_i32 = arith.constant 0 : i32
    %c0_i32_0 = arith.constant 0 : i32
    %c0_i32_1 = arith.constant 0 : i32
    return %c0_i32, %c0_i32_0 : i32, i32
  }
  func.func @transform_4(%arg0: i32) -> (i32, i32, i32) {
    %c0_i32 = arith.constant 0 : i32
    %c0_i32_0 = arith.constant 0 : i32
    %c0_i32_1 = arith.constant 0 : i32
    return %arg0, %c0_i32, %c0_i32_0 : i32, i32, i32
  }
}

</mosaic_0001>

<bundles_post_ra>
// kernel: resblock_forward.1
= control target key start
LH: loop header
LB: loop body
LE: loop exit
PB: predicated region body
PF: predicated region fallthrough
CT: control target
= control target key end

     0   :  { %s11497_s15 = smov 0   ;;  %s15829_s0 = inlined_call_operand.vmem [shape: f32[2,16,16,128], index: 0, kind: input, shape index: {}]   ;;  %s15830_s1 = inlined_call_operand.vmem [shape: bf16[1152,128], index: 1, kind: input, shape index: {}]   ;;  %s15831_s2 = inlined_call_operand.vmem [shape: bf16[1152,128], index: 2, kind: input, shape index: {}]   ;;  %s15832_s3 = inlined_call_operand.vmem [shape: f32[4,128], index: 3, kind: input, shape index: {}]   ;;  %s15833_s4 = inlined_call_operand.vmem [shape: f32[2,256,128], index: 4, kind: output, shape index: {}]  }
   0x1 LB: > { %s9395_s16 = sadd.s32 4294967295, %s11469_s15   ;;  %p9399_p0 = scmp.ge.s32.totalorder %s11469_s15, 1  ;;  %s11469_s15 = sphi %s11497_s15, %s14_s15  }
   0x2   : > { %p162_p1 = scmp.lt.s32.totalorder %s11469_s15, 3 }
   0x4   : > { %p163_p2 = pnand %p9399_p0, %p162_p1 }
   0x6   : > { %166 = sbr.rel (%p163_p2) target bundleno = 1292 (0x50c), region = 36 }
   0xd   : > { %v11117_v0 = vld [vmem:[%s15830_s1 + $0x40] sm:$0xff]   ;;  %v11471_v2 = vmov 0   ;;  %v11121_v5 = vld [vmem:[%s15830_s1 + $0x48] sm:$0xff]   ;;  %v11125_v9 = vld [vmem:[%s15830_s1 + $0x50] sm:$0xff]   ;;  %p188_p3 = scmp.lt.s32.totalorder %s9395_s16, 1  ;;  %vm255_vm0 = vcmask 1040384  }
   0xe   : > { %v11118_v1 = vld [vmem:[%s15830_s1 + $0xc0] sm:$0xff]   ;;  %247 = vst [vmem:[#allocation2] sm:$0xf] %v11471_v2  ;;  %248 = vst [vmem:[#allocation2 + $0x4] sm:$0xf] %v11471_v2  ;;  %10068 = vmatprep.subr.bf16.mxu0 %v11117_v0  ;;  %v11122_v6 = vld [vmem:[%s15830_s1 + $0xc8] sm:$0xff]  }
   0xf   : > { %249 = vst [vmem:[#allocation2 + $0x8] sm:$0x1] %v11471_v2  ;;  %251 = vst [vmem:[#allocation2 + $0xcc] sm:$0xf] %v11471_v2  ;;  %v11119_v3 = vld [vmem:[%s15830_s1] sm:$0xff]   ;;  %10180 = vmatprep.subr.bf16.mxu1 %v11118_v1  ;;  %v11123_v7 = vld [vmem:[%s15830_s1 + $0x8] sm:$0xff]  }
  0x10   : > { %252 = vst [vmem:[#allocation2 + $0xd0] sm:$0xf] %v11471_v2  ;;  %253 = vst [vmem:[#allocation2 + $0xd4] sm:$0x1] %v11471_v2  ;;  %v11120_v4 = vld [vmem:[%s15830_s1 + $0x80] sm:$0xff]   ;;  %10069 = vmatpush3.bf16.msra.mxu0 %v11119_v3  ;;  %v11124_v8 = vld [vmem:[%s15830_s1 + $0x88] sm:$0xff]  }
  0x11   : > { %10181 = vmatpush3.bf16.msra.mxu1 %v11120_v4  ;;  %10070 = vmatprep.subr.bf16.mxu0 %v11121_v5  ;;  %v11126_v10 = vld [vmem:[%s15830_s1 + $0xd0] sm:$0xff]   ;;  %v11129_v13 = vld [vmem:[%s15830_s1 + $0x58] sm:$0xff]   ;;  %v11133_v17 = vld [vmem:[%s15830_s1 + $0x60] sm:$0xff]   ;;  %s16125_s16 = smov (!%p188_p3, %s9395_s16), 1  ;;  %vm1371_vm1 = vcmask 1042432   ;;  %vm1372_vm2 = vcmask 1046532  }
  0x12   : > { %10182 = vmatprep.subr.bf16.mxu1 %v11122_v6  ;;  %v11127_v11 = vld [vmem:[%s15830_s1 + $0x10] sm:$0xff]   ;;  %v11130_v14 = vld [vmem:[%s15830_s1 + $0xd8] sm:$0xff]   ;;  %v11134_v18 = vld [vmem:[%s15830_s1 + $0xe0] sm:$0xff]   ;;  %s10002_s27 = sshll.u32 %s16125_s16, 8  ;;  %vm758_vm3 = vcmask 1043456   ;;  %v15869_v51 = vmov 0 }
  0x13   : > { %v11128_v12 = vld [vmem:[%s15830_s1 + $0x90] sm:$0xff]   ;;  %v11131_v15 = vld [vmem:[%s15830_s1 + $0x18] sm:$0xff]   ;;  %v11135_v19 = vld [vmem:[%s15830_s1 + $0x20] sm:$0xff]   ;;  %s11613_s10 = scalar_lea.vmem %s15829_s0, %s10002_s27  ;;  %vm920_vm4 = vsmask.f32 3328  ;;  %v15874_v58 = vmov 0  ;;  %s15676_s11 = scalar_lea.vmem %s15833_s4, %s10002_s27 }
  0x14   : > { %10071 = vmatpush3.bf16.msra.mxu0 %v11123_v7  ;;  %v11132_v16 = vld [vmem:[%s15830_s1 + $0x98] sm:$0xff]   ;;  %v11136_v20 = vld [vmem:[%s15830_s1 + $0xa0] sm:$0xff]   ;;  %v11137_v21 = vld [vmem:[%s15830_s1 + $0x68] sm:$0xff]   ;;  %vm921_vm5 = vsmask.f32 7440  ;;  %v15877_v63 = vmov 0 }
  0x15   : > { %10183 = vmatpush3.bf16.msra.mxu1 %v11124_v8  ;;  %10072 = vmatprep.subr.bf16.mxu0 %v11125_v9  ;;  %v11138_v22 = vld [vmem:[%s15830_s1 + $0xe8] sm:$0xff]   ;;  %v11141_v25 = vld [vmem:[%s15830_s1 + $0x70] sm:$0xff]   ;;  %v11145_v29 = vld [vmem:[%s15830_s1 + $0x78] sm:$0xff]   ;;  %vm256_vm6 = vsmask.f32 256  ;;  %v15880_v6 = vmov 0 }
  0x16   : > { %10184 = vmatprep.subr.bf16.mxu1 %v11126_v10  ;;  %v11139_v23 = vld [vmem:[%s15830_s1 + $0x28] sm:$0xff]   ;;  %v11142_v26 = vld [vmem:[%s15830_s1 + $0xf0] sm:$0xff]   ;;  %v11146_v30 = vld [vmem:[%s15830_s1 + $0xf8] sm:$0xff]   ;;  %vm306_vm8 = vsmask.f32 7938 }
  0x17   : > { %v11140_v24 = vld [vmem:[%s15830_s1 + $0xa8] sm:$0xff]   ;;  %v11143_v27 = vld [vmem:[%s15830_s1 + $0x30] sm:$0xff]   ;;  %v11147_v31 = vld [vmem:[%s15830_s1 + $0x38] sm:$0xff]   ;;  %vm436_vm9 = vsmask.f32 4368 }
  0x18   : > { %10073 = vmatpush3.bf16.msra.mxu0 %v11127_v11  ;;  %v11144_v28 = vld [vmem:[%s15830_s1 + $0xb0] sm:$0xff]   ;;  %v11148_v32 = vld [vmem:[%s15830_s1 + $0xb8] sm:$0xff]   ;;  %v11615_v33 = vld [vmem:[#allocation2] sm:$0xf] }
  0x19   : > { %10185 = vmatpush3.bf16.msra.mxu1 %v11128_v12  ;;  %10074 = vmatprep.subr.bf16.mxu0 %v11129_v13  ;;  %v11617_v34 = vld [vmem:[#allocation2 + $0x4] sm:$0xf]  ;;  %v11619_v35 = vld [vmem:[#allocation2 + $0x8] sm:$0x1]  ;;  %v924_v36 = vshrl.u32 %v11615_v33, 16  ;;  %v927_v37 = vshll.u32 %v11615_v33, 16  ;;  %vm11631_vm7 = vmand %vm255_vm0, %vm256_vm6 }
  0x1a   : > { %10186 = vmatprep.subr.bf16.mxu1 %v11130_v14  ;;  %v933_v38 = vshll.u32 %v11617_v34, 16  ;;  %v937_v39 = vshrl.u32 %v11617_v34, 16  ;;  %v943_v40 = vshll.u32 %v11619_v35, 16  ;;  %v1379_v41 = vrot.slane %v11619_v35, 5  ;;  %v199_v42 = vld [vmem:[%s11613_s10] sm:$0xff]  ;;  %v200_v43 = vld [vmem:[%s11613_s10 + $0x8] sm:$0xff]  ;;  %vm11642_vm10 = vmor %vm1371_vm1, %vm1372_vm2 }
  0x1b   : > { %v926_v44 = vrot.slane %v924_v36, 4  ;;  %v929_v45 = vrot.slane %v927_v37, 5  ;;  %v258_v46 = vld [vmem:[#allocation2 + $0xc] sm:$0x1]  ;;  %v10004_v47 = vpack.c.bf16 %v199_v42, %v199_v42  ;;  %v15870_v51 = vsel %vm11631_vm7, 4294967295, %v15869_v51  ;;  %v11151_v52 = vld [vmem:[%s15830_s1 + $0x140] sm:$0xff]   ;;  %vm11648_vm11 = vmor %vm920_vm4, %vm921_vm5 }
  0x1c   : > { %10075 = vmatpush3.bf16.msra.mxu0 %v11131_v15  ;;  %v935_v48 = vrot.slane %v933_v38, 5  ;;  %v939_v49 = vrot.slane %v937_v39, 4  ;;  %v945_v50 = vrot.slane %v943_v40, 5  ;;  %15871 = vst [vmem:[#allocation3_spill] sm:$0xff] %v15870_v51  ;;  %v259_v54 = vsel %vm11631_vm7, 0, %v258_v46  ;;  %vm11653_vm12 = vmor %vm256_vm6, %vm436_vm9  ;;  %v201_v7 = vld [vmem:[%s11613_s10 + $0x10] sm:$0xff] }
  0x1d   : > { %10187 = vmatpush3.bf16.msra.mxu1 %v11132_v16  ;;  %10076 = vmatprep.subr.bf16.mxu0 %v11133_v17  ;;  %v930_v53 = vor.u32 %v929_v45, %v926_v44  ;;  %v10005_v55 = vpack.c.bf16 %v200_v43, %v200_v43  ;;  %v1307_v56 = vld [vmem:[#allocation2] sm:$0xe]  ;;  %v15875_v58 = vsel %vm11648_vm11, 4294967295, %v15874_v58  ;;  %260 = vst [vmem:[#allocation2 + $0xc] sm:$0x1] %v259_v54  ;;  %v439_v60 = vshrl.u32 %v10004_v47, 16  ;;  %vm11660_vm13 = vmand %vm255_vm0, %vm306_vm8 }
  0x1e   : > { %10188 = vmatprep.subr.bf16.mxu1 %v11134_v18  ;;  %15876 = vst [vmem:[#allocation4_spill] sm:$0xff] %v15875_v58  ;;  %v940_v59 = vor.u32 %v939_v49, %v935_v48  ;;  %v442_v61 = vshll.u32 %v10004_v47, 16  ;;  %v15878_v63 = vsel %vm11653_vm12, 4294967295, %v15877_v63  ;;  %v9436_v2 = vrot.slane %v1307_v56, 9  ;;  %v11152_v10 = vld [vmem:[%s15830_s1 + $0x100] sm:$0xff]   ;;  %v202_v12 = vld [vmem:[%s11613_s10 + $0x18] sm:$0xff]  ;;  %vm11683_vm14 = vmand %vm758_vm3, %vm306_vm8 }
  0x1f   : > { %v931_v62 = vrot.slane %v930_v53, 4  ;;  %15879 = vst [vmem:[#allocation5_spill] sm:$0xff] %v15878_v63  ;;  %v447_v0 = vshrl.u32 %v10005_v55, 16  ;;  %v450_v1 = vshll.u32 %v10005_v55, 16  ;;  %v441_v4 = vrot.slane %v439_v60, 7  ;;  %v11158_v35 = vld [vmem:[%s15830_s1 + $0x108] sm:$0xff]  }
  0x20   : > { %10077 = vmatpush3.bf16.msra.mxu0 %v11135_v19  ;;  %v941_v3 = vrot.slane %v940_v59, 4  ;;  %v1376_v5 = vrot.slane %v11617_v34, 5  ;;  %v15881_v6 = vsel %vm11660_vm13, 4294967295, %v15880_v6  ;;  %v308_v11 = vld [vmem:[#allocation2 + $0x14] sm:$0x1]  ;;  %v10006_v14 = vpack.c.bf16 %v201_v7, %v201_v7  ;;  %v206_v54 = vld [vmem:[%s11613_s10 + $0x38] sm:$0xff] }
  0x21   : > { %10189 = vmatpush3.bf16.msra.mxu1 %v11136_v20  ;;  %10078 = vmatprep.subr.bf16.mxu0 %v11137_v21  ;;  %15882 = vst [vmem:[#allocation6_spill] sm:$0xff] %v15881_v6  ;;  %v936_v8 = vsel %vm11648_vm11, %v931_v62, %v935_v48  ;;  %v11667_v9 = vrot.slane %v447_v0, 7  ;;  %v261_v13 = vld [vmem:[#allocation2 + $0x18] sm:$0x1]  ;;  %v444_v16 = vor.u32 %v442_v61, %v441_v4  ;;  %v445_v17 = vrot.slane %v441_v4, 4  ;;  %v203_v20 = vld [vmem:[%s11613_s10 + $0x20] sm:$0xff] }
  0x22   : > { %10190 = vmatprep.subr.bf16.mxu1 %v11138_v22  ;;  %v946_v15 = vsel %vm11648_vm11, %v941_v3, %v945_v50  ;;  %v9484_v18 = vcombine.low %v11615_v33, %v11617_v34  ;;  %v311_v19 = vld [vmem:[#allocation2 + $0x20] sm:$0x1]  ;;  %v204_v21 = vld [vmem:[%s11613_s10 + $0x28] sm:$0xff]  ;;  %v11698_v36 = vsel %vm11642_vm10, %v9436_v2, %v1376_v5  ;;  %v459_v37 = vshll.u32 %v10006_v14, 16  ;;  %v205_v49 = vld [vmem:[%s11613_s10 + $0x30] sm:$0xff] }
  0x23   : > { %v9500_v22 = vcombine.low %v936_v8, %v946_v15  ;;  %v312_v38 = vsel %vm11660_vm13, 0, %v311_v19  ;;  %v10008_v46 = vpack.c.bf16 %v203_v20, %v203_v20  ;;  %v10009_v47 = vpack.c.bf16 %v204_v21, %v204_v21  ;;  %v314_v48 = vld [vmem:[#allocation2 + $0x2c] sm:$0x1]  ;;  %v267_v55 = vld [vmem:[#allocation2 + $0x30] sm:$0x1]  ;;  %v207_v4 = vld [vmem:[%s11613_s10 + $0x40] sm:$0xff] }
  0x24   : > { %10079 = vmatpush3.bf16.msra.mxu0 %v11139_v23  ;;  %v452_v23 = vor.u32 %v450_v1, %v11667_v9  ;;  %v760_v34 = vld [vmem:[#allocation2 + $0xc] sm:$0xf]  ;;  %313 = vst [vmem:[#allocation2 + $0x20] sm:$0x1] %v312_v38  ;;  %v315_v53 = vsel %vm11660_vm13, 0, %v314_v48  ;;  %v268_v2 = vsel %vm11631_vm7, 0, %v267_v55  ;;  %v11721_v3 = vpack.c.bf16 %v205_v49, %v205_v49 }
  0x25   : > { %10191 = vmatpush3.bf16.msra.mxu1 %v11140_v24  ;;  %10080 = vmatprep.subr.bf16.mxu0 %v11141_v25  ;;  %v454_v24 = vrot.slane %v11667_v9, 4  ;;  %v15883_v25 = vmov 0  ;;  %v761_v39 = vsel %vm11683_vm14, %v444_v16, %v760_v34  ;;  %v473_v56 = vshrl.u32 %v10008_v46, 16  ;;  %316 = vst [vmem:[#allocation2 + $0x2c] sm:$0x1] %v315_v53 }
  0x26   : > { %10192 = vmatprep.subr.bf16.mxu1 %v11142_v26  ;;  %v15884_v25 = vsel %vm11683_vm14, 4294967295, %v15883_v25  ;;  %v1378_v26 = vrot.slane %v1376_v5, 4  ;;  %3935 = vmatprep.mubr.bf16.mxu0 %v9500_v22  ;;  %v453_v33 = vsel %vm11653_vm12, %v445_v17, %v452_v23  ;;  %762 = vst [vmem:[#allocation2 + $0xc] sm:$0xf] %v761_v39  ;;  %v476_v59 = vshll.u32 %v10008_v46, 16 }
  0x27   : > { %15885 = vst [vmem:[#allocation7_spill] sm:$0xff] %v15884_v25  ;;  %763 = vst [vmem:[#allocation2 + $0x10] sm:$0xf] %v453_v33  ;;  %v481_v60 = vshrl.u32 %v10009_v47, 16  ;;  %v484_v61 = vshll.u32 %v10009_v47, 16  ;;  %v11726_v7 = vrot.slane %v473_v56, 7  ;;  %v11737_v15 = vpack.c.bf16 %v206_v54, %v206_v54 }
  0x28   : > { %10081 = vmatpush3.bf16.msra.mxu0 %v11143_v27  ;;  %v264_v27 = vld [vmem:[#allocation2 + $0x24] sm:$0x1]  ;;  %v11708_v40 = vsel %vm11642_vm10, %v1378_v26, %v1379_v41  ;;  %v317_v62 = vld [vmem:[#allocation2 + $0x38] sm:$0x1]  ;;  %269 = vst [vmem:[#allocation2 + $0x30] sm:$0x1] %v268_v2  ;;  %v11750_v26 = vpack.c.bf16 %v207_v4, %v207_v4 }
  0x29   : > { %10193 = vmatpush3.bf16.msra.mxu1 %v11144_v28  ;;  %10082 = vmatprep.subr.bf16.mxu0 %v11145_v29  ;;  %v309_v28 = vsel %vm11660_vm13, 0, %v308_v11  ;;  %v262_v29 = vsel %vm11631_vm7, 0, %v261_v13  ;;  %v265_v45 = vsel %vm11631_vm7, 0, %v264_v27  ;;  %v9516_v5 = vcombine.low %v11698_v36, %v11708_v40  ;;  %v11163_v11 = vld [vmem:[%s15830_s1 + $0x150] sm:$0xff]  }
  0x2a   : > { %10194 = vmatprep.subr.bf16.mxu1 %v11146_v30  ;;  %v10007_v30 = vpack.c.bf16 %v202_v12, %v202_v12  ;;  %310 = vst [vmem:[#allocation2 + $0x14] sm:$0x1] %v309_v28  ;;  %263 = vst [vmem:[#allocation2 + $0x18] sm:$0x1] %v262_v29  ;;  %v11728_v8 = vrot.slane %v481_v60, 7  ;;  %v490_v16 = vshrl.u32 %v11721_v3, 16  ;;  %v478_v23 = vor.u32 %v476_v59, %v11726_v7 }
  0x2b   : > { %266 = vst [vmem:[#allocation2 + $0x24] sm:$0x1] %v265_v45  ;;  %v493_v17 = vshll.u32 %v11721_v3, 16  ;;  %v771_v22 = vld [vmem:[#allocation2 + $0x20] sm:$0x1]  ;;  %v11164_v36 = vld [vmem:[%s15830_s1 + $0x110] sm:$0xff]  }
  0x2c   : > { %10083 = vmatpush3.bf16.msra.mxu0 %v11147_v31  ;;  %v456_v31 = vshrl.u32 %v10006_v14, 16  ;;  %v464_v43 = vshrl.u32 %v10007_v30, 16  ;;  %v467_v44 = vshll.u32 %v10007_v30, 16  ;;  %v11757_v30 = vor.u32 %v484_v61, %v11728_v8 }
  0x2d   : > { %10195 = vmatpush3.bf16.msra.mxu1 %v11148_v32  ;;  %10292 = vmatprep.subr.bf16.mxu0 %v11151_v52  ;;  %v11157_v32 = vld [vmem:[%s15830_s1 + $0x148] sm:$0xff]   ;;  %v479_v61 = vrot.slane %v11726_v7, 4 }
  0x2e   : > { %v458_v42 = vrot.slane %v456_v31, 7  ;;  %v466_v52 = vrot.slane %v464_v43, 7  ;;  %v11745_v20 = vld [vmem:[#allocation2 + $0x10] sm:$0xf]  ;;  %v1486_v27 = vld [vmem:[#allocation2 + $0xc] sm:$0xf] }
  0x2f   : > { %3936 = vmatmul.mubr.bf16.vlgmr.msra.gmra.mrb[0].mxu0 %v9484_v18  ;;  %v1487_v18 = vld [vmem:[#allocation2 + $0x10] sm:$0xf]  ;;  %v11752_v9 = vld [vmem:[#allocation2 + $0xc] sm:$0xf]  ;;  %v1535_v31 = vshrl.u32 %v1486_v27, 16  ;;  %v957_v40 = vshll.u32 %v11745_v20, 16 }
  0x30   : > { %10293 = vmatpush3.bf16.msra.mxu0 %v11152_v10  ;;  %v461_v41 = vor.u32 %v459_v37, %v458_v42  ;;  %v462_v50 = vrot.slane %v458_v42, 4  ;;  %v469_v0 = vor.u32 %v467_v44, %v466_v52  ;;  %v471_v1 = vrot.slane %v466_v52, 4  ;;  %v1308_v42 = vld [vmem:[#allocation2 + $0xc] sm:$0xe] }
  0x31   : > { %10294 = vmatprep.subr.bf16.mxu0 %v11157_v32  ;;  %v318_v10 = vsel %vm11660_vm13, 0, %v317_v62  ;;  %v764_v12 = vld [vmem:[#allocation2 + $0x14] sm:$0x1]  ;;  %v767_v14 = vld [vmem:[#allocation2 + $0x18] sm:$0xf]  ;;  %v1544_v28 = vshll.u32 %v1487_v18, 16  ;;  %v9532_v33 = vcombine.low %v1486_v27, %v1487_v18 }
  0x32   : > { %v470_v13 = vsel %vm11653_vm12, %v462_v50, %v469_v0  ;;  %319 = vst [vmem:[#allocation2 + $0x38] sm:$0x1] %v318_v10  ;;  %v765_v19 = vsel %vm11631_vm7, %v454_v24, %v764_v12  ;;  %v768_v21 = vsel %vm11683_vm14, %v461_v41, %v767_v14  ;;  %v1548_v29 = vshrl.u32 %v1487_v18, 16  ;;  %v774_v47 = vld [vmem:[#allocation2 + $0x24] sm:$0xf] }
  0x33   : > { %770 = vst [vmem:[#allocation2 + $0x1c] sm:$0xf] %v470_v13  ;;  %766 = vst [vmem:[#allocation2 + $0x14] sm:$0x1] %v765_v19  ;;  %v772_v24 = vsel %vm11631_vm7, %v471_v1, %v771_v22  ;;  %v1538_v32 = vshll.u32 %v1486_v27, 16  ;;  %v948_v34 = vshrl.u32 %v11752_v9, 16  ;;  %4096 = vmatprep.mubr.bf16.mxu1 %v9532_v33  ;;  %v9485_v41 = vcombine.low %v11752_v9, %v11745_v20 }
  0x34   : > { %10295 = vmatpush3.bf16.msra.mxu0 %v11158_v35  ;;  %769 = vst [vmem:[#allocation2 + $0x18] sm:$0xf] %v768_v21  ;;  %773 = vst [vmem:[#allocation2 + $0x20] sm:$0x1] %v772_v24  ;;  %v11763_v37 = vrot.slane %v1544_v28, 5  ;;  %v1550_v38 = vrot.slane %v1548_v29, 4  ;;  %4097 = vmatmul.mubr.bf16.vlgmr.msra.gmra.mrb[0].mxu1 %v9516_v5  ;;  %v775_v62 = vsel %vm11683_vm14, %v478_v23, %v774_v47 }
  0x35   : > { %10296 = vmatprep.subr.bf16.mxu0 %v11163_v11  ;;  %v951_v39 = vshll.u32 %v11752_v9, 16  ;;  %v1537_v43 = vrot.slane %v1535_v31, 4  ;;  %v1540_v44 = vrot.slane %v1538_v32, 5  ;;  %v950_v45 = vrot.slane %v948_v34, 4  ;;  %776 = vst [vmem:[#allocation2 + $0x24] sm:$0xf] %v775_v62 }
  0x36   : > { %v961_v46 = vshrl.u32 %v11745_v20, 16  ;;  %v1551_v35 = vor.u32 %v1550_v38, %v11763_v37  ;;  %v959_v49 = vrot.slane %v957_v40, 5  ;;  %v9437_v53 = vrot.slane %v1308_v42, 9  ;;  %v208_v34 = vld [vmem:[%s11613_s10 + $0x48] sm:$0xff] }
  0x37   : > { %v953_v48 = vrot.slane %v951_v39, 5  ;;  %v1541_v50 = vor.u32 %v1540_v44, %v1537_v43  ;;  %v1383_v54 = vrot.slane %v11745_v20, 5 }
  0x38   : > { %10297 = vmatpush3.bf16.msra.mxu0 %v11164_v36  ;;  %v963_v52 = vrot.slane %v961_v46, 4  ;;  %v11772_v55 = vrot.slane %v1551_v35, 4  ;;  %v778_v46 = vld [vmem:[#allocation2 + $0x2c] sm:$0x1]  ;;  %v488_v35 = vrot.slane %v11728_v8, 4  ;;  %v11169_v8 = vld [vmem:[%s15830_s1 + $0x158] sm:$0xff]  }
  0x39   : > { %v954_v56 = vor.u32 %v953_v48, %v950_v45  ;;  %v11779_v0 = vrot.slane %v1541_v50, 4  ;;  %v1384_v5 = vsel %vm11642_vm10, %v9437_v53, %v1383_v54  ;;  %v1385_v10 = vrot.slane %v1383_v54, 4  ;;  %10298 = vmatprep.subr.bf16.mxu0 %v11169_v8 }
  0x3a   : > { %v1489_v59 = vld [vmem:[#allocation2 + $0x1c] sm:$0xf]  ;;  %v905_v1 = vld [vmem:[#allocation2 + $0x14] sm:$0x1]  ;;  %v964_v2 = vor.u32 %v963_v52, %v959_v49  ;;  %v487_v45 = vsel %vm11653_vm12, %v479_v61, %v11757_v30  ;;  %v11809_v52 = vpack.c.bf16 %v208_v34, %v208_v34  ;;  %v779_v62 = vsel %vm11631_vm7, %v488_v35, %v778_v46 }
  0x3b   : > { %v11774_v60 = vld [vmem:[#allocation2 + $0x1c] sm:$0xf]  ;;  %v11781_v4 = vld [vmem:[#allocation2 + $0x18] sm:$0xf]  ;;  %v955_v11 = vrot.slane %v954_v56, 4  ;;  %v967_v12 = vshll.u32 %v905_v1, 16 }
  0x3c   : > { %v1559_v13 = vshrl.u32 %v11781_v4, 16  ;;  %v1562_v7 = vshll.u32 %v11781_v4, 16  ;;  %v11787_v14 = vld [vmem:[#allocation2 + $0x18] sm:$0xf]  ;;  %v965_v18 = vrot.slane %v964_v2, 4  ;;  %v9533_v19 = vcombine.low %v11781_v4, %v1489_v59 }
  0x3d   : > { %v1386_v20 = vrot.slane %v905_v1, 5  ;;  %v906_v21 = vld [vmem:[#allocation2 + $0x20] sm:$0x1]  ;;  %v972_v22 = vshrl.u32 %v11787_v14, 16  ;;  %v960_v23 = vsel %vm11648_vm11, %v955_v11, %v959_v49  ;;  %v969_v27 = vrot.slane %v967_v12, 5 }
  0x3e   : > { %v975_v28 = vshll.u32 %v11787_v14, 16  ;;  %v981_v29 = vshll.u32 %v11774_v60, 16  ;;  %v1309_v9 = vld [vmem:[#allocation2 + $0x18] sm:$0xe]  ;;  %4104 = vmatprep.mubr.bf16.mxu1 %v9533_v19  ;;  %v985_v32 = vshrl.u32 %v11774_v60, 16  ;;  %v991_v33 = vshll.u32 %v906_v21, 16 }
  0x3f   : > { %v1387_v24 = vsel %vm11642_vm10, %v1385_v10, %v1386_v20  ;;  %v974_v31 = vrot.slane %v972_v22, 4  ;;  %v970_v36 = vsel %vm11648_vm11, %v965_v18, %v969_v27  ;;  %777 = vst [vmem:[#allocation2 + $0x28] sm:$0xf] %v487_v45  ;;  %v11805_v48 = vld [vmem:[#allocation2 + $0x24] sm:$0xf]  ;;  %v9438_v49 = vrot.slane %v1309_v9, 9 }
  0x40   : > { %v9517_v38 = vcombine.low %v1384_v5, %v1387_v24  ;;  %v977_v39 = vrot.slane %v975_v28, 5  ;;  %v983_v40 = vrot.slane %v981_v29, 5  ;;  %v9501_v42 = vcombine.low %v960_v23, %v970_v36  ;;  %v11807_v50 = vld [vmem:[#allocation2 + $0x24] sm:$0xf]  ;;  %v11170_v5 = vld [vmem:[%s15830_s1 + $0x118] sm:$0xff]  }
  0x41   : > { %v987_v43 = vrot.slane %v985_v32, 4  ;;  %v993_v44 = vrot.slane %v991_v33, 5  ;;  %v9486_v30 = vcombine.low %v11787_v14, %v11774_v60  ;;  %v1390_v56 = vrot.slane %v11774_v60, 5  ;;  %v1310_v2 = vld [vmem:[#allocation2 + $0x24] sm:$0xe]  ;;  %10299 = vmatpush3.bf16.msra.mxu0 %v11170_v5 }
  0x42   : > { %4105 = vmatmul.mubr.bf16.gmra.mrb[4].mxu1 %v9517_v38  ;;  %v978_v47 = vor.u32 %v977_v39, %v974_v31  ;;  %3943 = vmatprep.mubr.bf16.mxu0 %v9501_v42  ;;  %v1393_v61 = vrot.slane %v906_v21, 5  ;;  %v996_v1 = vshrl.u32 %v11807_v50, 16  ;;  %780 = vst [vmem:[#allocation2 + $0x2c] sm:$0x1] %v779_v62  ;;  %v492_v18 = vrot.slane %v490_v16, 7  ;;  %v209_v31 = vld [vmem:[%s11613_s10 + $0x50] sm:$0xff] }
  0x43   : > { %v988_v53 = vor.u32 %v987_v43, %v983_v40  ;;  %3944 = vmatmul.mubr.bf16.gmra.mrb[4].mxu0 %v9485_v41  ;;  %v1391_v60 = vsel %vm11642_vm10, %v9438_v49, %v1390_v56  ;;  %v1392_v11 = vrot.slane %v1390_v56, 4  ;;  %v999_v41 = vshll.u32 %v11807_v50, 16  ;;  %v781_v27 = vld [vmem:[#allocation2 + $0x30] sm:$0xf]  ;;  %v270_v24 = vld [vmem:[#allocation2 + $0x3c] sm:$0x1] }
  0x44   : > { %v979_v59 = vrot.slane %v978_v47, 4  ;;  %v998_v14 = vrot.slane %v996_v1, 4  ;;  %v498_v19 = vshrl.u32 %v11737_v15, 16  ;;  %v501_v23 = vshll.u32 %v11737_v15, 16  ;;  %v11175_v43 = vld [vmem:[%s15830_s1 + $0x160] sm:$0xff]  }
  0x45   : > { %v989_v10 = vrot.slane %v988_v53, 4  ;;  %v1394_v21 = vsel %vm11642_vm10, %v1392_v11, %v1393_v61  ;;  %v1001_v22 = vrot.slane %v999_v41, 5  ;;  %v495_v9 = vor.u32 %v493_v17, %v492_v18  ;;  %v785_v17 = vld [vmem:[#allocation2 + $0x38] sm:$0x1]  ;;  %v320_v47 = vld [vmem:[#allocation2 + $0x44] sm:$0x1]  ;;  %10300 = vmatprep.subr.bf16.mxu0 %v11175_v43 }
  0x46   : > { %v984_v12 = vsel %vm11648_vm11, %v979_v59, %v983_v40  ;;  %v496_v16 = vrot.slane %v492_v18, 4  ;;  %v1491_v32 = vld [vmem:[#allocation2 + $0x28] sm:$0xf]  ;;  %v9518_v33 = vcombine.low %v1391_v60, %v1394_v21  ;;  %v500_v38 = vrot.slane %v498_v19, 7  ;;  %v11176_v41 = vld [vmem:[%s15830_s1 + $0x120] sm:$0xff]  }
  0x47   : > { %v994_v20 = vsel %vm11648_vm11, %v989_v10, %v993_v44  ;;  %v11841_v34 = vld [vmem:[#allocation2 + $0x28] sm:$0xf]  ;;  %v1002_v36 = vor.u32 %v1001_v22, %v998_v14  ;;  %v9439_v39 = vrot.slane %v1310_v2, 9  ;;  %v9534_v15 = vcombine.low %v11805_v48, %v1491_v32  ;;  %v211_v21 = vld [vmem:[%s11613_s10 + $0x60] sm:$0xff]  ;;  %10301 = vmatpush3.bf16.msra.mxu0 %v11176_v41  ;;  %v213_v32 = vld [vmem:[%s11613_s10 + $0x70] sm:$0xff] }
  0x48   : > { %v9502_v28 = vcombine.low %v984_v12, %v994_v20  ;;  %v1005_v40 = vshll.u32 %v11841_v34, 16  ;;  %v1009_v42 = vshrl.u32 %v11841_v34, 16  ;;  %v782_v3 = vsel %vm11683_vm14, %v495_v9, %v781_v27  ;;  %v273_v11 = vld [vmem:[#allocation2 + $0x48] sm:$0x1]  ;;  %v210_v20 = vld [vmem:[%s11613_s10 + $0x58] sm:$0xff] }
  0x49   : > { %v1003_v44 = vrot.slane %v1002_v36, 4  ;;  %v503_v45 = vor.u32 %v501_v23, %v500_v38  ;;  %v505_v46 = vrot.slane %v500_v38, 4  ;;  %783 = vst [vmem:[#allocation2 + $0x30] sm:$0xf] %v782_v3  ;;  %v11851_v35 = vpack.c.bf16 %v209_v31, %v209_v31  ;;  %4112 = vmatprep.mubr.bf16.mxu1 %v9534_v15  ;;  %v907_v49 = vld [vmem:[#allocation2 + $0x2c] sm:$0x1] }
  0x4a   : > { %3951 = vmatprep.mubr.bf16.mxu0 %v9502_v28  ;;  %v1007_v53 = vrot.slane %v1005_v40, 5  ;;  %v1011_v56 = vrot.slane %v1009_v42, 4  ;;  %v1397_v8 = vrot.slane %v11841_v34, 5  ;;  %v271_v59 = vsel %vm11631_vm7, 0, %v270_v24  ;;  %4113 = vmatmul.mubr.bf16.gmra.mrb[8].mxu1 %v9518_v33  ;;  %v212_v9 = vld [vmem:[%s11613_s10 + $0x68] sm:$0xff]  ;;  %v214_v33 = vld [vmem:[%s11613_s10 + $0x78] sm:$0xff] }
  0x4b   : > { %3952 = vmatmul.mubr.bf16.gmra.mrb[8].mxu0 %v9486_v30  ;;  %v1015_v61 = vshll.u32 %v907_v49, 16  ;;  %v504_v62 = vsel %vm11653_vm12, %v496_v16, %v503_v45  ;;  %v1400_v1 = vrot.slane %v907_v49, 5  ;;  %v786_v2 = vsel %vm11631_vm7, %v505_v46, %v785_v17  ;;  %272 = vst [vmem:[#allocation2 + $0x3c] sm:$0x1] %v271_v59  ;;  %v215_v40 = vld [vmem:[%s11613_s10 + $0x80] sm:$0xff]  ;;  %v11182_v45 = vld [vmem:[%s15830_s1 + $0x128] sm:$0xff]  }
  0x4c   : > { %v1008_v30 = vsel %vm11648_vm11, %v1003_v44, %v1007_v53  ;;  %v1012_v5 = vor.u32 %v1011_v56, %v1007_v53  ;;  %784 = vst [vmem:[#allocation2 + $0x34] sm:$0xf] %v504_v62  ;;  %v11864_v10 = vsel %vm11642_vm10, %v9439_v39, %v1397_v8  ;;  %v1399_v60 = vrot.slane %v1397_v8, 4  ;;  %787 = vst [vmem:[#allocation2 + $0x38] sm:$0x1] %v786_v2  ;;  %v216_v44 = vld [vmem:[%s11613_s10 + $0x88] sm:$0xff] }
  0x4d   : > { %v1017_v12 = vrot.slane %v1015_v61, 5  ;;  %v507_v14 = vshrl.u32 %v11750_v26, 16  ;;  %v510_v18 = vshll.u32 %v11750_v26, 16  ;;  %v515_v19 = vshrl.u32 %v11809_v52, 16 }
  0x4e   : > { %v1013_v22 = vrot.slane %v1012_v5, 4  ;;  %v1401_v23 = vsel %vm11642_vm10, %v1399_v60, %v1400_v1  ;;  %v518_v27 = vshll.u32 %v11809_v52, 16  ;;  %v321_v28 = vsel %vm11660_vm13, 0, %v320_v47  ;;  %v11181_v52 = vld [vmem:[%s15830_s1 + $0x168] sm:$0xff]  }
  0x4f   : > { %v9487_v26 = vcombine.low %v11807_v50, %v11841_v34  ;;  %v509_v16 = vrot.slane %v507_v14, 7  ;;  %v11882_v24 = vrot.slane %v515_v19, 7  ;;  %322 = vst [vmem:[#allocation2 + $0x44] sm:$0x1] %v321_v28  ;;  %v274_v31 = vsel %vm11631_vm7, 0, %v273_v11  ;;  %10302 = vmatprep.subr.bf16.mxu0 %v11181_v52 }
  0x50   : > { %v1018_v36 = vsel %vm11648_vm11, %v1013_v22, %v1017_v12  ;;  %v11893_v38 = vld [vmem:[#allocation2 + $0x30] sm:$0xf]  ;;  %v9519_v50 = vcombine.low %v11864_v10, %v1401_v23  ;;  %275 = vst [vmem:[#allocation2 + $0x48] sm:$0x1] %v274_v31  ;;  %v11898_v39 = vpack.c.bf16 %v210_v20, %v210_v20  ;;  %v11900_v15 = vpack.c.bf16 %v211_v21, %v211_v21 }
  0x51   : > { %v11896_v34 = vld [vmem:[#allocation2 + $0x30] sm:$0xf]  ;;  %v9503_v42 = vcombine.low %v1008_v30, %v1018_v36  ;;  %v512_v47 = vor.u32 %v510_v18, %v509_v16  ;;  %v513_v49 = vrot.slane %v509_v16, 4  ;;  %v520_v53 = vor.u32 %v518_v27, %v11882_v24  ;;  %10303 = vmatpush3.bf16.msra.mxu0 %v11182_v45  ;;  %v276_v36 = vld [vmem:[#allocation2 + $0x54] sm:$0x1] }
  0x52   : > { %v1020_v43 = vshrl.u32 %v11896_v34, 16  ;;  %v1023_v46 = vshll.u32 %v11896_v34, 16  ;;  %v788_v56 = vld [vmem:[#allocation2 + $0x3c] sm:$0xf]  ;;  %v1311_v8 = vld [vmem:[#allocation2 + $0x30] sm:$0xe]  ;;  %v11914_v1 = vpack.c.bf16 %v212_v9, %v212_v9  ;;  %v11916_v2 = vpack.c.bf16 %v213_v32, %v213_v32 }
  0x53   : > { %3959 = vmatprep.mubr.bf16.mxu0 %v9503_v42  ;;  %v1493_v59 = vld [vmem:[#allocation2 + $0x34] sm:$0xf]  ;;  %v908_v62 = vld [vmem:[#allocation2 + $0x38] sm:$0x1]  ;;  %v11918_v30 = vpack.c.bf16 %v214_v33, %v214_v33  ;;  %v11920_v5 = vpack.c.bf16 %v215_v40, %v215_v40  ;;  %v521_v18 = vsel %vm11653_vm12, %v513_v49, %v520_v53  ;;  %v522_v19 = vrot.slane %v11882_v24, 4 }
  0x54   : > { %v11912_v61 = vld [vmem:[#allocation2 + $0x34] sm:$0xf]  ;;  %v9535_v10 = vcombine.low %v11893_v38, %v1493_v59  ;;  %3960 = vmatmul.mubr.bf16.gmra.mrb[12].mxu0 %v9487_v26  ;;  %v1022_v60 = vrot.slane %v1020_v43, 4  ;;  %v1025_v11 = vrot.slane %v1023_v46, 5  ;;  %v1039_v14 = vshll.u32 %v908_v62, 16 }
  0x55   : > { %v1029_v41 = vshll.u32 %v11912_v61, 16  ;;  %v1033_v12 = vshrl.u32 %v11912_v61, 16  ;;  %v789_v22 = vsel %vm11683_vm14, %v512_v47, %v788_v56  ;;  %791 = vst [vmem:[#allocation2 + $0x40] sm:$0xf] %v521_v18  ;;  %v11930_v27 = vpack.c.bf16 %v216_v44, %v216_v44  ;;  %v323_v31 = vld [vmem:[#allocation2 + $0x50] sm:$0x1] }
  0x56   : > { %4120 = vmatprep.mubr.bf16.mxu1 %v9535_v10  ;;  %v1026_v20 = vor.u32 %v1025_v11, %v1022_v60  ;;  %v792_v23 = vld [vmem:[#allocation2 + $0x44] sm:$0x1]  ;;  %v1041_v9 = vrot.slane %v1039_v14, 5  ;;  %790 = vst [vmem:[#allocation2 + $0x3c] sm:$0xf] %v789_v22  ;;  %v9440_v26 = vrot.slane %v1311_v8, 9 }
  0x57   : > { %v1031_v21 = vrot.slane %v1029_v41, 5  ;;  %4121 = vmatmul.mubr.bf16.gmra.mrb[12].mxu1 %v9519_v50  ;;  %v1035_v28 = vrot.slane %v1033_v12, 4  ;;  %v1404_v16 = vrot.slane %v11912_v61, 5  ;;  %v1407_v32 = vrot.slane %v908_v62, 5  ;;  %v11187_v49 = vld [vmem:[%s15830_s1 + $0x170] sm:$0xff]  }
  0x58   : > { %v1027_v24 = vrot.slane %v1026_v20, 4  ;;  %v793_v33 = vsel %vm11631_vm7, %v522_v19, %v792_v23  ;;  %v524_v52 = vshrl.u32 %v11851_v35, 16  ;;  %v527_v43 = vshll.u32 %v11851_v35, 16  ;;  %v11188_v59 = vld [vmem:[%s15830_s1 + $0x130] sm:$0xff]   ;;  %v795_v11 = vld [vmem:[#allocation2 + $0x48] sm:$0xf]  ;;  %10304 = vmatprep.subr.bf16.mxu0 %v11187_v49 }
  0x59   : > { %v1036_v40 = vor.u32 %v1035_v28, %v1031_v21  ;;  %v1405_v42 = vsel %vm11642_vm10, %v9440_v26, %v1404_v16  ;;  %v1406_v50 = vrot.slane %v1404_v16, 4  ;;  %794 = vst [vmem:[#allocation2 + $0x44] sm:$0x1] %v793_v33  ;;  %v532_v46 = vshrl.u32 %v11898_v39, 16  ;;  %10305 = vmatpush3.bf16.msra.mxu0 %v11188_v59 }
  0x5a   : > { %v1032_v44 = vsel %vm11648_vm11, %v1027_v24, %v1031_v21  ;;  %v526_v45 = vrot.slane %v524_v52, 7  ;;  %v535_v47 = vshll.u32 %v11898_v39, 16  ;;  %v324_v8 = vsel %vm11660_vm13, 0, %v323_v31  ;;  %v217_v21 = vld [vmem:[%s11613_s10 + $0x90] sm:$0xff] }
  0x5b   : > { %v1037_v53 = vrot.slane %v1036_v40, 4  ;;  %v1408_v56 = vsel %vm11642_vm10, %v1406_v50, %v1407_v32  ;;  %v277_v35 = vsel %vm11631_vm7, 0, %v276_v36  ;;  %v9488_v39 = vcombine.low %v11896_v34, %v11912_v61  ;;  %325 = vst [vmem:[#allocation2 + $0x50] sm:$0x1] %v324_v8  ;;  %v11189_v32 = vld [vmem:[%s15830_s1 + $0x1c0] sm:$0xff]  }
  0x5c   : > { %v9520_v62 = vcombine.low %v1405_v42, %v1408_v56  ;;  %v530_v10 = vrot.slane %v526_v45, 4  ;;  %v534_v60 = vrot.slane %v532_v46, 7  ;;  %278 = vst [vmem:[#allocation2 + $0x54] sm:$0x1] %v277_v35  ;;  %v1495_v12 = vld [vmem:[#allocation2 + $0x40] sm:$0xf]  ;;  %v529_v18 = vor.u32 %v527_v43, %v526_v45  ;;  %10404 = vmatprep.subr.bf16.mxu1 %v11189_v32 }
  0x5d   : > { %v1042_v41 = vsel %vm11648_vm11, %v1037_v53, %v1041_v9  ;;  %v11959_v14 = vld [vmem:[#allocation2 + $0x40] sm:$0xf]  ;;  %v541_v19 = vshrl.u32 %v11900_v15, 16  ;;  %v544_v20 = vshll.u32 %v11900_v15, 16  ;;  %v11964_v61 = vld [vmem:[#allocation2 + $0x3c] sm:$0xf]  ;;  %v11988_v59 = vpack.c.bf16 %v217_v21, %v217_v21 }
  0x5e   : > { %v9504_v34 = vcombine.low %v1032_v44, %v1042_v41  ;;  %v11966_v22 = vld [vmem:[#allocation2 + $0x3c] sm:$0xf]  ;;  %v1053_v23 = vshll.u32 %v11959_v14, 16  ;;  %v1057_v28 = vshrl.u32 %v11959_v14, 16  ;;  %v537_v9 = vor.u32 %v535_v47, %v534_v60  ;;  %v11190_v50 = vld [vmem:[%s15830_s1 + $0x180] sm:$0xff]   ;;  %v11191_v47 = vld [vmem:[%s15830_s1 + $0x1c8] sm:$0xff]  }
  0x5f   : > { %v9536_v31 = vcombine.low %v11964_v61, %v1495_v12  ;;  %v1044_v15 = vshrl.u32 %v11966_v22, 16  ;;  %v1312_v24 = vld [vmem:[#allocation2 + $0x3c] sm:$0xe]  ;;  %v1047_v52 = vshll.u32 %v11966_v22, 16  ;;  %v539_v45 = vrot.slane %v534_v60, 4  ;;  %10405 = vmatpush3.bf16.msra.mxu1 %v11190_v50  ;;  %v11193_v50 = vld [vmem:[%s15830_s1 + $0x188] sm:$0xff]  }
  0x60   : > { %3967 = vmatprep.mubr.bf16.mxu0 %v9504_v34  ;;  %v909_v33 = vld [vmem:[#allocation2 + $0x44] sm:$0x1]  ;;  %v1055_v36 = vrot.slane %v1053_v23, 5  ;;  %v1059_v40 = vrot.slane %v1057_v28, 4  ;;  %v538_v42 = vsel %vm11653_vm12, %v530_v10, %v537_v9  ;;  %v796_v46 = vsel %vm11683_vm14, %v529_v18, %v795_v11  ;;  %v326_v8 = vld [vmem:[#allocation2 + $0x5c] sm:$0x1]  ;;  %10406 = vmatprep.subr.bf16.mxu1 %v11191_v47 }
  0x61   : > { %4128 = vmatprep.mubr.bf16.mxu1 %v9536_v31  ;;  %3968 = vmatmul.mubr.bf16.gmra.mrb[16].mxu0 %v9488_v39  ;;  %v1046_v43 = vrot.slane %v1044_v15, 4  ;;  %v1063_v44 = vshll.u32 %v909_v33, 16  ;;  %798 = vst [vmem:[#allocation2 + $0x4c] sm:$0xf] %v538_v42  ;;  %v1049_v49 = vrot.slane %v1047_v52, 5  ;;  %v9441_v56 = vrot.slane %v1312_v24, 9 }
  0x62   : > { %4129 = vmatmul.mubr.bf16.gmra.mrb[16].mxu1 %v9520_v62  ;;  %v1060_v53 = vor.u32 %v1059_v40, %v1055_v36  ;;  %797 = vst [vmem:[#allocation2 + $0x48] sm:$0xf] %v796_v46  ;;  %v279_v35 = vld [vmem:[#allocation2 + $0x60] sm:$0x1]  ;;  %v1411_v10 = vrot.slane %v11959_v14, 5  ;;  %v1414_v60 = vrot.slane %v909_v33, 5 }
  0x63   : > { %v1065_v39 = vrot.slane %v1063_v44, 5  ;;  %v799_v11 = vld [vmem:[#allocation2 + $0x50] sm:$0x1]  ;;  %v543_v41 = vrot.slane %v541_v19, 7  ;;  %v1050_v12 = vor.u32 %v1049_v49, %v1046_v43  ;;  %v549_v34 = vshrl.u32 %v11914_v1, 16  ;;  %v218_v42 = vld [vmem:[%s11613_s10 + $0x98] sm:$0xff]  ;;  %10407 = vmatpush3.bf16.msra.mxu1 %v11193_v50 }
  0x64   : > { %v1061_v18 = vrot.slane %v1060_v53, 4  ;;  %v800_v62 = vsel %vm11631_vm7, %v539_v45, %v799_v11  ;;  %v802_v23 = vld [vmem:[#allocation2 + $0x54] sm:$0xf]  ;;  %v1412_v21 = vsel %vm11642_vm10, %v9441_v56, %v1411_v10  ;;  %v1413_v28 = vrot.slane %v1411_v10, 4 }
  0x65   : > { %801 = vst [vmem:[#allocation2 + $0x50] sm:$0x1] %v800_v62  ;;  %v546_v9 = vor.u32 %v544_v20, %v543_v41  ;;  %v547_v31 = vrot.slane %v543_v41, 4  ;;  %v1051_v15 = vrot.slane %v1050_v12, 4  ;;  %v11998_v24 = vrot.slane %v549_v34, 7  ;;  %v11195_v49 = vld [vmem:[%s15830_s1 + $0x1d0] sm:$0xff]  }
  0x66   : > { %v1066_v19 = vsel %vm11648_vm11, %v1061_v18, %v1065_v39  ;;  %v552_v32 = vshll.u32 %v11914_v1, 16  ;;  %v1415_v33 = vsel %vm11642_vm10, %v1413_v28, %v1414_v60  ;;  %v327_v40 = vsel %vm11660_vm13, 0, %v326_v8  ;;  %10408 = vmatprep.subr.bf16.mxu1 %v11195_v49  ;;  %v11196_v41 = vld [vmem:[%s15830_s1 + $0x190] sm:$0xff]  }
  0x67   : > { %v803_v52 = vsel %vm11683_vm14, %v546_v9, %v802_v23  ;;  %v280_v20 = vsel %vm11631_vm7, 0, %v279_v35  ;;  %v1056_v1 = vsel %vm11648_vm11, %v1051_v15, %v1055_v36  ;;  %v9489_v44 = vcombine.low %v11966_v22, %v11959_v14  ;;  %328 = vst [vmem:[#allocation2 + $0x5c] sm:$0x1] %v327_v40  ;;  %v11197_v23 = vld [vmem:[%s15830_s1 + $0x1d8] sm:$0xff]   ;;  %10409 = vmatpush3.bf16.msra.mxu1 %v11196_v41 }
  0x68   : > { %v1497_v43 = vld [vmem:[#allocation2 + $0x4c] sm:$0xf]  ;;  %v554_v46 = vor.u32 %v552_v32, %v11998_v24  ;;  %v556_v47 = vrot.slane %v11998_v24, 4  ;;  %804 = vst [vmem:[#allocation2 + $0x54] sm:$0xf] %v803_v52  ;;  %v9505_v53 = vcombine.low %v1056_v1, %v1066_v19  ;;  %v9521_v36 = vcombine.low %v1412_v21, %v1415_v33  ;;  %v11199_v1 = vld [vmem:[%s15830_s1 + $0x198] sm:$0xff]   ;;  %10410 = vmatprep.subr.bf16.mxu1 %v11197_v23 }
  0x69   : > { %v12017_v45 = vld [vmem:[#allocation2 + $0x4c] sm:$0xf]  ;;  %281 = vst [vmem:[#allocation2 + $0x60] sm:$0x1] %v280_v20  ;;  %v12024_v56 = vld [vmem:[#allocation2 + $0x48] sm:$0xf]  ;;  %v12033_v11 = vpack.c.bf16 %v218_v42, %v218_v42 }
  0x6a   : > { %v12026_v8 = vld [vmem:[#allocation2 + $0x48] sm:$0xf]  ;;  %v1077_v14 = vshll.u32 %v12017_v45, 16  ;;  %v1081_v22 = vshrl.u32 %v12017_v45, 16  ;;  %v9537_v39 = vcombine.low %v12024_v56, %v1497_v43  ;;  %3975 = vmatprep.mubr.bf16.mxu0 %v9505_v53  ;;  %v555_v34 = vsel %vm11653_vm12, %v547_v31, %v554_v46  ;;  %v219_v31 = vld [vmem:[%s11613_s10 + $0xa0] sm:$0xff] }
  0x6b   : > { %v1068_v10 = vshrl.u32 %v12026_v8, 16  ;;  %v1313_v60 = vld [vmem:[#allocation2 + $0x48] sm:$0xe]  ;;  %v1071_v12 = vshll.u32 %v12026_v8, 16  ;;  %3976 = vmatmul.mubr.bf16.gmra.mrb[20].mxu0 %v9489_v44  ;;  %805 = vst [vmem:[#allocation2 + $0x58] sm:$0xf] %v555_v34  ;;  %v9490_v40 = vcombine.low %v12026_v8, %v12017_v45  ;;  %10411 = vmatpush3.bf16.msra.mxu1 %v11199_v1 }
  0x6c   : > { %v1079_v18 = vrot.slane %v1077_v14, 5  ;;  %v1083_v62 = vrot.slane %v1081_v22, 4  ;;  %4136 = vmatprep.mubr.bf16.mxu1 %v9537_v39  ;;  %v910_v28 = vld [vmem:[#allocation2 + $0x50] sm:$0x1]  ;;  %v9442_v15 = vrot.slane %v1313_v60, 9  ;;  %v1418_v19 = vrot.slane %v12017_v45, 5 }
  0x6d   : > { %v1070_v9 = vrot.slane %v1068_v10, 4  ;;  %4137 = vmatmul.mubr.bf16.gmra.mrb[20].mxu1 %v9521_v36  ;;  %v1073_v24 = vrot.slane %v1071_v12, 5  ;;  %v1087_v33 = vshll.u32 %v910_v28, 16  ;;  %v1421_v52 = vrot.slane %v910_v28, 5  ;;  %v220_v12 = vld [vmem:[%s11613_s10 + $0xa8] sm:$0xff] }
  0x6e   : > { %v1084_v32 = vor.u32 %v1083_v62, %v1079_v18  ;;  %v1420_v20 = vrot.slane %v1418_v19, 4  ;;  %v558_v42 = vshrl.u32 %v11916_v2, 16  ;;  %v561_v50 = vshll.u32 %v11916_v2, 16  ;;  %v806_v45 = vld [vmem:[#allocation2 + $0x5c] sm:$0x1] }
  0x6f   : > { %v1074_v43 = vor.u32 %v1073_v24, %v1070_v9  ;;  %v1089_v46 = vrot.slane %v1087_v33, 5  ;;  %v12054_v49 = vld [vmem:[#allocation2 + $0x54] sm:$0xf]  ;;  %v1419_v53 = vsel %vm11642_vm10, %v9442_v15, %v1418_v19  ;;  %v807_v14 = vsel %vm11631_vm7, %v556_v47, %v806_v45 }
  0x70   : > { %v1085_v44 = vrot.slane %v1084_v32, 4  ;;  %v1422_v8 = vsel %vm11642_vm10, %v1420_v20, %v1421_v52  ;;  %v12064_v22 = vld [vmem:[#allocation2 + $0x54] sm:$0xf]  ;;  %808 = vst [vmem:[#allocation2 + $0x5c] sm:$0x1] %v807_v14  ;;  %v12070_v62 = vpack.c.bf16 %v219_v31, %v219_v31  ;;  %v560_v23 = vrot.slane %v558_v42, 7 }
  0x71   : > { %v1075_v39 = vrot.slane %v1074_v43, 4  ;;  %v1092_v60 = vshrl.u32 %v12064_v22, 16  ;;  %v1314_v41 = vld [vmem:[#allocation2 + $0x54] sm:$0xe]  ;;  %v1095_v34 = vshll.u32 %v12064_v22, 16  ;;  %v566_v28 = vshrl.u32 %v11918_v30, 16 }
  0x72   : > { %v1090_v10 = vsel %vm11648_vm11, %v1085_v44, %v1089_v46  ;;  %v569_v47 = vshll.u32 %v11918_v30, 16  ;;  %v809_v9 = vld [vmem:[#allocation2 + $0x60] sm:$0xf]  ;;  %v1499_v19 = vld [vmem:[#allocation2 + $0x58] sm:$0xf]  ;;  %v9522_v24 = vcombine.low %v1419_v53, %v1422_v8  ;;  %v9443_v52 = vrot.slane %v1314_v41, 9 }
  0x73   : > { %v1080_v15 = vsel %vm11648_vm11, %v1075_v39, %v1079_v18  ;;  %v12077_v32 = vld [vmem:[#allocation2 + $0x58] sm:$0xf]  ;;  %v1094_v33 = vrot.slane %v1092_v60, 4  ;;  %v329_v31 = vld [vmem:[#allocation2 + $0x68] sm:$0x1]  ;;  %v9538_v43 = vcombine.low %v12054_v49, %v1499_v19  ;;  %v1097_v42 = vrot.slane %v1095_v34, 5 }
  0x74   : > { %v9506_v20 = vcombine.low %v1080_v15, %v1090_v10  ;;  %v1101_v44 = vshll.u32 %v12077_v32, 16  ;;  %v1105_v30 = vshrl.u32 %v12077_v32, 16  ;;  %v563_v46 = vor.u32 %v561_v50, %v560_v23  ;;  %v11201_v18 = vld [vmem:[%s15830_s1 + $0x178] sm:$0xff]   ;;  %v282_v39 = vld [vmem:[#allocation2 + $0x6c] sm:$0x1] }
  0x75   : > { %v564_v1 = vrot.slane %v560_v23, 4  ;;  %v12082_v45 = vrot.slane %v566_v28, 7  ;;  %4144 = vmatprep.mubr.bf16.mxu1 %v9538_v43  ;;  %v1098_v53 = vor.u32 %v1097_v42, %v1094_v33  ;;  %v1425_v14 = vrot.slane %v12077_v32, 5  ;;  %v332_v23 = vld [vmem:[#allocation2 + $0x74] sm:$0x1]  ;;  %10306 = vmatprep.subr.bf16.mxu0 %v11201_v18 }
  0x76   : > { %3983 = vmatprep.mubr.bf16.mxu0 %v9506_v20  ;;  %v1103_v8 = vrot.slane %v1101_v44, 5  ;;  %v12088_v10 = vpack.c.bf16 %v220_v12, %v220_v12  ;;  %4145 = vmatmul.mubr.bf16.gmra.mrb[24].mxu1 %v9522_v24  ;;  %v1107_v60 = vrot.slane %v1105_v30, 4  ;;  %v810_v34 = vsel %vm11683_vm14, %v563_v46, %v809_v9  ;;  %v285_v24 = vld [vmem:[#allocation2 + $0x78] sm:$0x1]  ;;  %v11203_v30 = vld [vmem:[%s15830_s1 + $0x1e0] sm:$0xff]  }
  0x77   : > { %3984 = vmatmul.mubr.bf16.gmra.mrb[24].mxu0 %v9490_v40  ;;  %v571_v50 = vor.u32 %v569_v47, %v12082_v45  ;;  %v573_v41 = vrot.slane %v12082_v45, 4  ;;  %v911_v28 = vld [vmem:[#allocation2 + $0x5c] sm:$0x1]  ;;  %v1099_v15 = vrot.slane %v1098_v53, 4  ;;  %811 = vst [vmem:[#allocation2 + $0x60] sm:$0xf] %v810_v34  ;;  %v12096_v19 = vsel %vm11642_vm10, %v9443_v52, %v1425_v14  ;;  %10412 = vmatprep.subr.bf16.mxu1 %v11203_v30 }
  0x78   : > { %v1427_v12 = vrot.slane %v1425_v14, 4  ;;  %v330_v40 = vsel %vm11660_vm13, 0, %v329_v31  ;;  %v11202_v47 = vld [vmem:[%s15830_s1 + $0x138] sm:$0xff]   ;;  %v1108_v33 = vor.u32 %v1107_v60, %v1103_v8  ;;  %v1111_v9 = vshll.u32 %v911_v28, 16 }
  0x79   : > { %v572_v20 = vsel %vm11653_vm12, %v564_v1, %v571_v50  ;;  %v1428_v43 = vrot.slane %v911_v28, 5  ;;  %331 = vst [vmem:[#allocation2 + $0x68] sm:$0x1] %v330_v40  ;;  %v1104_v52 = vsel %vm11648_vm11, %v1099_v15, %v1103_v8  ;;  %v283_v31 = vsel %vm11631_vm7, 0, %v282_v39  ;;  %10307 = vmatpush3.bf16.msra.mxu0 %v11202_v47  ;;  %v11204_v8 = vld [vmem:[%s15830_s1 + $0x1a0] sm:$0xff]   ;;  %v11205_v50 = vld [vmem:[%s15830_s1 + $0x1e8] sm:$0xff]  }
  0x7a   : > { %812 = vst [vmem:[#allocation2 + $0x64] sm:$0xf] %v572_v20  ;;  %v575_v42 = vshrl.u32 %v11920_v5, 16  ;;  %v578_v44 = vshll.u32 %v11920_v5, 16  ;;  %v1109_v46 = vrot.slane %v1108_v33, 4  ;;  %v1113_v1 = vrot.slane %v1111_v9, 5  ;;  %10413 = vmatpush3.bf16.msra.mxu1 %v11204_v8 }
  0x7b   : > { %v12116_v18 = vsel %vm11642_vm10, %v1427_v12, %v1428_v43  ;;  %284 = vst [vmem:[#allocation2 + $0x6c] sm:$0x1] %v283_v31  ;;  %v583_v53 = vshrl.u32 %v11930_v27, 16  ;;  %v9491_v5 = vcombine.low %v12064_v22, %v12077_v32  ;;  %v586_v39 = vshll.u32 %v11930_v27, 16  ;;  %v221_v27 = vld [vmem:[%s11613_s10 + $0xb0] sm:$0xff]  ;;  %v222_v47 = vld [vmem:[%s11613_s10 + $0xb8] sm:$0xff]  ;;  %10414 = vmatprep.subr.bf16.mxu1 %v11205_v50 }
  0x7c   : > { %v577_v14 = vrot.slane %v575_v42, 7  ;;  %v333_v60 = vsel %vm11660_vm13, 0, %v332_v23  ;;  %v1114_v34 = vsel %vm11648_vm11, %v1109_v46, %v1113_v1  ;;  %v286_v22 = vsel %vm11631_vm7, 0, %v285_v24 }
  0x7d   : > { %v585_v28 = vrot.slane %v583_v53, 7  ;;  %334 = vst [vmem:[#allocation2 + $0x74] sm:$0x1] %v333_v60  ;;  %v592_v32 = vshrl.u32 %v11988_v59, 16  ;;  %v9507_v15 = vcombine.low %v1104_v52, %v1114_v34  ;;  %v9523_v23 = vcombine.low %v12096_v19, %v12116_v18  ;;  %287 = vst [vmem:[#allocation2 + $0x78] sm:$0x1] %v286_v22 }
  0x7e   : > { %v581_v12 = vrot.slane %v577_v14, 4  ;;  %v595_v40 = vshll.u32 %v11988_v59, 16  ;;  %v12140_v33 = vld [vmem:[#allocation2 + $0x60] sm:$0xf]  ;;  %v580_v20 = vor.u32 %v578_v44, %v577_v14  ;;  %v12159_v14 = vpack.c.bf16 %v221_v27, %v221_v27  ;;  %v288_v34 = vld [vmem:[#allocation2 + $0x84] sm:$0x1] }
  0x7f   : > { %v12142_v9 = vld [vmem:[#allocation2 + $0x60] sm:$0xf]  ;;  %v588_v24 = vor.u32 %v586_v39, %v585_v28  ;;  %v590_v43 = vrot.slane %v585_v28, 4  ;;  %v12144_v31 = vrot.slane %v592_v32, 7  ;;  %3991 = vmatprep.mubr.bf16.mxu0 %v9507_v15  ;;  %v12168_v27 = vpack.c.bf16 %v222_v47, %v222_v47  ;;  %v11212_v19 = vld [vmem:[%s15830_s1 + $0x1b8] sm:$0xff]  }
  0x80   : > { %v813_v42 = vld [vmem:[#allocation2 + $0x68] sm:$0x1]  ;;  %v1116_v30 = vshrl.u32 %v12142_v9, 16  ;;  %v1119_v59 = vshll.u32 %v12142_v9, 16  ;;  %3992 = vmatmul.mubr.bf16.gmra.mrb[28].mxu0 %v9491_v5  ;;  %v1315_v53 = vld [vmem:[#allocation2 + $0x60] sm:$0xe] }
  0x81   : > { %v1501_v46 = vld [vmem:[#allocation2 + $0x64] sm:$0xf]  ;;  %v814_v44 = vsel %vm11631_vm7, %v573_v41, %v813_v42  ;;  %v589_v18 = vsel %vm11653_vm12, %v581_v12, %v588_v24  ;;  %v597_v8 = vor.u32 %v595_v40, %v12144_v31  ;;  %v335_v41 = vld [vmem:[#allocation2 + $0x80] sm:$0x1]  ;;  %v9444_v40 = vrot.slane %v1315_v53, 9 }
  0x82   : > { %v12154_v1 = vld [vmem:[#allocation2 + $0x64] sm:$0xf]  ;;  %v9539_v39 = vcombine.low %v12140_v33, %v1501_v46  ;;  %815 = vst [vmem:[#allocation2 + $0x68] sm:$0x1] %v814_v44  ;;  %v1118_v60 = vrot.slane %v1116_v30, 4  ;;  %v1121_v5 = vrot.slane %v1119_v59, 5 }
  0x83   : > { %v1125_v45 = vshll.u32 %v12154_v1, 16  ;;  %v816_v50 = vld [vmem:[#allocation2 + $0x6c] sm:$0xf]  ;;  %819 = vst [vmem:[#allocation2 + $0x70] sm:$0xf] %v589_v18  ;;  %v1129_v28 = vshrl.u32 %v12154_v1, 16  ;;  %v9492_v32 = vcombine.low %v12142_v9, %v12154_v1 }
  0x84   : > { %v817_v22 = vsel %vm11683_vm14, %v580_v20, %v816_v50  ;;  %4152 = vmatprep.mubr.bf16.mxu1 %v9539_v39  ;;  %v1122_v15 = vor.u32 %v1121_v5, %v1118_v60  ;;  %v1432_v24 = vrot.slane %v12154_v1, 5  ;;  %v820_v42 = vld [vmem:[#allocation2 + $0x74] sm:$0x1]  ;;  %v11207_v30 = vld [vmem:[%s15830_s1 + $0x1a8] sm:$0xff]   ;;  %v600_v47 = vshrl.u32 %v12033_v11, 16  ;;  %v223_v50 = vld [vmem:[%s11613_s10 + $0xc0] sm:$0xff] }
  0x85   : > { %v12170_v12 = vrot.slane %v1125_v45, 5  ;;  %818 = vst [vmem:[#allocation2 + $0x6c] sm:$0xf] %v817_v22  ;;  %4153 = vmatmul.mubr.bf16.gmra.mrb[28].mxu1 %v9523_v23  ;;  %v1131_v20 = vrot.slane %v1129_v28, 4  ;;  %v821_v59 = vsel %vm11631_vm7, %v590_v43, %v820_v42  ;;  %v603_v46 = vshll.u32 %v12033_v11, 16  ;;  %v11209_v18 = vld [vmem:[%s15830_s1 + $0x1f0] sm:$0xff]  }
  0x86   : > { %v823_v44 = vld [vmem:[#allocation2 + $0x78] sm:$0xf]  ;;  %v1123_v53 = vrot.slane %v1122_v15, 4  ;;  %v1434_v39 = vrot.slane %v1432_v24, 4  ;;  %822 = vst [vmem:[#allocation2 + $0x74] sm:$0x1] %v821_v59  ;;  %10415 = vmatpush3.bf16.msra.mxu1 %v11207_v30 }
  0x87   : > { %v598_v60 = vrot.slane %v12144_v31, 4  ;;  %v824_v23 = vsel %vm11683_vm14, %v597_v8, %v823_v44  ;;  %v1132_v43 = vor.u32 %v1131_v20, %v12170_v12  ;;  %v12187_v5 = vrot.slane %v600_v47, 7  ;;  %10416 = vmatprep.subr.bf16.mxu1 %v11209_v18  ;;  %v11210_v31 = vld [vmem:[%s15830_s1 + $0x1b0] sm:$0xff]  }
  0x88   : > { %825 = vst [vmem:[#allocation2 + $0x78] sm:$0xf] %v824_v23  ;;  %v336_v11 = vsel %vm11660_vm13, 0, %v335_v41  ;;  %v289_v45 = vsel %vm11631_vm7, 0, %v288_v34  ;;  %v1433_v8 = vsel %vm11642_vm10, %v9444_v40, %v1432_v24  ;;  %v609_v28 = vshrl.u32 %v12070_v62, 16  ;;  %v11211_v34 = vld [vmem:[%s15830_s1 + $0x1f8] sm:$0xff]  }
  0x89   : > { %337 = vst [vmem:[#allocation2 + $0x80] sm:$0x1] %v336_v11  ;;  %290 = vst [vmem:[#allocation2 + $0x84] sm:$0x1] %v289_v45  ;;  %v612_v22 = vshll.u32 %v12070_v62, 16  ;;  %v617_v41 = vshrl.u32 %v12088_v10, 16  ;;  %v1128_v42 = vsel %vm11648_vm11, %v1123_v53, %v12170_v12  ;;  %v605_v40 = vor.u32 %v603_v46, %v12187_v5 }
  0x8a   : > { %v912_v15 = vld [vmem:[#allocation2 + $0x68] sm:$0x1]  ;;  %v1133_v30 = vrot.slane %v1132_v43, 4  ;;  %v1503_v20 = vld [vmem:[#allocation2 + $0x70] sm:$0xf]  ;;  %v607_v24 = vrot.slane %v12187_v5, 4  ;;  %10417 = vmatpush3.bf16.msra.mxu1 %v11210_v31  ;;  %v12224_v43 = vpack.c.bf16 %v223_v50, %v223_v50 }
  0x8b   : > { %v1135_v59 = vshll.u32 %v912_v15, 16  ;;  %v1435_v47 = vrot.slane %v912_v15, 5  ;;  %v12210_v44 = vld [vmem:[#allocation2 + $0x70] sm:$0xf]  ;;  %v12212_v18 = vrot.slane %v609_v28, 7  ;;  %v12214_v23 = vrot.slane %v617_v41, 7  ;;  %10418 = vmatprep.subr.bf16.mxu1 %v11211_v34 }
  0x8c   : > { %v12216_v11 = vld [vmem:[#allocation2 + $0x6c] sm:$0xf]  ;;  %v1149_v12 = vshll.u32 %v12210_v44, 16  ;;  %v1153_v46 = vshrl.u32 %v12210_v44, 16  ;;  %v606_v53 = vsel %vm11653_vm12, %v598_v60, %v605_v40 }
  0x8d   : > { %v12218_v45 = vld [vmem:[#allocation2 + $0x6c] sm:$0xf]  ;;  %v1137_v5 = vrot.slane %v1135_v59, 5  ;;  %v9540_v31 = vcombine.low %v12216_v11, %v1503_v20  ;;  %826 = vst [vmem:[#allocation2 + $0x7c] sm:$0xf] %v606_v53  ;;  %v1436_v52 = vsel %vm11642_vm10, %v1434_v39, %v1435_v47  ;;  %v11213_v59 = vld [vmem:[%s15830_s1 + $0x200] sm:$0xff]  }
  0x8e   : > { %v224_v15 = vld [vmem:[%s11613_s10 + $0xc8] sm:$0xff]  ;;  %v913_v60 = vld [vmem:[#allocation2 + $0x74] sm:$0x1]  ;;  %v1140_v50 = vshrl.u32 %v12218_v45, 16  ;;  %v1143_v34 = vshll.u32 %v12218_v45, 16  ;;  %v1151_v40 = vrot.slane %v1149_v12, 5  ;;  %v9524_v53 = vcombine.low %v1433_v8, %v1436_v52  ;;  %10419 = vmatpush3.bf16.msra.mxu1 %v11212_v19  ;;  %11012 = vmatprep.subr.bf16.mxu0 %v11213_v59 }
  0x8f   : > { %v1138_v20 = vsel %vm11648_vm11, %v1133_v30, %v1137_v5  ;;  %4160 = vmatprep.mubr.bf16.mxu1 %v9540_v31  ;;  %v1155_v41 = vrot.slane %v1153_v46, 4  ;;  %v1159_v28 = vshll.u32 %v913_v60, 16  ;;  %v12242_v2 = vld [vmem:[#allocation2 + $0x78] sm:$0xf]  ;;  %v1316_v39 = vld [vmem:[#allocation2 + $0x6c] sm:$0xe]  ;;  %v12246_v16 = vpack.c.bf16 %v224_v15, %v224_v15 }
  0x90   : > { %v9508_v47 = vcombine.low %v1128_v42, %v1138_v20  ;;  %v1142_v36 = vrot.slane %v1140_v50, 4  ;;  %v1145_v21 = vrot.slane %v1143_v34, 5  ;;  %v827_v35 = vld [vmem:[#allocation2 + $0x80] sm:$0x1]  ;;  %v12244_v12 = vld [vmem:[#allocation2 + $0x78] sm:$0xf]  ;;  %4161 = vmatmul.mubr.bf16.gmra.mrb[32].mxu1 %v9524_v53 }
  0x91   : > { %v1156_v26 = vor.u32 %v1155_v41, %v1151_v40  ;;  %v1161_v30 = vrot.slane %v1159_v28, 5  ;;  %v9445_v5 = vrot.slane %v1316_v39, 9  ;;  %v1439_v19 = vrot.slane %v12210_v44, 5  ;;  %v830_v9 = vld [vmem:[#allocation2 + $0x84] sm:$0xf] }
  0x92   : > { %3999 = vmatprep.mubr.bf16.mxu0 %v9508_v47  ;;  %v1146_v46 = vor.u32 %v1145_v21, %v1142_v36  ;;  %v1442_v42 = vrot.slane %v913_v60, 5  ;;  %v828_v15 = vsel %vm11631_vm7, %v607_v24, %v827_v35  ;;  %v1164_v28 = vshrl.u32 %v12244_v12, 16 }
  0x93   : > { %4000 = vmatmul.mubr.bf16.gmra.mrb[32].mxu0 %v9492_v32  ;;  %v1157_v31 = vrot.slane %v1156_v26, 4  ;;  %v1167_v41 = vshll.u32 %v12244_v12, 16  ;;  %v1440_v21 = vsel %vm11642_vm10, %v9445_v5, %v1439_v19  ;;  %v1441_v36 = vrot.slane %v1439_v19, 4  ;;  %829 = vst [vmem:[#allocation2 + $0x80] sm:$0x1] %v828_v15 }
  0x94   : > { %v1147_v50 = vrot.slane %v1146_v46, 4  ;;  %v1505_v34 = vld [vmem:[#allocation2 + $0x7c] sm:$0xf]  ;;  %v614_v26 = vor.u32 %v612_v22, %v12212_v18  ;;  %v1166_v32 = vrot.slane %v1164_v28, 4  ;;  %v9493_v22 = vcombine.low %v12218_v45, %v12210_v44  ;;  %v338_v46 = vld [vmem:[#allocation2 + $0x8c] sm:$0x1] }
  0x95   : > { %v12260_v60 = vld [vmem:[#allocation2 + $0x7c] sm:$0xf]  ;;  %v1162_v35 = vsel %vm11648_vm11, %v1157_v31, %v1161_v30  ;;  %v9541_v1 = vcombine.low %v12242_v2, %v1505_v34  ;;  %v1169_v24 = vrot.slane %v1167_v41, 5  ;;  %v1443_v20 = vsel %vm11642_vm10, %v1441_v36, %v1442_v42  ;;  %v291_v5 = vld [vmem:[#allocation2 + $0x90] sm:$0x1] }
  0x96   : > { %v1152_v59 = vsel %vm11648_vm11, %v1147_v50, %v1151_v40  ;;  %v1173_v53 = vshll.u32 %v12260_v60, 16  ;;  %v1177_v39 = vshrl.u32 %v12260_v60, 16  ;;  %v9525_v47 = vcombine.low %v1440_v21, %v1443_v20  ;;  %v1317_v42 = vld [vmem:[#allocation2 + $0x78] sm:$0xe]  ;;  %v341_v45 = vld [vmem:[#allocation2 + $0x98] sm:$0x1] }
  0x97   : > { %v9509_v62 = vcombine.low %v1152_v59, %v1162_v35  ;;  %4168 = vmatprep.mubr.bf16.mxu1 %v9541_v1  ;;  %v1170_v30 = vor.u32 %v1169_v24, %v1166_v32  ;;  %v615_v40 = vrot.slane %v12212_v18, 4  ;;  %v620_v15 = vshll.u32 %v12088_v10, 16  ;;  %v294_v34 = vld [vmem:[#allocation2 + $0x9c] sm:$0x1] }
  0x98   : > { %v1175_v19 = vrot.slane %v1173_v53, 5  ;;  %v1179_v31 = vrot.slane %v1177_v39, 4  ;;  %4169 = vmatmul.mubr.bf16.gmra.mrb[36].mxu1 %v9525_v47  ;;  %v624_v41 = vrot.slane %v12214_v23, 4  ;;  %v831_v50 = vsel %vm11683_vm14, %v614_v26, %v830_v9 }
  0x99   : > { %4007 = vmatprep.mubr.bf16.mxu0 %v9509_v62  ;;  %v1171_v28 = vrot.slane %v1170_v30, 4  ;;  %v9494_v44 = vcombine.low %v12244_v12, %v12260_v60  ;;  %v622_v36 = vor.u32 %v620_v15, %v12214_v23  ;;  %832 = vst [vmem:[#allocation2 + $0x84] sm:$0xf] %v831_v50  ;;  %v1446_v10 = vrot.slane %v12260_v60, 5 }
  0x9a   : > { %v1180_v21 = vor.u32 %v1179_v31, %v1175_v19  ;;  %v339_v18 = vsel %vm11660_vm13, 0, %v338_v46  ;;  %v914_v35 = vld [vmem:[#allocation2 + $0x80] sm:$0x1]  ;;  %v9446_v26 = vrot.slane %v1317_v42, 9  ;;  %v292_v12 = vsel %vm11631_vm7, 0, %v291_v5  ;;  %v225_v42 = vld [vmem:[%s11613_s10 + $0xd0] sm:$0xff] }
  0x9b   : > { %4008 = vmatmul.mubr.bf16.gmra.mrb[36].mxu0 %v9493_v22  ;;  %v1176_v1 = vsel %vm11648_vm11, %v1171_v28, %v1175_v19  ;;  %340 = vst [vmem:[#allocation2 + $0x8c] sm:$0x1] %v339_v18  ;;  %v626_v9 = vshrl.u32 %v12159_v14, 16  ;;  %v1183_v23 = vshll.u32 %v914_v35, 16  ;;  %v623_v60 = vsel %vm11653_vm12, %v615_v40, %v622_v36  ;;  %293 = vst [vmem:[#allocation2 + $0x90] sm:$0x1] %v292_v12 }
  0x9c   : > { %v1181_v32 = vrot.slane %v1180_v21, 4  ;;  %v629_v24 = vshll.u32 %v12159_v14, 16  ;;  %833 = vst [vmem:[#allocation2 + $0x88] sm:$0xf] %v623_v60  ;;  %v1448_v59 = vrot.slane %v1446_v10, 4  ;;  %v1449_v20 = vrot.slane %v914_v35, 5 }
  0x9d   : > { %v628_v53 = vrot.slane %v626_v9, 7  ;;  %v634_v39 = vshrl.u32 %v12168_v27, 16  ;;  %v1185_v62 = vrot.slane %v1183_v23, 5  ;;  %v637_v22 = vshll.u32 %v12168_v27, 16 }
  0x9e   : > { %v342_v47 = vsel %vm11660_vm13, 0, %v341_v45  ;;  %v295_v30 = vsel %vm11631_vm7, 0, %v294_v34  ;;  %v1447_v46 = vsel %vm11642_vm10, %v9446_v26, %v1446_v10  ;;  %v1450_v14 = vsel %vm11642_vm10, %v1448_v59, %v1449_v20 }
  0x9f   : > { %v632_v5 = vrot.slane %v628_v53, 4  ;;  %v636_v19 = vrot.slane %v634_v39, 7  ;;  %343 = vst [vmem:[#allocation2 + $0x98] sm:$0x1] %v342_v47  ;;  %296 = vst [vmem:[#allocation2 + $0x9c] sm:$0x1] %v295_v30  ;;  %v1186_v31 = vsel %vm11648_vm11, %v1181_v32, %v1185_v62  ;;  %v631_v27 = vor.u32 %v629_v24, %v628_v53 }
  0xa0   : > { %v643_v40 = vshrl.u32 %v12224_v43, 16  ;;  %v646_v15 = vshll.u32 %v12224_v43, 16  ;;  %v9510_v28 = vcombine.low %v1176_v1, %v1186_v31  ;;  %v12310_v50 = vld [vmem:[#allocation2 + $0x84] sm:$0xf]  ;;  %v651_v36 = vshrl.u32 %v12246_v16, 16 }
  0xa1   : > { %v12312_v45 = vld [vmem:[#allocation2 + $0x84] sm:$0xf]  ;;  %v639_v34 = vor.u32 %v637_v22, %v636_v19  ;;  %v641_v21 = vrot.slane %v636_v19, 4  ;;  %v9526_v59 = vcombine.low %v1447_v46, %v1450_v14 }
  0xa2   : > { %v834_v35 = vld [vmem:[#allocation2 + $0x8c] sm:$0x1]  ;;  %v1188_v26 = vshrl.u32 %v12312_v45, 16  ;;  %v1191_v12 = vshll.u32 %v12312_v45, 16  ;;  %4015 = vmatprep.mubr.bf16.mxu0 %v9510_v28  ;;  %v837_v9 = vld [vmem:[#allocation2 + $0x90] sm:$0xf] }
  0xa3   : > { %v835_v43 = vsel %vm11631_vm7, %v624_v41, %v834_v35  ;;  %v640_v1 = vsel %vm11653_vm12, %v632_v5, %v639_v34  ;;  %v1318_v32 = vld [vmem:[#allocation2 + $0x84] sm:$0xe]  ;;  %v645_v23 = vrot.slane %v643_v40, 7  ;;  %v12323_v60 = vrot.slane %v651_v36, 7  ;;  %v1507_v24 = vld [vmem:[#allocation2 + $0x88] sm:$0xf]  ;;  %4016 = vmatmul.mubr.bf16.gmra.mrb[40].mxu0 %v9494_v44 }
  0xa4   : > { %836 = vst [vmem:[#allocation2 + $0x8c] sm:$0x1] %v835_v43  ;;  %v12325_v20 = vld [vmem:[#allocation2 + $0x88] sm:$0xf]  ;;  %v1190_v53 = vrot.slane %v1188_v26, 4  ;;  %v1193_v39 = vrot.slane %v1191_v12, 5  ;;  %v838_v41 = vsel %vm11683_vm14, %v631_v27, %v837_v9  ;;  %v9542_v62 = vcombine.low %v12310_v50, %v1507_v24 }
  0xa5   : > { %840 = vst [vmem:[#allocation2 + $0x94] sm:$0xf] %v640_v1  ;;  %v1197_v22 = vshll.u32 %v12325_v20, 16  ;;  %v1201_v47 = vshrl.u32 %v12325_v20, 16  ;;  %839 = vst [vmem:[#allocation2 + $0x90] sm:$0xf] %v838_v41  ;;  %v12332_v44 = vpack.c.bf16 %v225_v42, %v225_v42  ;;  %v648_v31 = vor.u32 %v646_v15, %v645_v23 }
  0xa6   : > { %v344_v30 = vld [vmem:[#allocation2 + $0xa4] sm:$0x1]  ;;  %v1194_v46 = vor.u32 %v1193_v39, %v1190_v53  ;;  %v9447_v14 = vrot.slane %v1318_v32, 9  ;;  %v1453_v5 = vrot.slane %v12325_v20, 5  ;;  %v841_v19 = vld [vmem:[#allocation2 + $0x98] sm:$0x1]  ;;  %4176 = vmatprep.mubr.bf16.mxu1 %v9542_v62  ;;  %v9495_v36 = vcombine.low %v12312_v45, %v12325_v20 }
  0xa7   : > { %v844_v40 = vld [vmem:[#allocation2 + $0x9c] sm:$0xf]  ;;  %v1199_v28 = vrot.slane %v1197_v22, 5  ;;  %v1203_v34 = vrot.slane %v1201_v47, 4  ;;  %v842_v42 = vsel %vm11631_vm7, %v641_v21, %v841_v19  ;;  %v297_v35 = vld [vmem:[#allocation2 + $0xa8] sm:$0x1]  ;;  %4177 = vmatmul.mubr.bf16.gmra.mrb[40].mxu1 %v9526_v59 }
  0xa8   : > { %v226_v27 = vld [vmem:[%s11613_s10 + $0xd8] sm:$0xff]  ;;  %v1195_v26 = vrot.slane %v1194_v46, 4  ;;  %v1454_v12 = vsel %vm11642_vm10, %v9447_v14, %v1453_v5  ;;  %843 = vst [vmem:[#allocation2 + $0x98] sm:$0x1] %v842_v42  ;;  %v649_v15 = vrot.slane %v645_v23, 4  ;;  %v654_v43 = vshll.u32 %v12246_v16, 16 }
  0xa9   : > { %v227_v1 = vld [vmem:[%s11613_s10 + $0xe0] sm:$0xff]  ;;  %v1204_v9 = vor.u32 %v1203_v34, %v1199_v28  ;;  %v1455_v32 = vrot.slane %v1453_v5, 4  ;;  %v845_v24 = vsel %vm11683_vm14, %v648_v31, %v844_v40  ;;  %v345_v21 = vsel %vm11660_vm13, 0, %v344_v30  ;;  %v228_v53 = vld [vmem:[%s11613_s10 + $0xe8] sm:$0xff]  ;;  %v229_v23 = vld [vmem:[%s11613_s10 + $0xf0] sm:$0xff] }
  0xaa   : > { %v1200_v59 = vsel %vm11648_vm11, %v1195_v26, %v1199_v28  ;;  %v656_v39 = vor.u32 %v654_v43, %v12323_v60  ;;  %v658_v41 = vrot.slane %v12323_v60, 4  ;;  %846 = vst [vmem:[#allocation2 + $0x9c] sm:$0xf] %v845_v24  ;;  %346 = vst [vmem:[#allocation2 + $0xa4] sm:$0x1] %v345_v21  ;;  %v298_v16 = vsel %vm11631_vm7, 0, %v297_v35 }
  0xab   : > { %v915_v62 = vld [vmem:[#allocation2 + $0x8c] sm:$0x1]  ;;  %v1205_v22 = vrot.slane %v1204_v9, 4  ;;  %299 = vst [vmem:[#allocation2 + $0xa8] sm:$0x1] %v298_v16  ;;  %v12356_v46 = vpack.c.bf16 %v226_v27, %v226_v27  ;;  %v660_v30 = vshrl.u32 %v12332_v44, 16  ;;  %v12359_v14 = vpack.c.bf16 %v227_v1, %v227_v1 }
  0xac   : > { %v1509_v47 = vld [vmem:[#allocation2 + $0x94] sm:$0xf]  ;;  %v1207_v5 = vshll.u32 %v915_v62, 16  ;;  %v12361_v19 = vld [vmem:[#allocation2 + $0x90] sm:$0xf]  ;;  %v1456_v60 = vrot.slane %v915_v62, 5  ;;  %v657_v40 = vsel %vm11653_vm12, %v649_v15, %v656_v39  ;;  %v12367_v28 = vpack.c.bf16 %v228_v53, %v228_v53 }
  0xad   : > { %v12363_v31 = vld [vmem:[#allocation2 + $0x90] sm:$0xf]  ;;  %v9543_v27 = vcombine.low %v12361_v19, %v1509_v47  ;;  %v12371_v42 = vld [vmem:[#allocation2 + $0x94] sm:$0xf]  ;;  %847 = vst [vmem:[#allocation2 + $0xa0] sm:$0xf] %v657_v40  ;;  %v12374_v26 = vpack.c.bf16 %v229_v23, %v229_v23 }
  0xae   : > { %v1212_v35 = vshrl.u32 %v12363_v31, 16  ;;  %v1209_v43 = vrot.slane %v1207_v5, 5  ;;  %v1457_v1 = vsel %vm11642_vm10, %v1455_v32, %v1456_v60  ;;  %v1215_v9 = vshll.u32 %v12363_v31, 16  ;;  %v1319_v24 = vld [vmem:[#allocation2 + $0x90] sm:$0xe] }
  0xaf   : > { %v1221_v15 = vshll.u32 %v12371_v42, 16  ;;  %4184 = vmatprep.mubr.bf16.mxu1 %v9543_v27  ;;  %v9527_v53 = vcombine.low %v1454_v12, %v1457_v1  ;;  %v916_v39 = vld [vmem:[#allocation2 + $0x98] sm:$0x1]  ;;  %v1225_v62 = vshrl.u32 %v12371_v42, 16  ;;  %v9448_v18 = vrot.slane %v1319_v24, 9 }
  0xb0   : > { %v1214_v16 = vrot.slane %v1212_v35, 4  ;;  %v1210_v23 = vsel %vm11648_vm11, %v1205_v22, %v1209_v43  ;;  %v1217_v47 = vrot.slane %v1215_v9, 5  ;;  %v1231_v40 = vshll.u32 %v916_v39, 16  ;;  %v2136_v6 = vld [vmem:[#allocation2 + $0x8c] sm:$0x1] }
  0xb1   : > { %v1223_v5 = vrot.slane %v1221_v15, 5  ;;  %v9511_v32 = vcombine.low %v1200_v59, %v1210_v23  ;;  %4185 = vmatmul.mubr.bf16.gmra.mrb[44].mxu1 %v9527_v53  ;;  %v1227_v60 = vrot.slane %v1225_v62, 4  ;;  %v12384_v34 = vld [vmem:[#allocation2 + $0x9c] sm:$0xf]  ;;  %v1460_v21 = vrot.slane %v12371_v42, 5 }
  0xb2   : > { %v1218_v27 = vor.u32 %v1217_v47, %v1214_v16  ;;  %v1233_v12 = vrot.slane %v1231_v40, 5  ;;  %v848_v10 = vld [vmem:[#allocation2 + $0xa4] sm:$0x1]  ;;  %v1463_v9 = vrot.slane %v916_v39, 5  ;;  %v12391_v15 = vld [vmem:[#allocation2 + $0x9c] sm:$0xf]  ;;  %v9496_v16 = vcombine.low %v12363_v31, %v12371_v42 }
  0xb3   : > { %4023 = vmatprep.mubr.bf16.mxu0 %v9511_v32  ;;  %v1228_v22 = vor.u32 %v1227_v60, %v1223_v5  ;;  %v1461_v43 = vsel %vm11642_vm10, %v9448_v18, %v1460_v21  ;;  %v1462_v59 = vrot.slane %v1460_v21, 4  ;;  %v849_v62 = vsel %vm11631_vm7, %v658_v41, %v848_v10  ;;  %v347_v41 = vld [vmem:[#allocation2 + $0xb0] sm:$0x1]  ;;  %v230_v47 = vld [vmem:[%s11613_s10 + $0xf8] sm:$0xff] }
  0xb4   : > { %4024 = vmatmul.mubr.bf16.gmra.mrb[44].mxu0 %v9495_v36  ;;  %v1219_v24 = vrot.slane %v1218_v27, 4  ;;  %v1511_v53 = vld [vmem:[#allocation2 + $0xa0] sm:$0xf]  ;;  %v1236_v18 = vshrl.u32 %v12391_v15, 16  ;;  %850 = vst [vmem:[#allocation2 + $0xa4] sm:$0x1] %v849_v62 }
  0xb5   : > { %v12400_v23 = vld [vmem:[#allocation2 + $0xa0] sm:$0xf]  ;;  %v1229_v21 = vrot.slane %v1228_v22, 4  ;;  %v9544_v39 = vcombine.low %v12384_v34, %v1511_v53  ;;  %v1464_v45 = vsel %vm11642_vm10, %v1462_v59, %v1463_v9  ;;  %v1239_v20 = vshll.u32 %v12391_v15, 16  ;;  %v851_v22 = vld [vmem:[#allocation2 + $0xa8] sm:$0xf] }
  0xb6   : > { %v1224_v36 = vsel %vm11648_vm11, %v1219_v24, %v1223_v5  ;;  %v9528_v31 = vcombine.low %v1461_v43, %v1464_v45  ;;  %v1238_v42 = vrot.slane %v1236_v18, 4  ;;  %v1245_v10 = vshll.u32 %v12400_v23, 16  ;;  %v300_v59 = vld [vmem:[#allocation2 + $0xb4] sm:$0x1]  ;;  %v1320_v18 = vld [vmem:[#allocation2 + $0x9c] sm:$0xe] }
  0xb7   : > { %v1234_v40 = vsel %vm11648_vm11, %v1229_v21, %v1233_v12  ;;  %4192 = vmatprep.mubr.bf16.mxu1 %v9544_v39  ;;  %v1241_v32 = vrot.slane %v1239_v20, 5  ;;  %v1249_v60 = vshrl.u32 %v12400_v23, 16  ;;  %v662_v27 = vrot.slane %v660_v30, 7 }
  0xb8   : > { %v9512_v9 = vcombine.low %v1224_v36, %v1234_v40  ;;  %v1247_v5 = vrot.slane %v1245_v10, 5  ;;  %v663_v43 = vshll.u32 %v12332_v44, 16  ;;  %v668_v24 = vshrl.u32 %v12356_v46, 16 }
  0xb9   : > { %4193 = vmatmul.mubr.bf16.gmra.mrb[48].mxu1 %v9528_v31  ;;  %v1242_v53 = vor.u32 %v1241_v32, %v1238_v42  ;;  %v1251_v62 = vrot.slane %v1249_v60, 4  ;;  %v671_v12 = vshll.u32 %v12356_v46, 16  ;;  %v12419_v21 = vpack.c.bf16 %v230_v47, %v230_v47  ;;  %v350_v60 = vld [vmem:[#allocation2 + $0xbc] sm:$0x1] }
  0xba   : > { %4031 = vmatprep.mubr.bf16.mxu0 %v9512_v9  ;;  %v665_v39 = vor.u32 %v663_v43, %v662_v27  ;;  %v666_v45 = vrot.slane %v662_v27, 4  ;;  %v670_v30 = vrot.slane %v668_v24, 7  ;;  %v9497_v20 = vcombine.low %v12391_v15, %v12400_v23 }
  0xbb   : > { %v1243_v36 = vrot.slane %v1242_v53, 4  ;;  %v1252_v10 = vor.u32 %v1251_v62, %v1247_v5  ;;  %v1467_v44 = vrot.slane %v12400_v23, 5  ;;  %v348_v31 = vsel %vm11660_vm13, 0, %v347_v41  ;;  %v917_v42 = vld [vmem:[#allocation2 + $0xa4] sm:$0x1] }
  0xbc   : > { %4032 = vmatmul.mubr.bf16.gmra.mrb[48].mxu0 %v9496_v16  ;;  %v673_v46 = vor.u32 %v671_v12, %v670_v30  ;;  %v852_v47 = vsel %vm11683_vm14, %v665_v39, %v851_v22  ;;  %v9449_v40 = vrot.slane %v1320_v18, 9  ;;  %349 = vst [vmem:[#allocation2 + $0xb0] sm:$0x1] %v348_v31  ;;  %v301_v32 = vsel %vm11631_vm7, 0, %v300_v59  ;;  %v303_v16 = vld [vmem:[#allocation2 + $0xc0] sm:$0x1] }
  0xbd   : > { %v1248_v15 = vsel %vm11648_vm11, %v1243_v36, %v1247_v5  ;;  %v1253_v27 = vrot.slane %v1252_v10, 4  ;;  %v1255_v23 = vshll.u32 %v917_v42, 16  ;;  %v675_v9 = vrot.slane %v670_v30, 4  ;;  %853 = vst [vmem:[#allocation2 + $0xa8] sm:$0xf] %v852_v47 }
  0xbe   : > { %302 = vst [vmem:[#allocation2 + $0xb4] sm:$0x1] %v301_v32  ;;  %v674_v41 = vsel %vm11653_vm12, %v666_v45, %v673_v46  ;;  %v1469_v43 = vrot.slane %v1467_v44, 4  ;;  %v1470_v22 = vrot.slane %v917_v42, 5  ;;  %v677_v24 = vshrl.u32 %v12359_v14, 16 }
  0xbf   : > { %v1257_v53 = vrot.slane %v1255_v23, 5  ;;  %854 = vst [vmem:[#allocation2 + $0xac] sm:$0xf] %v674_v41  ;;  %v680_v59 = vshll.u32 %v12359_v14, 16  ;;  %v685_v62 = vshrl.u32 %v12367_v28, 16  ;;  %v688_v5 = vshll.u32 %v12367_v28, 16 }
  0xc0   : > { %v12440_v12 = vsel %vm11642_vm10, %v9449_v40, %v1467_v44  ;;  %v679_v18 = vrot.slane %v677_v24, 7  ;;  %v351_v39 = vsel %vm11660_vm13, 0, %v350_v60  ;;  %v304_v45 = vsel %vm11631_vm7, 0, %v303_v16  ;;  %v12451_v10 = vld [vmem:[#allocation2 + $0x18] sm:$0xf] }
  0xc1   : > { %v1258_v30 = vsel %vm11648_vm11, %v1253_v27, %v1257_v53  ;;  %v1471_v14 = vsel %vm11642_vm10, %v1469_v43, %v1470_v22  ;;  %v687_v36 = vrot.slane %v685_v62, 7  ;;  %352 = vst [vmem:[#allocation2 + $0xbc] sm:$0x1] %v351_v39  ;;  %305 = vst [vmem:[#allocation2 + $0xc0] sm:$0x1] %v304_v45  ;;  %v694_v28 = vshrl.u32 %v12374_v26, 16 }
  0xc2   : > { %v12453_v44 = vld [vmem:[#allocation2 + $0x1c] sm:$0xf]  ;;  %v9513_v31 = vcombine.low %v1248_v15, %v1258_v30  ;;  %v682_v42 = vor.u32 %v680_v59, %v679_v18  ;;  %v683_v46 = vrot.slane %v679_v18, 4  ;;  %v697_v47 = vshll.u32 %v12374_v26, 16  ;;  %v12456_v40 = vld [vmem:[#allocation2 + $0x24] sm:$0xf] }
  0xc3   : > { %v12458_v32 = vld [vmem:[#allocation2 + $0x28] sm:$0xf]  ;;  %v855_v60 = vld [vmem:[#allocation2 + $0xb0] sm:$0x1]  ;;  %v690_v27 = vor.u32 %v688_v5, %v687_v36  ;;  %v692_v23 = vrot.slane %v687_v36, 4  ;;  %v12460_v16 = vrot.slane %v694_v28, 7  ;;  %v9529_v15 = vcombine.low %v12440_v12, %v1471_v14 }
  0xc4   : > { %v702_v41 = vshrl.u32 %v12419_v21, 16  ;;  %4039 = vmatprep.mubr.bf16.mxu0 %v9513_v31  ;;  %v12463_v43 = vld [vmem:[#allocation2 + $0xa8] sm:$0xf]  ;;  %v856_v22 = vsel %vm11631_vm7, %v675_v9, %v855_v60  ;;  %v1547_v53 = vsel %vm11648_vm11, %v11779_v0, %v11763_v37  ;;  %v9580_v59 = vcombine.low %v12451_v10, %v12453_v44  ;;  %v12490_v62 = vld [vmem:[#allocation2 + $0x14] sm:$0x1] }
  0xc5   : > { %v12468_v26 = vld [vmem:[#allocation2 + $0xa8] sm:$0xf]  ;;  %v858_v24 = vld [vmem:[#allocation2 + $0xb4] sm:$0xf]  ;;  %4040 = vmatmul.mubr.bf16.gmra.mrb[52].mxu0 %v9497_v20  ;;  %857 = vst [vmem:[#allocation2 + $0xb0] sm:$0x1] %v856_v22  ;;  %v691_v30 = vsel %vm11653_vm12, %v683_v46, %v690_v27  ;;  %v699_v20 = vor.u32 %v697_v47, %v12460_v16 }
  0xc6   : > { %v1260_v5 = vshrl.u32 %v12468_v26, 16  ;;  %v1263_v12 = vshll.u32 %v12468_v26, 16  ;;  %v1321_v9 = vld [vmem:[#allocation2 + $0xa8] sm:$0xe]  ;;  %v1513_v39 = vld [vmem:[#allocation2 + $0xac] sm:$0xf]  ;;  %v859_v14 = vsel %vm11683_vm14, %v682_v42, %v858_v24 }
  0xc7   : > { %v12481_v45 = vld [vmem:[#allocation2 + $0xac] sm:$0xf]  ;;  %v9450_v36 = vrot.slane %v1321_v9, 9  ;;  %v9545_v28 = vcombine.low %v12463_v43, %v1513_v39  ;;  %860 = vst [vmem:[#allocation2 + $0xb4] sm:$0xf] %v859_v14  ;;  %v12499_v9 = vrot.slane %v702_v41, 7 }
  0xc8   : > { %v1262_v31 = vrot.slane %v1260_v5, 4  ;;  %v1265_v60 = vrot.slane %v1263_v12, 5  ;;  %v1269_v22 = vshll.u32 %v12481_v45, 16  ;;  %861 = vst [vmem:[#allocation2 + $0xb8] sm:$0xf] %v691_v30  ;;  %v1273_v46 = vshrl.u32 %v12481_v45, 16 }
  0xc9   : > { %v9498_v42 = vcombine.low %v12468_v26, %v12481_v45  ;;  %v1474_v27 = vrot.slane %v12481_v45, 5  ;;  %v862_v47 = vld [vmem:[#allocation2 + $0xbc] sm:$0x1]  ;;  %4200 = vmatprep.mubr.bf16.mxu1 %v9545_v28  ;;  %15886 = vst [vmem:[#allocation8_spill] sm:$0xff] %v12499_v9  ;;  %v865_v39 = vld [vmem:[#allocation2 + $0xc0] sm:$0xf] }
  0xca   : > { %v1266_v24 = vor.u32 %v1265_v60, %v1262_v31  ;;  %v1271_v5 = vrot.slane %v1269_v22, 5  ;;  %v863_v12 = vsel %vm11631_vm7, %v692_v23, %v862_v47  ;;  %v1918_v30 = vld [vmem:[#allocation2 + $0xc] sm:$0xe]  ;;  %4201 = vmatmul.mubr.bf16.gmra.mrb[52].mxu1 %v9529_v15  ;;  %v1275_v14 = vrot.slane %v1273_v46, 4  ;;  %v11357_v47 = vld [vmem:[#allocation2 + $0x10] sm:$0xf] }
  0xcb   : > { %v1475_v1 = vsel %vm11642_vm10, %v9450_v36, %v1474_v27  ;;  %864 = vst [vmem:[#allocation2 + $0xbc] sm:$0x1] %v863_v12  ;;  %v700_v35 = vrot.slane %v12460_v16, 4  ;;  %v705_v8 = vshll.u32 %v12419_v21, 16  ;;  %v1476_v31 = vrot.slane %v1474_v27, 4 }
  0xcc   : > { %v1267_v28 = vrot.slane %v1266_v24, 4  ;;  %v866_v60 = vsel %vm11683_vm14, %v699_v20, %v865_v39  ;;  %v1554_v23 = vshll.u32 %v12490_v62, 16  ;;  %v918_v41 = vld [vmem:[#allocation2 + $0xb0] sm:$0x1]  ;;  %v1276_v22 = vor.u32 %v1275_v14, %v1271_v5 }
  0xcd   : > { %v707_v15 = vor.u32 %v705_v8, %v12499_v9  ;;  %867 = vst [vmem:[#allocation2 + $0xc0] sm:$0xf] %v866_v60  ;;  %v9452_v46 = vrot.slane %v1918_v30, 9  ;;  %v1984_v36 = vrot.slane %v11357_v47, 5  ;;  %v1279_v12 = vshll.u32 %v918_v41, 16 }
  0xce   : > { %v1477_v52 = vrot.slane %v918_v41, 5  ;;  %v12510_v21 = vrot.slane %v1554_v23, 5  ;;  %v1272_v27 = vsel %vm11648_vm11, %v1267_v28, %v1271_v5  ;;  %v1277_v20 = vrot.slane %v1276_v22, 4  ;;  %v12514_v24 = vld [vmem:[#allocation2 + $0xb4] sm:$0xf] }
  0xcf   : > { %15887 = vst [vmem:[#allocation9_spill] sm:$0xff] %v12514_v24  ;;  %v1515_v39 = vld [vmem:[#allocation2 + $0xb8] sm:$0xf]  ;;  %v708_v8 = vsel %vm11653_vm12, %v700_v35, %v707_v15  ;;  %v1986_v14 = vrot.slane %v1984_v36, 4  ;;  %v1281_v30 = vrot.slane %v1279_v12, 5  ;;  %v12531_v12 = vsel %vm11642_vm10, %v9452_v46, %v1984_v36 }
  0xd0   : > { %v9546_v47 = vcombine.low %v12514_v24, %v1515_v39  ;;  %v12521_v23 = vld [vmem:[#allocation2 + $0xb4] sm:$0xf]  ;;  %868 = vst [vmem:[#allocation2 + $0xc4] sm:$0xf] %v708_v8  ;;  %v1478_v5 = vsel %vm11642_vm10, %v1476_v31, %v1477_v52  ;;  %v12525_v28 = vld [vmem:[#allocation2 + $0xb8] sm:$0xf] }
  0xd1   : > { %v1284_v22 = vshrl.u32 %v12521_v23, 16  ;;  %v1287_v35 = vshll.u32 %v12521_v23, 16  ;;  %v1322_v15 = vld [vmem:[#allocation2 + $0xb4] sm:$0xe]  ;;  %v1282_v39 = vsel %vm11648_vm11, %v1277_v20, %v1281_v30  ;;  %v9530_v16 = vcombine.low %v1475_v1, %v1478_v5 }
  0xd2   : > { %4208 = vmatprep.mubr.bf16.mxu1 %v9546_v47  ;;  %v919_v8 = vld [vmem:[#allocation2 + $0xbc] sm:$0x1]  ;;  %v1293_v41 = vshll.u32 %v12525_v28, 16  ;;  %v1297_v52 = vshrl.u32 %v12525_v28, 16  ;;  %v9514_v31 = vcombine.low %v1272_v27, %v1282_v39  ;;  %v9451_v46 = vrot.slane %v1322_v15, 9 }
  0xd3   : > { %v1286_v60 = vrot.slane %v1284_v22, 4  ;;  %v1289_v17 = vrot.slane %v1287_v35, 5  ;;  %v1303_v3 = vshll.u32 %v919_v8, 16  ;;  %4209 = vmatmul.mubr.bf16.gmra.mrb[56].mxu1 %v9530_v16  ;;  %v1557_v1 = vsel %vm11648_vm11, %v11772_v55, %v12510_v21  ;;  %v1919_v15 = vld [vmem:[#allocation2 + $0x18] sm:$0xe] }
  0xd4   : > { %v1295_v18 = vrot.slane %v1293_v41, 5  ;;  %v1299_v29 = vrot.slane %v1297_v52, 4  ;;  %v12537_v54 = vld [vmem:[#allocation2 + $0xc0] sm:$0xf]  ;;  %4047 = vmatprep.mubr.bf16.mxu0 %v9514_v31  ;;  %v9499_v27 = vcombine.low %v12521_v23, %v12525_v28  ;;  %v1481_v41 = vrot.slane %v12525_v28, 5 }
  0xd5   : > { %15888 = vst [vmem:[#allocation10_spill] sm:$0xff] %v12537_v54  ;;  %v1290_v36 = vor.u32 %v1289_v17, %v1286_v60  ;;  %v1305_v20 = vrot.slane %v1303_v3, 5  ;;  %4048 = vmatmul.mubr.bf16.gmra.mrb[56].mxu0 %v9498_v42  ;;  %v1484_v47 = vrot.slane %v919_v8, 5  ;;  %v1987_v5 = vrot.slane %v12490_v62, 5  ;;  %v2127_v42 = vld [vmem:[#allocation2 + $0x20] sm:$0x1] }
  0xd6   : > { %v1300_v16 = vor.u32 %v1299_v29, %v1295_v18  ;;  %v2144_v3 = vshrl.u32 %v12451_v10, 16  ;;  %v2147_v21 = vshll.u32 %v12451_v10, 16  ;;  %v1482_v26 = vsel %vm11642_vm10, %v9451_v46, %v1481_v41  ;;  %v1519_v46 = vld [vmem:[#allocation2 + $0x20] sm:$0x1]  ;;  %v11219_v10 = vld [vmem:[%s15830_s1 + $0x210] sm:$0xff]  }
  0xd7   : > { %v1291_v22 = vrot.slane %v1290_v36, 4  ;;  %v1517_v55 = vld [vmem:[#allocation2 + $0xc4] sm:$0xf]  ;;  %v1483_v29 = vrot.slane %v1481_v41, 4  ;;  %v1988_v62 = vsel %vm11642_vm10, %v1986_v14, %v1987_v5  ;;  %v2153_v31 = vshll.u32 %v12453_v44, 16 }
  0xd8   : > { %v1301_v60 = vrot.slane %v1300_v16, 4  ;;  %v9547_v23 = vcombine.low %v12537_v54, %v1517_v55  ;;  %v2146_v28 = vrot.slane %v2144_v3, 4  ;;  %v2149_v35 = vrot.slane %v2147_v21, 5  ;;  %v11358_v55 = vld [vmem:[#allocation2 + $0x1c] sm:$0xf] }
  0xd9   : > { %v1296_v45 = vsel %vm11648_vm11, %v1291_v22, %v1295_v18  ;;  %v1485_v8 = vsel %vm11642_vm10, %v1483_v29, %v1484_v47  ;;  %v9564_v52 = vcombine.low %v12531_v12, %v1988_v62  ;;  %v2157_v14 = vshrl.u32 %v12453_v44, 16  ;;  %v1927_v54 = vld [vmem:[#allocation2 + $0x78] sm:$0xe] }
  0xda   : > { %v1306_v39 = vsel %vm11648_vm11, %v1301_v60, %v1305_v20  ;;  %4216 = vmatprep.mubr.bf16.mxu1 %v9547_v23  ;;  %v9531_v36 = vcombine.low %v1482_v26, %v1485_v8  ;;  %v2150_v16 = vor.u32 %v2149_v35, %v2146_v28  ;;  %v2155_v41 = vrot.slane %v2153_v31, 5 }
  0xdb   : > { %v9515_v18 = vcombine.low %v1296_v45, %v1306_v39  ;;  %v2163_v5 = vshll.u32 %v2127_v42, 16  ;;  %v9453_v22 = vrot.slane %v1919_v15, 9  ;;  %v1991_v3 = vrot.slane %v11358_v55, 5 }
  0xdc   : > { %4217 = vmatmul.mubr.bf16.gmra.mrb[60].mxu1 %v9531_v36  ;;  %v2151_v20 = vrot.slane %v2150_v16, 4  ;;  %v2159_v21 = vrot.slane %v2157_v14, 4  ;;  %v1994_v47 = vrot.slane %v1519_v46, 5  ;;  %v1561_v12 = vrot.slane %v1559_v13, 4  ;;  %v1920_v16 = vld [vmem:[#allocation2 + $0x24] sm:$0xe] }
  0xdd   : > { %4055 = vmatprep.mubr.bf16.mxu0 %v9515_v18  ;;  %v9548_v60 = vcombine.low %v1547_v53, %v1557_v1  ;;  %v2165_v23 = vrot.slane %v2163_v5, 5  ;;  %v1993_v26 = vrot.slane %v1991_v3, 4  ;;  %v1564_v29 = vrot.slane %v1562_v7, 5  ;;  %v2128_v1 = vld [vmem:[#allocation2 + $0x2c] sm:$0x1] }
  0xde   : > { %4056 = vmatmul.mubr.bf16.gmra.mrb[60].mxu0 %v9499_v27  ;;  %v2160_v45 = vor.u32 %v2159_v21, %v2155_v41  ;;  %v1992_v62 = vsel %vm11642_vm10, %v9453_v22, %v1991_v3  ;;  %v1568_v42 = vshll.u32 %v11358_v55, 16  ;;  %v1572_v28 = vshrl.u32 %v11358_v55, 16  ;;  %v1520_v55 = vld [vmem:[#allocation2 + $0x2c] sm:$0x1] }
  0xdf   : > { %4257 = vmatprep.mubr.bf16.mxu0 %v9564_v52  ;;  %v2156_v13 = vsel %vm11648_vm11, %v2151_v20, %v2155_v41  ;;  %v1565_v27 = vor.u32 %v1564_v29, %v1561_v12  ;;  %v1578_v35 = vshll.u32 %v1519_v46, 16  ;;  %v2168_v37 = vshrl.u32 %v12456_v40, 16  ;;  %v11216_v3 = vld [vmem:[%s15830_s1 + $0x208] sm:$0xff]  }
  0xe0   : > { %v2161_v0 = vrot.slane %v2160_v45, 4  ;;  %v1995_v53 = vsel %vm11642_vm10, %v1993_v26, %v1994_v47  ;;  %v1570_v4 = vrot.slane %v1568_v42, 5  ;;  %v1574_v7 = vrot.slane %v1572_v28, 4  ;;  %v11359_v45 = vld [vmem:[#allocation2 + $0x28] sm:$0xf]  ;;  %v11360_v28 = vld [vmem:[%s15830_s1 + $0x200] sm:$0xff]  }
  0xe1   : > { %v1566_v15 = vrot.slane %v1565_v27, 4  ;;  %v1580_v39 = vrot.slane %v1578_v35, 5  ;;  %v2170_v8 = vrot.slane %v2168_v37, 4  ;;  %v2171_v52 = vshll.u32 %v12456_v40, 16  ;;  %v12594_v42 = vld [vmem:[#allocation2 + $0x30] sm:$0xf] }
  0xe2   : > { %v2166_v31 = vsel %vm11648_vm11, %v2161_v0, %v2165_v23  ;;  %v1575_v18 = vor.u32 %v1574_v7, %v1570_v4  ;;  %v2177_v46 = vshll.u32 %v12458_v32, 16  ;;  %v2181_v36 = vshrl.u32 %v12458_v32, 16 }
  0xe3   : > { %v9596_v14 = vcombine.low %v2156_v13, %v2166_v31  ;;  %v9565_v41 = vcombine.low %v1992_v62, %v1995_v53  ;;  %v2173_v5 = vrot.slane %v2171_v52, 5  ;;  %v2187_v22 = vshll.u32 %v2128_v1, 16 }
  0xe4   : > { %v1571_v20 = vsel %vm11648_vm11, %v1566_v15, %v1570_v4  ;;  %v1576_v21 = vrot.slane %v1575_v18, 4  ;;  %v2179_v47 = vrot.slane %v2177_v46, 5  ;;  %v2183_v12 = vrot.slane %v2181_v36, 4  ;;  %v12617_v18 = vld [vmem:[#allocation2 + $0x34] sm:$0xf] }
  0xe5   : > { %4418 = vmatprep.mubr.bf16.mxu1 %v9596_v14  ;;  %v2174_v23 = vor.u32 %v2173_v5, %v2170_v8  ;;  %v2189_v26 = vrot.slane %v2187_v22, 5  ;;  %v9454_v29 = vrot.slane %v1920_v16, 9  ;;  %v1998_v62 = vrot.slane %v11359_v45, 5  ;;  %v1921_v5 = vld [vmem:[#allocation2 + $0x30] sm:$0xe] }
  0xe6   : > { %4258 = vmatmul.mubr.bf16.vlgmr.msra.gmra.mrb[64].mxu0 %v9548_v60  ;;  %4419 = vmatmul.mubr.bf16.vlgmr.msra.gmra.mrb[64].mxu1 %v9580_v59  ;;  %v1581_v60 = vsel %vm11648_vm11, %v1576_v21, %v1580_v39  ;;  %v2184_v13 = vor.u32 %v2183_v12, %v2179_v47  ;;  %v2001_v27 = vrot.slane %v1520_v55, 5  ;;  %v15889_v35 = vshrl.u32 %v11805_v48, 16 }
  0xe7   : > { %11013 = vmatpush3.bf16.msra.mxu0 %v11360_v28  ;;  %4265 = vmatprep.mubr.bf16.mxu0 %v9565_v41  ;;  %v9549_v0 = vcombine.low %v1571_v20, %v1581_v60  ;;  %v2175_v53 = vrot.slane %v2174_v23, 4  ;;  %v1999_v4 = vsel %vm11642_vm10, %v9454_v29, %v1998_v62  ;;  %v2000_v7 = vrot.slane %v1998_v62, 4  ;;  %v2129_v41 = vld [vmem:[#allocation2 + $0x38] sm:$0x1] }
  0xe8   : > { %v1585_v37 = vrot.slane %v15889_v35, 4  ;;  %11014 = vmatprep.subr.bf16.mxu0 %v11216_v3  ;;  %v2185_v44 = vrot.slane %v2184_v13, 4  ;;  %v15890_v59 = vshll.u32 %v11805_v48, 16  ;;  %v1592_v15 = vshll.u32 %v11359_v45, 16 }
  0xe9   : > { %v1596_v39 = vshrl.u32 %v11359_v45, 16  ;;  %v2180_v8 = vsel %vm11648_vm11, %v2175_v53, %v2179_v47  ;;  %v2002_v52 = vsel %vm11642_vm10, %v2000_v7, %v2001_v27  ;;  %v1602_v31 = vshll.u32 %v1520_v55, 16  ;;  %v11222_v55 = vld [vmem:[%s15830_s1 + $0x218] sm:$0xff]   ;;  %v11361_v7 = vld [vmem:[#allocation2 + $0x34] sm:$0xf] }
  0xea   : > { %v1588_v1 = vrot.slane %v15890_v59, 5  ;;  %v2192_v46 = vshrl.u32 %v12594_v42, 16  ;;  %v2190_v36 = vsel %vm11648_vm11, %v2185_v44, %v2189_v26  ;;  %v9566_v16 = vcombine.low %v1999_v4, %v2002_v52  ;;  %v1521_v45 = vld [vmem:[#allocation2 + $0x38] sm:$0x1] }
  0xeb   : > { %v1594_v48 = vrot.slane %v1592_v15, 5  ;;  %11015 = vmatpush3.bf16.msra.mxu0 %v11216_v3  ;;  %v9597_v22 = vcombine.low %v2180_v8, %v2190_v36  ;;  %v1598_v20 = vrot.slane %v1596_v39, 4  ;;  %v1604_v21 = vrot.slane %v1602_v31, 5  ;;  %v11225_v8 = vld [vmem:[%s15830_s1 + $0x220] sm:$0xff]  }
  0xec   : > { %v1589_v14 = vor.u32 %v1588_v1, %v1585_v37  ;;  %v2194_v47 = vrot.slane %v2192_v46, 4  ;;  %11016 = vmatprep.subr.bf16.mxu0 %v11219_v10  ;;  %v2195_v23 = vshll.u32 %v12594_v42, 16  ;;  %v2201_v26 = vshll.u32 %v12617_v18, 16  ;;  %v12646_v46 = vld [vmem:[#allocation2 + $0x3c] sm:$0xf] }
  0xed   : > { %v2205_v29 = vshrl.u32 %v12617_v18, 16  ;;  %4426 = vmatprep.mubr.bf16.mxu1 %v9597_v22  ;;  %v1599_v3 = vor.u32 %v1598_v20, %v1594_v48  ;;  %v2211_v62 = vshll.u32 %v2129_v41, 16  ;;  %v9582_v28 = vcombine.low %v12594_v42, %v12617_v18  ;;  %v12648_v36 = vld [vmem:[#allocation2 + $0x40] sm:$0xf]  ;;  %v2130_v41 = vld [vmem:[#allocation2 + $0x44] sm:$0x1] }
  0xee   : > { %v1590_v12 = vrot.slane %v1589_v14, 4  ;;  %4266 = vmatmul.mubr.bf16.gmra.mrb[68].mxu0 %v9549_v0  ;;  %v9455_v60 = vrot.slane %v1921_v5, 9  ;;  %v15891_v13 = vcombine.low %v12456_v40, %v12458_v32  ;;  %v2197_v35 = vrot.slane %v2195_v23, 5 }
  0xef   : > { %4273 = vmatprep.mubr.bf16.mxu0 %v9566_v16  ;;  %v2203_v37 = vrot.slane %v2201_v26, 5  ;;  %v2207_v53 = vrot.slane %v2205_v29, 4  ;;  %v1600_v4 = vrot.slane %v1599_v3, 4  ;;  %v2213_v0 = vrot.slane %v2211_v62, 5  ;;  %11017 = vmatpush3.bf16.msra.mxu0 %v11219_v10  ;;  %v1522_v3 = vld [vmem:[#allocation2 + $0x44] sm:$0x1] }
  0xf0   : > { %4427 = vmatmul.mubr.bf16.gmra.mrb[68].mxu1 %v15891_v13  ;;  %v1595_v27 = vsel %vm11648_vm11, %v1590_v12, %v1594_v48  ;;  %v2005_v44 = vrot.slane %v11361_v7, 5  ;;  %v2008_v59 = vrot.slane %v1521_v45, 5  ;;  %v2198_v1 = vor.u32 %v2197_v35, %v2194_v47  ;;  %11018 = vmatprep.subr.bf16.mxu0 %v11222_v55  ;;  %v1922_v47 = vld [vmem:[#allocation2 + $0x3c] sm:$0xe]  ;;  %v11228_v62 = vld [vmem:[%s15830_s1 + $0x228] sm:$0xff]  }
  0xf1   : > { %v2208_v42 = vor.u32 %v2207_v53, %v2203_v37  ;;  %v15892_v15 = vshrl.u32 %v11893_v38, 16  ;;  %v15893_v40 = vshll.u32 %v11893_v38, 16  ;;  %v1605_v52 = vsel %vm11648_vm11, %v1600_v4, %v1604_v21  ;;  %v11231_v4 = vld [vmem:[%s15830_s1 + $0x230] sm:$0xff]  }
  0xf2   : > { %v2006_v31 = vsel %vm11642_vm10, %v9455_v60, %v2005_v44  ;;  %v2007_v10 = vrot.slane %v2005_v44, 4  ;;  %v1616_v18 = vshll.u32 %v11361_v7, 16  ;;  %v9550_v16 = vcombine.low %v1595_v27, %v1605_v52  ;;  %v11362_v52 = vld [vmem:[#allocation2 + $0x40] sm:$0xf] }
  0xf3   : > { %v1609_v39 = vrot.slane %v15892_v15, 4  ;;  %v1612_v32 = vrot.slane %v15893_v40, 5  ;;  %v2199_v38 = vrot.slane %v2198_v1, 4  ;;  %v2209_v14 = vrot.slane %v2208_v42, 4  ;;  %11019 = vmatpush3.bf16.msra.mxu0 %v11222_v55 }
  0xf4   : > { %v2009_v5 = vsel %vm11642_vm10, %v2007_v10, %v2008_v59  ;;  %v1618_v22 = vrot.slane %v1616_v18, 5  ;;  %v1620_v20 = vshrl.u32 %v11361_v7, 16  ;;  %v1626_v21 = vshll.u32 %v1521_v45, 16  ;;  %11020 = vmatprep.subr.bf16.mxu0 %v11225_v8 }
  0xf5   : > { %v1613_v48 = vor.u32 %v1612_v32, %v1609_v39  ;;  %v2204_v12 = vsel %vm11648_vm11, %v2199_v38, %v2203_v37  ;;  %v2214_v23 = vsel %vm11648_vm11, %v2209_v14, %v2213_v0  ;;  %v9567_v26 = vcombine.low %v2006_v31, %v2009_v5 }
  0xf6   : > { %4274 = vmatmul.mubr.bf16.gmra.mrb[72].mxu0 %v9550_v16  ;;  %v9598_v60 = vcombine.low %v2204_v12, %v2214_v23  ;;  %v1622_v13 = vrot.slane %v1620_v20, 4  ;;  %v1628_v45 = vrot.slane %v1626_v21, 5  ;;  %v2216_v55 = vshrl.u32 %v12646_v46, 16  ;;  %v2131_v23 = vld [vmem:[#allocation2 + $0x50] sm:$0x1] }
  0xf7   : > { %v1614_v29 = vrot.slane %v1613_v48, 4  ;;  %4281 = vmatprep.mubr.bf16.mxu0 %v9567_v26  ;;  %v2219_v35 = vshll.u32 %v12646_v46, 16  ;;  %v2225_v37 = vshll.u32 %v12648_v36, 16  ;;  %v2229_v53 = vshrl.u32 %v12648_v36, 16  ;;  %11021 = vmatpush3.bf16.msra.mxu0 %v11225_v8  ;;  %v12674_v8 = vld [vmem:[#allocation2 + $0x48] sm:$0xf] }
  0xf8   : > { %4434 = vmatprep.mubr.bf16.mxu1 %v9598_v60  ;;  %v1623_v0 = vor.u32 %v1622_v13, %v1618_v22  ;;  %v2218_v7 = vrot.slane %v2216_v55, 4  ;;  %v2235_v44 = vshll.u32 %v2130_v41, 16  ;;  %v9583_v59 = vcombine.low %v12646_v46, %v12648_v36  ;;  %11022 = vmatprep.subr.bf16.mxu0 %v11228_v62 }
  0xf9   : > { %v1619_v27 = vsel %vm11648_vm11, %v1614_v29, %v1618_v22  ;;  %4435 = vmatmul.mubr.bf16.gmra.mrb[72].mxu1 %v9582_v28  ;;  %v2221_v1 = vrot.slane %v2219_v35, 5  ;;  %v2227_v42 = vrot.slane %v2225_v37, 5  ;;  %v2231_v15 = vrot.slane %v2229_v53, 4  ;;  %v12680_v22 = vld [vmem:[#allocation2 + $0x4c] sm:$0xf] }
  0xfa   : > { %v9456_v39 = vrot.slane %v1922_v47, 9  ;;  %v1624_v40 = vrot.slane %v1623_v0, 4  ;;  %v2237_v32 = vrot.slane %v2235_v44, 5  ;;  %v2012_v31 = vrot.slane %v11362_v52, 5 }
  0xfb   : > { %v2015_v10 = vrot.slane %v1522_v3, 5  ;;  %v2222_v18 = vor.u32 %v2221_v1, %v2218_v7  ;;  %v2232_v16 = vor.u32 %v2231_v15, %v2227_v42  ;;  %v15894_v38 = vshrl.u32 %v11964_v61, 16  ;;  %11023 = vmatpush3.bf16.msra.mxu0 %v11228_v62 }
  0xfc   : > { %v15895_v48 = vshll.u32 %v11964_v61, 16  ;;  %v1629_v28 = vsel %vm11648_vm11, %v1624_v40, %v1628_v45  ;;  %v2013_v36 = vsel %vm11642_vm10, %v9456_v39, %v2012_v31  ;;  %v2014_v41 = vrot.slane %v2012_v31, 4  ;;  %11024 = vmatprep.subr.bf16.mxu0 %v11231_v4  ;;  %v11234_v61 = vld [vmem:[%s15830_s1 + $0x238] sm:$0xff]   ;;  %v1923_v45 = vld [vmem:[#allocation2 + $0x48] sm:$0xe] }
  0xfd   : > { %v1633_v14 = vrot.slane %v15894_v38, 4  ;;  %v1640_v5 = vshll.u32 %v11362_v52, 16  ;;  %v9551_v20 = vcombine.low %v1619_v27, %v1629_v28  ;;  %v2223_v21 = vrot.slane %v2222_v18, 4  ;;  %v1523_v40 = vld [vmem:[#allocation2 + $0x50] sm:$0x1] }
  0xfe   : > { %v1636_v46 = vrot.slane %v15895_v48, 5  ;;  %v2233_v47 = vrot.slane %v2232_v16, 4  ;;  %v2016_v26 = vsel %vm11642_vm10, %v2014_v41, %v2015_v10  ;;  %v1644_v60 = vshrl.u32 %v11362_v52, 16 }
  0xff   : > { %v1642_v29 = vrot.slane %v1640_v5, 5  ;;  %v1650_v13 = vshll.u32 %v1522_v3, 16  ;;  %4282 = vmatmul.mubr.bf16.gmra.mrb[76].mxu0 %v9551_v20  ;;  %v2228_v62 = vsel %vm11648_vm11, %v2223_v21, %v2227_v42  ;;  %v9568_v27 = vcombine.low %v2013_v36, %v2016_v26  ;;  %v11363_v36 = vld [vmem:[#allocation2 + $0x4c] sm:$0xf] }
 0x100   : > { %v1637_v12 = vor.u32 %v1636_v46, %v1633_v14  ;;  %v2238_v55 = vsel %vm11648_vm11, %v2233_v47, %v2237_v32  ;;  %v1646_v0 = vrot.slane %v1644_v60, 4  ;;  %v2240_v44 = vshrl.u32 %v12674_v8, 16  ;;  %11025 = vmatpush3.bf16.msra.mxu0 %v11231_v4 }
 0x101   : > { %v9599_v53 = vcombine.low %v2228_v62, %v2238_v55  ;;  %v1652_v7 = vrot.slane %v1650_v13, 5  ;;  %4289 = vmatprep.mubr.bf16.mxu0 %v9568_v27  ;;  %v2243_v42 = vshll.u32 %v12674_v8, 16  ;;  %v2249_v15 = vshll.u32 %v12680_v22, 16  ;;  %11026 = vmatprep.subr.bf16.mxu0 %v11234_v61  ;;  %v12717_v13 = vld [vmem:[#allocation2 + $0x58] sm:$0xf] }
 0x102   : > { %v1638_v35 = vrot.slane %v1637_v12, 4  ;;  %v12691_v37 = vpop.f32.mrb[0].mxu0  ;;  %v2253_v39 = vshrl.u32 %v12680_v22, 16  ;;  %v1647_v52 = vor.u32 %v1646_v0, %v1642_v29  ;;  %v2242_v31 = vrot.slane %v2240_v44, 4 }
 0x103   : > { %v12694_v1 = vpop.f32.mrb[1].mxu0  ;;  %4442 = vmatprep.mubr.bf16.mxu1 %v9599_v53  ;;  %v2259_v10 = vshll.u32 %v2131_v23, 16  ;;  %v9584_v4 = vcombine.low %v12674_v8, %v12680_v22  ;;  %v2245_v16 = vrot.slane %v2243_v42, 5  ;;  %v2251_v38 = vrot.slane %v2249_v15, 5  ;;  %v12711_v23 = vld [vmem:[#allocation2 + $0x54] sm:$0xf] }
 0x104   : > { %v1643_v3 = vsel %vm11648_vm11, %v1638_v35, %v1642_v29  ;;  %v12701_v32 = vpop.f32.mrb[2].mxu0  ;;  %4443 = vmatmul.mubr.bf16.gmra.mrb[76].mxu1 %v9583_v59  ;;  %v2255_v14 = vrot.slane %v2253_v39, 4  ;;  %v9457_v48 = vrot.slane %v1923_v45, 9  ;;  %v1648_v46 = vrot.slane %v1647_v52, 4  ;;  %11027 = vmatpush3.bf16.msra.mxu0 %v11234_v61  ;;  %v2132_v15 = vld [vmem:[#allocation2 + $0x5c] sm:$0x1] }
 0x105   : > { %v12705_v18 = vpop.f32.mrb[3].mxu0  ;;  %v2261_v28 = vrot.slane %v2259_v10, 5  ;;  %v2019_v41 = vrot.slane %v11363_v36, 5  ;;  %v2022_v5 = vrot.slane %v1523_v40, 5  ;;  %v2246_v20 = vor.u32 %v2245_v16, %v2242_v31  ;;  %v1924_v10 = vld [vmem:[#allocation2 + $0x54] sm:$0xe] }
 0x106   : > { %v2256_v21 = vor.u32 %v2255_v14, %v2251_v38  ;;  %v15896_v47 = vshrl.u32 %v12024_v56, 16  ;;  %v15897_v8 = vshll.u32 %v12024_v56, 16  ;;  %v1653_v59 = vsel %vm11648_vm11, %v1648_v46, %v1652_v7 }
 0x107   : > { %v2020_v26 = vsel %vm11642_vm10, %v9457_v48, %v2019_v41  ;;  %v2021_v29 = vrot.slane %v2019_v41, 4  ;;  %v1664_v60 = vshll.u32 %v11363_v36, 16  ;;  %v9552_v61 = vcombine.low %v1643_v3, %v1653_v59  ;;  %v1524_v48 = vld [vmem:[#allocation2 + $0x5c] sm:$0x1]  ;;  %v12731_v46 = vpop.f32.mrb[0].mxu1 }
 0x108   : > { %v1657_v12 = vrot.slane %v15896_v47, 4  ;;  %v1660_v22 = vrot.slane %v15897_v8, 5  ;;  %v2247_v45 = vrot.slane %v2246_v20, 4  ;;  %v2257_v62 = vrot.slane %v2256_v21, 4  ;;  %v12735_v20 = vpop.f32.mrb[1].mxu1 }
 0x109   : > { %v2023_v56 = vsel %vm11642_vm10, %v2021_v29, %v2022_v5  ;;  %v1666_v27 = vrot.slane %v1664_v60, 5  ;;  %v1668_v35 = vshrl.u32 %v11363_v36, 16  ;;  %v1674_v53 = vshll.u32 %v1523_v40, 16  ;;  %4290 = vmatmul.mubr.bf16.gmra.mrb[80].mxu0 %v9552_v61  ;;  %v11364_v29 = vld [vmem:[#allocation2 + $0x58] sm:$0xf] }
 0x10a   : > { %v1661_v55 = vor.u32 %v1660_v22, %v1657_v12  ;;  %v2252_v0 = vsel %vm11648_vm11, %v2247_v45, %v2251_v38  ;;  %v2262_v7 = vsel %vm11648_vm11, %v2257_v62, %v2261_v28  ;;  %v9569_v44 = vcombine.low %v2020_v26, %v2023_v56  ;;  %v12737_v22 = vpop.f32.mrb[2].mxu1 }
 0x10b   : > { %v9600_v3 = vcombine.low %v2252_v0, %v2262_v7  ;;  %v1670_v39 = vrot.slane %v1668_v35, 4  ;;  %v1676_v52 = vrot.slane %v1674_v53, 5  ;;  %v2264_v31 = vshrl.u32 %v12711_v23, 16  ;;  %v12739_v45 = vpop.f32.mrb[3].mxu1 }
 0x10c   : > { %v1662_v42 = vrot.slane %v1661_v55, 4  ;;  %4297 = vmatprep.mubr.bf16.mxu0 %v9569_v44  ;;  %v2267_v16 = vshll.u32 %v12711_v23, 16  ;;  %v2273_v38 = vshll.u32 %v12717_v13, 16  ;;  %v2277_v14 = vshrl.u32 %v12717_v13, 16  ;;  %v12751_v44 = vld [vmem:[#allocation2 + $0x64] sm:$0xf] }
 0x10d   : > { %4450 = vmatprep.mubr.bf16.mxu1 %v9600_v3  ;;  %v1671_v28 = vor.u32 %v1670_v39, %v1666_v27  ;;  %v2266_v36 = vrot.slane %v2264_v31, 4  ;;  %v2283_v41 = vshll.u32 %v2132_v15, 16  ;;  %v9585_v5 = vcombine.low %v12711_v23, %v12717_v13  ;;  %v2133_v31 = vld [vmem:[#allocation2 + $0x68] sm:$0x1] }
 0x10e   : > { %v1667_v40 = vsel %vm11648_vm11, %v1662_v42, %v1666_v27  ;;  %4451 = vmatmul.mubr.bf16.gmra.mrb[80].mxu1 %v9584_v4  ;;  %v2269_v21 = vrot.slane %v2267_v16, 5  ;;  %v2275_v47 = vrot.slane %v2273_v38, 5  ;;  %v2279_v12 = vrot.slane %v2277_v14, 4  ;;  %v12745_v27 = vld [vmem:[#allocation2 + $0x60] sm:$0xf] }
 0x10f   : > { %v9458_v8 = vrot.slane %v1924_v10, 9  ;;  %v1672_v59 = vrot.slane %v1671_v28, 4  ;;  %v2285_v26 = vrot.slane %v2283_v41, 5  ;;  %v2026_v60 = vrot.slane %v11364_v29, 5  ;;  %v1925_v14 = vld [vmem:[#allocation2 + $0x60] sm:$0xe] }
 0x110   : > { %v2029_v61 = vrot.slane %v1524_v48, 5  ;;  %v2270_v62 = vor.u32 %v2269_v21, %v2266_v36  ;;  %v2280_v55 = vor.u32 %v2279_v12, %v2275_v47  ;;  %v15898_v23 = vshrl.u32 %v12054_v49, 16  ;;  %v1525_v41 = vld [vmem:[#allocation2 + $0x68] sm:$0x1] }
 0x111   : > { %v15899_v4 = vshll.u32 %v12054_v49, 16  ;;  %v1677_v35 = vsel %vm11648_vm11, %v1672_v59, %v1676_v52  ;;  %v2027_v53 = vsel %vm11642_vm10, %v9458_v8, %v2026_v60  ;;  %v2028_v0 = vrot.slane %v2026_v60, 4 }
 0x112   : > { %v1681_v13 = vrot.slane %v15898_v23, 4  ;;  %v1688_v7 = vshll.u32 %v11364_v29, 16  ;;  %v9553_v42 = vcombine.low %v1667_v40, %v1677_v35  ;;  %v2271_v15 = vrot.slane %v2270_v62, 4 }
 0x113   : > { %v1684_v56 = vrot.slane %v15899_v4, 5  ;;  %v2281_v3 = vrot.slane %v2280_v55, 4  ;;  %v2030_v49 = vsel %vm11642_vm10, %v2028_v0, %v2029_v61  ;;  %v1692_v16 = vshrl.u32 %v11364_v29, 16 }
 0x114   : > { %v1690_v10 = vrot.slane %v1688_v7, 5  ;;  %v1698_v38 = vshll.u32 %v1524_v48, 16  ;;  %4298 = vmatmul.mubr.bf16.gmra.mrb[84].mxu0 %v9553_v42  ;;  %v2276_v52 = vsel %vm11648_vm11, %v2271_v15, %v2275_v47  ;;  %v9570_v36 = vcombine.low %v2027_v53, %v2030_v49 }
 0x115   : > { %v1685_v39 = vor.u32 %v1684_v56, %v1681_v13  ;;  %v2286_v28 = vsel %vm11648_vm11, %v2281_v3, %v2285_v26  ;;  %v1694_v12 = vrot.slane %v1692_v16, 4  ;;  %v2288_v59 = vshrl.u32 %v12745_v27, 16  ;;  %v12765_v61 = vpop.f32.mrb[4].mxu1  ;;  %v11365_v3 = vld [vmem:[#allocation2 + $0x64] sm:$0xf] }
 0x116   : > { %v9601_v21 = vcombine.low %v2276_v52, %v2286_v28  ;;  %v1700_v8 = vrot.slane %v1698_v38, 5  ;;  %4305 = vmatprep.mubr.bf16.mxu0 %v9570_v36  ;;  %v2291_v29 = vshll.u32 %v12745_v27, 16  ;;  %v2297_v60 = vshll.u32 %v12751_v44, 16  ;;  %v12769_v13 = vpop.f32.mrb[5].mxu1  ;;  %v12771_v0 = vpop.f32.mrb[4].mxu0 }
 0x117   : > { %v1686_v40 = vrot.slane %v1685_v39, 4  ;;  %v2301_v47 = vshrl.u32 %v12751_v44, 16  ;;  %v1695_v26 = vor.u32 %v1694_v12, %v1690_v10  ;;  %v2290_v62 = vrot.slane %v2288_v59, 4  ;;  %v12773_v7 = vpop.f32.mrb[6].mxu1  ;;  %v12783_v52 = vld [vmem:[#allocation2 + $0x6c] sm:$0xf] }
 0x118   : > { %4458 = vmatprep.mubr.bf16.mxu1 %v9601_v21  ;;  %v2307_v55 = vshll.u32 %v2133_v31, 16  ;;  %v9586_v23 = vcombine.low %v12745_v27, %v12751_v44  ;;  %v2293_v4 = vrot.slane %v2291_v29, 5  ;;  %v2299_v56 = vrot.slane %v2297_v60, 5  ;;  %v12775_v31 = vpop.f32.mrb[5].mxu0  ;;  %v12791_v59 = vld [vmem:[#allocation2 + $0x70] sm:$0xf] }
 0x119   : > { %v1691_v48 = vsel %vm11648_vm11, %v1686_v40, %v1690_v10  ;;  %4459 = vmatmul.mubr.bf16.gmra.mrb[84].mxu1 %v9585_v5  ;;  %v2303_v35 = vrot.slane %v2301_v47, 4  ;;  %v9459_v53 = vrot.slane %v1925_v14, 9  ;;  %v1696_v42 = vrot.slane %v1695_v26, 4  ;;  %v12777_v10 = vpop.f32.mrb[7].mxu1  ;;  %v12785_v28 = vpop.f32.mrb[6].mxu0 }
 0x11a   : > { %v2309_v15 = vrot.slane %v2307_v55, 5  ;;  %v2033_v39 = vrot.slane %v11365_v3, 5  ;;  %v2036_v49 = vrot.slane %v1525_v41, 5  ;;  %v2294_v27 = vor.u32 %v2293_v4, %v2290_v62  ;;  %v12793_v29 = vpop.f32.mrb[7].mxu0  ;;  %v2134_v62 = vld [vmem:[#allocation2 + $0x74] sm:$0x1] }
 0x11b   : > { %v2304_v44 = vor.u32 %v2303_v35, %v2299_v56  ;;  %v15900_v5 = vshrl.u32 %v12140_v33, 16  ;;  %v15901_v38 = vshll.u32 %v12140_v33, 16  ;;  %v1701_v36 = vsel %vm11648_vm11, %v1696_v42, %v1700_v8  ;;  %v1926_v42 = vld [vmem:[#allocation2 + $0x6c] sm:$0xe] }
 0x11c   : > { %v2034_v40 = vsel %vm11642_vm10, %v9459_v53, %v2033_v39  ;;  %v2035_v21 = vrot.slane %v2033_v39, 4  ;;  %v1712_v12 = vshll.u32 %v11365_v3, 16  ;;  %v9554_v60 = vcombine.low %v1691_v48, %v1701_v36 }
 0x11d   : > { %v1705_v16 = vrot.slane %v15900_v5, 4  ;;  %v1708_v14 = vrot.slane %v15901_v38, 5  ;;  %v2295_v47 = vrot.slane %v2294_v27, 4  ;;  %v2305_v33 = vrot.slane %v2304_v44, 4  ;;  %v1526_v27 = vld [vmem:[#allocation2 + $0x74] sm:$0x1] }
 0x11e   : > { %v2037_v55 = vsel %vm11642_vm10, %v2035_v21, %v2036_v49  ;;  %v1714_v4 = vrot.slane %v1712_v12, 5  ;;  %v1716_v35 = vshrl.u32 %v11365_v3, 16  ;;  %v1722_v8 = vshll.u32 %v1525_v41, 16  ;;  %4306 = vmatmul.mubr.bf16.gmra.mrb[88].mxu0 %v9554_v60  ;;  %v12807_v36 = vpop.f32.mrb[8].mxu0  ;;  %v12811_v60 = vpop.f32.mrb[8].mxu1 }
 0x11f   : > { %v1709_v26 = vor.u32 %v1708_v14, %v1705_v16  ;;  %v2300_v53 = vsel %vm11648_vm11, %v2295_v47, %v2299_v56  ;;  %v2310_v39 = vsel %vm11648_vm11, %v2305_v33, %v2309_v15  ;;  %v9571_v5 = vcombine.low %v2034_v40, %v2037_v55  ;;  %v12813_v47 = vpop.f32.mrb[9].mxu0 }
 0x120   : > { %v9602_v44 = vcombine.low %v2300_v53, %v2310_v39  ;;  %v1718_v16 = vrot.slane %v1716_v35, 4  ;;  %v1724_v38 = vrot.slane %v1722_v8, 5  ;;  %v2312_v14 = vshrl.u32 %v12783_v52, 16  ;;  %v12815_v8 = vpop.f32.mrb[9].mxu1  ;;  %v12817_v53 = vpop.f32.mrb[10].mxu0 }
 0x121   : > { %v1710_v48 = vrot.slane %v1709_v26, 4  ;;  %4313 = vmatprep.mubr.bf16.mxu0 %v9571_v5  ;;  %v2315_v3 = vshll.u32 %v12783_v52, 16  ;;  %v2321_v49 = vshll.u32 %v12791_v59, 16  ;;  %v2325_v56 = vshrl.u32 %v12791_v59, 16  ;;  %v11366_v5 = vld [vmem:[#allocation2 + $0x70] sm:$0xf] }
 0x122   : > { %4466 = vmatprep.mubr.bf16.mxu1 %v9602_v44  ;;  %v1719_v15 = vor.u32 %v1718_v16, %v1714_v4  ;;  %v2314_v40 = vrot.slane %v2312_v14, 4  ;;  %v2331_v21 = vshll.u32 %v2134_v62, 16  ;;  %v9587_v12 = vcombine.low %v12783_v52, %v12791_v59  ;;  %v12819_v44 = vpop.f32.mrb[10].mxu1  ;;  %v12821_v52 = vpop.f32.mrb[11].mxu0 }
 0x123   : > { %v1715_v41 = vsel %vm11648_vm11, %v1710_v48, %v1714_v4  ;;  %4467 = vmatmul.mubr.bf16.gmra.mrb[88].mxu1 %v9586_v23  ;;  %v2317_v33 = vrot.slane %v2315_v3, 5  ;;  %v2323_v26 = vrot.slane %v2321_v49, 5  ;;  %v2327_v55 = vrot.slane %v2325_v56, 4  ;;  %v12827_v49 = vld [vmem:[#allocation2 + $0x78] sm:$0xf]  ;;  %v12829_v56 = vpop.f32.mrb[11].mxu1 }
 0x124   : > { %v9460_v35 = vrot.slane %v1926_v42, 9  ;;  %v1720_v39 = vrot.slane %v1719_v15, 4  ;;  %v2333_v4 = vrot.slane %v2331_v21, 5  ;;  %v2040_v62 = vrot.slane %v11366_v5, 5 }
 0x125   : > { %v2043_v48 = vrot.slane %v1526_v27, 5  ;;  %v2318_v59 = vor.u32 %v2317_v33, %v2314_v40  ;;  %v2328_v16 = vor.u32 %v2327_v55, %v2323_v26  ;;  %v15902_v23 = vshrl.u32 %v12216_v11, 16  ;;  %v12835_v40 = vld [vmem:[#allocation2 + $0x7c] sm:$0xf] }
 0x126   : > { %v15903_v42 = vshll.u32 %v12216_v11, 16  ;;  %v1725_v15 = vsel %vm11648_vm11, %v1720_v39, %v1724_v38  ;;  %v2041_v21 = vsel %vm11642_vm10, %v9460_v35, %v2040_v62  ;;  %v2042_v17 = vrot.slane %v2040_v62, 4  ;;  %v2135_v11 = vld [vmem:[#allocation2 + $0x80] sm:$0x1] }
 0x127   : > { %v1729_v14 = vrot.slane %v15902_v23, 4  ;;  %v1736_v30 = vshll.u32 %v11366_v5, 16  ;;  %v9555_v33 = vcombine.low %v1715_v41, %v1725_v15  ;;  %v2319_v55 = vrot.slane %v2318_v59, 4 }
 0x128   : > { %v1732_v3 = vrot.slane %v15903_v42, 5  ;;  %v2329_v23 = vrot.slane %v2328_v16, 4  ;;  %v2044_v42 = vsel %vm11642_vm10, %v2042_v17, %v2043_v48  ;;  %v1740_v51 = vshrl.u32 %v11366_v5, 16  ;;  %v1527_v5 = vld [vmem:[#allocation2 + $0x80] sm:$0x1]  ;;  %v12849_v48 = vpop.f32.mrb[12].mxu0 }
 0x129   : > { %v1738_v25 = vrot.slane %v1736_v30, 5  ;;  %v1746_v9 = vshll.u32 %v1526_v27, 16  ;;  %4314 = vmatmul.mubr.bf16.gmra.mrb[92].mxu0 %v9555_v33  ;;  %v2324_v38 = vsel %vm11648_vm11, %v2319_v55, %v2323_v26  ;;  %v9572_v39 = vcombine.low %v2041_v21, %v2044_v42 }
 0x12a   : > { %v1733_v63 = vor.u32 %v1732_v3, %v1729_v14  ;;  %v2334_v35 = vsel %vm11648_vm11, %v2329_v23, %v2333_v4  ;;  %v1742_v59 = vrot.slane %v1740_v51, 4  ;;  %v2336_v14 = vshrl.u32 %v12827_v49, 16  ;;  %v12853_v3 = vpop.f32.mrb[13].mxu0 }
 0x12b   : > { %v9603_v62 = vcombine.low %v2324_v38, %v2334_v35  ;;  %v1748_v16 = vrot.slane %v1746_v9, 5  ;;  %4321 = vmatprep.mubr.bf16.mxu0 %v9572_v39  ;;  %v2339_v17 = vshll.u32 %v12827_v49, 16  ;;  %v2345_v27 = vshll.u32 %v12835_v40, 16  ;;  %v12855_v23 = vpop.f32.mrb[14].mxu0  ;;  %v11367_v35 = vld [vmem:[#allocation2 + $0x7c] sm:$0xf] }
 0x12c   : > { %v1734_v41 = vrot.slane %v1733_v63, 4  ;;  %v2349_v26 = vshrl.u32 %v12835_v40, 16  ;;  %v1743_v63 = vor.u32 %v1742_v59, %v1738_v25  ;;  %v2338_v4 = vrot.slane %v2336_v14, 4  ;;  %15904 = vst [vmem:[#allocation11_spill] sm:$0xff] %v12855_v23 }
 0x12d   : > { %4474 = vmatprep.mubr.bf16.mxu1 %v9603_v62  ;;  %v2355_v51 = vshll.u32 %v2135_v11, 16  ;;  %v9588_v9 = vcombine.low %v12827_v49, %v12835_v40  ;;  %v2341_v15 = vrot.slane %v2339_v17, 5  ;;  %v2347_v21 = vrot.slane %v2345_v27, 5  ;;  %v12859_v11 = vpop.f32.mrb[15].mxu0 }
 0x12e   : > { %v1739_v30 = vsel %vm11648_vm11, %v1734_v41, %v1738_v25  ;;  %4475 = vmatmul.mubr.bf16.gmra.mrb[92].mxu1 %v9587_v12  ;;  %v2351_v33 = vrot.slane %v2349_v26, 4  ;;  %v9461_v55 = vrot.slane %v1927_v54, 9  ;;  %v1744_v42 = vrot.slane %v1743_v63, 4  ;;  %v12857_v25 = vpop.f32.mrb[12].mxu1  ;;  %15905 = vst [vmem:[#allocation12_spill] sm:$0xff] %v12859_v11 }
 0x12f   : > { %v2357_v38 = vrot.slane %v2355_v51, 5  ;;  %v2047_v39 = vrot.slane %v11367_v35, 5  ;;  %v2050_v41 = vrot.slane %v1527_v5, 5  ;;  %v2342_v62 = vor.u32 %v2341_v15, %v2338_v4  ;;  %v12865_v54 = vld [vmem:[#allocation2 + $0x84] sm:$0xf]  ;;  %v12867_v17 = vpop.f32.mrb[13].mxu1 }
 0x130   : > { %v2352_v49 = vor.u32 %v2351_v33, %v2347_v21  ;;  %v15906_v40 = vshrl.u32 %v12242_v2, 16  ;;  %v15907_v59 = vshll.u32 %v12242_v2, 16  ;;  %v1749_v27 = vsel %vm11648_vm11, %v1744_v42, %v1748_v16  ;;  %v12873_v4 = vld [vmem:[#allocation2 + $0x88] sm:$0xf]  ;;  %v12875_v15 = vpop.f32.mrb[14].mxu1 }
 0x131   : > { %v2048_v26 = vsel %vm11642_vm10, %v9461_v55, %v2047_v39  ;;  %v2049_v63 = vrot.slane %v2047_v39, 4  ;;  %v1760_v51 = vshll.u32 %v11367_v35, 16  ;;  %15908 = vst [vmem:[#allocation13_spill] sm:$0xff] %v12875_v15  ;;  %v9556_v33 = vcombine.low %v1739_v30, %v1749_v27  ;;  %v12877_v24 = vpop.f32.mrb[15].mxu1  ;;  %v1928_v15 = vld [vmem:[#allocation2 + $0x84] sm:$0xe] }
 0x132   : > { %v1753_v12 = vrot.slane %v15906_v40, 4  ;;  %v1756_v14 = vrot.slane %v15907_v59, 5  ;;  %v2343_v40 = vrot.slane %v2342_v62, 4  ;;  %v2353_v2 = vrot.slane %v2352_v49, 4  ;;  %15909 = vst [vmem:[#allocation14_spill] sm:$0xff] %v12877_v24 }
 0x133   : > { %v2051_v11 = vsel %vm11642_vm10, %v2049_v63, %v2050_v41  ;;  %v1762_v16 = vrot.slane %v1760_v51, 5  ;;  %v1764_v42 = vshrl.u32 %v11367_v35, 16  ;;  %v1770_v23 = vshll.u32 %v1527_v5, 16  ;;  %4322 = vmatmul.mubr.bf16.gmra.mrb[96].mxu0 %v9556_v33  ;;  %v1528_v49 = vld [vmem:[#allocation2 + $0x8c] sm:$0x1] }
 0x134   : > { %v1757_v59 = vor.u32 %v1756_v14, %v1753_v12  ;;  %v2348_v55 = vsel %vm11648_vm11, %v2343_v40, %v2347_v21  ;;  %v2358_v39 = vsel %vm11648_vm11, %v2353_v2, %v2357_v38  ;;  %v9573_v30 = vcombine.low %v2048_v26, %v2051_v11 }
 0x135   : > { %v9604_v12 = vcombine.low %v2348_v55, %v2358_v39  ;;  %v1766_v14 = vrot.slane %v1764_v42, 4  ;;  %v1772_v27 = vrot.slane %v1770_v23, 5  ;;  %v2360_v24 = vshrl.u32 %v12865_v54, 16  ;;  %v11368_v42 = vld [vmem:[#allocation2 + $0x88] sm:$0xf] }
 0x136   : > { %v1758_v62 = vrot.slane %v1757_v59, 4  ;;  %4329 = vmatprep.mubr.bf16.mxu0 %v9573_v30  ;;  %v2363_v35 = vshll.u32 %v12865_v54, 16  ;;  %v2369_v21 = vshll.u32 %v12873_v4, 16  ;;  %v2373_v41 = vshrl.u32 %v12873_v4, 16  ;;  %v12893_v30 = vpop.f32.mrb[16].mxu0 }
 0x137   : > { %4482 = vmatprep.mubr.bf16.mxu1 %v9604_v12  ;;  %v1767_v38 = vor.u32 %v1766_v14, %v1762_v16  ;;  %v2362_v11 = vrot.slane %v2360_v24, 4  ;;  %v2379_v26 = vshll.u32 %v2136_v6, 16  ;;  %v9589_v23 = vcombine.low %v12865_v54, %v12873_v4  ;;  %v12901_v4 = vpop.f32.mrb[16].mxu1 }
 0x138   : > { %v1763_v5 = vsel %vm11648_vm11, %v1758_v62, %v1762_v16  ;;  %4483 = vmatmul.mubr.bf16.gmra.mrb[96].mxu1 %v9588_v9  ;;  %v2365_v63 = vrot.slane %v2363_v35, 5  ;;  %v2371_v51 = vrot.slane %v2369_v21, 5  ;;  %v2375_v33 = vrot.slane %v2373_v41, 4  ;;  %v12899_v9 = vld [vmem:[#allocation2 + $0x90] sm:$0xf]  ;;  %15912 = vst [vmem:[#allocation15_spill] sm:$0xff] %v12901_v4 }
 0x139   : > { %v9462_v40 = vrot.slane %v1928_v15, 9  ;;  %v1768_v2 = vrot.slane %v1767_v38, 4  ;;  %v2381_v59 = vrot.slane %v2379_v26, 5  ;;  %v2054_v55 = vrot.slane %v11368_v42, 5  ;;  %v12903_v15 = vpop.f32.mrb[17].mxu0  ;;  %v12909_v38 = vpop.f32.mrb[17].mxu1 }
 0x13a   : > { %v2057_v39 = vrot.slane %v1528_v49, 5  ;;  %v2366_v62 = vor.u32 %v2365_v63, %v2362_v11  ;;  %v2376_v12 = vor.u32 %v2375_v33, %v2371_v51  ;;  %v15910_v24 = vshrl.u32 %v12310_v50, 16  ;;  %15913 = vst [vmem:[#allocation16_spill] sm:$0xff] %v12903_v15  ;;  %15914 = vst [vmem:[#allocation17_spill] sm:$0xff] %v12909_v38  ;;  %v12911_v11 = vpop.f32.mrb[18].mxu0 }
 0x13b   : > { %v15911_v16 = vshll.u32 %v12310_v50, 16  ;;  %v1773_v14 = vsel %vm11648_vm11, %v1768_v2, %v1772_v27  ;;  %v2055_v35 = vsel %vm11642_vm10, %v9462_v40, %v2054_v55  ;;  %v2056_v21 = vrot.slane %v2054_v55, 4  ;;  %v12917_v4 = vpop.f32.mrb[19].mxu0  ;;  %v2137_v15 = vld [vmem:[#allocation2 + $0x98] sm:$0x1] }
 0x13c   : > { %v1777_v6 = vrot.slane %v15910_v24, 4  ;;  %v1784_v41 = vshll.u32 %v11368_v42, 16  ;;  %v9557_v50 = vcombine.low %v1763_v5, %v1773_v14  ;;  %v2367_v26 = vrot.slane %v2366_v62, 4  ;;  %v12913_v24 = vld [vmem:[#allocation2 + $0x94] sm:$0xf] }
 0x13d   : > { %v1780_v54 = vrot.slane %v15911_v16, 5  ;;  %v2377_v63 = vrot.slane %v2376_v12, 4  ;;  %v12915_v16 = vpop.f32.mrb[18].mxu1  ;;  %v2058_v27 = vsel %vm11642_vm10, %v2056_v21, %v2057_v39  ;;  %v1788_v2 = vshrl.u32 %v11368_v42, 16  ;;  %v1929_v21 = vld [vmem:[#allocation2 + $0x90] sm:$0xe] }
 0x13e   : > { %15915 = vst [vmem:[#allocation18_spill] sm:$0xff] %v12915_v16  ;;  %v1786_v40 = vrot.slane %v1784_v41, 5  ;;  %v1794_v55 = vshll.u32 %v1528_v49, 16  ;;  %v12921_v38 = vpop.f32.mrb[19].mxu1  ;;  %4330 = vmatmul.mubr.bf16.gmra.mrb[100].mxu0 %v9557_v50  ;;  %v2372_v5 = vsel %vm11648_vm11, %v2367_v26, %v2371_v51  ;;  %v9574_v12 = vcombine.low %v2055_v35, %v2058_v27  ;;  %v1529_v50 = vld [vmem:[#allocation2 + $0x98] sm:$0x1] }
 0x13f   : > { %v1781_v33 = vor.u32 %v1780_v54, %v1777_v6  ;;  %v2382_v62 = vsel %vm11648_vm11, %v2377_v63, %v2381_v59  ;;  %v1790_v14 = vrot.slane %v1788_v2, 4  ;;  %v2384_v39 = vshrl.u32 %v12899_v9, 16 }
 0x140   : > { %v9605_v54 = vcombine.low %v2372_v5, %v2382_v62  ;;  %v1796_v16 = vrot.slane %v1794_v55, 5  ;;  %4337 = vmatprep.mubr.bf16.mxu0 %v9574_v12  ;;  %v2387_v42 = vshll.u32 %v12899_v9, 16  ;;  %v2393_v41 = vshll.u32 %v12913_v24, 16 }
 0x141   : > { %v1782_v6 = vrot.slane %v1781_v33, 4  ;;  %v2397_v51 = vshrl.u32 %v12913_v24, 16  ;;  %v1791_v59 = vor.u32 %v1790_v14, %v1786_v40  ;;  %v2386_v35 = vrot.slane %v2384_v39, 4 }
 0x142   : > { %4490 = vmatprep.mubr.bf16.mxu1 %v9605_v54  ;;  %v2403_v26 = vshll.u32 %v2137_v15, 16  ;;  %v9590_v63 = vcombine.low %v12899_v9, %v12913_v24  ;;  %v2389_v33 = vrot.slane %v2387_v42, 5  ;;  %v2395_v27 = vrot.slane %v2393_v41, 5 }
 0x143   : > { %v1787_v49 = vsel %vm11648_vm11, %v1782_v6, %v1786_v40  ;;  %4491 = vmatmul.mubr.bf16.gmra.mrb[100].mxu1 %v9589_v23  ;;  %v2399_v2 = vrot.slane %v2397_v51, 4  ;;  %v12937_v55 = vadd.f32 %v12694_v1, %v12691_v37  ;;  %v1792_v5 = vrot.slane %v1791_v59, 4  ;;  %v12951_v6 = vpop.f32.mrb[20].mxu0  ;;  %v11369_v1 = vld [vmem:[#allocation2 + $0x94] sm:$0xf] }
 0x144   : > { %v2405_v62 = vrot.slane %v2403_v26, 5  ;;  %v12941_v12 = vadd.f32 %v12735_v20, %v12731_v46  ;;  %v12945_v15 = vadd.f32 %v12705_v18, %v12701_v32  ;;  %v2390_v40 = vor.u32 %v2389_v33, %v2386_v35  ;;  %v12957_v32 = vld [vmem:[#allocation2 + $0x9c] sm:$0xf]  ;;  %v12959_v18 = vpop.f32.mrb[20].mxu1  ;;  %v12961_v39 = vpop.f32.mrb[21].mxu0 }
 0x145   : > { %15916 = vst [vmem:[#allocation19_spill] sm:$0xff] %v12937_v55  ;;  %v2400_v9 = vor.u32 %v2399_v2, %v2395_v27  ;;  %v12949_v23 = vadd.f32 %v12739_v45, %v12737_v22  ;;  %v9463_v24 = vrot.slane %v1929_v21, 9  ;;  %v1797_v37 = vsel %vm11648_vm11, %v1792_v5, %v1796_v16  ;;  %v12965_v51 = vld [vmem:[#allocation2 + $0xa0] sm:$0xf]  ;;  %v12967_v16 = vpop.f32.mrb[21].mxu1  ;;  %v12969_v59 = vpop.f32.mrb[22].mxu0 }
 0x146   : > { %15917 = vst [vmem:[#allocation20_spill] sm:$0xff] %v12941_v12  ;;  %15918 = vst [vmem:[#allocation21_spill] sm:$0xff] %v12945_v15  ;;  %v2061_v54 = vrot.slane %v11369_v1, 5  ;;  %v2064_v46 = vrot.slane %v1529_v50, 5  ;;  %v15920_v20 = vshrl.u32 %v12361_v19, 16  ;;  %v9558_v22 = vcombine.low %v1787_v49, %v1797_v37  ;;  %v12975_v49 = vpop.f32.mrb[23].mxu0 }
 0x147   : > { %15919 = vst [vmem:[#allocation22_spill] sm:$0xff] %v12949_v23  ;;  %v2391_v45 = vrot.slane %v2390_v40, 4  ;;  %v2401_v21 = vrot.slane %v2400_v9, 4  ;;  %v15921_v42 = vshll.u32 %v12361_v19, 16  ;;  %v1808_v33 = vshll.u32 %v11369_v1, 16 }
 0x148   : > { %v1801_v14 = vrot.slane %v15920_v20, 4  ;;  %v2062_v35 = vsel %vm11642_vm10, %v9463_v24, %v2061_v54  ;;  %v2063_v26 = vrot.slane %v2061_v54, 4  ;;  %v1812_v2 = vshrl.u32 %v11369_v1, 16  ;;  %v2138_v5 = vld [vmem:[#allocation2 + $0xa4] sm:$0x1]  ;;  %v12973_v20 = vpop.f32.mrb[22].mxu1  ;;  %4338 = vmatmul.mubr.bf16.gmra.mrb[104].mxu0 %v9558_v22 }
 0x149   : > { %v1804_v41 = vrot.slane %v15921_v42, 5  ;;  %v2396_v19 = vsel %vm11648_vm11, %v2391_v45, %v2395_v27  ;;  %v2406_v40 = vsel %vm11648_vm11, %v2401_v21, %v2405_v62  ;;  %v1818_v37 = vshll.u32 %v1529_v50, 16  ;;  %v12981_v42 = vpop.f32.mrb[23].mxu1  ;;  %v1930_v21 = vld [vmem:[#allocation2 + $0x9c] sm:$0xe] }
 0x14a   : > { %v9606_v24 = vcombine.low %v2396_v19, %v2406_v40  ;;  %v2065_v1 = vsel %vm11642_vm10, %v2063_v26, %v2064_v46  ;;  %v1810_v54 = vrot.slane %v1808_v33, 5  ;;  %v1814_v23 = vrot.slane %v1812_v2, 4 }
 0x14b   : > { %v1805_v9 = vor.u32 %v1804_v41, %v1801_v14  ;;  %v9575_v15 = vcombine.low %v2062_v35, %v2065_v1  ;;  %v1820_v55 = vrot.slane %v1818_v37, 5  ;;  %v2408_v22 = vshrl.u32 %v12957_v32, 16  ;;  %v1530_v14 = vld [vmem:[#allocation2 + $0xa4] sm:$0x1]  ;;  %v13011_v37 = vpop.f32.mrb[24].mxu0 }
 0x14c   : > { %4498 = vmatprep.mubr.bf16.mxu1 %v9606_v24  ;;  %v1815_v27 = vor.u32 %v1814_v23, %v1810_v54  ;;  %v2411_v45 = vshll.u32 %v12957_v32, 16  ;;  %v2417_v62 = vshll.u32 %v12965_v51, 16  ;;  %v2421_v50 = vshrl.u32 %v12965_v51, 16 }
 0x14d   : > { %v1806_v12 = vrot.slane %v1805_v9, 4  ;;  %4499 = vmatmul.mubr.bf16.gmra.mrb[104].mxu1 %v9590_v63  ;;  %4345 = vmatprep.mubr.bf16.mxu0 %v9575_v15  ;;  %v2410_v41 = vrot.slane %v2408_v22, 4  ;;  %v2427_v35 = vshll.u32 %v2138_v5, 16  ;;  %v9591_v26 = vcombine.low %v12957_v32, %v12965_v51 }
 0x14e   : > { %v1816_v33 = vrot.slane %v1815_v27, 4  ;;  %v2413_v23 = vrot.slane %v2411_v45, 5  ;;  %v2419_v2 = vrot.slane %v2417_v62, 5  ;;  %v2423_v19 = vrot.slane %v2421_v50, 4  ;;  %v13025_v62 = vld [vmem:[#allocation2 + $0xac] sm:$0xf] }
 0x14f   : > { %v1811_v46 = vsel %vm11648_vm11, %v1806_v12, %v1810_v54  ;;  %v2429_v40 = vrot.slane %v2427_v35, 5  ;;  %v12995_v9 = vadd.f32 %v12775_v31, %v12771_v0  ;;  %v12999_v63 = vadd.f32 %v12769_v13, %v12765_v61  ;;  %v13013_v0 = vpop.f32.mrb[24].mxu1  ;;  %v11370_v13 = vld [vmem:[#allocation2 + $0xa0] sm:$0xf]  ;;  %15928 = vst [vmem:[#allocation27_spill] sm:$0xff] %v13025_v62 }
 0x150   : > { %v13003_v12 = vadd.f32 %v12793_v29, %v12785_v28  ;;  %v1821_v15 = vsel %vm11648_vm11, %v1816_v33, %v1820_v55  ;;  %v2414_v32 = vor.u32 %v2413_v23, %v2410_v41  ;;  %v2424_v51 = vor.u32 %v2423_v19, %v2419_v2  ;;  %v13015_v28 = vld [vmem:[#allocation2 + $0xa8] sm:$0xf]  ;;  %v13017_v29 = vpop.f32.mrb[25].mxu0  ;;  %v13019_v55 = vpop.f32.mrb[25].mxu1  ;;  %v2139_v23 = vld [vmem:[#allocation2 + $0xb0] sm:$0x1] }
 0x151   : > { %15922 = vst [vmem:[#allocation23_spill] sm:$0xff] %v12995_v9  ;;  %15923 = vst [vmem:[#allocation24_spill] sm:$0xff] %v12999_v63  ;;  %v13009_v5 = vadd.f32 %v12777_v10, %v12773_v7  ;;  %v9559_v31 = vcombine.low %v1811_v46, %v1821_v15  ;;  %v9464_v61 = vrot.slane %v1930_v21, 9  ;;  %v2068_v24 = vrot.slane %v11370_v13, 5  ;;  %v13027_v50 = vpop.f32.mrb[26].mxu0  ;;  %v13029_v21 = vpop.f32.mrb[26].mxu1 }
 0x152   : > { %15924 = vst [vmem:[#allocation25_spill] sm:$0xff] %v13003_v12  ;;  %v2071_v1 = vrot.slane %v1530_v14, 5  ;;  %v2415_v54 = vrot.slane %v2414_v32, 4  ;;  %v2425_v22 = vrot.slane %v2424_v51, 4  ;;  %v15926_v7 = vshrl.u32 %v12384_v34, 16  ;;  %v13033_v19 = vpop.f32.mrb[27].mxu0 }
 0x153   : > { %15925 = vst [vmem:[#allocation26_spill] sm:$0xff] %v13009_v5  ;;  %v15927_v27 = vshll.u32 %v12384_v34, 16  ;;  %4346 = vmatmul.mubr.bf16.gmra.mrb[108].mxu0 %v9559_v31  ;;  %v2069_v46 = vsel %vm11642_vm10, %v9464_v61, %v2068_v24  ;;  %v2070_v41 = vrot.slane %v2068_v24, 4  ;;  %v1832_v35 = vshll.u32 %v11370_v13, 16  ;;  %v13035_v15 = vpop.f32.mrb[27].mxu1 }
 0x154   : > { %v1825_v10 = vrot.slane %v15926_v7, 4  ;;  %v1836_v33 = vshrl.u32 %v11370_v13, 16  ;;  %v2420_v34 = vsel %vm11648_vm11, %v2415_v54, %v2419_v2  ;;  %v2430_v32 = vsel %vm11648_vm11, %v2425_v22, %v2429_v40  ;;  %v1931_v22 = vld [vmem:[#allocation2 + $0xa8] sm:$0xe] }
 0x155   : > { %v1828_v45 = vrot.slane %v15927_v27, 5  ;;  %v1842_v7 = vshll.u32 %v1530_v14, 16  ;;  %v9607_v31 = vcombine.low %v2420_v34, %v2430_v32  ;;  %v2072_v61 = vsel %vm11642_vm10, %v2070_v41, %v2071_v1  ;;  %v1531_v14 = vld [vmem:[#allocation2 + $0xb0] sm:$0x1] }
 0x156   : > { %v1834_v24 = vrot.slane %v1832_v35, 5  ;;  %v1838_v27 = vrot.slane %v1836_v33, 4  ;;  %v9576_v13 = vcombine.low %v2069_v46, %v2072_v61  ;;  %v2432_v63 = vshrl.u32 %v13015_v28, 16 }
 0x157   : > { %v1829_v51 = vor.u32 %v1828_v45, %v1825_v10  ;;  %v1844_v12 = vrot.slane %v1842_v7, 5  ;;  %4506 = vmatprep.mubr.bf16.mxu1 %v9607_v31  ;;  %v2435_v2 = vshll.u32 %v13015_v28, 16  ;;  %v2441_v54 = vshll.u32 %v13025_v62, 16 }
 0x158   : > { %v1839_v9 = vor.u32 %v1838_v27, %v1834_v24  ;;  %v2445_v40 = vshrl.u32 %v13025_v62, 16  ;;  %4507 = vmatmul.mubr.bf16.gmra.mrb[108].mxu1 %v9591_v26  ;;  %4353 = vmatprep.mubr.bf16.mxu0 %v9576_v13  ;;  %v2434_v10 = vrot.slane %v2432_v63, 4  ;;  %v2451_v45 = vshll.u32 %v2139_v23, 16 }
 0x159   : > { %v1830_v5 = vrot.slane %v1829_v51, 4  ;;  %v9592_v46 = vcombine.low %v13015_v28, %v13025_v62  ;;  %v2437_v35 = vrot.slane %v2435_v2, 5  ;;  %v2443_v33 = vrot.slane %v2441_v54, 5 }
 0x15a   : > { %v1840_v41 = vrot.slane %v1839_v9, 4  ;;  %v2447_v34 = vrot.slane %v2445_v40, 4  ;;  %v2453_v32 = vrot.slane %v2451_v45, 5  ;;  %v13053_v51 = vadd.f32 %v12813_v47, %v12807_v36  ;;  %v13087_v45 = vld [vmem:[#allocation2 + $0xbc] sm:$0x1] }
 0x15b   : > { %v1835_v1 = vsel %vm11648_vm11, %v1830_v5, %v1834_v24  ;;  %v13057_v26 = vadd.f32 %v12815_v8, %v12811_v60  ;;  %v13061_v63 = vadd.f32 %v12821_v52, %v12817_v53  ;;  %v13063_v5 = vpop.f32.mrb[28].mxu0  ;;  %v2438_v28 = vor.u32 %v2437_v35, %v2434_v10  ;;  %v11371_v8 = vld [vmem:[#allocation2 + $0xac] sm:$0xf]  ;;  %v13073_v53 = vld [vmem:[#allocation2 + $0xb4] sm:$0xf]  ;;  %15936 = vst [vmem:[#allocation33_spill] sm:$0xff] %v13087_v45 }
 0x15c   : > { %15929 = vst [vmem:[#allocation28_spill] sm:$0xff] %v13053_v51  ;;  %v1845_v9 = vsel %vm11648_vm11, %v1840_v41, %v1844_v12  ;;  %v2448_v23 = vor.u32 %v2447_v34, %v2443_v33  ;;  %v13069_v7 = vadd.f32 %v12829_v56, %v12819_v44  ;;  %v13071_v36 = vpop.f32.mrb[29].mxu0  ;;  %v9465_v60 = vrot.slane %v1931_v22, 9  ;;  %v13081_v56 = vld [vmem:[#allocation2 + $0xb8] sm:$0xf]  ;;  %v13089_v41 = vpop.f32.mrb[28].mxu1 }
 0x15d   : > { %15930 = vst [vmem:[#allocation29_spill] sm:$0xff] %v13057_v26  ;;  %15931 = vst [vmem:[#allocation30_spill] sm:$0xff] %v13061_v63  ;;  %v9560_v47 = vcombine.low %v1835_v1, %v1845_v9  ;;  %v2075_v31 = vrot.slane %v11371_v8, 5  ;;  %v2078_v61 = vrot.slane %v1531_v14, 5  ;;  %v13075_v52 = vpop.f32.mrb[30].mxu0  ;;  %v2439_v24 = vrot.slane %v2438_v28, 4 }
 0x15e   : > { %15932 = vst [vmem:[#allocation31_spill] sm:$0xff] %v13069_v7  ;;  %v2449_v27 = vrot.slane %v2448_v23, 4  ;;  %v15933_v12 = vshrl.u32 %v12463_v43, 16  ;;  %v15934_v2 = vshll.u32 %v12463_v43, 16  ;;  %15935 = vst [vmem:[#allocation32_spill] sm:$0xff] %v13081_v56  ;;  %v13083_v54 = vpop.f32.mrb[31].mxu0 }
 0x15f   : > { %4354 = vmatmul.mubr.bf16.gmra.mrb[112].mxu0 %v9560_v47  ;;  %v2076_v40 = vsel %vm11642_vm10, %v9465_v60, %v2075_v31  ;;  %v2077_v22 = vrot.slane %v2075_v31, 4  ;;  %v1856_v1 = vshll.u32 %v11371_v8, 16  ;;  %v1860_v10 = vshrl.u32 %v11371_v8, 16  ;;  %v13095_v28 = vpop.f32.mrb[29].mxu1 }
 0x160   : > { %v1849_v13 = vrot.slane %v15933_v12, 4  ;;  %v1852_v44 = vrot.slane %v15934_v2, 5  ;;  %v2444_v35 = vsel %vm11648_vm11, %v2439_v24, %v2443_v33  ;;  %v2454_v43 = vsel %vm11648_vm11, %v2449_v27, %v2453_v32  ;;  %v13099_v31 = vpop.f32.mrb[30].mxu1 }
 0x161   : > { %v1866_v9 = vshll.u32 %v1531_v14, 16  ;;  %v9608_v23 = vcombine.low %v2444_v35, %v2454_v43  ;;  %v2079_v47 = vsel %vm11642_vm10, %v2077_v22, %v2078_v61  ;;  %v1858_v60 = vrot.slane %v1856_v1, 5  ;;  %v13102_v24 = vpop.f32.mrb[31].mxu1  ;;  %v1532_v61 = vld [vmem:[#allocation2 + $0xbc] sm:$0x1] }
 0x162   : > { %v1853_v34 = vor.u32 %v1852_v44, %v1849_v13  ;;  %v1862_v8 = vrot.slane %v1860_v10, 4  ;;  %v9577_v12 = vcombine.low %v2076_v40, %v2079_v47  ;;  %v2456_v33 = vshrl.u32 %v13073_v53, 16  ;;  %v1932_v44 = vld [vmem:[#allocation2 + $0xb4] sm:$0xe] }
 0x163   : > { %v1868_v7 = vrot.slane %v1866_v9, 5  ;;  %4514 = vmatprep.mubr.bf16.mxu1 %v9608_v23  ;;  %v2459_v14 = vshll.u32 %v13073_v53, 16  ;;  %v2465_v27 = vshll.u32 %v13081_v56, 16  ;;  %v2469_v13 = vshrl.u32 %v13081_v56, 16  ;;  %v11237_v23 = vld [vmem:[%s15831_s2 + $0x40] sm:$0xff]  }
 0x164   : > { %v1854_v2 = vrot.slane %v1853_v34, 4  ;;  %v1863_v32 = vor.u32 %v1862_v8, %v1858_v60  ;;  %4515 = vmatmul.mubr.bf16.gmra.mrb[112].mxu1 %v9592_v46  ;;  %4361 = vmatprep.mubr.bf16.mxu0 %v9577_v12  ;;  %v2458_v22 = vrot.slane %v2456_v33, 4  ;;  %v2475_v1 = vshll.u32 %v13087_v45, 16  ;;  %v11238_v46 = vld [vmem:[%s15831_s2] sm:$0xff]   ;;  %v15939_v8 = vld [vmem:[#allocation11_spill] sm:$0xff] }
 0x165   : > { %v9593_v10 = vcombine.low %v13073_v53, %v13081_v56  ;;  %v2461_v43 = vrot.slane %v2459_v14, 5  ;;  %v2467_v34 = vrot.slane %v2465_v27, 5  ;;  %v2471_v9 = vrot.slane %v2469_v13, 4  ;;  %v15940_v12 = vld [vmem:[#allocation12_spill] sm:$0xff]  ;;  %v15942_v27 = vld [vmem:[#allocation13_spill] sm:$0xff]  ;;  %v15943_v13 = vld [vmem:[#allocation14_spill] sm:$0xff]  ;;  %10540 = vmatprep.subr.bf16.mxu1 %v11237_v23 }
 0x166   : > { %v1859_v40 = vsel %vm11648_vm11, %v1854_v2, %v1858_v60  ;;  %v1864_v35 = vrot.slane %v1863_v32, 4  ;;  %v2477_v47 = vrot.slane %v2475_v1, 5  ;;  %v13120_v60 = vadd.f32 %v12853_v3, %v12849_v48  ;;  %v11372_v45 = vld [vmem:[#allocation2 + $0xb8] sm:$0xf]  ;;  %10541 = vmatpush3.bf16.msra.mxu1 %v11238_v46  ;;  %v13146_v46 = vpop.f32.mrb[32].mxu1 }
 0x167   : > { %v13124_v53 = vadd.f32 %v12867_v17, %v12857_v25  ;;  %v13128_v2 = vadd.f32 %v15940_v12, %v15939_v8  ;;  %v2462_v32 = vor.u32 %v2461_v43, %v2458_v22  ;;  %v2472_v14 = vor.u32 %v2471_v9, %v2467_v34  ;;  %v353_v17 = vld [vmem:[#allocation2 + $0xc8] sm:$0x1]  ;;  %v13142_v43 = vld [vmem:[#allocation2 + $0xc4] sm:$0xf] }
 0x168   : > { %15937 = vst [vmem:[#allocation34_spill] sm:$0xff] %v13120_v60  ;;  %v1869_v33 = vsel %vm11648_vm11, %v1864_v35, %v1868_v7  ;;  %v13134_v1 = vadd.f32 %v15943_v13, %v15942_v27  ;;  %v9466_v3 = vrot.slane %v1932_v44, 9  ;;  %v2082_v56 = vrot.slane %v11372_v45, 5  ;;  %v15945_v12 = vld [vmem:[#allocation9_spill] sm:$0xff]  ;;  %v13140_v35 = vld [vmem:[#allocation2 + $0xc0] sm:$0xf] }
 0x169   : > { %15938 = vst [vmem:[#allocation35_spill] sm:$0xff] %v13124_v53  ;;  %15941 = vst [vmem:[#allocation11_spill] sm:$0xff] %v13128_v2  ;;  %v9561_v48 = vcombine.low %v1859_v40, %v1869_v33  ;;  %v2085_v25 = vrot.slane %v1532_v61, 5  ;;  %v2463_v53 = vrot.slane %v2462_v32, 4  ;;  %v2473_v8 = vrot.slane %v2472_v14, 4  ;;  %v13152_v27 = vpop.f32.mrb[33].mxu1 }
 0x16a   : > { %15944 = vst [vmem:[#allocation12_spill] sm:$0xff] %v13134_v1  ;;  %v15946_v2 = vshrl.u32 %v15945_v12, 16  ;;  %v15947_v7 = vshll.u32 %v15945_v12, 16  ;;  %v2083_v44 = vsel %vm11642_vm10, %v9466_v3, %v2082_v56  ;;  %v2084_v40 = vrot.slane %v2082_v56, 4  ;;  %v13156_v12 = vpop.f32.mrb[32].mxu0 }
 0x16b   : > { %4362 = vmatmul.mubr.bf16.gmra.mrb[116].mxu0 %v9561_v48  ;;  %v1880_v9 = vshll.u32 %v11372_v45, 16  ;;  %v1884_v23 = vshrl.u32 %v11372_v45, 16  ;;  %v2468_v33 = vsel %vm11648_vm11, %v2463_v53, %v2467_v34  ;;  %v1890_v14 = vshll.u32 %v1532_v61, 16  ;;  %v13158_v45 = vpop.f32.mrb[34].mxu1  ;;  %v15952_v53 = vld [vmem:[#allocation15_spill] sm:$0xff] }
 0x16c   : > { %v1873_v60 = vrot.slane %v15946_v2, 4  ;;  %v1876_v22 = vrot.slane %v15947_v7, 5  ;;  %v2478_v2 = vsel %vm11648_vm11, %v2473_v8, %v2477_v47  ;;  %v2086_v48 = vsel %vm11642_vm10, %v2084_v40, %v2085_v25  ;;  %v13164_v61 = vpop.f32.mrb[35].mxu1 }
 0x16d   : > { %v9609_v13 = vcombine.low %v2468_v33, %v2478_v2  ;;  %v1882_v3 = vrot.slane %v1880_v9, 5  ;;  %v1886_v56 = vrot.slane %v1884_v23, 4  ;;  %v9578_v7 = vcombine.low %v2083_v44, %v2086_v48  ;;  %15949 = vst [vmem:[#allocation13_spill] sm:$0xff] %v13164_v61  ;;  %v15950_v23 = vld [vmem:[#allocation16_spill] sm:$0xff] }
 0x16e   : > { %v1877_v32 = vor.u32 %v1876_v22, %v1873_v60  ;;  %v1892_v34 = vrot.slane %v1890_v14, 5  ;;  %v354_v47 = vsel %vm11660_vm13, 0, %v353_v17  ;;  %v13162_v60 = vpop.f32.mrb[33].mxu0  ;;  %v2480_v25 = vshrl.u32 %v13140_v35, 16  ;;  %v13178_v2 = vld [vmem:[#allocation2 + $0xc0] sm:$0xe] }
 0x16f   : > { %4522 = vmatprep.mubr.bf16.mxu1 %v9609_v13  ;;  %v1887_v8 = vor.u32 %v1886_v56, %v1882_v3  ;;  %355 = vst [vmem:[#allocation2 + $0xc8] sm:$0x1] %v354_v47  ;;  %v2483_v22 = vshll.u32 %v13140_v35, 16  ;;  %v2489_v40 = vshll.u32 %v13142_v43, 16  ;;  %v13169_v9 = vpop.f32.mrb[34].mxu0  ;;  %4369 = vmatprep.mubr.bf16.mxu0 %v9578_v7  ;;  %v2493_v44 = vshrl.u32 %v13142_v43, 16 }
 0x170   : > { %v1878_v1 = vrot.slane %v1877_v32, 4  ;;  %4523 = vmatmul.mubr.bf16.gmra.mrb[116].mxu1 %v9593_v10  ;;  %v13176_v33 = vadd.f32 %v15950_v23, %v12893_v30  ;;  %v13180_v32 = vpop.f32.mrb[35].mxu0  ;;  %v2482_v13 = vrot.slane %v2480_v25, 4  ;;  %v13184_v10 = vld [vmem:[#allocation2 + $0xcc] sm:$0xf]  ;;  %v13192_v30 = vadd.f32 %v12917_v4, %v12911_v11  ;;  %v15956_v47 = vld [vmem:[#allocation18_spill] sm:$0xff] }
 0x171   : > { %v1888_v14 = vrot.slane %v1887_v8, 4  ;;  %v2485_v48 = vrot.slane %v2483_v22, 5  ;;  %v13182_v56 = vrot.slane %v2489_v40, 5  ;;  %v2495_v7 = vrot.slane %v2493_v44, 4  ;;  %v13198_v8 = vld [vmem:[#allocation2 + $0x2c] sm:$0x1] }
 0x172   : > { %v1883_v17 = vsel %vm11648_vm11, %v1878_v1, %v1882_v3  ;;  %15951 = vst [vmem:[#allocation14_spill] sm:$0xff] %v13176_v33  ;;  %v15953_v1 = vld [vmem:[#allocation17_spill] sm:$0xff]  ;;  %15955 = vst [vmem:[#allocation6_spill] sm:$0xff] %v13192_v30  ;;  %v13196_v23 = vadd.f32 %v12921_v38, %v15956_v47  ;;  %v13203_v44 = vld [vmem:[#allocation2 + $0xd0] sm:$0xf]  ;;  %v2504_v33 = vshrl.u32 %v13184_v10, 16 }
 0x173   : > { %v13188_v3 = vadd.f32 %v15953_v1, %v15952_v53  ;;  %v1893_v22 = vsel %vm11648_vm11, %v1888_v14, %v1892_v34  ;;  %v2486_v40 = vor.u32 %v2485_v48, %v2482_v13  ;;  %v13205_v53 = vpop.f32.mrb[36].mxu1  ;;  %v15959_v11 = vld [vmem:[#allocation10_spill] sm:$0xff]  ;;  %v2496_v34 = vor.u32 %v2495_v7, %v13182_v56 }
 0x174   : > { %15957 = vst [vmem:[#allocation16_spill] sm:$0xff] %v13196_v23  ;;  %15958 = vst [vmem:[#allocation15_spill] sm:$0xff] %v13205_v53  ;;  %v9562_v1 = vcombine.low %v1883_v17, %v1893_v22  ;;  %v15960_v38 = vshrl.u32 %v15959_v11, 16  ;;  %v15961_v23 = vshll.u32 %v15959_v11, 16  ;;  %v13214_v25 = vpop.f32.mrb[37].mxu1  ;;  %v9467_v14 = vrot.slane %v13178_v2, 9 }
 0x175   : > { %15954 = vst [vmem:[#allocation9_spill] sm:$0xff] %v13188_v3  ;;  %v13207_v3 = vld [vmem:[#allocation2 + $0xc4] sm:$0xf]  ;;  %15962 = vst [vmem:[#allocation17_spill] sm:$0xff] %v13214_v25  ;;  %v13219_v48 = vld [vmem:[#allocation2 + $0xd4] sm:$0x1] }
 0x176   : > { %v1897_v47 = vrot.slane %v15960_v38, 4  ;;  %v1900_v30 = vrot.slane %v15961_v23, 5  ;;  %v1904_v13 = vshll.u32 %v13207_v3, 16  ;;  %15963 = vst [vmem:[#allocation18_spill] sm:$0xff] %v13219_v48  ;;  %v13221_v17 = vpop.f32.mrb[36].mxu0  ;;  %v13223_v22 = vpop.f32.mrb[38].mxu1  ;;  %4370 = vmatmul.mubr.bf16.gmra.mrb[120].mxu0 %v9562_v1 }
 0x177   : > { %15964 = vst [vmem:[#allocation10_spill] sm:$0xff] %v13221_v17  ;;  %15965 = vst [vmem:[#allocation36_spill] sm:$0xff] %v13223_v22  ;;  %v869_v4 = vld [vmem:[#allocation2 + $0xc8] sm:$0x1]  ;;  %v13225_v38 = vrot.slane %v2486_v40, 4  ;;  %v1908_v23 = vshrl.u32 %v13207_v3, 16 }
 0x178   : > { %v1901_v11 = vor.u32 %v1900_v30, %v1897_v47  ;;  %v13229_v7 = vpop.f32.mrb[37].mxu0  ;;  %v15967_v2 = vld [vmem:[#allocation8_spill] sm:$0xff]  ;;  %v13237_v22 = vrot.slane %v1904_v13, 5  ;;  %v2507_v40 = vshll.u32 %v13184_v10, 16  ;;  %v2527_v1 = vld [vmem:[#allocation2 + $0x18] sm:$0xe] }
 0x179   : > { %15966 = vst [vmem:[#allocation37_spill] sm:$0xff] %v13229_v7  ;;  %v15968_v63 = vrot.slane %v15967_v2, 4  ;;  %v13240_v30 = vpop.f32.mrb[38].mxu0  ;;  %v13242_v47 = vpop.f32.mrb[39].mxu1  ;;  %v15972_v25 = vrot.slane %v13207_v3, 5  ;;  %v1910_v2 = vrot.slane %v1908_v23, 4 }
 0x17a   : > { %15970 = vst [vmem:[#allocation8_spill] sm:$0xff] %v13240_v30  ;;  %15971 = vst [vmem:[#allocation38_spill] sm:$0xff] %v13242_v47  ;;  %v2506_v7 = vrot.slane %v2504_v33, 4  ;;  %v13249_v62 = vrot.slane %v2496_v34, 4  ;;  %v2509_v13 = vrot.slane %v2507_v40, 5  ;;  %v2517_v26 = vshrl.u32 %v13203_v44, 16 }
 0x17b   : > { %v870_v51 = vsel %vm11631_vm7, %v15968_v63, %v869_v4  ;;  %v2091_v53 = vrot.slane %v15972_v25, 4  ;;  %v2513_v63 = vshll.u32 %v13203_v44, 16  ;;  %v13247_v4 = vpop.f32.mrb[39].mxu0  ;;  %v2523_v17 = vshll.u32 %v13219_v48, 16  ;;  %v13253_v30 = vld [vmem:[#allocation2 + $0x24] sm:$0xe] }
 0x17c   : > { %871 = vst [vmem:[#allocation2 + $0xc8] sm:$0x1] %v870_v51  ;;  %15973 = vst [vmem:[#allocation39_spill] sm:$0xff] %v13247_v4  ;;  %v13255_v47 = vrot.slane %v1901_v11, 4  ;;  %v1911_v51 = vor.u32 %v1910_v2, %v13237_v22  ;;  %v13260_v33 = vadd.f32 %v12961_v39, %v12951_v6  ;;  %v11239_v34 = vld [vmem:[%s15831_s2 + $0x48] sm:$0xff]   ;;  %v2510_v40 = vor.u32 %v2509_v13, %v2506_v7 }
 0x17d   : > { %v2515_v25 = vrot.slane %v2513_v63, 5  ;;  %v11240_v23 = vld [vmem:[%s15831_s2 + $0x8] sm:$0xff]   ;;  %v2519_v48 = vrot.slane %v2517_v26, 4  ;;  %v2525_v4 = vrot.slane %v2523_v17, 5  ;;  %v13270_v11 = vadd.f32 %v12967_v16, %v12959_v18  ;;  %10542 = vmatprep.subr.bf16.mxu1 %v11239_v34  ;;  %v11375_v7 = vld [vmem:[#allocation2 + $0x1c] sm:$0xf] }
 0x17e   : > { %15974 = vst [vmem:[#allocation40_spill] sm:$0xff] %v13260_v33  ;;  %v1912_v2 = vrot.slane %v1911_v51, 4  ;;  %v13274_v6 = vadd.f32 %v12975_v49, %v12969_v59  ;;  %v13278_v39 = vadd.f32 %v12981_v42, %v12973_v20  ;;  %v9468_v63 = vrot.slane %v2527_v1, 9  ;;  %v11376_v17 = vld [vmem:[#allocation2 + $0x20] sm:$0x1]  ;;  %10543 = vmatpush3.bf16.msra.mxu1 %v11240_v23  ;;  %v13289_v49 = vpop.f32.mrb[40].mxu0 }
 0x17f   : > { %v2511_v33 = vrot.slane %v2510_v40, 4  ;;  %v2520_v61 = vor.u32 %v2519_v48, %v2515_v25  ;;  %v2593_v26 = vrot.slane %v11375_v7, 5  ;;  %v2596_v13 = vrot.slane %v11376_v17, 5  ;;  %v11377_v16 = vld [vmem:[#allocation2 + $0x28] sm:$0xf]  ;;  %v13304_v17 = vpop.f32.mrb[41].mxu0 }
 0x180   : > { %v9469_v18 = vrot.slane %v13253_v30, 9  ;;  %v2600_v51 = vrot.slane %v11377_v16, 5  ;;  %v13283_v59 = vadd.f32 %v13017_v29, %v13011_v37  ;;  %v13287_v20 = vadd.f32 %v13019_v55, %v13013_v0  ;;  %v2529_v23 = vld [vmem:[#allocation2 + $0x30] sm:$0xe] }
 0x181   : > { %v2492_v48 = vsel %vm11648_vm11, %v13225_v38, %v13182_v56  ;;  %v15975_v30 = vrot.slane %v13207_v3, 5  ;;  %v2521_v29 = vrot.slane %v2520_v61, 4  ;;  %v2595_v34 = vrot.slane %v2593_v26, 4  ;;  %v13316_v38 = vpop.f32.mrb[42].mxu0 }
 0x182   : > { %v2516_v7 = vsel %vm11648_vm11, %v2511_v33, %v2515_v25  ;;  %v2594_v3 = vsel %vm11642_vm10, %v9468_v63, %v2593_v26  ;;  %v13324_v63 = vpop.f32.mrb[40].mxu1  ;;  %v13326_v26 = vpop.f32.mrb[43].mxu0 }
 0x183   : > { %v13291_v42 = vld [vmem:[#allocation2 + $0xc8] sm:$0x1]  ;;  %v2090_v37 = vsel %vm11642_vm10, %v9467_v14, %v15975_v30  ;;  %v2526_v56 = vsel %vm11648_vm11, %v2521_v29, %v2525_v4  ;;  %v2597_v61 = vsel %vm11642_vm10, %v2595_v34, %v2596_v13  ;;  %v13314_v14 = vadd.f32 %v13033_v19, %v13027_v50  ;;  %v13332_v30 = vpop.f32.mrb[41].mxu1 }
 0x184   : > { %v1533_v1 = vld [vmem:[#allocation2 + $0xc8] sm:$0x1]  ;;  %v2499_v0 = vshll.u32 %v13291_v42, 16  ;;  %v1907_v4 = vsel %vm11648_vm11, %v13255_v47, %v13237_v22  ;;  %v2602_v50 = vrot.slane %v2600_v51, 4  ;;  %v13330_v19 = vadd.f32 %v13035_v15, %v13029_v21  ;;  %v13339_v34 = vpop.f32.mrb[42].mxu1 }
 0x185   : > { %v2092_v55 = vrot.slane %v1533_v1, 5  ;;  %v1914_v40 = vshll.u32 %v1533_v1, 16  ;;  %v9611_v1 = vcombine.low %v2516_v7, %v2526_v56  ;;  %v9612_v47 = vcombine.low %v2594_v3, %v2597_v61  ;;  %v11379_v21 = vld [vmem:[#allocation2 + $0x38] sm:$0x1]  ;;  %v13341_v7 = vpop.f32.mrb[43].mxu1 }
 0x186   : > { %v2501_v16 = vrot.slane %v2499_v0, 5  ;;  %v9470_v29 = vrot.slane %v2529_v23, 9  ;;  %v2610_v15 = vrot.slane %v11379_v21, 5  ;;  %v2601_v56 = vsel %vm11642_vm10, %v9469_v18, %v2600_v51  ;;  %v2530_v61 = vld [vmem:[#allocation2 + $0x3c] sm:$0xe] }
 0x187   : > { %v2093_v25 = vsel %vm11642_vm10, %v2091_v53, %v2092_v55  ;;  %v1916_v33 = vrot.slane %v1914_v40, 5  ;;  %v11378_v55 = vld [vmem:[#allocation2 + $0x34] sm:$0xf]  ;;  %v13359_v18 = vadd.f32 %v13083_v54, %v13075_v52  ;;  %v2531_v51 = vld [vmem:[#allocation2 + $0x48] sm:$0xe] }
 0x188   : > { %v9579_v13 = vcombine.low %v2090_v37, %v2093_v25  ;;  %v2502_v53 = vsel %vm11648_vm11, %v13249_v62, %v2501_v16  ;;  %v2607_v40 = vrot.slane %v11378_v55, 5  ;;  %v11380_v62 = vld [vmem:[#allocation2 + $0x40] sm:$0xf]  ;;  %v13355_v25 = vadd.f32 %v13095_v28, %v13089_v41  ;;  %v11381_v54 = vld [vmem:[#allocation2 + $0x4c] sm:$0xf] }
 0x189   : > { %v1917_v22 = vsel %vm11648_vm11, %v1912_v2, %v1916_v33  ;;  %v9610_v37 = vcombine.low %v2492_v48, %v2502_v53  ;;  %v2614_v16 = vrot.slane %v11380_v62, 5  ;;  %v13347_v2 = vadd.f32 %v13071_v36, %v13063_v5 }
 0x18a   : > { %4377 = vmatprep.mubr.bf16.mxu0 %v9579_v13  ;;  %v9563_v0 = vcombine.low %v1907_v4, %v1917_v22  ;;  %v15976_v48 = vrot.slane %v13198_v8, 5  ;;  %v2609_v3 = vrot.slane %v2607_v40, 4  ;;  %v15977_v5 = vcombine.low %v13140_v35, %v13142_v43  ;;  %v11382_v13 = vld [vmem:[#allocation2 + $0x44] sm:$0x1] }
 0x18b   : > { %4530 = vmatprep.mubr.bf16.mxu1 %v9610_v37  ;;  %v2608_v36 = vsel %vm11642_vm10, %v9470_v29, %v2607_v40  ;;  %v13368_v8 = vadd.f32 %v13102_v24, %v13099_v31  ;;  %v9595_v41 = vcombine.low %v13184_v10, %v13203_v44  ;;  %v2621_v28 = vrot.slane %v11381_v54, 5  ;;  %v2532_v29 = vld [vmem:[#allocation2 + $0x54] sm:$0xe]  ;;  %v11384_v37 = vld [vmem:[#allocation2 + $0x58] sm:$0xf]  ;;  %v15980_v54 = vld [vmem:[#allocation37_spill] sm:$0xff] }
 0x18c   : > { %4378 = vmatmul.mubr.bf16.gmra.mrb[124].mxu0 %v9563_v0  ;;  %v2604_v23 = vsel %vm11642_vm10, %v2602_v50, %v15976_v48  ;;  %4531 = vmatmul.mubr.bf16.gmra.mrb[120].mxu1 %v15977_v5  ;;  %v2611_v52 = vsel %vm11642_vm10, %v2609_v3, %v2610_v15  ;;  %v9471_v4 = vrot.slane %v2530_v61, 9  ;;  %v2616_v33 = vrot.slane %v2614_v16, 4  ;;  %v15978_v15 = vld [vmem:[#allocation13_spill] sm:$0xff]  ;;  %v13392_v48 = vpop.f32.mrb[44].mxu0 }
 0x18d   : > { %11028 = vmatprep.mubr.bf16.mxu0 %v9612_v47  ;;  %4538 = vmatprep.mubr.bf16.mxu1 %v9611_v1  ;;  %v9613_v35 = vcombine.low %v2601_v56, %v2604_v23  ;;  %v2617_v50 = vrot.slane %v11382_v13, 5  ;;  %v9614_v53 = vcombine.low %v2608_v36, %v2611_v52  ;;  %v9472_v22 = vrot.slane %v2531_v51, 9  ;;  %v11383_v47 = vld [vmem:[#allocation2 + $0x50] sm:$0x1]  ;;  %v13376_v1 = vpop.f32.mrb[44].mxu1  ;;  %v10151_v61 = vpop.f32.mrb[45].mxu0 }
 0x18e   : > { %v2624_v31 = vrot.slane %v11383_v47, 5  ;;  %v10134_v24 = vadd.f32 %v13162_v60, %v13156_v12  ;;  %v2623_v10 = vrot.slane %v2621_v28, 4  ;;  %v2628_v0 = vrot.slane %v11384_v37, 5  ;;  %v13382_v21 = vpop.f32.mrb[45].mxu1  ;;  %v15979_v52 = vld [vmem:[#allocation10_spill] sm:$0xff]  ;;  %v15981_v47 = vld [vmem:[#allocation15_spill] sm:$0xff] }
 0x18f   : > { %v10246_v55 = vadd.f32 %v13152_v27, %v13146_v46  ;;  %v10137_v40 = vadd.f32 %v13180_v32, %v13169_v9  ;;  %v10249_v56 = vadd.f32 %v15978_v15, %v13158_v45  ;;  %v13386_v62 = vpop.f32.mrb[46].mxu1  ;;  %v2615_v12 = vsel %vm11642_vm10, %v9471_v4, %v2614_v16  ;;  %v11241_v46 = vld [vmem:[%s15831_s2 + $0x50] sm:$0xff]   ;;  %v11385_v32 = vld [vmem:[#allocation2 + $0x5c] sm:$0x1]  ;;  %v10153_v4 = vpop.f32.mrb[46].mxu0  ;;  %v15983_v37 = vld [vmem:[#allocation8_spill] sm:$0xff] }
 0x190   : > { %v13394_v23 = vpop.f32.mrb[47].mxu1  ;;  %v11242_v27 = vld [vmem:[%s15831_s2 + $0x10] sm:$0xff]   ;;  %v2618_v45 = vsel %vm11642_vm10, %v2616_v33, %v2617_v50  ;;  %v9473_v9 = vrot.slane %v2532_v29, 9  ;;  %v2631_v16 = vrot.slane %v11385_v32, 5  ;;  %v2622_v5 = vsel %vm11642_vm10, %v9472_v22, %v2621_v28  ;;  %v2533_v33 = vld [vmem:[#allocation2 + $0x60] sm:$0xe]  ;;  %10544 = vmatprep.subr.bf16.mxu1 %v11241_v46 }
 0x191   : > { %v13390_v60 = vadd.f32 %v10246_v55, %v10134_v24  ;;  %v13404_v3 = vadd.f32 %v10249_v56, %v10137_v40  ;;  %v2625_v36 = vsel %vm11642_vm10, %v2623_v10, %v2624_v31  ;;  %v2630_v51 = vrot.slane %v2628_v0, 4  ;;  %v11386_v13 = vld [vmem:[#allocation2 + $0x64] sm:$0xf]  ;;  %v15982_v24 = vld [vmem:[#allocation17_spill] sm:$0xff]  ;;  %v15986_v40 = vld [vmem:[#allocation38_spill] sm:$0xff]  ;;  %v10154_v22 = vpop.f32.mrb[47].mxu0  ;;  %10545 = vmatpush3.bf16.msra.mxu1 %v11242_v27 }
 0x192   : > { %v2635_v50 = vrot.slane %v11386_v13, 5  ;;  %v10252_v29 = vadd.f32 %v15982_v24, %v15981_v47  ;;  %v15985_v55 = vld [vmem:[#allocation36_spill] sm:$0xff]  ;;  %v9615_v31 = vcombine.low %v2615_v12, %v2618_v45  ;;  %v13422_v56 = vpop.f32.mrb[48].mxu1  ;;  %v9616_v32 = vcombine.low %v2622_v5, %v2625_v36  ;;  %v11387_v46 = vld [vmem:[#allocation2 + $0x68] sm:$0x1]  ;;  %v10156_v36 = vpop.f32.mrb[48].mxu0 }
 0x193   : > { %v10255_v28 = vadd.f32 %v15986_v40, %v15985_v55  ;;  %v13426_v13 = vpop.f32.mrb[49].mxu1  ;;  %v2632_v47 = vsel %vm11642_vm10, %v2630_v51, %v2631_v16  ;;  %v2638_v27 = vrot.slane %v11387_v46, 5  ;;  %v10146_v12 = vadd.f32 %v13304_v17, %v13289_v49  ;;  %v2535_v16 = vld [vmem:[#allocation2 + $0x78] sm:$0xe]  ;;  %v11389_v51 = vld [vmem:[#allocation2 + $0x7c] sm:$0xf] }
 0x194   : > { %11029 = vmatmul.mubr.bf16.vlgmr.msra.gmra.mrb[128].mxu0 %v9613_v35  ;;  %4539 = vmatmul.mubr.bf16.gmra.mrb[124].mxu1 %v9595_v41  ;;  %v10140_v35 = vadd.f32 %v15980_v54, %v15979_v52  ;;  %v15984_v41 = vld [vmem:[#allocation39_spill] sm:$0xff]  ;;  %v2629_v52 = vsel %vm11642_vm10, %v9473_v9, %v2628_v0  ;;  %v9474_v54 = vrot.slane %v2533_v33, 9  ;;  %v2637_v24 = vrot.slane %v2635_v50, 4  ;;  %v13432_v45 = vpop.f32.mrb[50].mxu1  ;;  %v10157_v17 = vpop.f32.mrb[49].mxu0 }
 0x195   : > { %11032 = vmatprep.mubr.bf16.mxu0 %v9614_v53  ;;  %v10143_v53 = vadd.f32 %v15984_v41, %v15983_v37  ;;  %v10258_v0 = vadd.f32 %v13332_v30, %v13324_v63  ;;  %v10149_v9 = vadd.f32 %v13326_v26, %v13316_v38  ;;  %v10272_v33 = vpop.f32.mrb[51].mxu1  ;;  %v2649_v37 = vrot.slane %v11389_v51, 5  ;;  %v11390_v55 = vld [vmem:[#allocation2 + $0x88] sm:$0xf]  ;;  %v10159_v38 = vpop.f32.mrb[50].mxu0 }
 0x196   : > { %v13418_v10 = vadd.f32 %v10252_v29, %v10140_v35  ;;  %v2534_v35 = vld [vmem:[#allocation2 + $0x6c] sm:$0xe]  ;;  %v11388_v29 = vld [vmem:[#allocation2 + $0x70] sm:$0xf]  ;;  %v10261_v49 = vadd.f32 %v13341_v7, %v13339_v34  ;;  %v9617_v41 = vcombine.low %v2629_v52, %v2632_v47  ;;  %v2656_v63 = vrot.slane %v11390_v55, 5  ;;  %v10160_v34 = vpop.f32.mrb[51].mxu0 }
 0x197   : > { %v13420_v15 = vadd.f32 %v10255_v28, %v10143_v53  ;;  %v2642_v5 = vrot.slane %v11388_v29, 5  ;;  %v2636_v53 = vsel %vm11642_vm10, %v9474_v54, %v2635_v50  ;;  %v13442_v30 = vadd.f32 %v10258_v0, %v10146_v12  ;;  %v11391_v28 = vld [vmem:[#allocation2 + $0x74] sm:$0x1]  ;;  %v2536_v46 = vld [vmem:[#allocation2 + $0x84] sm:$0xe] }
 0x198   : > { %v2639_v26 = vsel %vm11642_vm10, %v2637_v24, %v2638_v27  ;;  %v9475_v40 = vrot.slane %v2534_v35, 9  ;;  %v13446_v29 = vadd.f32 %v10261_v49, %v10149_v9  ;;  %v11392_v52 = vld [vmem:[#allocation2 + $0x80] sm:$0x1]  ;;  %v10152_v50 = vadd.f32 %v10151_v61, %v13392_v48  ;;  %v11393_v9 = vld [vmem:[#allocation2 + $0x8c] sm:$0x1] }
 0x199   : > { %v2644_v7 = vrot.slane %v2642_v5, 4  ;;  %v2652_v47 = vrot.slane %v11392_v52, 5  ;;  %v2651_v54 = vrot.slane %v2649_v37, 4  ;;  %v10264_v12 = vadd.f32 %v13382_v21, %v13376_v1  ;;  %v2537_v55 = vld [vmem:[#allocation2 + $0x90] sm:$0xe] }
 0x19a   : > { %v10155_v0 = vadd.f32 %v10154_v22, %v10153_v4  ;;  %v10267_v24 = vadd.f32 %v13394_v23, %v13386_v62  ;;  %v9618_v27 = vcombine.low %v2636_v53, %v2639_v26  ;;  %v9477_v35 = vrot.slane %v2536_v46, 9  ;;  %v10162_v4 = vpop.f32.mrb[52].mxu0 }
 0x19b   : > { %v2658_v51 = vrot.slane %v2656_v63, 4  ;;  %v2659_v49 = vrot.slane %v11393_v9, 5  ;;  %v13453_v58 = vadd.f32 %v10264_v12, %v10152_v50  ;;  %v2643_v48 = vsel %vm11642_vm10, %v9475_v40, %v2642_v5  ;;  %v11395_v40 = vld [vmem:[#allocation2 + $0x98] sm:$0x1] }
 0x19c   : > { %11033 = vmatmul.mubr.bf16.gmra.mrb[132].mxu0 %v9615_v31  ;;  %v2645_v31 = vrot.slane %v11391_v28, 5  ;;  %v11394_v28 = vld [vmem:[#allocation2 + $0x94] sm:$0xf]  ;;  %v13455_v52 = vadd.f32 %v10267_v24, %v10155_v0  ;;  %v2653_v62 = vsel %vm11642_vm10, %v2651_v54, %v2652_v47  ;;  %v9478_v23 = vrot.slane %v2537_v55, 9  ;;  %v11243_v50 = vld [vmem:[%s15831_s2 + $0x58] sm:$0xff]  }
 0x19d   : > { %11036 = vmatprep.mubr.bf16.mxu0 %v9616_v32  ;;  %v9476_v32 = vrot.slane %v2535_v16, 9  ;;  %v2663_v16 = vrot.slane %v11394_v28, 5  ;;  %v10158_v61 = vadd.f32 %v10157_v17, %v10156_v36  ;;  %v13467_v22 = vsel %vm11642_vm10, %v9477_v35, %v2656_v63  ;;  %v2542_v17 = vld [vmem:[#allocation2 + $0xcc] sm:$0xe]  ;;  %v15987_v0 = vld [vmem:[#allocation18_spill] sm:$0xff]  ;;  %10546 = vmatprep.subr.bf16.mxu1 %v11243_v50  ;;  %v15988_v55 = vld [vmem:[#allocation19_spill] sm:$0xff] }
 0x19e   : > { %v2646_v1 = vsel %vm11642_vm10, %v2644_v7, %v2645_v31  ;;  %v13471_v5 = vsel %vm11642_vm10, %v2658_v51, %v2659_v49  ;;  %v10161_v53 = vadd.f32 %v10160_v34, %v10159_v38  ;;  %v2666_v31 = vrot.slane %v11395_v40, 5  ;;  %v15989_v28 = vld [vmem:[#allocation20_spill] sm:$0xff]  ;;  %v15996_v40 = vld [vmem:[#allocation26_spill] sm:$0xff]  ;;  %v16000_v50 = vld [vmem:[#allocation31_spill] sm:$0xff] }
 0x19f   : > { %v2650_v21 = vsel %vm11642_vm10, %v9476_v32, %v2649_v37  ;;  %v10163_v37 = vpop.f32.mrb[53].mxu0  ;;  %v2665_v26 = vrot.slane %v2663_v16, 4  ;;  %v10273_v36 = vadd.f32 %v10272_v33, %v13432_v45  ;;  %v9619_v7 = vcombine.low %v2643_v48, %v2646_v1  ;;  %v11396_v33 = vld [vmem:[#allocation2 + $0xa0] sm:$0xf]  ;;  %v15990_v48 = vld [vmem:[#allocation21_spill] sm:$0xff]  ;;  %v15991_v1 = vld [vmem:[#allocation22_spill] sm:$0xff] }
 0x1a0   : > { %v10165_v46 = vpop.f32.mrb[54].mxu0  ;;  %v9620_v32 = vcombine.low %v2650_v21, %v2653_v62  ;;  %v2664_v45 = vsel %vm11642_vm10, %v9478_v23, %v2663_v16  ;;  %v2670_v38 = vrot.slane %v11396_v33, 5  ;;  %v9483_v54 = vrot.slane %v2542_v17, 9  ;;  %v15998_v17 = vld [vmem:[#allocation29_spill] sm:$0xff]  ;;  %v2538_v33 = vld [vmem:[#allocation2 + $0x9c] sm:$0xe] }
 0x1a1   : > { %v10166_v47 = vpop.f32.mrb[55].mxu0  ;;  %v13488_v34 = vadd.f32 %v10273_v36, %v10161_v53  ;;  %v2698_v12 = vrot.slane %v13203_v44, 5  ;;  %v2701_v24 = vrot.slane %v15987_v0, 5  ;;  %v10164_v35 = vadd.f32 %v10163_v37, %v10162_v4  ;;  %v15992_v44 = vld [vmem:[#allocation27_spill] sm:$0xff]  ;;  %v15994_v53 = vld [vmem:[#allocation24_spill] sm:$0xff]  ;;  %v16001_v0 = vld [vmem:[#allocation34_spill] sm:$0xff] }
 0x1a2   : > { %v2667_v51 = vsel %vm11642_vm10, %v2665_v26, %v2666_v31  ;;  %v10167_v49 = vadd.f32 %v10166_v47, %v10165_v46  ;;  %v13496_v16 = vadd.f32 %v15989_v28, %v15988_v55  ;;  %v13500_v21 = vadd.f32 %v15991_v1, %v15990_v48  ;;  %v15995_v26 = vld [vmem:[#allocation25_spill] sm:$0xff]  ;;  %v15997_v36 = vld [vmem:[#allocation28_spill] sm:$0xff]  ;;  %v15999_v47 = vld [vmem:[#allocation30_spill] sm:$0xff] }
 0x1a3   : > { %v2677_v62 = vrot.slane %v15992_v44, 5  ;;  %v13505_v23 = vsel %vm11642_vm10, %v9483_v54, %v2698_v12  ;;  %v13513_v31 = vadd.f32 %v15996_v40, %v15995_v26  ;;  %v13517_v46 = vadd.f32 %v15998_v17, %v15997_v36  ;;  %v2539_v55 = vld [vmem:[#allocation2 + $0xa8] sm:$0xe]  ;;  %v16003_v48 = vld [vmem:[#allocation11_spill] sm:$0xff]  ;;  %v16004_v1 = vld [vmem:[#allocation12_spill] sm:$0xff] }
 0x1a4   : > { %11037 = vmatmul.mubr.bf16.gmra.mrb[136].mxu0 %v9617_v41  ;;  %v10270_v41 = vadd.f32 %v13426_v13, %v13422_v56  ;;  %v11244_v56 = vld [vmem:[%s15831_s2 + $0x18] sm:$0xff]   ;;  %v9621_v13 = vcombine.low %v13467_v22, %v13471_v5  ;;  %v13537_v44 = vadd.f32 %v16004_v1, %v16003_v48  ;;  %v13555_v26 = vadd.f32 %v13278_v39, %v13274_v6  ;;  %v11397_v39 = vld [vmem:[#allocation2 + $0xa4] sm:$0x1]  ;;  %v2540_v1 = vld [vmem:[#allocation2 + $0xb4] sm:$0xe] }
 0x1a5   : > { %11040 = vmatprep.mubr.bf16.mxu0 %v9618_v27  ;;  %v10274_v27 = vpop.f32.mrb[52].mxu1  ;;  %10547 = vmatpush3.bf16.msra.mxu1 %v11244_v56  ;;  %v13521_v56 = vadd.f32 %v16000_v50, %v15999_v47  ;;  %v13559_v40 = vadd.f32 %v13287_v20, %v13283_v59  ;;  %v9479_v36 = vrot.slane %v2538_v33, 9  ;;  %v13563_v17 = vadd.f32 %v13330_v19, %v13314_v14  ;;  %v11398_v20 = vld [vmem:[#allocation2 + $0xb0] sm:$0x1] }
 0x1a6   : > { %v13476_v63 = vadd.f32 %v10270_v41, %v10158_v61  ;;  %v10275_v9 = vpop.f32.mrb[53].mxu1  ;;  %v2700_v61 = vrot.slane %v2698_v12, 4  ;;  %v15993_v41 = vld [vmem:[#allocation23_spill] sm:$0xff]  ;;  %v9622_v47 = vcombine.low %v2664_v45, %v2667_v51  ;;  %v2672_v6 = vrot.slane %v2670_v38, 4 }
 0x1a7   : > { %v10276_v4 = vadd.f32 %v10275_v9, %v10274_v27  ;;  %v10277_v22 = vpop.f32.mrb[54].mxu1  ;;  %v13509_v37 = vadd.f32 %v15994_v53, %v15993_v41  ;;  %v16002_v27 = vld [vmem:[#allocation35_spill] sm:$0xff]  ;;  %v16006_v41 = vld [vmem:[#allocation9_spill] sm:$0xff]  ;;  %v2673_v50 = vrot.slane %v11397_v39, 5  ;;  %v2679_v59 = vrot.slane %v2677_v62, 4 }
 0x1a8   : > { %v10278_v5 = vpop.f32.mrb[55].mxu1  ;;  %v13531_v9 = vadd.f32 %v16002_v27, %v16001_v0  ;;  %v2680_v33 = vrot.slane %v11398_v20, 5  ;;  %v10168_v14 = vpop.f32.mrb[56].mxu0  ;;  %v9481_v39 = vrot.slane %v2540_v1, 9 }
 0x1a9   : > { %v13527_v54 = vadd.f32 %v10276_v4, %v10164_v35  ;;  %v10279_v12 = vadd.f32 %v10278_v5, %v10277_v22  ;;  %v16008_v35 = vld [vmem:[#allocation16_spill] sm:$0xff]  ;;  %v10280_v0 = vpop.f32.mrb[56].mxu1  ;;  %v10169_v51 = vpop.f32.mrb[57].mxu0 }
 0x1aa   : > { %v16009_v22 = vld [vmem:[#allocation40_spill] sm:$0xff]  ;;  %v10281_v27 = vpop.f32.mrb[57].mxu1 }
 0x1ab   : > { %v13547_v4 = vadd.f32 %v10279_v12, %v10167_v49  ;;  %v13551_v5 = vadd.f32 %v13270_v11, %v16009_v22  ;;  %v13567_v49 = vadd.f32 %v13355_v25, %v13347_v2  ;;  %v13571_v11 = vadd.f32 %v13368_v8, %v13359_v18  ;;  %v10283_v48 = vpop.f32.mrb[58].mxu1  ;;  %v16010_v8 = vld [vmem:[#allocation32_spill] sm:$0xff] }
 0x1ac   : > { %11041 = vmatmul.mubr.bf16.gmra.mrb[140].mxu0 %v9619_v7  ;;  %v13525_v7 = vsel %vm11642_vm10, %v2700_v61, %v2701_v24  ;;  %v16007_v24 = vld [vmem:[#allocation6_spill] sm:$0xff]  ;;  %v9480_v12 = vrot.slane %v2539_v55, 9  ;;  %v10282_v19 = vadd.f32 %v10281_v27, %v10280_v0  ;;  %v2671_v2 = vsel %vm11642_vm10, %v9479_v36, %v2670_v38  ;;  %v10284_v55 = vpop.f32.mrb[59].mxu1  ;;  %v2541_v38 = vld [vmem:[#allocation2 + $0xc0] sm:$0xe] }
 0x1ad   : > { %11044 = vmatprep.mubr.bf16.mxu0 %v9620_v32  ;;  %v9627_v28 = vcombine.low %v13505_v23, %v13525_v7  ;;  %v16005_v32 = vld [vmem:[#allocation14_spill] sm:$0xff]  ;;  %v13545_v61 = vadd.f32 %v16008_v35, %v16007_v24  ;;  %v2674_v25 = vsel %vm11642_vm10, %v2672_v6, %v2673_v50  ;;  %v2684_v45 = vrot.slane %v16010_v8, 5  ;;  %v10171_v24 = vpop.f32.mrb[58].mxu0  ;;  %v11247_v23 = vld [vmem:[%s15831_s2 + $0x68] sm:$0xff]  }
 0x1ae   : > { %v13541_v53 = vadd.f32 %v16006_v41, %v16005_v32  ;;  %v2678_v18 = vsel %vm11642_vm10, %v9480_v12, %v2677_v62  ;;  %v2691_v32 = vrot.slane %v13142_v43, 5  ;;  %v10170_v41 = vadd.f32 %v10169_v51, %v10168_v14  ;;  %v10172_v22 = vpop.f32.mrb[59].mxu0  ;;  %v16011_v12 = vld [vmem:[#allocation33_spill] sm:$0xff]  ;;  %v11246_v51 = vld [vmem:[%s15831_s2 + $0x20] sm:$0xff]  }
 0x1af   : > { %v10285_v35 = vadd.f32 %v10284_v55, %v10283_v48  ;;  %v9623_v36 = vcombine.low %v2671_v2, %v2674_v25  ;;  %v10173_v6 = vadd.f32 %v10172_v22, %v10171_v24  ;;  %v2686_v50 = vrot.slane %v2684_v45, 4  ;;  %v10286_v43 = vpop.f32.mrb[60].mxu1 }
 0x1b0   : > { %v2687_v20 = vrot.slane %v16011_v12, 5  ;;  %v9482_v0 = vrot.slane %v2541_v38, 9  ;;  %v2693_v27 = vrot.slane %v2691_v32, 4  ;;  %v10287_v48 = vpop.f32.mrb[61].mxu1  ;;  %v2685_v2 = vsel %vm11642_vm10, %v9481_v39, %v2684_v45 }
 0x1b1   : > { %v10174_v14 = vpop.f32.mrb[60].mxu0  ;;  %v10288_v8 = vadd.f32 %v10287_v48, %v10286_v43 }
 0x1b2   : > { %v2688_v25 = vsel %vm11642_vm10, %v2686_v50, %v2687_v20  ;;  %v2692_v55 = vsel %vm11642_vm10, %v9482_v0, %v2691_v32 }
 0x1b3   : > { %v9625_v38 = vcombine.low %v2685_v2, %v2688_v25 }
 0x1b4   : > { %11045 = vmatmul.mubr.bf16.gmra.mrb[144].mxu0 %v9621_v13  ;;  %v2681_v13 = vsel %vm11642_vm10, %v2679_v59, %v2680_v33  ;;  %v2694_v59 = vrot.slane %v13291_v42, 5  ;;  %v13587_v33 = vadd.f32 %v10285_v35, %v10173_v6  ;;  %v10289_v42 = vpop.f32.mrb[62].mxu1 }
 0x1b5   : > { %11048 = vmatprep.mubr.bf16.mxu0 %v9622_v47  ;;  %v13583_v47 = vadd.f32 %v10282_v19, %v10170_v41  ;;  %v9624_v62 = vcombine.low %v2678_v18, %v2681_v13  ;;  %v11245_v19 = vld [vmem:[%s15831_s2 + $0x60] sm:$0xff]   ;;  %v10175_v18 = vpop.f32.mrb[61].mxu0  ;;  %v10290_v24 = vpop.f32.mrb[63].mxu1 }
 0x1b6   : > { %v2695_v13 = vsel %vm11642_vm10, %v2693_v27, %v2694_v59  ;;  %v10176_v1 = vadd.f32 %v10175_v18, %v10174_v14  ;;  %v10177_v41 = vpop.f32.mrb[62].mxu0  ;;  %10548 = vmatprep.subr.bf16.mxu1 %v11245_v19  ;;  %v10291_v35 = vadd.f32 %v10290_v24, %v10289_v42 }
 0x1b7   : > { %v10178_v45 = vpop.f32.mrb[63].mxu0  ;;  %10549 = vmatpush3.bf16.msra.mxu1 %v11246_v51  ;;  %v9626_v6 = vcombine.low %v2692_v55, %v2695_v13 }
 0x1b8   : > { %v13603_v22 = vadd.f32 %v10288_v8, %v10176_v1  ;;  %10550 = vmatprep.subr.bf16.mxu1 %v11247_v23 }
 0x1b9   : > { %v10308_v39 = vpop.f32.mrb[64].mxu0  ;;  %v10420_v50 = vpop.f32.mrb[64].mxu1 }
 0x1ba   : > { %v10309_v32 = vpop.f32.mrb[65].mxu0  ;;  %v10421_v0 = vpop.f32.mrb[65].mxu1 }
 0x1bb   : > { %v10310_v12 = vadd.f32 %v10309_v32, %v10308_v39  ;;  %v10311_v20 = vpop.f32.mrb[66].mxu0  ;;  %v10422_v59 = vadd.f32 %v10421_v0, %v10420_v50  ;;  %v10423_v43 = vpop.f32.mrb[66].mxu1 }
 0x1bc   : > { %11049 = vmatmul.mubr.bf16.gmra.mrb[148].mxu0 %v9623_v36  ;;  %v10179_v36 = vadd.f32 %v10178_v45, %v10177_v41  ;;  %v10312_v27 = vpop.f32.mrb[67].mxu0  ;;  %v10424_v19 = vpop.f32.mrb[67].mxu1 }
 0x1bd   : > { %11052 = vmatprep.mubr.bf16.mxu0 %v9624_v62  ;;  %v4260_v14 = vadd.f32 %v10310_v12, %v13496_v16  ;;  %v10313_v48 = vadd.f32 %v10312_v27, %v10311_v20  ;;  %v10425_v2 = vadd.f32 %v10424_v19, %v10423_v43 }
 0x1be   : > { %v13605_v62 = vadd.f32 %v10291_v35, %v10179_v36 }
 0x1bf   : > { %v4263_v25 = vadd.f32 %v10313_v48, %v13500_v21  ;;  %v13609_v18 = vadd.f32 %v10422_v59, %v4260_v14 }
 0x1c1   : > { %v10314_v8 = vpop.f32.mrb[68].mxu0  ;;  %v13614_v42 = vadd.f32 %v10425_v2, %v4263_v25 }
 0x1c2   : > { %v10315_v51 = vpop.f32.mrb[69].mxu0 }
 0x1c3   : > { %v10426_v55 = vpop.f32.mrb[68].mxu1  ;;  %v10316_v13 = vadd.f32 %v10315_v51, %v10314_v8  ;;  %v10317_v1 = vpop.f32.mrb[70].mxu0 }
 0x1c4   : > { %11053 = vmatmul.mubr.bf16.gmra.mrb[152].mxu0 %v9625_v38  ;;  %v10427_v41 = vpop.f32.mrb[69].mxu1  ;;  %v10318_v16 = vpop.f32.mrb[71].mxu0 }
 0x1c5   : > { %11056 = vmatprep.mubr.bf16.mxu0 %v9626_v6  ;;  %v10428_v24 = vadd.f32 %v10427_v41, %v10426_v55  ;;  %v10429_v45 = vpop.f32.mrb[70].mxu1  ;;  %v4268_v35 = vadd.f32 %v10316_v13, %v13509_v37  ;;  %v10319_v21 = vadd.f32 %v10318_v16, %v10317_v1 }
 0x1c6   : > { %v10430_v38 = vpop.f32.mrb[71].mxu1 }
 0x1c7   : > { %v10431_v36 = vadd.f32 %v10430_v38, %v10429_v45  ;;  %v4271_v6 = vadd.f32 %v10319_v21, %v13513_v31  ;;  %v13621_v7 = vadd.f32 %v10428_v24, %v4268_v35 }
 0x1c9   : > { %v13623_v39 = vadd.f32 %v10431_v36, %v4271_v6 }
 0x1cc   : > { %11057 = vmatmul.mubr.bf16.gmra.mrb[156].mxu0 %v9627_v28  ;;  %v10320_v28 = vpop.f32.mrb[72].mxu0  ;;  %v10432_v20 = vpop.f32.mrb[72].mxu1 }
 0x1cd   : > { %v10321_v32 = vpop.f32.mrb[73].mxu0  ;;  %v10433_v59 = vpop.f32.mrb[73].mxu1 }
 0x1ce   : > { %v10322_v50 = vadd.f32 %v10321_v32, %v10320_v28  ;;  %v10323_v12 = vpop.f32.mrb[74].mxu0  ;;  %v10434_v31 = vadd.f32 %v10433_v59, %v10432_v20  ;;  %v10435_v43 = vpop.f32.mrb[74].mxu1 }
 0x1cf   : > { %v10324_v37 = vpop.f32.mrb[75].mxu0  ;;  %v10436_v48 = vpop.f32.mrb[75].mxu1 }
 0x1d0   : > { %v4276_v0 = vadd.f32 %v10322_v50, %v13517_v46  ;;  %v10325_v27 = vadd.f32 %v10324_v37, %v10323_v12  ;;  %v10437_v19 = vadd.f32 %v10436_v48, %v10435_v43  ;;  %v11248_v46 = vld [vmem:[%s15831_s2 + $0x28] sm:$0xff]  }
 0x1d1   : > { %10551 = vmatpush3.bf16.msra.mxu1 %v11248_v46 }
 0x1d2   : > { %v4279_v14 = vadd.f32 %v10325_v27, %v13521_v56  ;;  %v13627_v2 = vadd.f32 %v10434_v31, %v4276_v0  ;;  %v10326_v25 = vpop.f32.mrb[76].mxu0 }
 0x1d3   : > { %v10327_v51 = vpop.f32.mrb[77].mxu0 }
 0x1d4   : > { %v13629_v8 = vadd.f32 %v10437_v19, %v4279_v14  ;;  %v10328_v55 = vadd.f32 %v10327_v51, %v10326_v25  ;;  %v10329_v13 = vpop.f32.mrb[78].mxu0 }
 0x1d5   : > { %v10330_v1 = vpop.f32.mrb[79].mxu0 }
 0x1d6   : > { %v4284_v41 = vadd.f32 %v10328_v55, %v13531_v9  ;;  %v10331_v24 = vadd.f32 %v10330_v1, %v10329_v13 }
 0x1d7   : > { %v10438_v16 = vpop.f32.mrb[76].mxu1 }
 0x1d8   : > { %v10439_v56 = vpop.f32.mrb[77].mxu1  ;;  %v4287_v45 = vadd.f32 %v10331_v24, %v13537_v44 }
 0x1d9   : > { %v10440_v35 = vadd.f32 %v10439_v56, %v10438_v16  ;;  %v10441_v21 = vpop.f32.mrb[78].mxu1 }
 0x1da   : > { %v10442_v38 = vpop.f32.mrb[79].mxu1 }
 0x1db   : > { %v10443_v36 = vadd.f32 %v10442_v38, %v10441_v21  ;;  %v13636_v6 = vadd.f32 %v10440_v35, %v4284_v41  ;;  %v11249_v21 = vld [vmem:[%s15831_s2 + $0xc0] sm:$0xff]  }
 0x1dc   : > { %v10332_v23 = vpop.f32.mrb[80].mxu0  ;;  %10652 = vmatprep.subr.bf16.mxu0 %v11249_v21 }
 0x1dd   : > { %v13638_v28 = vadd.f32 %v10443_v36, %v4287_v45  ;;  %v10333_v32 = vpop.f32.mrb[81].mxu0  ;;  %v11250_v36 = vld [vmem:[%s15831_s2 + $0x70] sm:$0xff]  }
 0x1de   : > { %v10334_v50 = vadd.f32 %v10333_v32, %v10332_v23  ;;  %v10335_v12 = vpop.f32.mrb[82].mxu0  ;;  %10552 = vmatprep.subr.bf16.mxu1 %v11250_v36 }
 0x1df   : > { %v10336_v20 = vpop.f32.mrb[83].mxu0 }
 0x1e0   : > { %v4292_v9 = vadd.f32 %v10334_v50, %v13541_v53  ;;  %v10337_v0 = vadd.f32 %v10336_v20, %v10335_v12  ;;  %v11253_v12 = vld [vmem:[%s15831_s2 + $0xc8] sm:$0xff]  }
 0x1e1   : > { %v10444_v37 = vpop.f32.mrb[80].mxu1  ;;  %v11254_v20 = vld [vmem:[%s15831_s2 + $0x88] sm:$0xff]  }
 0x1e2   : > { %v10445_v27 = vpop.f32.mrb[81].mxu1  ;;  %v4295_v44 = vadd.f32 %v10337_v0, %v13545_v61 }
 0x1e3   : > { %v10446_v59 = vadd.f32 %v10445_v27, %v10444_v37  ;;  %v10447_v31 = vpop.f32.mrb[82].mxu1 }
 0x1e4   : > { %v10448_v43 = vpop.f32.mrb[83].mxu1 }
 0x1e5   : > { %v10449_v14 = vadd.f32 %v10448_v43, %v10447_v31  ;;  %v13642_v48 = vadd.f32 %v10446_v59, %v4292_v9 }
 0x1e7   : > { %v10338_v19 = vpop.f32.mrb[84].mxu0  ;;  %v13644_v25 = vadd.f32 %v10449_v14, %v4295_v44 }
 0x1e8   : > { %v10339_v51 = vpop.f32.mrb[85].mxu0 }
 0x1e9   : > { %v10340_v55 = vadd.f32 %v10339_v51, %v10338_v19  ;;  %v10341_v13 = vpop.f32.mrb[86].mxu0  ;;  %v11255_v51 = vld [vmem:[%s15831_s2 + $0xd0] sm:$0xff]  }
 0x1ea   : > { %v10342_v1 = vpop.f32.mrb[87].mxu0 }
 0x1eb   : > { %v4300_v53 = vadd.f32 %v10340_v55, %v13551_v5  ;;  %v10343_v41 = vadd.f32 %v10342_v1, %v10341_v13  ;;  %v11251_v5 = vld [vmem:[%s15831_s2 + $0x80] sm:$0xff]   ;;  %v11256_v13 = vld [vmem:[%s15831_s2 + $0x90] sm:$0xff]  }
 0x1ec   : > { %v10450_v46 = vpop.f32.mrb[84].mxu1  ;;  %10653 = vmatpush3.bf16.msra.mxu0 %v11251_v5 }
 0x1ed   : > { %v10451_v16 = vpop.f32.mrb[85].mxu1  ;;  %v4303_v61 = vadd.f32 %v10343_v41, %v13555_v26  ;;  %v11252_v26 = vld [vmem:[%s15831_s2 + $0x30] sm:$0xff]   ;;  %10654 = vmatprep.subr.bf16.mxu0 %v11253_v12 }
 0x1ee   : > { %v10452_v24 = vadd.f32 %v10451_v16, %v10450_v46  ;;  %v10453_v56 = vpop.f32.mrb[86].mxu1  ;;  %10553 = vmatpush3.bf16.msra.mxu1 %v11252_v26 }
 0x1ef   : > { %v10454_v45 = vpop.f32.mrb[87].mxu1 }
 0x1f0   : > { %v10455_v35 = vadd.f32 %v10454_v45, %v10453_v56  ;;  %v13651_v38 = vadd.f32 %v10452_v24, %v4300_v53  ;;  %10655 = vmatpush3.bf16.msra.mxu0 %v11254_v20  ;;  %v11258_v20 = vld [vmem:[%s15831_s2 + $0x98] sm:$0xff]  }
 0x1f1   : > { %v10344_v23 = vpop.f32.mrb[88].mxu0  ;;  %10656 = vmatprep.subr.bf16.mxu0 %v11255_v51 }
 0x1f2   : > { %v13662_v32 = vadd.f32 %v10455_v35, %v4303_v61  ;;  %v10345_v50 = vpop.f32.mrb[89].mxu0 }
 0x1f3   : > { %v10346_v9 = vadd.f32 %v10345_v50, %v10344_v23  ;;  %v10347_v37 = vpop.f32.mrb[90].mxu0  ;;  %v11257_v50 = vld [vmem:[%s15831_s2 + $0xd8] sm:$0xff]  }
 0x1f4   : > { %v10348_v0 = vpop.f32.mrb[91].mxu0  ;;  %10657 = vmatpush3.bf16.msra.mxu0 %v11256_v13 }
 0x1f5   : > { %v4308_v27 = vadd.f32 %v10346_v9, %v13559_v40  ;;  %v10349_v59 = vadd.f32 %v10348_v0, %v10347_v37  ;;  %10658 = vmatprep.subr.bf16.mxu0 %v11257_v50 }
 0x1f6   : > { %v10456_v44 = vpop.f32.mrb[88].mxu1 }
 0x1f7   : > { %v10457_v31 = vpop.f32.mrb[89].mxu1  ;;  %v4311_v43 = vadd.f32 %v10349_v59, %v13563_v17 }
 0x1f8   : > { %v10458_v14 = vadd.f32 %v10457_v31, %v10456_v44  ;;  %v10459_v19 = vpop.f32.mrb[90].mxu1  ;;  %10659 = vmatpush3.bf16.msra.mxu0 %v11258_v20 }
 0x1f9   : > { %v10460_v55 = vpop.f32.mrb[91].mxu1 }
 0x1fa   : > { %v10461_v1 = vadd.f32 %v10460_v55, %v10459_v19  ;;  %v13678_v40 = vadd.f32 %v10458_v14, %v4308_v27  ;;  %v11261_v27 = vld [vmem:[%s15831_s2 + $0xa0] sm:$0xff]   ;;  %v11262_v55 = vld [vmem:[%s15831_s2 + $0x38] sm:$0xff]  }
 0x1fc   : > { %v10350_v53 = vpop.f32.mrb[92].mxu0  ;;  %v13680_v46 = vadd.f32 %v10461_v1, %v4311_v43 }
 0x1fd   : > { %v10351_v17 = vpop.f32.mrb[93].mxu0 }
 0x1fe   : > { %v10352_v41 = vadd.f32 %v10351_v17, %v10350_v53  ;;  %v10353_v16 = vpop.f32.mrb[94].mxu0  ;;  %v11263_v17 = vld [vmem:[%s15831_s2 + $0xe8] sm:$0xff]  }
 0x1ff   : > { %v10354_v61 = vpop.f32.mrb[95].mxu0 }
 0x200   : > { %v4316_v24 = vadd.f32 %v10352_v41, %v13567_v49  ;;  %v10355_v45 = vadd.f32 %v10354_v61, %v10353_v16  ;;  %v11259_v49 = vld [vmem:[%s15831_s2 + $0xe0] sm:$0xff]  }
 0x201   : > { %v10462_v56 = vpop.f32.mrb[92].mxu1  ;;  %10660 = vmatprep.subr.bf16.mxu0 %v11259_v49 }
 0x202   : > { %v10463_v35 = vpop.f32.mrb[93].mxu1  ;;  %v4319_v21 = vadd.f32 %v10355_v45, %v13571_v11  ;;  %v11260_v11 = vld [vmem:[%s15831_s2 + $0x78] sm:$0xff]   ;;  %10661 = vmatpush3.bf16.msra.mxu0 %v11261_v27 }
 0x203   : > { %v10464_v36 = vadd.f32 %v10463_v35, %v10462_v56  ;;  %v10465_v5 = vpop.f32.mrb[94].mxu1  ;;  %10554 = vmatprep.subr.bf16.mxu1 %v11260_v11  ;;  %10662 = vmatprep.subr.bf16.mxu0 %v11263_v17  ;;  %v11266_v35 = vld [vmem:[%s15831_s2 + $0xb0] sm:$0xff]  }
 0x204   : > { %v10466_v23 = vpop.f32.mrb[95].mxu1  ;;  %10555 = vmatpush3.bf16.msra.mxu1 %v11262_v55 }
 0x205   : > { %v10467_v26 = vadd.f32 %v10466_v23, %v10465_v5  ;;  %v13687_v12 = vadd.f32 %v10464_v36, %v4316_v24 }
 0x206   : > { %v10356_v9 = vpop.f32.mrb[96].mxu0 }
 0x207   : > { %v13698_v37 = vadd.f32 %v10467_v26, %v4319_v21  ;;  %v10357_v0 = vpop.f32.mrb[97].mxu0 }
 0x208   : > { %v10358_v44 = vadd.f32 %v10357_v0, %v10356_v9  ;;  %v10359_v59 = vpop.f32.mrb[98].mxu0 }
 0x209   : > { %v10360_v31 = vpop.f32.mrb[99].mxu0 }
 0x20a   : > { %v4324_v43 = vadd.f32 %v10358_v44, %v13390_v60  ;;  %v10361_v19 = vadd.f32 %v10360_v31, %v10359_v59  ;;  %v11264_v60 = vld [vmem:[%s15831_s2 + $0xa8] sm:$0xff]   ;;  %v11267_v59 = vld [vmem:[%s15831_s2 + $0xf8] sm:$0xff]  }
 0x20b   : > { %v10468_v14 = vpop.f32.mrb[96].mxu1  ;;  %10663 = vmatpush3.bf16.msra.mxu0 %v11264_v60  ;;  %v11268_v31 = vld [vmem:[%s15831_s2 + $0xb8] sm:$0xff]  }
 0x20c   : > { %v10469_v51 = vpop.f32.mrb[97].mxu1  ;;  %v4327_v13 = vadd.f32 %v10361_v19, %v13404_v3  ;;  %v11265_v3 = vld [vmem:[%s15831_s2 + $0xf0] sm:$0xff]  }
 0x20d   : > { %v10470_v1 = vadd.f32 %v10469_v51, %v10468_v14  ;;  %v10471_v53 = vpop.f32.mrb[98].mxu1  ;;  %10664 = vmatprep.subr.bf16.mxu0 %v11265_v3  ;;  %v5342_v14 = vld [vmem:[#allocation2 + $0x4] sm:$0xf]  ;;  %v5373_v51 = vld [vmem:[#allocation2 + $0x8] sm:$0x1] }
 0x20e   : > { %v10472_v41 = vpop.f32.mrb[99].mxu1  ;;  %v5403_v60 = vshrl.u32 %v5342_v14, 16 }
 0x20f   : > { %v10473_v16 = vadd.f32 %v10472_v41, %v10471_v53  ;;  %v13714_v61 = vadd.f32 %v10470_v1, %v4324_v43  ;;  %10665 = vmatpush3.bf16.msra.mxu0 %v11266_v35  ;;  %v5341_v43 = vld [vmem:[#allocation2] sm:$0xf]  ;;  %v5399_v1 = vshll.u32 %v5342_v14, 16  ;;  %v5409_v41 = vshll.u32 %v5373_v51, 16 }
 0x210   : > { %10666 = vmatprep.subr.bf16.mxu0 %v11267_v59  ;;  %v5390_v55 = vshrl.u32 %v5341_v43, 16  ;;  %v5842_v59 = vrot.slane %v5373_v51, 5 }
 0x211   : > { %v10362_v24 = vpop.f32.mrb[100].mxu0  ;;  %v13719_v56 = vadd.f32 %v10473_v16, %v4327_v13  ;;  %v5393_v13 = vshll.u32 %v5341_v43, 16 }
 0x212   : > { %v10363_v45 = vpop.f32.mrb[101].mxu0 }
 0x213   : > { %v10364_v21 = vadd.f32 %v10363_v45, %v10362_v24  ;;  %v10365_v36 = vpop.f32.mrb[102].mxu0  ;;  %10667 = vmatpush3.bf16.msra.mxu0 %v11268_v31  ;;  %v5392_v24 = vrot.slane %v5390_v55, 4  ;;  %v5395_v3 = vrot.slane %v5393_v13, 5  ;;  %v5401_v45 = vrot.slane %v5399_v1, 5 }
 0x214   : > { %v10366_v5 = vpop.f32.mrb[103].mxu0  ;;  %v5839_v55 = vrot.slane %v5342_v14, 5 }
 0x215   : > { %v4332_v23 = vadd.f32 %v10364_v21, %v13418_v10  ;;  %v10367_v50 = vadd.f32 %v10366_v5, %v10365_v36  ;;  %v5405_v5 = vrot.slane %v5403_v60, 4 }
 0x216   : > { %v10474_v26 = vpop.f32.mrb[100].mxu1  ;;  %v5841_v51 = vrot.slane %v5839_v55, 4 }
 0x217   : > { %v10475_v20 = vpop.f32.mrb[101].mxu1  ;;  %v4335_v49 = vadd.f32 %v10367_v50, %v13420_v15 }
 0x218   : > { %v10476_v9 = vadd.f32 %v10475_v20, %v10474_v26  ;;  %v10477_v11 = vpop.f32.mrb[102].mxu1  ;;  %v5396_v26 = vor.u32 %v5395_v3, %v5392_v24 }
 0x219   : > { %v10478_v0 = vpop.f32.mrb[103].mxu1 }
 0x21a   : > { %v10479_v27 = vadd.f32 %v10478_v0, %v10477_v11  ;;  %v13726_v44 = vadd.f32 %v10476_v9, %v4332_v23  ;;  %v5406_v9 = vor.u32 %v5405_v5, %v5401_v45  ;;  %v5411_v11 = vrot.slane %v5409_v41, 5 }
 0x21b   : > { %v10368_v10 = vpop.f32.mrb[104].mxu0  ;;  %v9782_v41 = vcombine.low %v5341_v43, %v5342_v14 }
 0x21c   : > { %v13734_v19 = vadd.f32 %v10479_v27, %v4335_v49  ;;  %v10369_v15 = vpop.f32.mrb[105].mxu0  ;;  %v5397_v27 = vrot.slane %v5396_v26, 4 }
 0x21d   : > { %v10370_v53 = vadd.f32 %v10369_v15, %v10368_v10  ;;  %v10371_v17 = vpop.f32.mrb[106].mxu0  ;;  %v5407_v10 = vrot.slane %v5406_v9, 4  ;;  %v5773_v15 = vld [vmem:[#allocation2] sm:$0xe] }
 0x21e   : > { %v10372_v16 = vpop.f32.mrb[107].mxu0  ;;  %v5402_v1 = vsel %vm11648_vm11, %v5397_v27, %v5401_v45 }
 0x21f   : > { %v4340_v35 = vadd.f32 %v10370_v53, %v13442_v30  ;;  %v10373_v36 = vadd.f32 %v10372_v16, %v10371_v17  ;;  %v9734_v53 = vrot.slane %v5773_v15, 9  ;;  %v5412_v60 = vsel %vm11648_vm11, %v5407_v10, %v5411_v11 }
 0x220   : > { %v10480_v21 = vpop.f32.mrb[104].mxu1  ;;  %v9798_v3 = vcombine.low %v5402_v1, %v5412_v60 }
 0x221   : > { %v10481_v23 = vpop.f32.mrb[105].mxu1  ;;  %v4343_v50 = vadd.f32 %v10373_v36, %v13446_v29  ;;  %v11272_v29 = vld [vmem:[%s15831_s2 + $0x140] sm:$0xff]   ;;  %v13755_v36 = vsel %vm11642_vm10, %v5841_v51, %v5842_v59 }
 0x222   : > { %v10482_v20 = vadd.f32 %v10481_v23, %v10480_v21  ;;  %v10483_v49 = vpop.f32.mrb[106].mxu1  ;;  %10764 = vmatprep.subr.bf16.mxu1 %v11272_v29  ;;  %8397 = vmatprep.mubr.bf16.mxu1 %v9798_v3 }
 0x223   : > { %v10484_v0 = vpop.f32.mrb[107].mxu1  ;;  %8398 = vmatmul.mubr.bf16.vlgmr.msra.gmra.mrb[128].mxu1 %v9782_v41 }
 0x224   : > { %v10485_v31 = vadd.f32 %v10484_v0, %v10483_v49  ;;  %v13738_v13 = vadd.f32 %v10482_v20, %v4340_v35  ;;  %v13751_v35 = vsel %vm11642_vm10, %v9734_v53, %v5839_v55 }
 0x225   : > { %v9814_v43 = vcombine.low %v13751_v35, %v13755_v36 }
 0x226   : > { %v10374_v17 = vpop.f32.mrb[108].mxu0  ;;  %v13747_v16 = vadd.f32 %v10485_v31, %v4343_v50  ;;  %v11273_v50 = vld [vmem:[%s15831_s2 + $0x100] sm:$0xff]  }
 0x227   : > { %v10375_v24 = vpop.f32.mrb[109].mxu0  ;;  %10765 = vmatpush3.bf16.msra.mxu1 %v11273_v50 }
 0x228   : > { %v10376_v45 = vadd.f32 %v10375_v24, %v10374_v17  ;;  %v10377_v21 = vpop.f32.mrb[110].mxu0 }
 0x229   : > { %v10378_v5 = vpop.f32.mrb[111].mxu0 }
 0x22a   : > { %v4348_v14 = vadd.f32 %v10376_v45, %v13453_v58  ;;  %v10379_v23 = vadd.f32 %v10378_v5, %v10377_v21 }
 0x22b   : > { %v10486_v26 = vpop.f32.mrb[108].mxu1 }
 0x22c   : > { %v4351_v20 = vadd.f32 %v10379_v23, %v13455_v52  ;;  %v10487_v49 = vpop.f32.mrb[109].mxu1 }
 0x22d   : > { %v10488_v9 = vadd.f32 %v10487_v49, %v10486_v26  ;;  %v10489_v11 = vpop.f32.mrb[110].mxu1 }
 0x22e   : > { %v10490_v0 = vpop.f32.mrb[111].mxu1 }
 0x22f   : > { %v10491_v27 = vadd.f32 %v10490_v0, %v10489_v11  ;;  %v13764_v59 = vadd.f32 %v10488_v9, %v4348_v14 }
 0x231   : > { %v13766_v10 = vadd.f32 %v10491_v27, %v4351_v20 }
 0x232   : > { %v10380_v31 = vpop.f32.mrb[112].mxu0 }
 0x233   : > { %v10381_v58 = vpop.f32.mrb[113].mxu0 }
 0x234   : > { %v10382_v15 = vadd.f32 %v10381_v58, %v10380_v31  ;;  %v10383_v55 = vpop.f32.mrb[114].mxu0 }
 0x235   : > { %v10384_v1 = vpop.f32.mrb[115].mxu0 }
 0x236   : > { %v4356_v53 = vadd.f32 %v10382_v15, %v13476_v63  ;;  %v10385_v29 = vadd.f32 %v10384_v1, %v10383_v55 }
 0x237   : > { %v10492_v17 = vpop.f32.mrb[112].mxu1 }
 0x238   : > { %v4359_v52 = vadd.f32 %v10385_v29, %v13488_v34  ;;  %v10493_v60 = vpop.f32.mrb[113].mxu1 }
 0x239   : > { %v10494_v41 = vadd.f32 %v10493_v60, %v10492_v17  ;;  %v10495_v51 = vpop.f32.mrb[114].mxu1 }
 0x23a   : > { %v10496_v24 = vpop.f32.mrb[115].mxu1 }
 0x23b   : > { %v10497_v3 = vadd.f32 %v10496_v24, %v10495_v51  ;;  %v13770_v45 = vadd.f32 %v10494_v41, %v4356_v53  ;;  %v11279_v41 = vld [vmem:[%s15831_s2 + $0x108] sm:$0xff]  }
 0x23d   : > { %v13772_v5 = vadd.f32 %v10497_v3, %v4359_v52 }
 0x23e   : > { %v10386_v21 = vpop.f32.mrb[116].mxu0 }
 0x23f   : > { %v10387_v14 = vpop.f32.mrb[117].mxu0 }
 0x240   : > { %v10388_v23 = vadd.f32 %v10387_v14, %v10386_v21  ;;  %v10389_v26 = vpop.f32.mrb[118].mxu0 }
 0x241   : > { %v10390_v50 = vpop.f32.mrb[119].mxu0 }
 0x242   : > { %v4364_v63 = vadd.f32 %v10388_v23, %v13527_v54  ;;  %v10391_v20 = vadd.f32 %v10390_v50, %v10389_v26 }
 0x243   : > { %v10498_v49 = vpop.f32.mrb[116].mxu1 }
 0x244   : > { %v4367_v34 = vadd.f32 %v10391_v20, %v13547_v4  ;;  %v10499_v9 = vpop.f32.mrb[117].mxu1  ;;  %v11278_v4 = vld [vmem:[%s15831_s2 + $0x148] sm:$0xff]  }
 0x245   : > { %v10500_v11 = vadd.f32 %v10499_v9, %v10498_v49  ;;  %v10501_v0 = vpop.f32.mrb[118].mxu1  ;;  %10766 = vmatprep.subr.bf16.mxu1 %v11278_v4 }
 0x246   : > { %v10502_v27 = vpop.f32.mrb[119].mxu1  ;;  %10767 = vmatpush3.bf16.msra.mxu1 %v11279_v41 }
 0x247   : > { %v10503_v31 = vadd.f32 %v10502_v27, %v10501_v0  ;;  %v13776_v58 = vadd.f32 %v10500_v11, %v4364_v63  ;;  %v13797_v27 = vld [vmem:[%s15832_s3] ss:$0 sm:$0xff] }
 0x249   : > { %v10392_v15 = vpop.f32.mrb[120].mxu0  ;;  %v13778_v55 = vadd.f32 %v10503_v31, %v4367_v34 }
 0x24a   : > { %v10393_v1 = vpop.f32.mrb[121].mxu0 }
 0x24b   : > { %v10394_v53 = vadd.f32 %v10393_v1, %v10392_v15  ;;  %v10395_v29 = vpop.f32.mrb[122].mxu0 }
 0x24c   : > { %v10396_v17 = vpop.f32.mrb[123].mxu0 }
 0x24d   : > { %v4372_v54 = vadd.f32 %v10394_v53, %v13583_v47  ;;  %v10397_v52 = vadd.f32 %v10396_v17, %v10395_v29 }
 0x24f   : > { %v4375_v60 = vadd.f32 %v10397_v52, %v13587_v33 }
 0x25f   : > { %v10398_v51 = vpop.f32.mrb[124].mxu0  ;;  %v10504_v24 = vpop.f32.mrb[120].mxu1 }
 0x260   : > { %v10399_v3 = vpop.f32.mrb[125].mxu0  ;;  %v10505_v21 = vpop.f32.mrb[121].mxu1 }
 0x261   : > { %v10400_v14 = vadd.f32 %v10399_v3, %v10398_v51  ;;  %v10401_v23 = vpop.f32.mrb[126].mxu0  ;;  %v10506_v47 = vadd.f32 %v10505_v21, %v10504_v24  ;;  %v10507_v26 = vpop.f32.mrb[122].mxu1 }
 0x262   : > { %v10402_v50 = vpop.f32.mrb[127].mxu0  ;;  %v10508_v33 = vpop.f32.mrb[123].mxu1 }
 0x263   : > { %v4380_v63 = vadd.f32 %v10400_v14, %v13603_v22  ;;  %v10403_v20 = vadd.f32 %v10402_v50, %v10401_v23  ;;  %v10509_v49 = vadd.f32 %v10508_v33, %v10507_v26  ;;  %v13789_v34 = vadd.f32 %v10506_v47, %v4372_v54  ;;  %v13803_v22 = vld [vmem:[%s15832_s3 + $0x1] ss:$0 sm:$0xff] }
 0x265   : > { %v4383_v9 = vadd.f32 %v10403_v20, %v13605_v62  ;;  %v13792_v11 = vadd.f32 %v10509_v49, %v4375_v60 }
 0x267   : > { %v11030_v0 = vpop.f32.mrb[128].mxu0  ;;  %v10510_v31 = vpop.f32.mrb[124].mxu1 }
 0x268   : > { %v4590_v15 = vadd.f32 %v11030_v0, %v13621_v7  ;;  %v4581_v1 = vpop.f32.mrb[129].mxu0  ;;  %v10511_v53 = vpop.f32.mrb[125].mxu1 }
 0x269   : > { %v4582_v62 = vadd.f32 %v4581_v1, %v13609_v18  ;;  %v11031_v29 = vpop.f32.mrb[130].mxu0  ;;  %v10512_v17 = vadd.f32 %v10511_v53, %v10510_v31  ;;  %v10513_v54 = vpop.f32.mrb[126].mxu1 }
 0x26a   : > { %v4715_v52 = vmul.f32 %v13797_v27, %v4590_v15  ;;  %v4593_v60 = vadd.f32 %v11031_v29, %v13623_v39  ;;  %v4584_v4 = vpop.f32.mrb[131].mxu0  ;;  %v10514_v41 = vpop.f32.mrb[127].mxu1 }
 0x26b   : > { %v4713_v7 = vmul.f32 %v13797_v27, %v4582_v62  ;;  %v4585_v51 = vadd.f32 %v4584_v4, %v13614_v42  ;;  %v10515_v24 = vadd.f32 %v10514_v41, %v10513_v54  ;;  %v13812_v14 = vadd.f32 %v10512_v17, %v4380_v63 }
 0x26c   : > { %v4752_v3 = vadd.f32 %v13803_v22, %v4715_v52  ;;  %v4716_v21 = vmul.f32 %v13797_v27, %v4593_v60  ;;  %v11284_v52 = vld [vmem:[%s15831_s2 + $0x150] sm:$0xff]  }
 0x26d   : > { %v4750_v18 = vadd.f32 %v13803_v22, %v4713_v7  ;;  %v4714_v23 = vmul.f32 %v13797_v27, %v4585_v51  ;;  %v13817_v26 = vadd.f32 %v10515_v24, %v4383_v9  ;;  %10768 = vmatprep.subr.bf16.mxu1 %v11284_v52 }
 0x26e   : > { %v4784_v47 = vmax.f32 %v4752_v3, 0.0  ;;  %v4753_v39 = vadd.f32 %v13803_v22, %v4716_v21  ;;  %v5236_v3 = vld [vmem:[#allocation2 + $0x18] sm:$0xf] }
 0x26f   : > { %v4782_v50 = vmax.f32 %v4750_v18, 0.0  ;;  %v4751_v33 = vadd.f32 %v13803_v22, %v4714_v23  ;;  %v11034_v42 = vpop.f32.mrb[132].mxu0 }
 0x270   : > { %v10038_v20 = vpack.c.bf16 %v4784_v47, %v4784_v47  ;;  %v4785_v49 = vmax.f32 %v4753_v39, 0.0  ;;  %v4606_v0 = vadd.f32 %v11034_v42, %v13636_v6  ;;  %v4597_v31 = vpop.f32.mrb[133].mxu0  ;;  %v11285_v39 = vld [vmem:[%s15831_s2 + $0x110] sm:$0xff]  }
 0x271   : > { %v10036_v63 = vpack.c.bf16 %v4782_v50, %v4782_v50  ;;  %v4783_v15 = vmax.f32 %v4751_v33, 0.0  ;;  %v4598_v1 = vadd.f32 %v4597_v31, %v13627_v2  ;;  %v11035_v53 = vpop.f32.mrb[134].mxu0  ;;  %v5240_v31 = vld [vmem:[#allocation2 + $0x20] sm:$0x1]  ;;  %10769 = vmatpush3.bf16.msra.mxu1 %v11285_v39 }
 0x272   : > { %v4928_v62 = vshrl.u32 %v10038_v20, 16  ;;  %v4931_v29 = vshll.u32 %v10038_v20, 16  ;;  %v10039_v17 = vpack.c.bf16 %v4785_v49, %v4785_v49  ;;  %v4719_v9 = vmul.f32 %v13797_v27, %v4606_v0  ;;  %v4600_v54 = vpop.f32.mrb[135].mxu0 }
 0x273   : > { %v4911_v60 = vshrl.u32 %v10036_v63, 16  ;;  %v4914_v4 = vshll.u32 %v10036_v63, 16  ;;  %v10037_v41 = vpack.c.bf16 %v4783_v15, %v4783_v15  ;;  %v4717_v6 = vmul.f32 %v13797_v27, %v4598_v1 }
 0x274   : > { %v4930_v7 = vrot.slane %v4928_v62, 7  ;;  %v4936_v51 = vshrl.u32 %v10039_v17, 16  ;;  %v4939_v24 = vshll.u32 %v10039_v17, 16  ;;  %v4756_v2 = vadd.f32 %v13803_v22, %v4719_v9 }
 0x275   : > { %v4913_v21 = vrot.slane %v4911_v60, 7  ;;  %v4919_v18 = vshrl.u32 %v10037_v41, 16  ;;  %v4922_v23 = vshll.u32 %v10037_v41, 16  ;;  %v4754_v47 = vadd.f32 %v13803_v22, %v4717_v6  ;;  %v5233_v60 = vld [vmem:[#allocation2 + $0x14] sm:$0x1] }
 0x276   : > { %v4933_v50 = vor.u32 %v4931_v29, %v4930_v7  ;;  %v4934_v33 = vrot.slane %v4930_v7, 4  ;;  %v4938_v42 = vrot.slane %v4936_v51, 7  ;;  %v4788_v20 = vmax.f32 %v4756_v2, 0.0  ;;  %v11399_v29 = vld [vmem:[#allocation2 + $0xc] sm:$0xf] }
 0x277   : > { %v4916_v49 = vor.u32 %v4914_v4, %v4913_v21  ;;  %v4917_v0 = vrot.slane %v4913_v21, 4  ;;  %v4921_v63 = vrot.slane %v4919_v18, 7  ;;  %v4786_v15 = vmax.f32 %v4754_v47, 0.0  ;;  %v11038_v1 = vpop.f32.mrb[136].mxu0 }
 0x278   : > { %v5237_v17 = vsel %vm11683_vm14, %v4933_v50, %v5236_v3  ;;  %v4941_v9 = vor.u32 %v4939_v24, %v4938_v42  ;;  %v4943_v52 = vrot.slane %v4938_v42, 4  ;;  %v10042_v41 = vpack.c.bf16 %v4788_v20, %v4788_v20  ;;  %v4613_v6 = vpop.f32.mrb[137].mxu0 }
 0x279   : > { %5238 = vst [vmem:[#allocation2 + $0x18] sm:$0xf] %v5237_v17  ;;  %v5230_v7 = vsel %vm11683_vm14, %v4916_v49, %v11399_v29  ;;  %v4924_v4 = vor.u32 %v4922_v23, %v4921_v63  ;;  %v4926_v51 = vrot.slane %v4921_v63, 4  ;;  %v10040_v2 = vpack.c.bf16 %v4786_v15, %v4786_v15  ;;  %v11039_v21 = vpop.f32.mrb[138].mxu0 }
 0x27a   : > { %5231 = vst [vmem:[#allocation2 + $0xc] sm:$0xf] %v5230_v7  ;;  %v4942_v47 = vsel %vm11653_vm12, %v4934_v33, %v4941_v9  ;;  %v5241_v24 = vsel %vm11631_vm7, %v4943_v52, %v5240_v31  ;;  %v4962_v3 = vshrl.u32 %v10042_v41, 16  ;;  %v4965_v50 = vshll.u32 %v10042_v41, 16  ;;  %v4616_v42 = vpop.f32.mrb[139].mxu0 }
 0x27b   : > { %5239 = vst [vmem:[#allocation2 + $0x1c] sm:$0xf] %v4942_v47  ;;  %5242 = vst [vmem:[#allocation2 + $0x20] sm:$0x1] %v5241_v24  ;;  %v4925_v20 = vsel %vm11653_vm12, %v4917_v0, %v4924_v4  ;;  %v5234_v23 = vsel %vm11631_vm7, %v4926_v51, %v5233_v60  ;;  %v4945_v49 = vshrl.u32 %v10040_v2, 16  ;;  %v4948_v63 = vshll.u32 %v10040_v2, 16 }
 0x27c   : > { %5232 = vst [vmem:[#allocation2 + $0x10] sm:$0xf] %v4925_v20  ;;  %5235 = vst [vmem:[#allocation2 + $0x14] sm:$0x1] %v5234_v23  ;;  %v13844_v15 = vrot.slane %v4962_v3, 7  ;;  %v4609_v33 = vadd.f32 %v11035_v53, %v13638_v28  ;;  %v4601_v31 = vadd.f32 %v4600_v54, %v13629_v8  ;;  %v4622_v17 = vadd.f32 %v11038_v1, %v13651_v38 }
 0x27d   : > { %v5250_v9 = vld [vmem:[#allocation2 + $0x30] sm:$0xf]  ;;  %v13849_v52 = vrot.slane %v4945_v49, 7  ;;  %v4614_v0 = vadd.f32 %v4613_v6, %v13642_v48  ;;  %v4625_v41 = vadd.f32 %v11039_v21, %v13662_v32  ;;  %v4617_v60 = vadd.f32 %v4616_v42, %v13644_v25  ;;  %v5243_v4 = vld [vmem:[#allocation2 + $0x24] sm:$0xf]  ;;  %v11290_v42 = vld [vmem:[%s15831_s2 + $0x158] sm:$0xff]  }
 0x27e   : > { %v4967_v29 = vor.u32 %v4965_v50, %v13844_v15  ;;  %v4968_v7 = vrot.slane %v13844_v15, 4  ;;  %v4720_v28 = vmul.f32 %v13797_v27, %v4609_v33  ;;  %v4718_v8 = vmul.f32 %v13797_v27, %v4601_v31  ;;  %10770 = vmatprep.subr.bf16.mxu1 %v11290_v42  ;;  %v5247_v42 = vld [vmem:[#allocation2 + $0x2c] sm:$0x1] }
 0x27f   : > { %v4950_v38 = vor.u32 %v4948_v63, %v13849_v52  ;;  %v4951_v53 = vrot.slane %v13849_v52, 4  ;;  %v4723_v54 = vmul.f32 %v13797_v27, %v4622_v17  ;;  %v4721_v48 = vmul.f32 %v13797_v27, %v4614_v0  ;;  %v11042_v32 = vpop.f32.mrb[140].mxu0 }
 0x280   : > { %v5251_v25 = vsel %vm11683_vm14, %v4967_v29, %v5250_v9  ;;  %v4757_v1 = vadd.f32 %v13803_v22, %v4720_v28  ;;  %v4755_v6 = vadd.f32 %v13803_v22, %v4718_v8  ;;  %v4724_v51 = vmul.f32 %v13797_v27, %v4625_v41  ;;  %v4629_v2 = vpop.f32.mrb[141].mxu0 }
 0x281   : > { %5252 = vst [vmem:[#allocation2 + $0x30] sm:$0xf] %v5251_v25  ;;  %v5244_v21 = vsel %vm11683_vm14, %v4950_v38, %v5243_v4  ;;  %v4760_v47 = vadd.f32 %v13803_v22, %v4723_v54  ;;  %v4758_v24 = vadd.f32 %v13803_v22, %v4721_v48  ;;  %v4722_v3 = vmul.f32 %v13797_v27, %v4617_v60  ;;  %v13872_v50 = vpop.f32.mrb[142].mxu0 }
 0x282   : > { %5245 = vst [vmem:[#allocation2 + $0x24] sm:$0xf] %v5244_v21  ;;  %v4789_v20 = vmax.f32 %v4757_v1, 0.0  ;;  %v4787_v23 = vmax.f32 %v4755_v6, 0.0  ;;  %v4761_v49 = vadd.f32 %v13803_v22, %v4724_v51  ;;  %v4638_v63 = vadd.f32 %v11042_v32, %v13687_v12  ;;  %v13879_v33 = vpop.f32.mrb[143].mxu0 }
 0x283   : > { %v4792_v31 = vmax.f32 %v4760_v47, 0.0  ;;  %v4790_v17 = vmax.f32 %v4758_v24, 0.0  ;;  %v4759_v9 = vadd.f32 %v13803_v22, %v4722_v3  ;;  %v4630_v0 = vadd.f32 %v4629_v2, %v13678_v40  ;;  %v5254_v1 = vld [vmem:[#allocation2 + $0x38] sm:$0x1] }
 0x284   : > { %v10043_v41 = vpack.c.bf16 %v4789_v20, %v4789_v20  ;;  %v10041_v60 = vpack.c.bf16 %v4787_v23, %v4787_v23  ;;  %v4793_v29 = vmax.f32 %v4761_v49, 0.0  ;;  %v4727_v4 = vmul.f32 %v13797_v27, %v4638_v63  ;;  %v11291_v47 = vld [vmem:[%s15831_s2 + $0x118] sm:$0xff]  }
 0x285   : > { %v10046_v28 = vpack.c.bf16 %v4792_v31, %v4792_v31  ;;  %v10044_v8 = vpack.c.bf16 %v4790_v17, %v4790_v17  ;;  %v4791_v38 = vmax.f32 %v4759_v9, 0.0  ;;  %v4725_v54 = vmul.f32 %v13797_v27, %v4630_v0  ;;  %v5264_v31 = vld [vmem:[#allocation2 + $0x48] sm:$0xf]  ;;  %10771 = vmatpush3.bf16.msra.mxu1 %v11291_v47  ;;  %v13918_v47 = vld [vmem:[#allocation2 + $0xc] sm:$0xf] }
 0x286   : > { %v4970_v12 = vshrl.u32 %v10043_v41, 16  ;;  %v4973_v48 = vshll.u32 %v10043_v41, 16  ;;  %v4953_v32 = vshrl.u32 %v10041_v60, 16  ;;  %v4956_v25 = vshll.u32 %v10041_v60, 16 }
 0x287   : > { %v4996_v6 = vshrl.u32 %v10046_v28, 16  ;;  %v4999_v51 = vshll.u32 %v10046_v28, 16  ;;  %v4979_v21 = vshrl.u32 %v10044_v8, 16  ;;  %v4982_v40 = vshll.u32 %v10044_v8, 16  ;;  %v13885_v2 = vpop.f32.mrb[144].mxu0 }
 0x288   : > { %v4972_v24 = vrot.slane %v4970_v12, 7  ;;  %v4955_v3 = vrot.slane %v4953_v32, 7  ;;  %v10047_v20 = vpack.c.bf16 %v4793_v29, %v4793_v29  ;;  %v10045_v23 = vpack.c.bf16 %v4791_v38, %v4791_v38  ;;  %v13890_v49 = vpop.f32.mrb[145].mxu0  ;;  %v5257_v29 = vld [vmem:[#allocation2 + $0x3c] sm:$0xf] }
 0x289   : > { %v13892_v63 = vrot.slane %v4996_v6, 7  ;;  %v13894_v17 = vrot.slane %v4979_v21, 7  ;;  %v4764_v9 = vadd.f32 %v13803_v22, %v4727_v4  ;;  %v4762_v0 = vadd.f32 %v13803_v22, %v4725_v54  ;;  %v13898_v41 = vpop.f32.mrb[146].mxu0  ;;  %v6991_v30 = vld [vmem:[#allocation2 + $0x30] sm:$0xe] }
 0x28a   : > { %v4975_v60 = vor.u32 %v4973_v48, %v4972_v24  ;;  %v4977_v28 = vrot.slane %v4972_v24, 4  ;;  %v4958_v8 = vor.u32 %v4956_v25, %v4955_v3  ;;  %v4960_v12 = vrot.slane %v4955_v3, 4  ;;  %v13900_v38 = vpop.f32.mrb[147].mxu0 }
 0x28b   : > { %v5001_v32 = vor.u32 %v4999_v51, %v13892_v63  ;;  %v5002_v6 = vrot.slane %v13892_v63, 4  ;;  %v4984_v21 = vor.u32 %v4982_v40, %v13894_v17  ;;  %v4985_v4 = vrot.slane %v13894_v17, 4 }
 0x28c   : > { %v4976_v54 = vsel %vm11653_vm12, %v4968_v7, %v4975_v60  ;;  %v5255_v48 = vsel %vm11631_vm7, %v4977_v28, %v5254_v1  ;;  %v4959_v25 = vsel %vm11653_vm12, %v4951_v53, %v4958_v8  ;;  %v5248_v51 = vsel %vm11631_vm7, %v4960_v12, %v5247_v42  ;;  %v5268_v28 = vld [vmem:[#allocation2 + $0x50] sm:$0x1] }
 0x28d   : > { %5253 = vst [vmem:[#allocation2 + $0x34] sm:$0xf] %v4976_v54  ;;  %5256 = vst [vmem:[#allocation2 + $0x38] sm:$0x1] %v5255_v48  ;;  %v5265_v15 = vsel %vm11683_vm14, %v5001_v32, %v5264_v31  ;;  %v5258_v7 = vsel %vm11683_vm14, %v4984_v21, %v5257_v29  ;;  %v5004_v1 = vshrl.u32 %v10047_v20, 16  ;;  %v5007_v52 = vshll.u32 %v10047_v20, 16 }
 0x28e   : > { %5246 = vst [vmem:[#allocation2 + $0x28] sm:$0xf] %v4959_v25  ;;  %5249 = vst [vmem:[#allocation2 + $0x2c] sm:$0x1] %v5248_v51  ;;  %v4987_v53 = vshrl.u32 %v10045_v23, 16  ;;  %v4990_v40 = vshll.u32 %v10045_v23, 16  ;;  %v4641_v63 = vadd.f32 %v13872_v50, %v13698_v37  ;;  %v4633_v17 = vadd.f32 %v13879_v33, %v13680_v46 }
 0x28f   : > { %5266 = vst [vmem:[#allocation2 + $0x48] sm:$0xf] %v5265_v15  ;;  %5259 = vst [vmem:[#allocation2 + $0x3c] sm:$0xf] %v5258_v7  ;;  %v4796_v24 = vmax.f32 %v4764_v9, 0.0  ;;  %v4794_v3 = vmax.f32 %v4762_v0, 0.0 }
 0x290   : > { %v5006_v42 = vrot.slane %v5004_v1, 7  ;;  %v5998_v31 = vshrl.u32 %v13918_v47, 16  ;;  %v13929_v60 = vpop.f32.mrb[148].mxu0  ;;  %v11294_v20 = vld [vmem:[%s15831_s2 + $0x1c0] sm:$0xff]   ;;  %v4989_v8 = vrot.slane %v4987_v53, 7  ;;  %v6001_v0 = vshll.u32 %v13918_v47, 16 }
 0x291   : > { %v10050_v23 = vpack.c.bf16 %v4796_v24, %v4796_v24  ;;  %v10048_v9 = vpack.c.bf16 %v4794_v3, %v4794_v3  ;;  %v13935_v12 = vpop.f32.mrb[149].mxu0  ;;  %v5261_v29 = vld [vmem:[#allocation2 + $0x44] sm:$0x1]  ;;  %v4728_v46 = vmul.f32 %v13797_v27, %v4641_v63  ;;  %v4726_v33 = vmul.f32 %v13797_v27, %v4633_v17  ;;  %10876 = vmatprep.subr.bf16.mxu0 %v11294_v20  ;;  %v5950_v24 = vld [vmem:[#allocation2 + $0x10] sm:$0xf] }
 0x292   : > { %v5009_v37 = vor.u32 %v5007_v52, %v5006_v42  ;;  %v5011_v50 = vrot.slane %v5006_v42, 4  ;;  %v13939_v32 = vpop.f32.mrb[150].mxu0  ;;  %v11298_v21 = vld [vmem:[%s15831_s2 + $0x160] sm:$0xff]   ;;  %v4992_v54 = vor.u32 %v4990_v40, %v4989_v8  ;;  %v4994_v48 = vrot.slane %v4989_v8, 4 }
 0x293   : > { %v5030_v25 = vshrl.u32 %v10050_v23, 16  ;;  %v5033_v51 = vshll.u32 %v10050_v23, 16  ;;  %v13944_v15 = vpop.f32.mrb[151].mxu0  ;;  %v5013_v52 = vshrl.u32 %v10048_v9, 16  ;;  %v5016_v53 = vshll.u32 %v10048_v9, 16  ;;  %10772 = vmatprep.subr.bf16.mxu1 %v11298_v21 }
 0x294   : > { %v5010_v7 = vsel %vm11653_vm12, %v5002_v6, %v5009_v37  ;;  %v5269_v1 = vsel %vm11631_vm7, %v5011_v50, %v5268_v28  ;;  %v4993_v40 = vsel %vm11653_vm12, %v4985_v4, %v4992_v54  ;;  %v5262_v3 = vsel %vm11631_vm7, %v4994_v48, %v5261_v29  ;;  %v5278_v6 = vld [vmem:[#allocation2 + $0x60] sm:$0xf]  ;;  %v5271_v9 = vld [vmem:[#allocation2 + $0x54] sm:$0xf] }
 0x295   : > { %5267 = vst [vmem:[#allocation2 + $0x4c] sm:$0xf] %v5010_v7  ;;  %5270 = vst [vmem:[#allocation2 + $0x50] sm:$0x1] %v5269_v1  ;;  %v13954_v42 = vrot.slane %v5030_v25, 7  ;;  %v4765_v63 = vadd.f32 %v13803_v22, %v4728_v46  ;;  %v13957_v17 = vrot.slane %v5013_v52, 7  ;;  %v4763_v20 = vadd.f32 %v13803_v22, %v4726_v33 }
 0x296   : > { %5260 = vst [vmem:[#allocation2 + $0x40] sm:$0xf] %v4993_v40  ;;  %5263 = vst [vmem:[#allocation2 + $0x44] sm:$0x1] %v5262_v3  ;;  %v6000_v28 = vrot.slane %v5998_v31, 4  ;;  %v6003_v8 = vrot.slane %v6001_v0, 5  ;;  %v9830_v3 = vcombine.low %v13918_v47, %v5950_v24 }
 0x297   : > { %v5035_v23 = vor.u32 %v5033_v51, %v13954_v42  ;;  %v5036_v4 = vrot.slane %v13954_v42, 4  ;;  %v4797_v37 = vmax.f32 %v4765_v63, 0.0  ;;  %v6007_v50 = vshll.u32 %v5950_v24, 16  ;;  %v13964_v48 = vpop.f32.mrb[152].mxu0  ;;  %v11299_v31 = vld [vmem:[%s15831_s2 + $0x120] sm:$0xff]  }
 0x298   : > { %v5018_v29 = vor.u32 %v5016_v53, %v13957_v17  ;;  %v5019_v46 = vrot.slane %v13957_v17, 4  ;;  %v4795_v21 = vmax.f32 %v4763_v20, 0.0  ;;  %v6004_v54 = vor.u32 %v6003_v8, %v6000_v28  ;;  %v5951_v7 = vld [vmem:[#allocation2 + $0x18] sm:$0xf]  ;;  %v13973_v1 = vpop.f32.mrb[153].mxu0  ;;  %v11295_v63 = vld [vmem:[%s15831_s2 + $0x180] sm:$0xff]   ;;  %10773 = vmatpush3.bf16.msra.mxu1 %v11299_v31  ;;  %8558 = vmatprep.mubr.bf16.mxu0 %v9830_v3 }
 0x299   : > { %v5279_v0 = vsel %vm11683_vm14, %v5035_v23, %v5278_v6  ;;  %v10051_v33 = vpack.c.bf16 %v4797_v37, %v4797_v37  ;;  %v13971_v25 = vrot.slane %v6007_v50, 5  ;;  %v6011_v51 = vshrl.u32 %v5950_v24, 16  ;;  %v13980_v42 = vpop.f32.mrb[154].mxu0  ;;  %v13987_v23 = vld [vmem:[#allocation2 + $0x1c] sm:$0xf]  ;;  %8559 = vmatmul.mubr.bf16.vlgmr.msra.gmra.mrb[160].mxu0 %v9814_v43 }
 0x29a   : > { %5280 = vst [vmem:[#allocation2 + $0x60] sm:$0xf] %v5279_v0  ;;  %v5272_v52 = vsel %vm11683_vm14, %v5018_v29, %v5271_v9  ;;  %v10049_v53 = vpack.c.bf16 %v4795_v21, %v4795_v21  ;;  %v13977_v40 = vrot.slane %v6004_v54, 4  ;;  %v4654_v8 = vadd.f32 %v13885_v2, %v13726_v44  ;;  %16016 = vst [vmem:[#allocation13_spill] sm:$0xff] %v13987_v23  ;;  %v13989_v9 = vpop.f32.mrb[155].mxu0 }
 0x29b   : > { %5273 = vst [vmem:[#allocation2 + $0x54] sm:$0xf] %v5272_v52  ;;  %v5038_v6 = vshrl.u32 %v10051_v33, 16  ;;  %v5041_v20 = vshll.u32 %v10051_v33, 16  ;;  %v6013_v28 = vrot.slane %v6011_v51, 4  ;;  %v4646_v24 = vadd.f32 %v13890_v49, %v13714_v61  ;;  %10877 = vmatpush3.bf16.msra.mxu0 %v11295_v63  ;;  %v11302_v63 = vld [vmem:[%s15831_s2 + $0x1c8] sm:$0xff]  }
 0x29c   : > { %v5021_v37 = vshrl.u32 %v10049_v53, 16  ;;  %v5024_v47 = vshll.u32 %v10049_v53, 16  ;;  %v6022_v50 = vshrl.u32 %v5951_v7, 16  ;;  %v4731_v54 = vmul.f32 %v13797_v27, %v4654_v8  ;;  %v5282_v2 = vld [vmem:[#allocation2 + $0x68] sm:$0x1]  ;;  %10878 = vmatprep.subr.bf16.mxu0 %v11302_v63 }
 0x29d   : > { %v5040_v29 = vrot.slane %v5038_v6, 7  ;;  %v6014_v21 = vor.u32 %v6013_v28, %v13971_v25  ;;  %v6025_v44 = vshll.u32 %v5951_v7, 16  ;;  %v4729_v0 = vmul.f32 %v13797_v27, %v4646_v24  ;;  %v5275_v52 = vld [vmem:[#allocation2 + $0x5c] sm:$0x1]  ;;  %v14008_v28 = vld [vmem:[#allocation2 + $0xc] sm:$0xf] }
 0x29e   : > { %v5023_v31 = vrot.slane %v5021_v37, 7  ;;  %v13999_v33 = vrot.slane %v6022_v50, 4  ;;  %v4768_v3 = vadd.f32 %v13803_v22, %v4731_v54  ;;  %v9831_v24 = vcombine.low %v5951_v7, %v13987_v23  ;;  %v14020_v50 = vld [vmem:[#allocation2 + $0x10] sm:$0xf] }
 0x29f   : > { %v5043_v61 = vor.u32 %v5041_v20, %v5040_v29  ;;  %v5045_v49 = vrot.slane %v5040_v29, 4  ;;  %v14002_v53 = vrot.slane %v6014_v21, 4  ;;  %v4766_v36 = vadd.f32 %v13803_v22, %v4729_v0  ;;  %v14010_v8 = vpop.f32.mrb[156].mxu0 }
 0x2a0   : > { %v5026_v6 = vor.u32 %v5024_v47, %v5023_v31  ;;  %v5028_v35 = vrot.slane %v5023_v31, 4  ;;  %v14006_v43 = vrot.slane %v6025_v44, 5  ;;  %v4800_v47 = vmax.f32 %v4768_v3, 0.0  ;;  %v14022_v29 = vpop.f32.mrb[157].mxu0  ;;  %8566 = vmatprep.mubr.bf16.mxu0 %v9831_v24 }
 0x2a1   : > { %v5044_v20 = vsel %vm11653_vm12, %v5036_v4, %v5043_v61  ;;  %v5283_v37 = vsel %vm11631_vm7, %v5045_v49, %v5282_v2  ;;  %v4798_v54 = vmax.f32 %v4766_v36, 0.0  ;;  %v4657_v44 = vadd.f32 %v13898_v41, %v13734_v19  ;;  %v14032_v2 = vpop.f32.mrb[158].mxu0 }
 0x2a2   : > { %16017 = vst [vmem:[#allocation10_spill] sm:$0xff] %v14006_v43  ;;  %5281 = vst [vmem:[#allocation2 + $0x64] sm:$0xf] %v5044_v20  ;;  %v5027_v21 = vsel %vm11653_vm12, %v5019_v46, %v5026_v6  ;;  %v5276_v4 = vsel %vm11631_vm7, %v5028_v35, %v5275_v52  ;;  %v10054_v7 = vpack.c.bf16 %v4800_v47, %v4800_v47  ;;  %v5414_v31 = vshrl.u32 %v14008_v28, 16  ;;  %v14039_v0 = vpop.f32.mrb[159].mxu0 }
 0x2a3   : > { %5284 = vst [vmem:[#allocation2 + $0x68] sm:$0x1] %v5283_v37  ;;  %5274 = vst [vmem:[#allocation2 + $0x58] sm:$0xf] %v5027_v21  ;;  %v4649_v17 = vadd.f32 %v13900_v38, %v13719_v56  ;;  %v4670_v46 = vadd.f32 %v13929_v60, %v13764_v59  ;;  %v10052_v61 = vpack.c.bf16 %v4798_v54, %v4798_v54  ;;  %v5417_v41 = vshll.u32 %v14008_v28, 16  ;;  %v11303_v59 = vld [vmem:[%s15831_s2 + $0x188] sm:$0xff]  }
 0x2a4   : > { %5277 = vst [vmem:[#allocation2 + $0x5c] sm:$0x1] %v5276_v4  ;;  %v4732_v19 = vmul.f32 %v13797_v27, %v4657_v44  ;;  %v5423_v49 = vshll.u32 %v14020_v50, 16  ;;  %v5064_v52 = vshrl.u32 %v10054_v7, 16  ;;  %v5067_v3 = vshll.u32 %v10054_v7, 16  ;;  %v11306_v38 = vld [vmem:[%s15831_s2 + $0x168] sm:$0xff]   ;;  %10879 = vmatpush3.bf16.msra.mxu0 %v11303_v59 }
 0x2a5   : > { %v4730_v6 = vmul.f32 %v13797_v27, %v4649_v17  ;;  %v4735_v56 = vmul.f32 %v13797_v27, %v4670_v46  ;;  %v5047_v60 = vshrl.u32 %v10052_v61, 16  ;;  %v5050_v35 = vshll.u32 %v10052_v61, 16  ;;  %10774 = vmatprep.subr.bf16.mxu1 %v11306_v38  ;;  %v11307_v21 = vld [vmem:[%s15831_s2 + $0x128] sm:$0xff]   ;;  %v5292_v4 = vld [vmem:[#allocation2 + $0x78] sm:$0xf] }
 0x2a6   : > { %v4769_v36 = vadd.f32 %v13803_v22, %v4732_v19  ;;  %v5416_v63 = vrot.slane %v5414_v31, 4  ;;  %v5066_v20 = vrot.slane %v5064_v52, 7  ;;  %v5419_v24 = vrot.slane %v5417_v41, 5  ;;  %v5285_v61 = vld [vmem:[#allocation2 + $0x6c] sm:$0xf]  ;;  %10775 = vmatpush3.bf16.msra.mxu1 %v11307_v21 }
 0x2a7   : > { %v4767_v37 = vadd.f32 %v13803_v22, %v4730_v6  ;;  %v4772_v47 = vadd.f32 %v13803_v22, %v4735_v56  ;;  %v14058_v54 = vrot.slane %v5047_v60, 7  ;;  %v14060_v7 = vrot.slane %v5423_v49, 5 }
 0x2a8   : > { %v4801_v44 = vmax.f32 %v4769_v36, 0.0  ;;  %v5427_v17 = vshrl.u32 %v14020_v50, 16  ;;  %v5069_v46 = vor.u32 %v5067_v3, %v5066_v20  ;;  %v5070_v31 = vrot.slane %v5066_v20, 4  ;;  %v14067_v36 = vld [vmem:[#allocation2 + $0x14] sm:$0x1] }
 0x2a9   : > { %v4799_v19 = vmax.f32 %v4767_v37, 0.0  ;;  %v4804_v52 = vmax.f32 %v4772_v47, 0.0  ;;  %v5052_v41 = vor.u32 %v5050_v35, %v14058_v54  ;;  %v5053_v6 = vrot.slane %v14058_v54, 4  ;;  %v5774_v35 = vld [vmem:[#allocation2 + $0xc] sm:$0xe] }
 0x2aa   : > { %v10055_v56 = vpack.c.bf16 %v4801_v44, %v4801_v44  ;;  %v5420_v59 = vor.u32 %v5419_v24, %v5416_v63  ;;  %v5293_v38 = vsel %vm11683_vm14, %v5069_v46, %v5292_v4  ;;  %v5429_v51 = vrot.slane %v5427_v17, 4  ;;  %v5296_v4 = vld [vmem:[#allocation2 + $0x80] sm:$0x1]  ;;  %v5289_v46 = vld [vmem:[#allocation2 + $0x74] sm:$0x1] }
 0x2ab   : > { %v10053_v60 = vpack.c.bf16 %v4799_v19, %v4799_v19  ;;  %v10058_v49 = vpack.c.bf16 %v4804_v52, %v4804_v52  ;;  %5294 = vst [vmem:[#allocation2 + $0x78] sm:$0xf] %v5293_v38  ;;  %v5286_v3 = vsel %vm11683_vm14, %v5052_v41, %v5285_v61  ;;  %v5433_v61 = vshll.u32 %v14067_v36, 16  ;;  %v11310_v38 = vld [vmem:[%s15831_s2 + $0x1d0] sm:$0xff]  }
 0x2ac   : > { %v5072_v20 = vshrl.u32 %v10055_v56, 16  ;;  %v5075_v37 = vshll.u32 %v10055_v56, 16  ;;  %v5421_v47 = vrot.slane %v5420_v59, 4  ;;  %5287 = vst [vmem:[#allocation2 + $0x6c] sm:$0xf] %v5286_v3  ;;  %v5430_v19 = vor.u32 %v5429_v51, %v14060_v7  ;;  %10880 = vmatprep.subr.bf16.mxu0 %v11310_v38 }
 0x2ad   : > { %v5055_v21 = vshrl.u32 %v10053_v60, 16  ;;  %v5058_v54 = vshll.u32 %v10053_v60, 16  ;;  %v5098_v63 = vshrl.u32 %v10058_v49, 16  ;;  %v5101_v24 = vshll.u32 %v10058_v49, 16  ;;  %v11311_v60 = vld [vmem:[%s15831_s2 + $0x190] sm:$0xff]  }
 0x2ae   : > { %v5074_v44 = vrot.slane %v5072_v20, 7  ;;  %v5426_v17 = vsel %vm11648_vm11, %v5421_v47, %v14060_v7  ;;  %v9735_v56 = vrot.slane %v5774_v35, 9  ;;  %v5846_v59 = vrot.slane %v14020_v50, 5  ;;  %v5306_v20 = vld [vmem:[#allocation2 + $0x90] sm:$0xf]  ;;  %10881 = vmatpush3.bf16.msra.mxu0 %v11311_v60 }
 0x2af   : > { %v5057_v52 = vrot.slane %v5055_v21, 7  ;;  %v14076_v41 = vrot.slane %v5098_v63, 7  ;;  %v5431_v51 = vrot.slane %v5430_v19, 4  ;;  %v5435_v7 = vrot.slane %v5433_v61, 5  ;;  %v5953_v19 = vld [vmem:[#allocation2 + $0x24] sm:$0xf] }
 0x2b0   : > { %v5077_v49 = vor.u32 %v5075_v37, %v5074_v44  ;;  %v5079_v3 = vrot.slane %v5074_v44, 4  ;;  %v5847_v44 = vsel %vm11642_vm10, %v9735_v56, %v5846_v59  ;;  %v14106_v56 = vld [vmem:[#allocation2 + $0x18] sm:$0xf]  ;;  %v5848_v38 = vrot.slane %v5846_v59, 4 }
 0x2b1   : > { %v5060_v47 = vor.u32 %v5058_v54, %v5057_v52  ;;  %v5062_v21 = vrot.slane %v5057_v52, 4  ;;  %v5103_v63 = vor.u32 %v5101_v24, %v14076_v41  ;;  %v5104_v35 = vrot.slane %v14076_v41, 4  ;;  %v14095_v54 = vld [vmem:[#allocation2 + $0x28] sm:$0xf]  ;;  %v11314_v24 = vld [vmem:[%s15831_s2 + $0x170] sm:$0xff]  }
 0x2b2   : > { %v5078_v23 = vsel %vm11653_vm12, %v5070_v31, %v5077_v49  ;;  %v5297_v43 = vsel %vm11631_vm7, %v5079_v3, %v5296_v4  ;;  %v5436_v37 = vsel %vm11648_vm11, %v5431_v51, %v5435_v7  ;;  %v5849_v60 = vrot.slane %v14067_v36, 5  ;;  %10776 = vmatprep.subr.bf16.mxu1 %v11314_v24  ;;  %v14115_v3 = vld [vmem:[#allocation2 + $0x1c] sm:$0xf]  ;;  %v11327_v41 = vld [vmem:[%s15831_s2 + $0x1a8] sm:$0xff]  }
 0x2b3   : > { %5295 = vst [vmem:[#allocation2 + $0x7c] sm:$0xf] %v5078_v23  ;;  %5298 = vst [vmem:[#allocation2 + $0x80] sm:$0x1] %v5297_v43  ;;  %v5061_v31 = vsel %vm11653_vm12, %v5053_v6, %v5060_v47  ;;  %v5290_v4 = vsel %vm11631_vm7, %v5062_v21, %v5289_v46  ;;  %v5307_v61 = vsel %vm11683_vm14, %v5103_v63, %v5306_v20  ;;  %v6046_v6 = vshrl.u32 %v5953_v19, 16  ;;  %v11315_v47 = vld [vmem:[%s15831_s2 + $0x130] sm:$0xff]  }
 0x2b4   : > { %v9799_v52 = vcombine.low %v5426_v17, %v5436_v37  ;;  %5288 = vst [vmem:[#allocation2 + $0x70] sm:$0xf] %v5061_v31  ;;  %5291 = vst [vmem:[#allocation2 + $0x74] sm:$0x1] %v5290_v4  ;;  %v4662_v23 = vadd.f32 %v13935_v12, %v13738_v13  ;;  %v9783_v43 = vcombine.low %v14008_v28, %v14020_v50  ;;  %v6049_v46 = vshll.u32 %v5953_v19, 16 }
 0x2b5   : > { %5308 = vst [vmem:[#allocation2 + $0x90] sm:$0xf] %v5307_v61  ;;  %v9832_v49 = vcombine.low %v5953_v19, %v14095_v54  ;;  %v5850_v59 = vsel %vm11642_vm10, %v5848_v38, %v5849_v60  ;;  %v4673_v13 = vadd.f32 %v13939_v32, %v13766_v10  ;;  %v14122_v12 = vld [vmem:[#allocation2 + $0x20] sm:$0x1]  ;;  %v5438_v28 = vshrl.u32 %v14106_v56, 16  ;;  %10777 = vmatpush3.bf16.msra.mxu1 %v11315_v47 }
 0x2b6   : > { %8405 = vmatprep.mubr.bf16.mxu1 %v9799_v52  ;;  %v4733_v36 = vmul.f32 %v13797_v27, %v4662_v23  ;;  %v9815_v50 = vcombine.low %v5847_v44, %v5850_v59  ;;  %v14125_v20 = vrot.slane %v6046_v6, 4  ;;  %v14127_v51 = vrot.slane %v6049_v46, 5  ;;  %v5775_v31 = vld [vmem:[#allocation2 + $0x18] sm:$0xe] }
 0x2b7   : > { %8406 = vmatmul.mubr.bf16.gmra.mrb[132].mxu1 %v9783_v43  ;;  %v5441_v7 = vshll.u32 %v14106_v56, 16  ;;  %v4736_v63 = vmul.f32 %v13797_v27, %v4673_v13  ;;  %v5440_v10 = vrot.slane %v5438_v28, 4  ;;  %v5447_v32 = vshll.u32 %v14115_v3, 16 }
 0x2b8   : > { %v4770_v21 = vadd.f32 %v13803_v22, %v4733_v36  ;;  %8567 = vmatmul.mubr.bf16.gmra.mrb[164].mxu0 %v9815_v50  ;;  %v5451_v44 = vshrl.u32 %v14115_v3, 16  ;;  %v5457_v19 = vshll.u32 %v14122_v12, 16  ;;  %v4665_v24 = vadd.f32 %v13944_v15, %v13747_v16 }
 0x2b9   : > { %v5443_v37 = vrot.slane %v5441_v7, 5  ;;  %8574 = vmatprep.mubr.bf16.mxu0 %v9832_v49  ;;  %v4773_v61 = vadd.f32 %v13803_v22, %v4736_v63  ;;  %v5449_v52 = vrot.slane %v5447_v32, 5  ;;  %v4686_v38 = vadd.f32 %v13964_v48, %v13776_v58  ;;  %v11318_v48 = vld [vmem:[%s15831_s2 + $0x1d8] sm:$0xff]  }
 0x2ba   : > { %v4802_v4 = vmax.f32 %v4770_v21, 0.0  ;;  %v5453_v23 = vrot.slane %v5451_v44, 4  ;;  %v5459_v43 = vrot.slane %v5457_v19, 5  ;;  %v4734_v6 = vmul.f32 %v13797_v27, %v4665_v24  ;;  %10882 = vmatprep.subr.bf16.mxu0 %v11318_v48 }
 0x2bb   : > { %v5444_v60 = vor.u32 %v5443_v37, %v5440_v10  ;;  %v4805_v59 = vmax.f32 %v4773_v61, 0.0  ;;  %v4739_v36 = vmul.f32 %v13797_v27, %v4686_v38  ;;  %v9736_v16 = vrot.slane %v5775_v31, 9  ;;  %v11319_v27 = vld [vmem:[%s15831_s2 + $0x198] sm:$0xff]   ;;  %v5299_v31 = vld [vmem:[#allocation2 + $0x84] sm:$0xf] }
 0x2bc   : > { %v10056_v46 = vpack.c.bf16 %v4802_v4, %v4802_v4  ;;  %v5454_v13 = vor.u32 %v5453_v23, %v5449_v52  ;;  %v4771_v49 = vadd.f32 %v13803_v22, %v4734_v6  ;;  %v5853_v28 = vrot.slane %v14115_v3, 5  ;;  %10883 = vmatpush3.bf16.msra.mxu0 %v11319_v27 }
 0x2bd   : > { %v5445_v15 = vrot.slane %v5444_v60, 4  ;;  %v10059_v47 = vpack.c.bf16 %v4805_v59, %v4805_v59  ;;  %v4776_v58 = vadd.f32 %v13803_v22, %v4739_v36  ;;  %v11320_v22 = vld [vmem:[%s15831_s2 + $0x1e0] sm:$0xff]   ;;  %v5856_v38 = vrot.slane %v14122_v12, 5  ;;  %v11323_v59 = vld [vmem:[%s15831_s2 + $0x178] sm:$0xff]  }
 0x2be   : > { %v5081_v50 = vshrl.u32 %v10056_v46, 16  ;;  %v5084_v7 = vshll.u32 %v10056_v46, 16  ;;  %v5455_v63 = vrot.slane %v5454_v13, 4  ;;  %v4803_v10 = vmax.f32 %v4771_v49, 0.0  ;;  %10884 = vmatprep.subr.bf16.mxu0 %v11320_v22  ;;  %v5310_v36 = vld [vmem:[#allocation2 + $0x98] sm:$0x1]  ;;  %10778 = vmatprep.subr.bf16.mxu1 %v11323_v59 }
 0x2bf   : > { %v5450_v21 = vsel %vm11648_vm11, %v5445_v15, %v5449_v52  ;;  %v5854_v32 = vsel %vm11642_vm10, %v9736_v16, %v5853_v28  ;;  %v5106_v44 = vshrl.u32 %v10059_v47, 16  ;;  %v5109_v19 = vshll.u32 %v10059_v47, 16  ;;  %v5955_v49 = vld [vmem:[#allocation2 + $0x30] sm:$0xf]  ;;  %v5303_v47 = vld [vmem:[#allocation2 + $0x8c] sm:$0x1] }
 0x2c0   : > { %v14161_v37 = vrot.slane %v5081_v50, 7  ;;  %v4808_v24 = vmax.f32 %v4776_v58, 0.0  ;;  %v5460_v4 = vsel %vm11648_vm11, %v5455_v63, %v5459_v43  ;;  %v10057_v61 = vpack.c.bf16 %v4803_v10, %v4803_v10  ;;  %v11324_v43 = vld [vmem:[%s15831_s2 + $0x1a0] sm:$0xff]   ;;  %v14180_v10 = vld [vmem:[#allocation2 + $0x34] sm:$0xf] }
 0x2c1   : > { %v5855_v52 = vrot.slane %v5853_v28, 4  ;;  %v5108_v6 = vrot.slane %v5106_v44, 7  ;;  %v9800_v46 = vcombine.low %v5450_v21, %v5460_v4  ;;  %v4678_v63 = vadd.f32 %v13973_v1, %v13770_v45  ;;  %10885 = vmatpush3.bf16.msra.mxu0 %v11324_v43  ;;  %v11325_v45 = vld [vmem:[%s15831_s2 + $0x138] sm:$0xff]   ;;  %v11326_v1 = vld [vmem:[%s15831_s2 + $0x1e8] sm:$0xff]   ;;  %v14207_v4 = vld [vmem:[#allocation2 + $0x24] sm:$0xf] }
 0x2c2   : > { %v5086_v60 = vor.u32 %v5084_v7, %v14161_v37  ;;  %v5087_v23 = vrot.slane %v14161_v37, 4  ;;  %v5089_v16 = vshrl.u32 %v10057_v61, 16  ;;  %v5092_v15 = vshll.u32 %v10057_v61, 16  ;;  %v11328_v61 = vld [vmem:[%s15831_s2 + $0x1f0] sm:$0xff]   ;;  %10886 = vmatprep.subr.bf16.mxu0 %v11326_v1  ;;  %10779 = vmatpush3.bf16.msra.mxu1 %v11325_v45  ;;  %v11332_v45 = vld [vmem:[%s15831_s2 + $0x1b8] sm:$0xff]  }
 0x2c3   : > { %v10062_v12 = vpack.c.bf16 %v4808_v24, %v4808_v24  ;;  %v5857_v13 = vsel %vm11642_vm10, %v5855_v52, %v5856_v38  ;;  %v5111_v50 = vor.u32 %v5109_v19, %v5108_v6  ;;  %v5113_v7 = vrot.slane %v5108_v6, 4  ;;  %8413 = vmatprep.mubr.bf16.mxu1 %v9800_v46  ;;  %v14216_v46 = vld [vmem:[#allocation2 + $0x28] sm:$0xf] }
 0x2c4   : > { %v5300_v28 = vsel %vm11683_vm14, %v5086_v60, %v5299_v31  ;;  %v9816_v58 = vcombine.low %v5854_v32, %v5857_v13  ;;  %v5091_v48 = vrot.slane %v5089_v16, 7  ;;  %v5320_v32 = vld [vmem:[#allocation2 + $0xa8] sm:$0xf]  ;;  %v9784_v44 = vcombine.low %v14106_v56, %v14115_v3  ;;  %v14204_v56 = vld [vmem:[%s15832_s3] ss:$0 sm:$0xff] }
 0x2c5   : > { %5301 = vst [vmem:[#allocation2 + $0x84] sm:$0xf] %v5300_v28  ;;  %v5132_v27 = vshrl.u32 %v10062_v12, 16  ;;  %v5135_v21 = vshll.u32 %v10062_v12, 16  ;;  %v5112_v22 = vsel %vm11653_vm12, %v5104_v35, %v5111_v50  ;;  %v5311_v37 = vsel %vm11631_vm7, %v5113_v7, %v5310_v36  ;;  %10887 = vmatpush3.bf16.msra.mxu0 %v11327_v41  ;;  %v14229_v12 = vld [vmem:[%s15832_s3 + $0x1] ss:$0 sm:$0xff] }
 0x2c6   : > { %8575 = vmatmul.mubr.bf16.gmra.mrb[168].mxu0 %v9816_v58  ;;  %v6070_v19 = vshrl.u32 %v5955_v49, 16  ;;  %5309 = vst [vmem:[#allocation2 + $0x94] sm:$0xf] %v5112_v22  ;;  %5312 = vst [vmem:[#allocation2 + $0x98] sm:$0x1] %v5311_v37  ;;  %v5094_v35 = vor.u32 %v5092_v15, %v5091_v48  ;;  %v5096_v24 = vrot.slane %v5091_v48, 4  ;;  %v4737_v3 = vmul.f32 %v14204_v56, %v4678_v63 }
 0x2c7   : > { %v14199_v31 = vrot.slane %v5132_v27, 7  ;;  %8414 = vmatmul.mubr.bf16.gmra.mrb[136].mxu1 %v9784_v44  ;;  %v6073_v38 = vshll.u32 %v5955_v49, 16  ;;  %v9833_v6 = vcombine.low %v5955_v49, %v14180_v10  ;;  %v14224_v15 = vld [vmem:[#allocation2 + $0x2c] sm:$0x1]  ;;  %v4689_v49 = vadd.f32 %v13980_v42, %v13778_v55  ;;  %10888 = vmatprep.subr.bf16.mxu0 %v11328_v61  ;;  %v11330_v50 = vld [vmem:[%s15831_s2 + $0x1b0] sm:$0xff]   ;;  %v11331_v22 = vld [vmem:[%s15831_s2 + $0x1f8] sm:$0xff]  }
 0x2c8   : > { %v14212_v52 = vrot.slane %v6070_v19, 4  ;;  %v5095_v59 = vsel %vm11653_vm12, %v5087_v23, %v5094_v35  ;;  %v5304_v43 = vsel %vm11631_vm7, %v5096_v24, %v5303_v47  ;;  %v4774_v23 = vadd.f32 %v14229_v12, %v4737_v3  ;;  %v5776_v63 = vld [vmem:[#allocation2 + $0x24] sm:$0xe] }
 0x2c9   : > { %v5137_v36 = vor.u32 %v5135_v21, %v14199_v31  ;;  %v5138_v16 = vrot.slane %v14199_v31, 4  ;;  %5302 = vst [vmem:[#allocation2 + $0x88] sm:$0xf] %v5095_v59  ;;  %5305 = vst [vmem:[#allocation2 + $0x8c] sm:$0x1] %v5304_v43  ;;  %v14232_v13 = vrot.slane %v6073_v38, 5  ;;  %8582 = vmatprep.mubr.bf16.mxu0 %v9833_v6  ;;  %v4740_v55 = vmul.f32 %v14204_v56, %v4689_v49 }
 0x2ca   : > { %v5462_v28 = vshrl.u32 %v14207_v4, 16  ;;  %v5465_v47 = vshll.u32 %v14207_v4, 16  ;;  %v5471_v58 = vshll.u32 %v14216_v46, 16  ;;  %v5475_v48 = vshrl.u32 %v14216_v46, 16  ;;  %10889 = vmatpush3.bf16.msra.mxu0 %v11330_v50 }
 0x2cb   : > { %v5321_v7 = vsel %vm11683_vm14, %v5137_v36, %v5320_v32  ;;  %v4806_v27 = vmax.f32 %v4774_v23, 0.0  ;;  %v5481_v21 = vshll.u32 %v14224_v15, 16  ;;  %v4681_v19 = vadd.f32 %v13989_v9, %v13772_v5  ;;  %10890 = vmatprep.subr.bf16.mxu0 %v11331_v22 }
 0x2cc   : > { %5322 = vst [vmem:[#allocation2 + $0xa8] sm:$0xf] %v5321_v7  ;;  %v5464_v42 = vrot.slane %v5462_v28, 4  ;;  %v5467_v37 = vrot.slane %v5465_v47, 5  ;;  %v5473_v32 = vrot.slane %v5471_v58, 5  ;;  %v5477_v44 = vrot.slane %v5475_v48, 4 }
 0x2cd   : > { %v10060_v1 = vpack.c.bf16 %v4806_v27, %v4806_v27  ;;  %v4777_v41 = vadd.f32 %v14229_v12, %v4740_v55  ;;  %v5483_v35 = vrot.slane %v5481_v21, 5  ;;  %v4702_v24 = vadd.f32 %v14010_v8, %v13812_v14  ;;  %v5313_v47 = vld [vmem:[#allocation2 + $0x9c] sm:$0xf] }
 0x2ce   : > { %v5468_v3 = vor.u32 %v5467_v37, %v5464_v42  ;;  %v5478_v61 = vor.u32 %v5477_v44, %v5473_v32  ;;  %v4738_v38 = vmul.f32 %v14204_v56, %v4681_v19  ;;  %v9737_v6 = vrot.slane %v5776_v63, 9  ;;  %10891 = vmatpush3.bf16.msra.mxu0 %v11332_v45 }
 0x2cf   : > { %v5115_v59 = vshrl.u32 %v10060_v1, 16  ;;  %v5118_v5 = vshll.u32 %v10060_v1, 16  ;;  %v4809_v9 = vmax.f32 %v4777_v41, 0.0  ;;  %v4743_v43 = vmul.f32 %v14204_v56, %v4702_v24  ;;  %v11334_v24 = vld [vmem:[%s15831_s2 + $0x200] sm:$0xff]  }
 0x2d0   : > { %v5469_v36 = vrot.slane %v5468_v3, 4  ;;  %v5479_v23 = vrot.slane %v5478_v61, 4  ;;  %v4775_v49 = vadd.f32 %v14229_v12, %v4738_v38  ;;  %v5860_v28 = vrot.slane %v14216_v46, 5  ;;  %v5324_v3 = vld [vmem:[#allocation2 + $0xb0] sm:$0x1]  ;;  %11060 = vmatprep.subr.bf16.mxu1 %v11334_v24 }
 0x2d1   : > { %v14262_v50 = vrot.slane %v5115_v59, 7  ;;  %v10063_v14 = vpack.c.bf16 %v4809_v9, %v4809_v9  ;;  %v4780_v8 = vadd.f32 %v14229_v12, %v4743_v43  ;;  %v5863_v7 = vrot.slane %v14224_v15, 5 }
 0x2d2   : > { %v5474_v58 = vsel %vm11648_vm11, %v5469_v36, %v5473_v32  ;;  %v5484_v48 = vsel %vm11648_vm11, %v5479_v23, %v5483_v35  ;;  %v4807_v27 = vmax.f32 %v4775_v49, 0.0  ;;  %v5861_v55 = vsel %vm11642_vm10, %v9737_v6, %v5860_v28  ;;  %v5957_v35 = vld [vmem:[#allocation2 + $0x3c] sm:$0xf]  ;;  %v14286_v23 = vld [vmem:[#allocation2 + $0x40] sm:$0xf] }
 0x2d3   : > { %v5120_v42 = vor.u32 %v5118_v5, %v14262_v50  ;;  %v5121_v21 = vrot.slane %v14262_v50, 4  ;;  %v5140_v63 = vshrl.u32 %v10063_v14, 16  ;;  %v5143_v22 = vshll.u32 %v10063_v14, 16  ;;  %v5334_v14 = vld [vmem:[#allocation2 + $0xc0] sm:$0xf] }
 0x2d4   : > { %v9801_v37 = vcombine.low %v5474_v58, %v5484_v48  ;;  %v10061_v44 = vpack.c.bf16 %v4807_v27, %v4807_v27  ;;  %v4812_v15 = vmax.f32 %v4780_v8, 0.0  ;;  %v5862_v19 = vrot.slane %v5860_v28, 4 }
 0x2d5   : > { %v5314_v32 = vsel %vm11683_vm14, %v5120_v42, %v5313_v47  ;;  %v5142_v45 = vrot.slane %v5140_v63, 7  ;;  %v4694_v1 = vadd.f32 %v14022_v29, %v13789_v34  ;;  %v9785_v41 = vcombine.low %v14207_v4, %v14216_v46  ;;  %v5317_v34 = vld [vmem:[#allocation2 + $0xa4] sm:$0x1]  ;;  %v14295_v47 = vld [vmem:[#allocation2 + $0x30] sm:$0xf] }
 0x2d6   : > { %5315 = vst [vmem:[#allocation2 + $0x9c] sm:$0xf] %v5314_v32  ;;  %8421 = vmatprep.mubr.bf16.mxu1 %v9801_v37  ;;  %v5123_v61 = vshrl.u32 %v10061_v44, 16  ;;  %v5126_v38 = vshll.u32 %v10061_v44, 16  ;;  %v10066_v6 = vpack.c.bf16 %v4812_v15, %v4812_v15  ;;  %v5864_v59 = vsel %vm11642_vm10, %v5862_v19, %v5863_v7  ;;  %v5377_v37 = vld [vmem:[#allocation2 + $0x38] sm:$0x1] }
 0x2d7   : > { %v5145_v5 = vor.u32 %v5143_v22, %v5142_v45  ;;  %v5147_v9 = vrot.slane %v5142_v45, 4  ;;  %v9817_v29 = vcombine.low %v5861_v55, %v5864_v59  ;;  %v4741_v4 = vmul.f32 %v14204_v56, %v4694_v1  ;;  %8422 = vmatmul.mubr.bf16.gmra.mrb[140].mxu1 %v9785_v41  ;;  %v14301_v55 = vld [vmem:[#allocation2 + $0x34] sm:$0xf] }
 0x2d8   : > { %v5125_v46 = vrot.slane %v5123_v61, 7  ;;  %v5166_v43 = vshrl.u32 %v10066_v6, 16  ;;  %v5169_v36 = vshll.u32 %v10066_v6, 16  ;;  %v6094_v49 = vshrl.u32 %v5957_v35, 16 }
 0x2d9   : > { %v5146_v28 = vsel %vm11653_vm12, %v5138_v16, %v5145_v5  ;;  %v5325_v50 = vsel %vm11631_vm7, %v5147_v9, %v5324_v3  ;;  %8583 = vmatmul.mubr.bf16.gmra.mrb[172].mxu0 %v9817_v29  ;;  %v4778_v8 = vadd.f32 %v14229_v12, %v4741_v4  ;;  %v6097_v7 = vshll.u32 %v5957_v35, 16 }
 0x2da   : > { %5323 = vst [vmem:[#allocation2 + $0xac] sm:$0xf] %v5146_v28  ;;  %5326 = vst [vmem:[#allocation2 + $0xb0] sm:$0x1] %v5325_v50  ;;  %v5128_v58 = vor.u32 %v5126_v38, %v5125_v46  ;;  %v5130_v48 = vrot.slane %v5125_v46, 4  ;;  %v14297_v27 = vrot.slane %v5166_v43, 7  ;;  %v9834_v22 = vcombine.low %v5957_v35, %v14286_v23 }
 0x2db   : > { %v14299_v31 = vrot.slane %v6094_v49, 4  ;;  %v4810_v16 = vmax.f32 %v4778_v8, 0.0  ;;  %v14303_v42 = vrot.slane %v6097_v7, 5  ;;  %v4705_v1 = vadd.f32 %v14032_v2, %v13817_v26  ;;  %v5777_v38 = vld [vmem:[#allocation2 + $0x30] sm:$0xe] }
 0x2dc   : > { %v5129_v44 = vsel %vm11653_vm12, %v5121_v21, %v5128_v58  ;;  %v5318_v15 = vsel %vm11631_vm7, %v5130_v48, %v5317_v34  ;;  %v5171_v19 = vor.u32 %v5169_v36, %v14297_v27  ;;  %v5172_v32 = vrot.slane %v14297_v27, 4  ;;  %8590 = vmatprep.mubr.bf16.mxu0 %v9834_v22  ;;  %v5327_v49 = vld [vmem:[#allocation2 + $0xb4] sm:$0xf]  ;;  %v5959_v22 = vld [vmem:[#allocation2 + $0x48] sm:$0xf] }
 0x2dd   : > { %5316 = vst [vmem:[#allocation2 + $0xa0] sm:$0xf] %v5129_v44  ;;  %5319 = vst [vmem:[#allocation2 + $0xa4] sm:$0x1] %v5318_v15  ;;  %v10064_v45 = vpack.c.bf16 %v4810_v16, %v4810_v16  ;;  %v5486_v41 = vshrl.u32 %v14295_v47, 16  ;;  %v5489_v35 = vshll.u32 %v14295_v47, 16  ;;  %v4744_v5 = vmul.f32 %v14204_v56, %v4705_v1 }
 0x2de   : > { %v5335_v21 = vsel %vm11683_vm14, %v5171_v19, %v5334_v14  ;;  %v5495_v24 = vshll.u32 %v14301_v55, 16  ;;  %v5499_v3 = vshrl.u32 %v14301_v55, 16  ;;  %v5505_v61 = vshll.u32 %v5377_v37, 16 }
 0x2df   : > { %5336 = vst [vmem:[#allocation2 + $0xc0] sm:$0xf] %v5335_v21  ;;  %v5149_v6 = vshrl.u32 %v10064_v45, 16  ;;  %v5152_v59 = vshll.u32 %v10064_v45, 16  ;;  %v5488_v9 = vrot.slane %v5486_v41, 4  ;;  %v5491_v26 = vrot.slane %v5489_v35, 5 }
 0x2e0   : > { %v5497_v2 = vrot.slane %v5495_v24, 5  ;;  %v5501_v34 = vrot.slane %v5499_v3, 4  ;;  %v5507_v29 = vrot.slane %v5505_v61, 5  ;;  %v4781_v46 = vadd.f32 %v14229_v12, %v4744_v5  ;;  %v14338_v41 = vld [vmem:[#allocation2 + $0x4c] sm:$0xf] }
 0x2e1   : > { %v14322_v4 = vrot.slane %v5149_v6, 7  ;;  %v4697_v43 = vadd.f32 %v14039_v0, %v13792_v11  ;;  %v9738_v36 = vrot.slane %v5777_v38, 9  ;;  %v5492_v28 = vor.u32 %v5491_v26, %v5488_v9  ;;  %v14346_v24 = vld [vmem:[#allocation2 + $0x3c] sm:$0xf]  ;;  %v5338_v26 = vld [vmem:[#allocation2 + $0xc8] sm:$0x1] }
 0x2e2   : > { %v5502_v50 = vor.u32 %v5501_v34, %v5497_v2  ;;  %v5867_v14 = vrot.slane %v14301_v55, 5  ;;  %v5870_v8 = vrot.slane %v5377_v37, 5  ;;  %v4813_v48 = vmax.f32 %v4781_v46, 0.0  ;;  %v14507_v5 = vld [vmem:[#allocation2 + $0x94] sm:$0xf] }
 0x2e3   : > { %v5154_v7 = vor.u32 %v5152_v59, %v14322_v4  ;;  %v5155_v58 = vrot.slane %v14322_v4, 4  ;;  %v4742_v16 = vmul.f32 %v14204_v56, %v4697_v43  ;;  %v5493_v44 = vrot.slane %v5492_v28, 4  ;;  %v5378_v43 = vld [vmem:[#allocation2 + $0x44] sm:$0x1]  ;;  %16020 = vst [vmem:[#allocation17_spill] sm:$0xff] %v14507_v5 }
 0x2e4   : > { %v5503_v15 = vrot.slane %v5502_v50, 4  ;;  %v5868_v11 = vsel %vm11642_vm10, %v9738_v36, %v5867_v14  ;;  %v5869_v0 = vrot.slane %v5867_v14, 4  ;;  %v10067_v45 = vpack.c.bf16 %v4813_v48, %v4813_v48  ;;  %v5778_v48 = vld [vmem:[#allocation2 + $0x3c] sm:$0xe]  ;;  %v14535_v60 = vld [vmem:[#allocation2 + $0xa0] sm:$0xf] }
 0x2e5   : > { %v5328_v19 = vsel %vm11683_vm14, %v5154_v7, %v5327_v49  ;;  %v4779_v37 = vadd.f32 %v14229_v12, %v4742_v16  ;;  %v9786_v1 = vcombine.low %v14295_v47, %v14301_v55  ;;  %v5498_v56 = vsel %vm11648_vm11, %v5493_v44, %v5497_v2  ;;  %v14348_v47 = vld [vmem:[#allocation2 + $0x40] sm:$0xf]  ;;  %16023 = vst [vmem:[#allocation36_spill] sm:$0xff] %v14535_v60 }
 0x2e6   : > { %5329 = vst [vmem:[#allocation2 + $0xb4] sm:$0xf] %v5328_v19  ;;  %v5508_v35 = vsel %vm11648_vm11, %v5503_v15, %v5507_v29  ;;  %v5871_v21 = vsel %vm11642_vm10, %v5869_v0, %v5870_v8  ;;  %v6118_v62 = vshrl.u32 %v5959_v22, 16  ;;  %v5174_v3 = vshrl.u32 %v10067_v45, 16 }
 0x2e7   : > { %v5177_v12 = vshll.u32 %v10067_v45, 16  ;;  %v9802_v61 = vcombine.low %v5498_v56, %v5508_v35  ;;  %v4811_v38 = vmax.f32 %v4779_v37, 0.0  ;;  %v9818_v55 = vcombine.low %v5868_v11, %v5871_v21  ;;  %v5331_v37 = vld [vmem:[#allocation2 + $0xbc] sm:$0x1] }
 0x2e8   : > { %v14350_v6 = vrot.slane %v6118_v62, 4  ;;  %v6121_v59 = vshll.u32 %v5959_v22, 16  ;;  %v5176_v9 = vrot.slane %v5174_v3, 7  ;;  %v9835_v34 = vcombine.low %v5959_v22, %v14338_v41  ;;  %v5961_v62 = vld [vmem:[#allocation2 + $0x54] sm:$0xf] }
 0x2e9   : > { %8429 = vmatprep.mubr.bf16.mxu1 %v9802_v61  ;;  %v10065_v2 = vpack.c.bf16 %v4811_v38, %v4811_v38  ;;  %v5510_v29 = vshrl.u32 %v14346_v24, 16  ;;  %8591 = vmatmul.mubr.bf16.gmra.mrb[176].mxu0 %v9818_v55  ;;  %v5513_v36 = vshll.u32 %v14346_v24, 16  ;;  %v5519_v49 = vshll.u32 %v14348_v47, 16 }
 0x2ea   : > { %8430 = vmatmul.mubr.bf16.gmra.mrb[144].mxu1 %v9786_v1  ;;  %v14355_v46 = vrot.slane %v6121_v59, 5  ;;  %v5523_v28 = vshrl.u32 %v14348_v47, 16  ;;  %v5179_v50 = vor.u32 %v5177_v12, %v5176_v9  ;;  %v5181_v14 = vrot.slane %v5176_v9, 4  ;;  %8598 = vmatprep.mubr.bf16.mxu0 %v9835_v34  ;;  %v14369_v9 = vld [vmem:[#allocation2 + $0x58] sm:$0xf] }
 0x2eb   : > { %v5157_v8 = vshrl.u32 %v10065_v2, 16  ;;  %v5160_v7 = vshll.u32 %v10065_v2, 16  ;;  %v5512_v16 = vrot.slane %v5510_v29, 4  ;;  %v5515_v22 = vrot.slane %v5513_v36, 5  ;;  %v14381_v36 = vld [vmem:[#allocation2 + $0x4c] sm:$0xf] }
 0x2ec   : > { %v5521_v44 = vrot.slane %v5519_v49, 5  ;;  %v5525_v15 = vrot.slane %v5523_v28, 4  ;;  %v5180_v11 = vsel %vm11653_vm12, %v5172_v32, %v5179_v50  ;;  %v5339_v0 = vsel %vm11631_vm7, %v5181_v14, %v5338_v26  ;;  %v5779_v28 = vld [vmem:[#allocation2 + $0x48] sm:$0xe] }
 0x2ed   : > { %v5159_v19 = vrot.slane %v5157_v8, 7  ;;  %v5529_v45 = vshll.u32 %v5378_v43, 16  ;;  %5337 = vst [vmem:[#allocation2 + $0xc4] sm:$0xf] %v5180_v11  ;;  %5340 = vst [vmem:[#allocation2 + $0xc8] sm:$0x1] %v5339_v0  ;;  %v5516_v1 = vor.u32 %v5515_v22, %v5512_v16  ;;  %v9787_v34 = vcombine.low %v14346_v24, %v14348_v47 }
 0x2ee   : > { %v5526_v56 = vor.u32 %v5525_v15, %v5521_v44  ;;  %v9739_v35 = vrot.slane %v5778_v48, 9  ;;  %v5874_v21 = vrot.slane %v14348_v47, 5  ;;  %v5877_v61 = vrot.slane %v5378_v43, 5  ;;  %v14379_v43 = vld [vmem:[#allocation2 + $0x48] sm:$0xf] }
 0x2ef   : > { %v5162_v3 = vor.u32 %v5160_v7, %v5159_v19  ;;  %v5164_v12 = vrot.slane %v5159_v19, 4  ;;  %v5531_v27 = vrot.slane %v5529_v45, 5  ;;  %v5517_v38 = vrot.slane %v5516_v1, 4  ;;  %v5963_v0 = vld [vmem:[#allocation2 + $0x60] sm:$0xf] }
 0x2f0   : > { %v5527_v32 = vrot.slane %v5526_v56, 4  ;;  %v5875_v55 = vsel %vm11642_vm10, %v9739_v35, %v5874_v21  ;;  %v5876_v59 = vrot.slane %v5874_v21, 4  ;;  %v6142_v29 = vshrl.u32 %v5961_v62, 16  ;;  %v14400_v56 = vld [vmem:[#allocation2 + $0x64] sm:$0xf] }
 0x2f1   : > { %v5163_v26 = vsel %vm11653_vm12, %v5155_v58, %v5162_v3  ;;  %v5332_v2 = vsel %vm11631_vm7, %v5164_v12, %v5331_v37  ;;  %v5522_v49 = vsel %vm11648_vm11, %v5517_v38, %v5521_v44  ;;  %v6145_v4 = vshll.u32 %v5961_v62, 16  ;;  %v5379_v58 = vld [vmem:[#allocation2 + $0x50] sm:$0x1]  ;;  %v14404_v12 = vld [vmem:[#allocation2 + $0x54] sm:$0xf] }
 0x2f2   : > { %5330 = vst [vmem:[#allocation2 + $0xb8] sm:$0xf] %v5163_v26  ;;  %5333 = vst [vmem:[#allocation2 + $0xbc] sm:$0x1] %v5332_v2  ;;  %v5532_v18 = vsel %vm11648_vm11, %v5527_v32, %v5531_v27  ;;  %v5878_v39 = vsel %vm11642_vm10, %v5876_v59, %v5877_v61  ;;  %v14389_v50 = vrot.slane %v6142_v29, 4  ;;  %v9836_v7 = vcombine.low %v5961_v62, %v14369_v9 }
 0x2f3   : > { %v9803_v24 = vcombine.low %v5522_v49, %v5532_v18  ;;  %v9819_v47 = vcombine.low %v5875_v55, %v5878_v39  ;;  %v14392_v8 = vrot.slane %v6145_v4, 5  ;;  %v5534_v48 = vshrl.u32 %v14379_v43, 16  ;;  %v5780_v29 = vld [vmem:[#allocation2 + $0x54] sm:$0xe]  ;;  %v5380_v18 = vld [vmem:[#allocation2 + $0x5c] sm:$0x1] }
 0x2f4   : > { %v5537_v16 = vshll.u32 %v14379_v43, 16  ;;  %v5543_v22 = vshll.u32 %v14381_v36, 16  ;;  %v5547_v44 = vshrl.u32 %v14381_v36, 16  ;;  %v5553_v15 = vshll.u32 %v5379_v58, 16 }
 0x2f5   : > { %8437 = vmatprep.mubr.bf16.mxu1 %v9803_v24  ;;  %8599 = vmatmul.mubr.bf16.gmra.mrb[180].mxu0 %v9819_v47  ;;  %v9740_v11 = vrot.slane %v5779_v28, 9  ;;  %v5536_v19 = vrot.slane %v5534_v48, 4  ;;  %v5881_v37 = vrot.slane %v14381_v36, 5  ;;  %v5884_v1 = vrot.slane %v5379_v58, 5 }
 0x2f6   : > { %8438 = vmatmul.mubr.bf16.gmra.mrb[148].mxu1 %v9787_v34  ;;  %8606 = vmatprep.mubr.bf16.mxu0 %v9836_v7  ;;  %v5539_v45 = vrot.slane %v5537_v16, 5  ;;  %v5545_v35 = vrot.slane %v5543_v22, 5  ;;  %v5549_v21 = vrot.slane %v5547_v44, 4  ;;  %v5555_v62 = vrot.slane %v5553_v15, 5  ;;  %v14410_v34 = vld [vmem:[#allocation2 + $0x58] sm:$0xf] }
 0x2f7   : > { %v9788_v3 = vcombine.low %v14379_v43, %v14381_v36  ;;  %v5882_v61 = vsel %vm11642_vm10, %v9740_v11, %v5881_v37  ;;  %v5883_v38 = vrot.slane %v5881_v37, 4  ;;  %v6166_v32 = vshrl.u32 %v5963_v0, 16 }
 0x2f8   : > { %v5540_v27 = vor.u32 %v5539_v45, %v5536_v19  ;;  %v5550_v55 = vor.u32 %v5549_v21, %v5545_v35  ;;  %v6169_v59 = vshll.u32 %v5963_v0, 16  ;;  %v9837_v2 = vcombine.low %v5963_v0, %v14400_v56  ;;  %v5965_v0 = vld [vmem:[#allocation2 + $0x6c] sm:$0xf] }
 0x2f9   : > { %v5885_v43 = vsel %vm11642_vm10, %v5883_v38, %v5884_v1  ;;  %v14414_v36 = vrot.slane %v6166_v32, 4  ;;  %v5558_v39 = vshrl.u32 %v14404_v12, 16  ;;  %v5561_v24 = vshll.u32 %v14404_v12, 16 }
 0x2fa   : > { %v5541_v49 = vrot.slane %v5540_v27, 4  ;;  %v5551_v4 = vrot.slane %v5550_v55, 4  ;;  %v9820_v58 = vcombine.low %v5882_v61, %v5885_v43  ;;  %v14417_v28 = vrot.slane %v6169_v59, 5 }
 0x2fb   : > { %v5560_v7 = vrot.slane %v5558_v39, 4  ;;  %v5567_v48 = vshll.u32 %v14410_v34, 16  ;;  %v5571_v16 = vshrl.u32 %v14410_v34, 16  ;;  %v5563_v44 = vrot.slane %v5561_v24, 5  ;;  %v5381_v24 = vld [vmem:[#allocation2 + $0x68] sm:$0x1] }
 0x2fc   : > { %v5546_v47 = vsel %vm11648_vm11, %v5541_v49, %v5545_v35  ;;  %v5556_v22 = vsel %vm11648_vm11, %v5551_v4, %v5555_v62  ;;  %v5577_v15 = vshll.u32 %v5380_v18, 16  ;;  %v9741_v11 = vrot.slane %v5780_v29, 9  ;;  %v14427_v35 = vld [vmem:[#allocation2 + $0x70] sm:$0xf]  ;;  %v14431_v62 = vld [vmem:[#allocation2 + $0x60] sm:$0xf] }
 0x2fd   : > { %8607 = vmatmul.mubr.bf16.gmra.mrb[184].mxu0 %v9820_v58  ;;  %v9804_v19 = vcombine.low %v5546_v47, %v5556_v22  ;;  %v5569_v45 = vrot.slane %v5567_v48, 5  ;;  %v5573_v37 = vrot.slane %v5571_v16, 4  ;;  %v5888_v1 = vrot.slane %v14410_v34, 5  ;;  %v5781_v29 = vld [vmem:[#allocation2 + $0x60] sm:$0xe] }
 0x2fe   : > { %8614 = vmatprep.mubr.bf16.mxu0 %v9837_v2  ;;  %v5564_v21 = vor.u32 %v5563_v44, %v5560_v7  ;;  %v5579_v27 = vrot.slane %v5577_v15, 5  ;;  %v5891_v61 = vrot.slane %v5380_v18, 5  ;;  %v9789_v38 = vcombine.low %v14404_v12, %v14410_v34  ;;  %v14437_v4 = vld [vmem:[#allocation2 + $0x64] sm:$0xf] }
 0x2ff   : > { %8445 = vmatprep.mubr.bf16.mxu1 %v9804_v19  ;;  %v5574_v32 = vor.u32 %v5573_v37, %v5569_v45  ;;  %v5889_v55 = vsel %vm11642_vm10, %v9741_v11, %v5888_v1  ;;  %v5890_v59 = vrot.slane %v5888_v1, 4  ;;  %v6190_v2 = vshrl.u32 %v5965_v0, 16 }
 0x300   : > { %8446 = vmatmul.mubr.bf16.gmra.mrb[152].mxu1 %v9788_v3  ;;  %v5565_v49 = vrot.slane %v5564_v21, 4  ;;  %v6193_v43 = vshll.u32 %v5965_v0, 16  ;;  %v9838_v18 = vcombine.low %v5965_v0, %v14427_v35  ;;  %v5582_v47 = vshrl.u32 %v14431_v62, 16  ;;  %v5967_v0 = vld [vmem:[#allocation2 + $0x78] sm:$0xf] }
 0x301   : > { %v5575_v12 = vrot.slane %v5574_v32, 4  ;;  %v5892_v34 = vsel %vm11642_vm10, %v5890_v59, %v5891_v61  ;;  %v14441_v58 = vrot.slane %v6190_v2, 4  ;;  %v5585_v16 = vshll.u32 %v14431_v62, 16  ;;  %v14454_v59 = vld [vmem:[#allocation2 + $0x7c] sm:$0xf] }
 0x302   : > { %v5570_v3 = vsel %vm11648_vm11, %v5565_v49, %v5569_v45  ;;  %v9821_v7 = vcombine.low %v5889_v55, %v5892_v34  ;;  %v14446_v48 = vrot.slane %v6193_v43, 5  ;;  %v5584_v44 = vrot.slane %v5582_v47, 4 }
 0x303   : > { %v5580_v22 = vsel %vm11648_vm11, %v5575_v12, %v5579_v27  ;;  %v5591_v15 = vshll.u32 %v14437_v4, 16  ;;  %v5595_v11 = vshrl.u32 %v14437_v4, 16  ;;  %v5587_v37 = vrot.slane %v5585_v16, 5  ;;  %v14458_v12 = vld [vmem:[#allocation2 + $0x6c] sm:$0xf] }
 0x304   : > { %v9805_v19 = vcombine.low %v5570_v3, %v5580_v22  ;;  %v5601_v1 = vshll.u32 %v5381_v24, 16  ;;  %v9742_v21 = vrot.slane %v5781_v29, 9  ;;  %v5895_v32 = vrot.slane %v14437_v4, 5  ;;  %v14462_v3 = vld [vmem:[#allocation2 + $0x70] sm:$0xf] }
 0x305   : > { %8615 = vmatmul.mubr.bf16.gmra.mrb[188].mxu0 %v9821_v7  ;;  %v5593_v45 = vrot.slane %v5591_v15, 5  ;;  %v5597_v61 = vrot.slane %v5595_v11, 4  ;;  %v5898_v55 = vrot.slane %v5381_v24, 5  ;;  %v5588_v27 = vor.u32 %v5587_v37, %v5584_v44  ;;  %v14480_v16 = vld [vmem:[#allocation2 + $0x88] sm:$0xf] }
 0x306   : > { %8622 = vmatprep.mubr.bf16.mxu0 %v9838_v18  ;;  %8453 = vmatprep.mubr.bf16.mxu1 %v9805_v19  ;;  %v5603_v2 = vrot.slane %v5601_v1, 5  ;;  %v9790_v49 = vcombine.low %v14431_v62, %v14437_v4  ;;  %v6214_v43 = vshrl.u32 %v5967_v0, 16  ;;  %v5896_v29 = vsel %vm11642_vm10, %v9742_v21, %v5895_v32  ;;  %v5382_v62 = vld [vmem:[#allocation2 + $0x74] sm:$0x1]  ;;  %v5782_v19 = vld [vmem:[#allocation2 + $0x6c] sm:$0xe] }
 0x307   : > { %v5598_v34 = vor.u32 %v5597_v61, %v5593_v45  ;;  %v5897_v18 = vrot.slane %v5895_v32, 4  ;;  %v6217_v47 = vshll.u32 %v5967_v0, 16  ;;  %v5589_v24 = vrot.slane %v5588_v27, 4  ;;  %v5969_v27 = vld [vmem:[#allocation2 + $0x84] sm:$0xf]  ;;  %16018 = vst [vmem:[#allocation37_spill] sm:$0xff] %v14480_v16 }
 0x308   : > { %8454 = vmatmul.mubr.bf16.gmra.mrb[156].mxu1 %v9789_v38  ;;  %v14464_v7 = vrot.slane %v6214_v43, 4  ;;  %v9839_v22 = vcombine.low %v5967_v0, %v14454_v59  ;;  %v5606_v11 = vshrl.u32 %v14458_v12, 16  ;;  %v5609_v1 = vshll.u32 %v14458_v12, 16 }
 0x309   : > { %v5599_v4 = vrot.slane %v5598_v34, 4  ;;  %v5899_v44 = vsel %vm11642_vm10, %v5897_v18, %v5898_v55  ;;  %v14470_v15 = vrot.slane %v6217_v47, 5  ;;  %v5594_v38 = vsel %vm11648_vm11, %v5589_v24, %v5593_v45 }
 0x30a   : > { %v9822_v37 = vcombine.low %v5896_v29, %v5899_v44  ;;  %v5615_v21 = vshll.u32 %v14462_v3, 16  ;;  %v5608_v61 = vrot.slane %v5606_v11, 4  ;;  %v5619_v32 = vshrl.u32 %v14462_v3, 16 }
 0x30b   : > { %v5604_v0 = vsel %vm11648_vm11, %v5599_v4, %v5603_v2  ;;  %v5625_v55 = vshll.u32 %v5382_v62, 16  ;;  %v5611_v34 = vrot.slane %v5609_v1, 5  ;;  %v9743_v47 = vrot.slane %v5782_v19, 9 }
 0x30c   : > { %v9806_v43 = vcombine.low %v5594_v38, %v5604_v0  ;;  %v5617_v18 = vrot.slane %v5615_v21, 5  ;;  %v5621_v45 = vrot.slane %v5619_v32, 4  ;;  %v5902_v24 = vrot.slane %v14462_v3, 5  ;;  %v14485_v38 = vld [vmem:[#allocation2 + $0x78] sm:$0xf] }
 0x30d   : > { %8623 = vmatmul.mubr.bf16.gmra.mrb[192].mxu0 %v9822_v37  ;;  %v5627_v29 = vrot.slane %v5625_v55, 5  ;;  %v5905_v44 = vrot.slane %v5382_v62, 5  ;;  %v5612_v2 = vor.u32 %v5611_v34, %v5608_v61  ;;  %v9791_v4 = vcombine.low %v14458_v12, %v14462_v3  ;;  %v14490_v21 = vld [vmem:[#allocation2 + $0x7c] sm:$0xf]  ;;  %v5383_v3 = vld [vmem:[#allocation2 + $0x80] sm:$0x1] }
 0x30e   : > { %8630 = vmatprep.mubr.bf16.mxu0 %v9839_v22  ;;  %8461 = vmatprep.mubr.bf16.mxu1 %v9806_v43  ;;  %v6238_v11 = vshrl.u32 %v5969_v27, 16  ;;  %v6241_v39 = vshll.u32 %v5969_v27, 16  ;;  %v5622_v37 = vor.u32 %v5621_v45, %v5617_v18  ;;  %v5903_v19 = vsel %vm11642_vm10, %v9743_v47, %v5902_v24  ;;  %v5783_v47 = vld [vmem:[#allocation2 + $0x78] sm:$0xe] }
 0x30f   : > { %v5904_v1 = vrot.slane %v5902_v24, 4  ;;  %v5613_v62 = vrot.slane %v5612_v2, 4  ;;  %v9840_v12 = vcombine.low %v5969_v27, %v14480_v16  ;;  %v5630_v43 = vshrl.u32 %v14485_v38, 16 }
 0x310   : > { %8462 = vmatmul.mubr.bf16.gmra.mrb[160].mxu1 %v9790_v49  ;;  %v14492_v0 = vrot.slane %v6238_v11, 4  ;;  %v14494_v61 = vrot.slane %v6241_v39, 5  ;;  %v5623_v32 = vrot.slane %v5622_v37, 4  ;;  %v5633_v34 = vshll.u32 %v14485_v38, 16 }
 0x311   : > { %v5906_v55 = vsel %vm11642_vm10, %v5904_v1, %v5905_v44  ;;  %v5618_v49 = vsel %vm11648_vm11, %v5613_v62, %v5617_v18  ;;  %v5639_v24 = vshll.u32 %v14490_v21, 16  ;;  %v5643_v39 = vshrl.u32 %v14490_v21, 16  ;;  %v5971_v44 = vld [vmem:[#allocation2 + $0x90] sm:$0xf] }
 0x312   : > { %16019 = vst [vmem:[#allocation15_spill] sm:$0xff] %v14494_v61  ;;  %v9823_v45 = vcombine.low %v5903_v19, %v5906_v55  ;;  %v5628_v27 = vsel %vm11648_vm11, %v5623_v32, %v5627_v29  ;;  %v5632_v2 = vrot.slane %v5630_v43, 4  ;;  %v5635_v11 = vrot.slane %v5633_v34, 5  ;;  %v14512_v34 = vld [vmem:[#allocation2 + $0x84] sm:$0xf] }
 0x313   : > { %v5649_v37 = vshll.u32 %v5383_v3, 16  ;;  %v9807_v1 = vcombine.low %v5618_v49, %v5628_v27  ;;  %v5641_v22 = vrot.slane %v5639_v24, 5  ;;  %v5645_v26 = vrot.slane %v5643_v39, 4  ;;  %v14517_v24 = vld [vmem:[#allocation2 + $0x88] sm:$0xf] }
 0x314   : > { %v9744_v14 = vrot.slane %v5783_v47, 9  ;;  %v5636_v18 = vor.u32 %v5635_v11, %v5632_v2  ;;  %v5909_v62 = vrot.slane %v14490_v21, 5  ;;  %v5912_v55 = vrot.slane %v5383_v3, 5 }
 0x315   : > { %8631 = vmatmul.mubr.bf16.gmra.mrb[196].mxu0 %v9823_v45  ;;  %v5651_v19 = vrot.slane %v5649_v37, 5  ;;  %8469 = vmatprep.mubr.bf16.mxu1 %v9807_v1  ;;  %v5646_v63 = vor.u32 %v5645_v26, %v5641_v22  ;;  %v9792_v29 = vcombine.low %v14485_v38, %v14490_v21  ;;  %v6262_v32 = vshrl.u32 %v5971_v44, 16  ;;  %v5384_v21 = vld [vmem:[#allocation2 + $0x8c] sm:$0x1]  ;;  %v5784_v37 = vld [vmem:[#allocation2 + $0x84] sm:$0xe] }
 0x316   : > { %8638 = vmatprep.mubr.bf16.mxu0 %v9840_v12  ;;  %v6265_v43 = vshll.u32 %v5971_v44, 16  ;;  %v5637_v49 = vrot.slane %v5636_v18, 4  ;;  %v5910_v47 = vsel %vm11642_vm10, %v9744_v14, %v5909_v62  ;;  %v5911_v45 = vrot.slane %v5909_v62, 4 }
 0x317   : > { %v5647_v3 = vrot.slane %v5646_v63, 4  ;;  %v14519_v39 = vrot.slane %v6262_v32, 4  ;;  %v9841_v38 = vcombine.low %v5971_v44, %v14507_v5  ;;  %v5654_v2 = vshrl.u32 %v14512_v34, 16 }
 0x318   : > { %8470 = vmatmul.mubr.bf16.gmra.mrb[164].mxu1 %v9791_v4  ;;  %v14521_v26 = vrot.slane %v6265_v43, 5  ;;  %v5642_v27 = vsel %vm11648_vm11, %v5637_v49, %v5641_v22  ;;  %v5913_v14 = vsel %vm11642_vm10, %v5911_v45, %v5912_v55  ;;  %v5657_v11 = vshll.u32 %v14512_v34, 16  ;;  %v5973_v43 = vld [vmem:[#allocation2 + $0x9c] sm:$0xf] }
 0x319   : > { %16021 = vst [vmem:[#allocation8_spill] sm:$0xff] %v14519_v39  ;;  %v5652_v63 = vsel %vm11648_vm11, %v5647_v3, %v5651_v19  ;;  %v9824_v4 = vcombine.low %v5910_v47, %v5913_v14  ;;  %v5663_v1 = vshll.u32 %v14517_v24, 16  ;;  %v5667_v44 = vshrl.u32 %v14517_v24, 16  ;;  %v14539_v14 = vld [vmem:[#allocation2 + $0x90] sm:$0xf] }
 0x31a   : > { %16022 = vst [vmem:[#allocation39_spill] sm:$0xff] %v14521_v26  ;;  %v9808_v18 = vcombine.low %v5642_v27, %v5652_v63  ;;  %v5656_v62 = vrot.slane %v5654_v2, 4  ;;  %v5659_v32 = vrot.slane %v5657_v11, 5  ;;  %v5673_v22 = vshll.u32 %v5384_v21, 16 }
 0x31b   : > { %v5665_v55 = vrot.slane %v5663_v1, 5  ;;  %v5669_v49 = vrot.slane %v5667_v44, 4  ;;  %v9745_v45 = vrot.slane %v5784_v37, 9  ;;  %v5916_v12 = vrot.slane %v14517_v24, 5 }
 0x31c   : > { %8477 = vmatprep.mubr.bf16.mxu1 %v9808_v18  ;;  %v5660_v19 = vor.u32 %v5659_v32, %v5656_v62  ;;  %v5675_v47 = vrot.slane %v5673_v22, 5  ;;  %v5919_v3 = vrot.slane %v5384_v21, 5  ;;  %v9793_v27 = vcombine.low %v14512_v34, %v14517_v24  ;;  %v14545_v62 = vld [vmem:[#allocation2 + $0x94] sm:$0xf]  ;;  %v5385_v32 = vld [vmem:[#allocation2 + $0x98] sm:$0x1] }
 0x31d   : > { %8639 = vmatmul.mubr.bf16.gmra.mrb[200].mxu0 %v9824_v4  ;;  %v5670_v2 = vor.u32 %v5669_v49, %v5665_v55  ;;  %v5917_v11 = vsel %vm11642_vm10, %v9745_v45, %v5916_v12  ;;  %v5918_v63 = vrot.slane %v5916_v12, 4  ;;  %v6286_v37 = vshrl.u32 %v5973_v43, 16  ;;  %v5785_v4 = vld [vmem:[#allocation2 + $0x90] sm:$0xe] }
 0x31e   : > { %8646 = vmatprep.mubr.bf16.mxu0 %v9841_v38  ;;  %v5661_v1 = vrot.slane %v5660_v19, 4  ;;  %v6289_v44 = vshll.u32 %v5973_v43, 16  ;;  %v9842_v38 = vcombine.low %v5973_v43, %v14535_v60  ;;  %v5678_v12 = vshrl.u32 %v14539_v14, 16 }
 0x31f   : > { %v5671_v21 = vrot.slane %v5670_v2, 4  ;;  %v5920_v34 = vsel %vm11642_vm10, %v5918_v63, %v5919_v3  ;;  %v14549_v24 = vrot.slane %v6286_v37, 4  ;;  %v5681_v43 = vshll.u32 %v14539_v14, 16  ;;  %v5975_v63 = vld [vmem:[#allocation2 + $0xa8] sm:$0xf] }
 0x320   : > { %8478 = vmatmul.mubr.bf16.gmra.mrb[168].mxu1 %v9792_v29  ;;  %v5666_v22 = vsel %vm11648_vm11, %v5661_v1, %v5665_v55  ;;  %v9825_v49 = vcombine.low %v5917_v11, %v5920_v34  ;;  %v14554_v45 = vrot.slane %v6289_v44, 5  ;;  %v5680_v19 = vrot.slane %v5678_v12, 4  ;;  %v14562_v34 = vld [vmem:[#allocation2 + $0xac] sm:$0xf] }
 0x321   : > { %16024 = vst [vmem:[#allocation38_spill] sm:$0xff] %v14549_v24  ;;  %v5676_v29 = vsel %vm11648_vm11, %v5671_v21, %v5675_v47  ;;  %v5687_v2 = vshll.u32 %v14545_v62, 16  ;;  %v5691_v3 = vshrl.u32 %v14545_v62, 16  ;;  %v5683_v18 = vrot.slane %v5681_v43, 5  ;;  %16026 = vst [vmem:[#allocation19_spill] sm:$0xff] %v14562_v34 }
 0x322   : > { %16025 = vst [vmem:[#allocation18_spill] sm:$0xff] %v14554_v45  ;;  %v9809_v37 = vcombine.low %v5666_v22, %v5676_v29  ;;  %v5697_v17 = vshll.u32 %v5385_v32, 16  ;;  %v9746_v60 = vrot.slane %v5785_v4, 9  ;;  %v5923_v1 = vrot.slane %v14545_v62, 5  ;;  %v14566_v22 = vld [vmem:[#allocation2 + $0x9c] sm:$0xf] }
 0x323   : > { %v5689_v55 = vrot.slane %v5687_v2, 5  ;;  %v5693_v11 = vrot.slane %v5691_v3, 4  ;;  %v5926_v44 = vrot.slane %v5385_v32, 5  ;;  %v5684_v47 = vor.u32 %v5683_v18, %v5680_v19  ;;  %v14570_v2 = vld [vmem:[#allocation2 + $0xa0] sm:$0xf] }
 0x324   : > { %8485 = vmatprep.mubr.bf16.mxu1 %v9809_v37  ;;  %v5699_v21 = vrot.slane %v5697_v17, 5  ;;  %v9794_v12 = vcombine.low %v14539_v14, %v14545_v62  ;;  %v6310_v45 = vshrl.u32 %v5975_v63, 16  ;;  %v5924_v4 = vsel %vm11642_vm10, %v9746_v60, %v5923_v1  ;;  %v5786_v37 = vld [vmem:[#allocation2 + $0x9c] sm:$0xe] }
 0x325   : > { %8647 = vmatmul.mubr.bf16.gmra.mrb[204].mxu0 %v9825_v49  ;;  %v5694_v43 = vor.u32 %v5693_v11, %v5689_v55  ;;  %v5925_v49 = vrot.slane %v5923_v1, 4  ;;  %v6313_v29 = vshll.u32 %v5975_v63, 16  ;;  %v5685_v32 = vrot.slane %v5684_v47, 4 }
 0x326   : > { %8654 = vmatprep.mubr.bf16.mxu0 %v9842_v38  ;;  %v14572_v3 = vrot.slane %v6310_v45, 4  ;;  %v9843_v17 = vcombine.low %v5975_v63, %v14562_v34  ;;  %v5386_v38 = vld [vmem:[#allocation2 + $0xa4] sm:$0x1]  ;;  %v5702_v60 = vshrl.u32 %v14566_v22, 16  ;;  %v5705_v1 = vshll.u32 %v14566_v22, 16 }
 0x327   : > { %v5695_v14 = vrot.slane %v5694_v43, 4  ;;  %v5927_v62 = vsel %vm11642_vm10, %v5925_v49, %v5926_v44  ;;  %v14578_v19 = vrot.slane %v6313_v29, 5  ;;  %v5690_v11 = vsel %vm11648_vm11, %v5685_v32, %v5689_v55  ;;  %v5977_v49 = vld [vmem:[#allocation2 + $0xb4] sm:$0xf] }
 0x328   : > { %16027 = vst [vmem:[#allocation20_spill] sm:$0xff] %v14572_v3  ;;  %8486 = vmatmul.mubr.bf16.gmra.mrb[172].mxu1 %v9793_v27  ;;  %v9826_v45 = vcombine.low %v5924_v4, %v5927_v62  ;;  %v5711_v47 = vshll.u32 %v14570_v2, 16  ;;  %v5704_v63 = vrot.slane %v5702_v60, 4  ;;  %v5715_v43 = vshrl.u32 %v14570_v2, 16  ;;  %v14588_v3 = vld [vmem:[#allocation2 + $0xb8] sm:$0xf] }
 0x329   : > { %16028 = vst [vmem:[#allocation21_spill] sm:$0xff] %v14578_v19  ;;  %v5700_v27 = vsel %vm11648_vm11, %v5695_v14, %v5699_v21  ;;  %v5721_v44 = vshll.u32 %v5386_v38, 16  ;;  %v5707_v18 = vrot.slane %v5705_v1, 5  ;;  %v9747_v19 = vrot.slane %v5786_v37, 9  ;;  %16029 = vst [vmem:[#allocation22_spill] sm:$0xff] %v14588_v3 }
 0x32a   : > { %v9810_v29 = vcombine.low %v5690_v11, %v5700_v27  ;;  %v5713_v34 = vrot.slane %v5711_v47, 5  ;;  %v5717_v55 = vrot.slane %v5715_v43, 4  ;;  %v5930_v32 = vrot.slane %v14570_v2, 5  ;;  %v14593_v11 = vld [vmem:[#allocation2 + $0xa8] sm:$0xf] }
 0x32b   : > { %v5723_v4 = vrot.slane %v5721_v44, 5  ;;  %v5933_v62 = vrot.slane %v5386_v38, 5  ;;  %v5708_v21 = vor.u32 %v5707_v18, %v5704_v63  ;;  %v9795_v14 = vcombine.low %v14566_v22, %v14570_v2  ;;  %v14598_v27 = vld [vmem:[#allocation2 + $0xac] sm:$0xf]  ;;  %v5387_v2 = vld [vmem:[#allocation2 + $0xb0] sm:$0x1] }
 0x32c   : > { %8493 = vmatprep.mubr.bf16.mxu1 %v9810_v29  ;;  %v6334_v60 = vshrl.u32 %v5977_v49, 16  ;;  %v6337_v24 = vshll.u32 %v5977_v49, 16  ;;  %v5718_v1 = vor.u32 %v5717_v55, %v5713_v34  ;;  %v5931_v37 = vsel %vm11642_vm10, %v9747_v19, %v5930_v32  ;;  %v5787_v29 = vld [vmem:[#allocation2 + $0xa8] sm:$0xe] }
 0x32d   : > { %8655 = vmatmul.mubr.bf16.gmra.mrb[208].mxu0 %v9826_v45  ;;  %v5932_v45 = vrot.slane %v5930_v32, 4  ;;  %v5709_v38 = vrot.slane %v5708_v21, 4  ;;  %v9844_v22 = vcombine.low %v5977_v49, %v14588_v3  ;;  %v5726_v19 = vshrl.u32 %v14593_v11, 16 }
 0x32e   : > { %8662 = vmatprep.mubr.bf16.mxu0 %v9843_v17  ;;  %v14600_v43 = vrot.slane %v6334_v60, 4  ;;  %v14602_v18 = vrot.slane %v6337_v24, 5  ;;  %v5719_v17 = vrot.slane %v5718_v1, 4  ;;  %v5729_v44 = vshll.u32 %v14593_v11, 16 }
 0x32f   : > { %v5934_v63 = vsel %vm11642_vm10, %v5932_v45, %v5933_v62  ;;  %v5714_v55 = vsel %vm11648_vm11, %v5709_v38, %v5713_v34  ;;  %v5735_v24 = vshll.u32 %v14598_v27, 16  ;;  %v5739_v21 = vshrl.u32 %v14598_v27, 16  ;;  %v5979_v62 = vld [vmem:[#allocation2 + $0xc0] sm:$0xf] }
 0x330   : > { %16030 = vst [vmem:[#allocation27_spill] sm:$0xff] %v14600_v43  ;;  %16031 = vst [vmem:[#allocation23_spill] sm:$0xff] %v14602_v18  ;;  %8494 = vmatmul.mubr.bf16.gmra.mrb[176].mxu1 %v9794_v12  ;;  %v9827_v32 = vcombine.low %v5931_v37, %v5934_v63  ;;  %v5724_v12 = vsel %vm11648_vm11, %v5719_v17, %v5723_v4  ;;  %v5728_v49 = vrot.slane %v5726_v19, 4  ;;  %v5731_v60 = vrot.slane %v5729_v44, 5  ;;  %v14615_v43 = vld [vmem:[#allocation2 + $0xc4] sm:$0xf] }
 0x331   : > { %v5745_v1 = vshll.u32 %v5387_v2, 16  ;;  %v9811_v45 = vcombine.low %v5714_v55, %v5724_v12  ;;  %v5737_v47 = vrot.slane %v5735_v24, 5  ;;  %v5741_v3 = vrot.slane %v5739_v21, 4  ;;  %16032 = vst [vmem:[#allocation24_spill] sm:$0xff] %v14615_v43  ;;  %v14620_v44 = vld [vmem:[#allocation2 + $0xb4] sm:$0xf] }
 0x332   : > { %v9748_v18 = vrot.slane %v5787_v29, 9  ;;  %v5732_v34 = vor.u32 %v5731_v60, %v5728_v49  ;;  %v5937_v38 = vrot.slane %v14598_v27, 5  ;;  %v5940_v63 = vrot.slane %v5387_v2, 5  ;;  %v14625_v21 = vld [vmem:[#allocation2 + $0xb8] sm:$0xf] }
 0x333   : > { %v5747_v37 = vrot.slane %v5745_v1, 5  ;;  %8501 = vmatprep.mubr.bf16.mxu1 %v9811_v45  ;;  %v5742_v5 = vor.u32 %v5741_v3, %v5737_v47  ;;  %v9796_v4 = vcombine.low %v14593_v11, %v14598_v27  ;;  %v6358_v17 = vshrl.u32 %v5979_v62, 16  ;;  %v5388_v27 = vld [vmem:[#allocation2 + $0xbc] sm:$0x1]  ;;  %v5788_v1 = vld [vmem:[#allocation2 + $0xb4] sm:$0xe] }
 0x334   : > { %v6361_v19 = vshll.u32 %v5979_v62, 16  ;;  %v5733_v55 = vrot.slane %v5732_v34, 4  ;;  %v5938_v29 = vsel %vm11642_vm10, %v9748_v18, %v5937_v38  ;;  %v9845_v11 = vcombine.low %v5979_v62, %v14615_v43 }
 0x335   : > { %8663 = vmatmul.mubr.bf16.gmra.mrb[212].mxu0 %v9827_v32  ;;  %v5939_v32 = vrot.slane %v5937_v38, 4  ;;  %v5743_v2 = vrot.slane %v5742_v5, 4  ;;  %v14627_v12 = vrot.slane %v6358_v17, 4  ;;  %v5750_v60 = vshrl.u32 %v14620_v44, 16 }
 0x336   : > { %8670 = vmatprep.mubr.bf16.mxu0 %v9844_v22  ;;  %v14629_v3 = vrot.slane %v6361_v19, 5  ;;  %v14632_v22 = vpop.f32.mrb[128].mxu1  ;;  %v5738_v49 = vsel %vm11648_vm11, %v5733_v55, %v5737_v47  ;;  %v5753_v5 = vshll.u32 %v14620_v44, 16  ;;  %v5759_v38 = vshll.u32 %v14625_v21, 16 }
 0x337   : > { %16033 = vst [vmem:[#allocation25_spill] sm:$0xff] %v14627_v12  ;;  %16035 = vst [vmem:[#allocation28_spill] sm:$0xff] %v14632_v22  ;;  %v5941_v18 = vsel %vm11642_vm10, %v5939_v32, %v5940_v63  ;;  %v14640_v45 = vpop.f32.mrb[129].mxu1  ;;  %v5748_v62 = vsel %vm11648_vm11, %v5743_v2, %v5747_v37  ;;  %v5752_v19 = vrot.slane %v5750_v60, 4  ;;  %v5769_v55 = vshll.u32 %v5388_v27, 16 }
 0x338   : > { %16034 = vst [vmem:[#allocation26_spill] sm:$0xff] %v14629_v3  ;;  %8502 = vmatmul.mubr.bf16.gmra.mrb[180].mxu1 %v9795_v14  ;;  %16036 = vst [vmem:[#allocation29_spill] sm:$0xff] %v14640_v45  ;;  %v9828_v34 = vcombine.low %v5938_v29, %v5941_v18  ;;  %v5763_v14 = vshrl.u32 %v14625_v21, 16  ;;  %v14646_v17 = vpop.f32.mrb[130].mxu1  ;;  %v9812_v47 = vcombine.low %v5738_v49, %v5748_v62  ;;  %v5755_v63 = vrot.slane %v5753_v5, 5 }
 0x339   : > { %16037 = vst [vmem:[#allocation30_spill] sm:$0xff] %v14646_v17  ;;  %v14648_v32 = vld [vmem:[#allocation2 + $0x18] sm:$0xf]  ;;  %v14650_v24 = vpop.f32.mrb[131].mxu1  ;;  %v5761_v43 = vrot.slane %v5759_v38, 5  ;;  %v9749_v12 = vrot.slane %v5788_v1, 9  ;;  %v9797_v49 = vcombine.low %v14620_v44, %v14625_v21 }
 0x33a   : > { %16038 = vst [vmem:[#allocation31_spill] sm:$0xff] %v14650_v24  ;;  %v5765_v3 = vrot.slane %v5763_v14, 4  ;;  %v5944_v37 = vrot.slane %v14625_v21, 5  ;;  %v14653_v29 = vld [vmem:[#allocation2 + $0x1c] sm:$0xf]  ;;  %8509 = vmatprep.mubr.bf16.mxu1 %v9812_v47  ;;  %v5756_v2 = vor.u32 %v5755_v63, %v5752_v19  ;;  %v5771_v18 = vrot.slane %v5769_v55, 5 }
 0x33b   : > { %v5947_v26 = vrot.slane %v5388_v27, 5  ;;  %v6589_v60 = vld [vmem:[#allocation2 + $0x20] sm:$0x1]  ;;  %v6606_v1 = vshrl.u32 %v14648_v32, 16  ;;  %v6609_v39 = vshll.u32 %v14648_v32, 16  ;;  %v6619_v47 = vshrl.u32 %v14653_v29, 16 }
 0x33c   : > { %v5766_v5 = vor.u32 %v5765_v3, %v5761_v43  ;;  %v5945_v62 = vsel %vm11642_vm10, %v9749_v12, %v5944_v37  ;;  %v5946_v38 = vrot.slane %v5944_v37, 4  ;;  %v5757_v14 = vrot.slane %v5756_v2, 4  ;;  %v5981_v27 = vld [vmem:[#allocation2 + $0x14] sm:$0x1] }
 0x33d   : > { %8671 = vmatmul.mubr.bf16.gmra.mrb[216].mxu0 %v9828_v34  ;;  %v6615_v34 = vshll.u32 %v14653_v29, 16  ;;  %v6608_v21 = vrot.slane %v6606_v1, 4  ;;  %v6625_v3 = vshll.u32 %v6589_v60, 16  ;;  %v6611_v55 = vrot.slane %v6609_v39, 5  ;;  %v14669_v60 = vld [vmem:[#allocation2 + $0x24] sm:$0xf] }
 0x33e   : > { %8678 = vmatprep.mubr.bf16.mxu0 %v9845_v11  ;;  %v5767_v19 = vrot.slane %v5766_v5, 4  ;;  %v5948_v44 = vsel %vm11642_vm10, %v5946_v38, %v5947_v26  ;;  %v6381_v11 = vld [vmem:[#allocation2 + $0xc] sm:$0xe]  ;;  %v5762_v12 = vsel %vm11648_vm11, %v5757_v14, %v5761_v43  ;;  %v6621_v24 = vrot.slane %v6619_v47, 4  ;;  %v11402_v26 = vld [vmem:[#allocation2 + $0x10] sm:$0xf] }
 0x33f   : > { %v9829_v63 = vcombine.low %v5945_v62, %v5948_v44  ;;  %v6617_v37 = vrot.slane %v6615_v34, 5  ;;  %v6627_v17 = vrot.slane %v6625_v3, 5  ;;  %v6017_v45 = vshll.u32 %v5981_v27, 16  ;;  %v14673_v43 = vld [vmem:[#allocation2 + $0x28] sm:$0xf] }
 0x340   : > { %8510 = vmatmul.mubr.bf16.gmra.mrb[184].mxu1 %v9796_v4  ;;  %v5772_v2 = vsel %vm11648_vm11, %v5767_v19, %v5771_v18  ;;  %v6612_v22 = vor.u32 %v6611_v55, %v6608_v21  ;;  %v9750_v16 = vrot.slane %v6381_v11, 9  ;;  %v6447_v38 = vrot.slane %v11402_v26, 5  ;;  %v6382_v3 = vld [vmem:[#allocation2 + $0x18] sm:$0xe] }
 0x341   : > { %v9813_v5 = vcombine.low %v5762_v12, %v5772_v2  ;;  %v6622_v4 = vor.u32 %v6621_v24, %v6617_v37  ;;  %v6019_v1 = vrot.slane %v6017_v45, 5  ;;  %v6450_v61 = vrot.slane %v5981_v27, 5 }
 0x342   : > { %v9878_v39 = vcombine.low %v14648_v32, %v14653_v29  ;;  %v6613_v18 = vrot.slane %v6612_v22, 4  ;;  %v6448_v62 = vsel %vm11642_vm10, %v9750_v16, %v6447_v38  ;;  %v6449_v14 = vrot.slane %v6447_v38, 4  ;;  %v6590_v32 = vld [vmem:[#allocation2 + $0x2c] sm:$0x1] }
 0x343   : > { %8517 = vmatprep.mubr.bf16.mxu1 %v9813_v5  ;;  %v6010_v34 = vsel %vm11648_vm11, %v13977_v40, %v13971_v25  ;;  %v6623_v24 = vrot.slane %v6622_v4, 4  ;;  %v6020_v45 = vsel %vm11648_vm11, %v14002_v53, %v6019_v1  ;;  %v6630_v29 = vshrl.u32 %v14669_v60, 16  ;;  %v6990_v25 = vld [vmem:[#allocation2 + $0x24] sm:$0xe]  ;;  %v11403_v1 = vld [vmem:[#allocation2 + $0x1c] sm:$0xf] }
 0x344   : > { %v6633_v47 = vshll.u32 %v14669_v60, 16  ;;  %v6618_v22 = vsel %vm11648_vm11, %v6613_v18, %v6617_v37  ;;  %v6451_v16 = vsel %vm11642_vm10, %v6449_v14, %v6450_v61  ;;  %v9846_v27 = vcombine.low %v6010_v34, %v6020_v45  ;;  %v5982_v37 = vld [vmem:[#allocation2 + $0x20] sm:$0x1] }
 0x345   : > { %8679 = vmatmul.mubr.bf16.gmra.mrb[220].mxu0 %v9829_v63  ;;  %v6639_v19 = vshll.u32 %v14673_v43, 16  ;;  %v6628_v40 = vsel %vm11648_vm11, %v6623_v24, %v6627_v17  ;;  %v9862_v44 = vcombine.low %v6448_v62, %v6451_v16  ;;  %v6632_v53 = vrot.slane %v6630_v29, 4  ;;  %v16039_v16 = vld [vmem:[#allocation10_spill] sm:$0xff] }
 0x346   : > { %v6635_v21 = vrot.slane %v6633_v47, 5  ;;  %v9894_v11 = vcombine.low %v6618_v22, %v6628_v40  ;;  %v6643_v63 = vshrl.u32 %v14673_v43, 16  ;;  %v6649_v55 = vshll.u32 %v6590_v32, 16  ;;  %v14713_v40 = vld [vmem:[#allocation2 + $0x34] sm:$0xf] }
 0x347   : > { %v6641_v12 = vrot.slane %v6639_v19, 5  ;;  %v9767_v2 = vrot.slane %v6990_v25, 9  ;;  %v7062_v5 = vrot.slane %v14673_v43, 5  ;;  %v7065_v26 = vrot.slane %v6590_v32, 5 }
 0x348   : > { %8518 = vmatmul.mubr.bf16.gmra.mrb[188].mxu1 %v9797_v49  ;;  %v6636_v61 = vor.u32 %v6635_v21, %v6632_v53  ;;  %8880 = vmatprep.mubr.bf16.mxu0 %v9894_v11  ;;  %v6645_v38 = vrot.slane %v6643_v63, 4  ;;  %v6651_v17 = vrot.slane %v6649_v55, 5  ;;  %v9751_v4 = vrot.slane %v6382_v3, 9  ;;  %v11337_v11 = vld [vmem:[%s15831_s2 + $0x208] sm:$0xff]  }
 0x349   : > { %8719 = vmatprep.mubr.bf16.mxu1 %v9862_v44  ;;  %v6454_v18 = vrot.slane %v11403_v1, 5  ;;  %v14697_v49 = vsel %vm11642_vm10, %v9767_v2, %v7062_v5  ;;  %v7064_v14 = vrot.slane %v7062_v5, 4  ;;  %v6457_v34 = vrot.slane %v5982_v37, 5  ;;  %v6591_v5 = vld [vmem:[#allocation2 + $0x38] sm:$0x1] }
 0x34a   : > { %v6637_v62 = vrot.slane %v6636_v61, 4  ;;  %v6646_v24 = vor.u32 %v6645_v38, %v6641_v12  ;;  %v9879_v32 = vcombine.low %v14669_v60, %v14673_v43  ;;  %v6028_v19 = vor.u32 %v16039_v16, %v13999_v33  ;;  %v16040_v43 = vld [vmem:[#allocation13_spill] sm:$0xff]  ;;  %v6383_v61 = vld [vmem:[#allocation2 + $0x24] sm:$0xe] }
 0x34b   : > { %v6455_v45 = vsel %vm11642_vm10, %v9751_v4, %v6454_v18  ;;  %v6456_v29 = vrot.slane %v6454_v18, 4  ;;  %v14707_v22 = vsel %vm11642_vm10, %v7064_v14, %v7065_v26  ;;  %v6031_v25 = vshll.u32 %v11403_v1, 16  ;;  %v11404_v18 = vld [vmem:[%s15831_s2 + $0x200] sm:$0xff]  }
 0x34c   : > { %v6642_v47 = vsel %vm11648_vm11, %v6637_v62, %v6641_v12  ;;  %v6647_v44 = vrot.slane %v6646_v24, 4  ;;  %v16041_v21 = vshrl.u32 %v16040_v43, 16  ;;  %v6029_v12 = vrot.slane %v6028_v19, 4 }
 0x34d   : > { %8881 = vmatmul.mubr.bf16.vlgmr.msra.gmra.mrb[224].mxu0 %v9878_v39  ;;  %v14711_v39 = vld [vmem:[#allocation2 + $0x30] sm:$0xf]  ;;  %v6458_v60 = vsel %vm11642_vm10, %v6456_v29, %v6457_v34  ;;  %v6033_v63 = vrot.slane %v6031_v25, 5  ;;  %v6041_v55 = vshll.u32 %v5982_v37, 16  ;;  %v6663_v4 = vshll.u32 %v14713_v40, 16 }
 0x34e   : > { %v6037_v3 = vrot.slane %v16041_v21, 4  ;;  %v9863_v33 = vcombine.low %v6455_v45, %v6458_v60  ;;  %v6652_v2 = vsel %vm11648_vm11, %v6647_v44, %v6651_v17  ;;  %v6654_v26 = vshrl.u32 %v14711_v39, 16  ;;  %v5983_v17 = vld [vmem:[#allocation2 + $0x2c] sm:$0x1]  ;;  %v11340_v29 = vld [vmem:[%s15831_s2 + $0x210] sm:$0xff]  }
 0x34f   : > { %v6657_v38 = vshll.u32 %v14711_v39, 16  ;;  %v9895_v1 = vcombine.low %v6642_v47, %v6652_v2  ;;  %v6043_v62 = vrot.slane %v6041_v55, 5  ;;  %v6665_v24 = vrot.slane %v6663_v4, 5  ;;  %v11405_v25 = vld [vmem:[#allocation2 + $0x28] sm:$0xf] }
 0x350   : > { %8720 = vmatmul.mubr.bf16.vlgmr.msra.gmra.mrb[192].mxu1 %v9846_v27  ;;  %v6034_v27 = vsel %vm11648_vm11, %v6029_v12, %v6033_v63  ;;  %v6038_v37 = vor.u32 %v6037_v3, %v6033_v63  ;;  %v6656_v14 = vrot.slane %v6654_v26, 4  ;;  %v6667_v45 = vshrl.u32 %v14713_v40, 16  ;;  %v14746_v26 = vld [vmem:[#allocation2 + $0x3c] sm:$0xf] }
 0x351   : > { %8727 = vmatprep.mubr.bf16.mxu1 %v9863_v33  ;;  %11061 = vmatpush3.bf16.msra.mxu1 %v11404_v18  ;;  %v6659_v34 = vrot.slane %v6657_v38, 5  ;;  %v6673_v16 = vshll.u32 %v6591_v5, 16  ;;  %v9752_v19 = vrot.slane %v6383_v61, 9  ;;  %v6461_v44 = vrot.slane %v11405_v25, 5  ;;  %v14748_v38 = vld [vmem:[#allocation2 + $0x40] sm:$0xf] }
 0x352   : > { %11062 = vmatprep.subr.bf16.mxu1 %v11337_v11  ;;  %8888 = vmatprep.mubr.bf16.mxu0 %v9895_v1  ;;  %v6039_v47 = vrot.slane %v6038_v37, 4  ;;  %v6669_v43 = vrot.slane %v6667_v45, 4  ;;  %v6464_v21 = vrot.slane %v5983_v17, 5  ;;  %v9880_v3 = vcombine.low %v14711_v39, %v14713_v40  ;;  %v11343_v39 = vld [vmem:[%s15831_s2 + $0x218] sm:$0xff]  }
 0x353   : > { %v6660_v60 = vor.u32 %v6659_v34, %v6656_v14  ;;  %v6675_v12 = vrot.slane %v6673_v16, 5  ;;  %v6462_v63 = vsel %vm11642_vm10, %v9752_v19, %v6461_v44  ;;  %v6463_v55 = vrot.slane %v6461_v44, 4 }
 0x354   : > { %v6044_v33 = vsel %vm11648_vm11, %v6039_v47, %v6043_v62  ;;  %v6670_v5 = vor.u32 %v6669_v43, %v6665_v24  ;;  %v6055_v4 = vshll.u32 %v11405_v25, 16  ;;  %v6065_v18 = vshll.u32 %v5983_v17, 16  ;;  %v11347_v25 = vld [vmem:[%s15831_s2 + $0x220] sm:$0xff]  }
 0x355   : > { %8889 = vmatmul.mubr.bf16.gmra.mrb[228].mxu0 %v9879_v32  ;;  %11063 = vmatpush3.bf16.msra.mxu1 %v11337_v11  ;;  %v9847_v2 = vcombine.low %v6034_v27, %v6044_v33  ;;  %v6661_v61 = vrot.slane %v6660_v60, 4  ;;  %v6052_v32 = vor.u32 %v14127_v51, %v14125_v20  ;;  %v6465_v40 = vsel %vm11642_vm10, %v6463_v55, %v6464_v21  ;;  %v6592_v27 = vld [vmem:[#allocation2 + $0x44] sm:$0x1]  ;;  %v6384_v21 = vld [vmem:[#allocation2 + $0x30] sm:$0xe] }
 0x356   : > { %11064 = vmatprep.subr.bf16.mxu1 %v11340_v29  ;;  %v16042_v11 = vshrl.u32 %v14095_v54, 16  ;;  %v6671_v51 = vrot.slane %v6670_v5, 4  ;;  %v9864_v37 = vcombine.low %v6462_v63, %v6465_v40  ;;  %v6057_v14 = vrot.slane %v6055_v4, 5 }
 0x357   : > { %v6666_v20 = vsel %vm11648_vm11, %v6661_v61, %v6665_v24  ;;  %v6053_v62 = vrot.slane %v6052_v32, 4  ;;  %v6067_v34 = vrot.slane %v6065_v18, 5  ;;  %v6678_v45 = vshrl.u32 %v14746_v26, 16  ;;  %v6992_v24 = vld [vmem:[#allocation2 + $0x3c] sm:$0xe] }
 0x358   : > { %v6061_v1 = vrot.slane %v16042_v11, 4  ;;  %8728 = vmatmul.mubr.bf16.gmra.mrb[196].mxu1 %v9847_v2  ;;  %v6681_v47 = vshll.u32 %v14746_v26, 16  ;;  %v6676_v54 = vsel %vm11648_vm11, %v6671_v51, %v6675_v12  ;;  %v6687_v17 = vshll.u32 %v14748_v38, 16  ;;  %v5984_v2 = vld [vmem:[#allocation2 + $0x38] sm:$0x1]  ;;  %v11350_v51 = vld [vmem:[%s15831_s2 + $0x228] sm:$0xff]  }
 0x359   : > { %11065 = vmatpush3.bf16.msra.mxu1 %v11340_v29  ;;  %8735 = vmatprep.mubr.bf16.mxu1 %v9864_v37  ;;  %v6691_v16 = vshrl.u32 %v14748_v38, 16  ;;  %v6697_v19 = vshll.u32 %v6592_v27, 16  ;;  %v9896_v44 = vcombine.low %v6666_v20, %v6676_v54  ;;  %v6058_v60 = vsel %vm11648_vm11, %v6053_v62, %v6057_v14  ;;  %v11406_v20 = vld [vmem:[#allocation2 + $0x34] sm:$0xf] }
 0x35a   : > { %11066 = vmatprep.subr.bf16.mxu1 %v11343_v39  ;;  %v6062_v29 = vor.u32 %v6061_v1, %v6057_v14  ;;  %v6680_v43 = vrot.slane %v6678_v45, 4  ;;  %v6683_v33 = vrot.slane %v6681_v47, 5  ;;  %v6689_v12 = vrot.slane %v6687_v17, 5 }
 0x35b   : > { %v6693_v63 = vrot.slane %v6691_v16, 4  ;;  %v6699_v55 = vrot.slane %v6697_v19, 5  ;;  %8896 = vmatprep.mubr.bf16.mxu0 %v9896_v44  ;;  %v9769_v5 = vrot.slane %v6992_v24, 9  ;;  %v7076_v32 = vrot.slane %v14748_v38, 5  ;;  %v14790_v19 = vld [vmem:[#allocation2 + $0x48] sm:$0xf] }
 0x35c   : > { %v6063_v61 = vrot.slane %v6062_v29, 4  ;;  %v7079_v40 = vrot.slane %v6592_v27, 5  ;;  %v6684_v4 = vor.u32 %v6683_v33, %v6680_v43  ;;  %v9753_v18 = vrot.slane %v6384_v21, 9  ;;  %v14798_v43 = vld [vmem:[#allocation2 + $0x4c] sm:$0xf]  ;;  %v11353_v33 = vld [vmem:[%s15831_s2 + $0x230] sm:$0xff]  }
 0x35d   : > { %11067 = vmatpush3.bf16.msra.mxu1 %v11343_v39  ;;  %8897 = vmatmul.mubr.bf16.gmra.mrb[232].mxu0 %v9880_v3  ;;  %v6694_v11 = vor.u32 %v6693_v63, %v6689_v12  ;;  %v6468_v1 = vrot.slane %v11406_v20, 5  ;;  %v14778_v62 = vsel %vm11642_vm10, %v9769_v5, %v7076_v32  ;;  %v7078_v27 = vrot.slane %v7076_v32, 4  ;;  %v6385_v5 = vld [vmem:[#allocation2 + $0x3c] sm:$0xe] }
 0x35e   : > { %11068 = vmatprep.subr.bf16.mxu1 %v11347_v25  ;;  %v6068_v37 = vsel %vm11648_vm11, %v6063_v61, %v6067_v34  ;;  %v6471_v39 = vrot.slane %v5984_v2, 5  ;;  %v6685_v14 = vrot.slane %v6684_v4, 4  ;;  %v9881_v34 = vcombine.low %v14746_v26, %v14748_v38  ;;  %v6593_v26 = vld [vmem:[#allocation2 + $0x50] sm:$0x1] }
 0x35f   : > { %v9848_v3 = vcombine.low %v6058_v60, %v6068_v37  ;;  %v6695_v45 = vrot.slane %v6694_v11, 4  ;;  %v6469_v47 = vsel %vm11642_vm10, %v9753_v18, %v6468_v1  ;;  %v14784_v54 = vsel %vm11642_vm10, %v7078_v27, %v7079_v40  ;;  %v11355_v37 = vld [vmem:[%s15831_s2 + $0x238] sm:$0xff]  }
 0x360   : > { %v6470_v17 = vrot.slane %v6468_v1, 4  ;;  %v6076_v16 = vor.u32 %v14232_v13, %v14212_v52  ;;  %v6690_v24 = vsel %vm11648_vm11, %v6685_v14, %v6689_v12  ;;  %v6079_v29 = vshll.u32 %v11406_v20, 16 }
 0x361   : > { %11069 = vmatpush3.bf16.msra.mxu1 %v11347_v25  ;;  %v6700_v44 = vsel %vm11648_vm11, %v6695_v45, %v6699_v55  ;;  %v16043_v25 = vshrl.u32 %v14180_v10, 16  ;;  %v6089_v55 = vshll.u32 %v5984_v2, 16  ;;  %v6702_v61 = vshrl.u32 %v14790_v19, 16  ;;  %v5985_v10 = vld [vmem:[#allocation2 + $0x44] sm:$0x1] }
 0x362   : > { %8736 = vmatmul.mubr.bf16.gmra.mrb[200].mxu1 %v9848_v3  ;;  %11070 = vmatprep.subr.bf16.mxu1 %v11350_v51  ;;  %v9897_v38 = vcombine.low %v6690_v24, %v6700_v44  ;;  %v6472_v52 = vsel %vm11642_vm10, %v6470_v17, %v6471_v39  ;;  %v6077_v13 = vrot.slane %v6076_v16, 4  ;;  %v6081_v63 = vrot.slane %v6079_v29, 5 }
 0x363   : > { %v6085_v21 = vrot.slane %v16043_v25, 4  ;;  %v9865_v12 = vcombine.low %v6469_v47, %v6472_v52  ;;  %v6705_v32 = vshll.u32 %v14790_v19, 16  ;;  %v6711_v40 = vshll.u32 %v14798_v43, 16  ;;  %v14824_v25 = vld [vmem:[#allocation2 + $0x54] sm:$0xf] }
 0x364   : > { %8904 = vmatprep.mubr.bf16.mxu0 %v9897_v38  ;;  %v6715_v4 = vshrl.u32 %v14798_v43, 16  ;;  %v6721_v11 = vshll.u32 %v6593_v26, 16  ;;  %v6082_v18 = vsel %vm11648_vm11, %v6077_v13, %v6081_v63  ;;  %v6091_v2 = vrot.slane %v6089_v55, 5 }
 0x365   : > { %11071 = vmatpush3.bf16.msra.mxu1 %v11350_v51  ;;  %8743 = vmatprep.mubr.bf16.mxu1 %v9865_v12  ;;  %v6086_v20 = vor.u32 %v6085_v21, %v6081_v63  ;;  %v6704_v1 = vrot.slane %v6702_v61, 4  ;;  %v6707_v27 = vrot.slane %v6705_v32, 5  ;;  %v6713_v39 = vrot.slane %v6711_v40, 5  ;;  %v11407_v51 = vld [vmem:[#allocation2 + $0x40] sm:$0xf] }
 0x366   : > { %8905 = vmatmul.mubr.bf16.gmra.mrb[236].mxu0 %v9881_v34  ;;  %v6717_v3 = vrot.slane %v6715_v4, 4  ;;  %v6723_v14 = vrot.slane %v6721_v11, 5  ;;  %11072 = vmatprep.subr.bf16.mxu1 %v11353_v33  ;;  %v9754_v47 = vrot.slane %v6385_v5, 9  ;;  %v6475_v17 = vrot.slane %v11407_v51, 5  ;;  %v14830_v61 = vld [vmem:[#allocation2 + $0x58] sm:$0xf] }
 0x367   : > { %v6087_v45 = vrot.slane %v6086_v20, 4  ;;  %v6478_v34 = vrot.slane %v5985_v10, 5  ;;  %v6708_v16 = vor.u32 %v6707_v27, %v6704_v1  ;;  %v9882_v44 = vcombine.low %v14790_v19, %v14798_v43  ;;  %v6594_v4 = vld [vmem:[#allocation2 + $0x5c] sm:$0x1]  ;;  %v6386_v1 = vld [vmem:[#allocation2 + $0x48] sm:$0xe] }
 0x368   : > { %v6718_v24 = vor.u32 %v6717_v3, %v6713_v39  ;;  %v6100_v29 = vor.u32 %v14303_v42, %v14299_v31  ;;  %v6476_v38 = vsel %vm11642_vm10, %v9754_v47, %v6475_v17  ;;  %v6477_v52 = vrot.slane %v6475_v17, 4  ;;  %v5986_v47 = vld [vmem:[#allocation2 + $0x50] sm:$0x1] }
 0x369   : > { %11073 = vmatpush3.bf16.msra.mxu1 %v11353_v33  ;;  %v6092_v26 = vsel %vm11648_vm11, %v6087_v45, %v6091_v2  ;;  %v6103_v13 = vshll.u32 %v11407_v51, 16  ;;  %v6709_v12 = vrot.slane %v6708_v16, 4  ;;  %v16044_v42 = vshrl.u32 %v14286_v23, 16 }
 0x36a   : > { %11074 = vmatprep.subr.bf16.mxu1 %v11355_v37  ;;  %v9849_v21 = vcombine.low %v6082_v18, %v6092_v26  ;;  %v6719_v63 = vrot.slane %v6718_v24, 4  ;;  %v6101_v55 = vrot.slane %v6100_v29, 4  ;;  %v6479_v19 = vsel %vm11642_vm10, %v6477_v52, %v6478_v34  ;;  %v6994_v18 = vld [vmem:[#allocation2 + $0x54] sm:$0xe] }
 0x36b   : > { %v6105_v31 = vrot.slane %v6103_v13, 5  ;;  %v6109_v43 = vrot.slane %v16044_v42, 4  ;;  %v6113_v33 = vshll.u32 %v5985_v10, 16  ;;  %v6714_v5 = vsel %vm11648_vm11, %v6709_v12, %v6713_v39 }
 0x36c   : > { %8744 = vmatmul.mubr.bf16.gmra.mrb[204].mxu1 %v9849_v21  ;;  %v6724_v32 = vsel %vm11648_vm11, %v6719_v63, %v6723_v14  ;;  %v9866_v40 = vcombine.low %v6476_v38, %v6479_v19  ;;  %v6726_v11 = vshrl.u32 %v14824_v25, 16  ;;  %v14839_v27 = vpop.f32.mrb[160].mxu0  ;;  %v6729_v3 = vshll.u32 %v14824_v25, 16 }
 0x36d   : > { %v9898_v20 = vcombine.low %v6714_v5, %v6724_v32  ;;  %v6106_v23 = vsel %vm11648_vm11, %v6101_v55, %v6105_v31  ;;  %v6110_v2 = vor.u32 %v6109_v43, %v6105_v31  ;;  %v6115_v10 = vrot.slane %v6113_v33, 5  ;;  %11075 = vmatpush3.bf16.msra.mxu1 %v11355_v37  ;;  %v14844_v51 = vpop.f32.mrb[161].mxu0  ;;  %v11408_v33 = vld [vmem:[#allocation2 + $0x4c] sm:$0xf] }
 0x36e   : > { %8751 = vmatprep.mubr.bf16.mxu1 %v9866_v40  ;;  %v6728_v39 = vrot.slane %v6726_v11, 4  ;;  %v6735_v14 = vshll.u32 %v14830_v61, 16  ;;  %v6739_v45 = vshrl.u32 %v14830_v61, 16  ;;  %v6745_v34 = vshll.u32 %v6594_v4, 16  ;;  %v14847_v29 = vpop.f32.mrb[162].mxu0 }
 0x36f   : > { %8912 = vmatprep.mubr.bf16.mxu0 %v9898_v20  ;;  %v6111_v17 = vrot.slane %v6110_v2, 4  ;;  %v9771_v16 = vrot.slane %v6994_v18, 9  ;;  %v7090_v24 = vrot.slane %v14830_v61, 5  ;;  %v6731_v37 = vrot.slane %v6729_v3, 5  ;;  %v14849_v13 = vpop.f32.mrb[163].mxu0 }
 0x370   : > { %8913 = vmatmul.mubr.bf16.gmra.mrb[240].mxu0 %v9882_v44  ;;  %v6737_v26 = vrot.slane %v6735_v14, 5  ;;  %v6741_v38 = vrot.slane %v6739_v45, 4  ;;  %v7093_v52 = vrot.slane %v6594_v4, 5  ;;  %v6747_v12 = vrot.slane %v6745_v34, 5 }
 0x371   : > { %v6116_v21 = vsel %vm11648_vm11, %v6111_v17, %v6115_v10  ;;  %v14855_v63 = vsel %vm11642_vm10, %v9771_v16, %v7090_v24  ;;  %v7092_v55 = vrot.slane %v7090_v24, 4  ;;  %v6732_v31 = vor.u32 %v6731_v37, %v6728_v39  ;;  %v6595_v16 = vld [vmem:[#allocation2 + $0x68] sm:$0x1] }
 0x372   : > { %v9850_v19 = vcombine.low %v6106_v23, %v6116_v21  ;;  %v6742_v42 = vor.u32 %v6741_v38, %v6737_v26  ;;  %v9755_v43 = vrot.slane %v6386_v1, 9  ;;  %v6482_v5 = vrot.slane %v11408_v33, 5  ;;  %v14867_v23 = vld [vmem:[#allocation2 + $0x60] sm:$0xf]  ;;  %v5987_v21 = vld [vmem:[#allocation2 + $0x5c] sm:$0x1] }
 0x373   : > { %v14859_v44 = vsel %vm11642_vm10, %v7092_v55, %v7093_v52  ;;  %v6485_v32 = vrot.slane %v5986_v47, 5  ;;  %v9883_v40 = vcombine.low %v14824_v25, %v14830_v61  ;;  %v6733_v4 = vrot.slane %v6732_v31, 4  ;;  %v14873_v25 = vld [vmem:[#allocation2 + $0x64] sm:$0xf] }
 0x374   : > { %8752 = vmatmul.mubr.bf16.gmra.mrb[208].mxu1 %v9850_v19  ;;  %v6743_v11 = vrot.slane %v6742_v42, 4  ;;  %v6124_v20 = vor.u32 %v14355_v46, %v14350_v6  ;;  %v6483_v2 = vsel %vm11642_vm10, %v9755_v43, %v6482_v5  ;;  %v6484_v10 = vrot.slane %v6482_v5, 4 }
 0x375   : > { %v6127_v1 = vshll.u32 %v11408_v33, 16  ;;  %v16045_v39 = vshrl.u32 %v14338_v41, 16  ;;  %v6738_v61 = vsel %vm11648_vm11, %v6733_v4, %v6737_v26  ;;  %v6137_v6 = vshll.u32 %v5986_v47, 16  ;;  %v6387_v41 = vld [vmem:[#allocation2 + $0x54] sm:$0xe] }
 0x376   : > { %v6748_v14 = vsel %vm11648_vm11, %v6743_v11, %v6747_v12  ;;  %v6125_v45 = vrot.slane %v6124_v20, 4  ;;  %v6486_v17 = vsel %vm11642_vm10, %v6484_v10, %v6485_v32  ;;  %v6750_v24 = vshrl.u32 %v14867_v23, 16  ;;  %v11409_v4 = vld [vmem:[#allocation2 + $0x58] sm:$0xf] }
 0x377   : > { %v6133_v3 = vrot.slane %v16045_v39, 4  ;;  %v9899_v46 = vcombine.low %v6738_v61, %v6748_v14  ;;  %v6129_v34 = vrot.slane %v6127_v1, 5  ;;  %v9867_v37 = vcombine.low %v6483_v2, %v6486_v17 }
 0x378   : > { %v6139_v38 = vrot.slane %v6137_v6, 5  ;;  %v6753_v52 = vshll.u32 %v14867_v23, 16  ;;  %v6759_v26 = vshll.u32 %v14873_v25, 16  ;;  %v6752_v55 = vrot.slane %v6750_v24, 4 }
 0x379   : > { %8920 = vmatprep.mubr.bf16.mxu0 %v9899_v46  ;;  %v6130_v47 = vsel %vm11648_vm11, %v6125_v45, %v6129_v34  ;;  %v6134_v12 = vor.u32 %v6133_v3, %v6129_v34  ;;  %v6763_v19 = vshrl.u32 %v14873_v25, 16  ;;  %8759 = vmatprep.mubr.bf16.mxu1 %v9867_v37  ;;  %v6769_v43 = vshll.u32 %v6595_v16, 16  ;;  %v14895_v45 = vld [vmem:[#allocation2 + $0x6c] sm:$0xf]  ;;  %v14897_v16 = vld [vmem:[#allocation2 + $0x70] sm:$0xf] }
 0x37a   : > { %8921 = vmatmul.mubr.bf16.gmra.mrb[244].mxu0 %v9883_v40  ;;  %v6755_v31 = vrot.slane %v6753_v52, 5  ;;  %v6761_v42 = vrot.slane %v6759_v26, 5  ;;  %v9756_v33 = vrot.slane %v6387_v41, 9  ;;  %v6489_v11 = vrot.slane %v11409_v4, 5  ;;  %v6596_v52 = vld [vmem:[#allocation2 + $0x74] sm:$0x1] }
 0x37b   : > { %v6135_v5 = vrot.slane %v6134_v12, 4  ;;  %v6765_v32 = vrot.slane %v6763_v19, 4  ;;  %v6492_v20 = vrot.slane %v5987_v21, 5  ;;  %v6771_v10 = vrot.slane %v6769_v43, 5 }
 0x37c   : > { %v6756_v2 = vor.u32 %v6755_v31, %v6752_v55  ;;  %v9884_v1 = vcombine.low %v14867_v23, %v14873_v25  ;;  %v6148_v39 = vor.u32 %v14392_v8, %v14389_v50  ;;  %v6490_v61 = vsel %vm11642_vm10, %v9756_v33, %v6489_v11  ;;  %v6388_v33 = vld [vmem:[#allocation2 + $0x60] sm:$0xe] }
 0x37d   : > { %v6140_v40 = vsel %vm11648_vm11, %v6135_v5, %v6139_v38  ;;  %v6766_v3 = vor.u32 %v6765_v32, %v6761_v42  ;;  %v6491_v14 = vrot.slane %v6489_v11, 4  ;;  %v6151_v34 = vshll.u32 %v11409_v4, 16 }
 0x37e   : > { %v9851_v6 = vcombine.low %v6130_v47, %v6140_v40  ;;  %v6757_v46 = vrot.slane %v6756_v2, 4  ;;  %v6149_v17 = vrot.slane %v6148_v39, 4  ;;  %v16046_v8 = vshrl.u32 %v14369_v9, 16  ;;  %v6996_v9 = vld [vmem:[#allocation2 + $0x6c] sm:$0xe] }
 0x37f   : > { %v6767_v23 = vrot.slane %v6766_v3, 4  ;;  %v6493_v50 = vsel %vm11642_vm10, %v6491_v14, %v6492_v20  ;;  %v6161_v24 = vshll.u32 %v5987_v21, 16  ;;  %v6153_v38 = vrot.slane %v6151_v34, 5  ;;  %v5988_v40 = vld [vmem:[#allocation2 + $0x68] sm:$0x1] }
 0x380   : > { %v6157_v25 = vrot.slane %v16046_v8, 4  ;;  %8760 = vmatmul.mubr.bf16.gmra.mrb[212].mxu1 %v9851_v6  ;;  %v6762_v41 = vsel %vm11648_vm11, %v6757_v46, %v6761_v42  ;;  %v9868_v37 = vcombine.low %v6490_v61, %v6493_v50  ;;  %v6774_v26 = vshrl.u32 %v14895_v45, 16 }
 0x381   : > { %v6772_v47 = vsel %vm11648_vm11, %v6767_v23, %v6771_v10  ;;  %v6163_v12 = vrot.slane %v6161_v24, 5  ;;  %v6777_v55 = vshll.u32 %v14895_v45, 16  ;;  %v6783_v19 = vshll.u32 %v14897_v16, 16  ;;  %v11410_v23 = vld [vmem:[#allocation2 + $0x64] sm:$0xf] }
 0x382   : > { %v9900_v31 = vcombine.low %v6762_v41, %v6772_v47  ;;  %8767 = vmatprep.mubr.bf16.mxu1 %v9868_v37  ;;  %v6154_v21 = vsel %vm11648_vm11, %v6149_v17, %v6153_v38  ;;  %v6158_v42 = vor.u32 %v6157_v25, %v6153_v38  ;;  %v6776_v43 = vrot.slane %v6774_v26, 4 }
 0x383   : > { %v6779_v5 = vrot.slane %v6777_v55, 5  ;;  %v6785_v32 = vrot.slane %v6783_v19, 5  ;;  %v6787_v4 = vshrl.u32 %v14897_v16, 16  ;;  %v6793_v11 = vshll.u32 %v6596_v52, 16 }
 0x384   : > { %8928 = vmatprep.mubr.bf16.mxu0 %v9900_v31  ;;  %v6159_v20 = vrot.slane %v6158_v42, 4  ;;  %v9773_v2 = vrot.slane %v6996_v9, 9  ;;  %v7104_v10 = vrot.slane %v14897_v16, 5  ;;  %v7107_v39 = vrot.slane %v6596_v52, 5  ;;  %v14942_v42 = vld [vmem:[#allocation2 + $0x7c] sm:$0xf] }
 0x385   : > { %8929 = vmatmul.mubr.bf16.gmra.mrb[248].mxu0 %v9884_v1  ;;  %v6780_v3 = vor.u32 %v6779_v5, %v6776_v43  ;;  %v6789_v61 = vrot.slane %v6787_v4, 4  ;;  %v6795_v14 = vrot.slane %v6793_v11, 5  ;;  %v9757_v6 = vrot.slane %v6388_v33, 9  ;;  %v6597_v11 = vld [vmem:[#allocation2 + $0x80] sm:$0x1] }
 0x386   : > { %v6164_v46 = vsel %vm11648_vm11, %v6159_v20, %v6163_v12  ;;  %v14918_v17 = vsel %vm11642_vm10, %v9773_v2, %v7104_v10  ;;  %v7106_v34 = vrot.slane %v7104_v10, 4  ;;  %v6496_v50 = vrot.slane %v11410_v23, 5  ;;  %v14932_v12 = vld [vmem:[#allocation2 + $0x78] sm:$0xf]  ;;  %v11413_v31 = vld [vmem:[#allocation2 + $0x88] sm:$0xf] }
 0x387   : > { %16047 = vst [vmem:[#allocation34_spill] sm:$0xff] %v14918_v17  ;;  %v9852_v25 = vcombine.low %v6154_v21, %v6164_v46  ;;  %v6781_v24 = vrot.slane %v6780_v3, 4  ;;  %v6790_v41 = vor.u32 %v6789_v61, %v6785_v32  ;;  %v6499_v1 = vrot.slane %v5988_v40, 5 }
 0x388   : > { %v14926_v38 = vsel %vm11642_vm10, %v7106_v34, %v7107_v39  ;;  %v6497_v52 = vsel %vm11642_vm10, %v9757_v6, %v6496_v50  ;;  %v6498_v26 = vrot.slane %v6496_v50, 4  ;;  %v9885_v47 = vcombine.low %v14895_v45, %v14897_v16 }
 0x389   : > { %16048 = vst [vmem:[#allocation35_spill] sm:$0xff] %v14926_v38  ;;  %8768 = vmatmul.mubr.bf16.gmra.mrb[216].mxu1 %v9852_v25  ;;  %v6786_v19 = vsel %vm11648_vm11, %v6781_v24, %v6785_v32  ;;  %v6791_v9 = vrot.slane %v6790_v41, 4  ;;  %v6172_v21 = vor.u32 %v14417_v28, %v14414_v36  ;;  %v6175_v33 = vshll.u32 %v11410_v23, 16  ;;  %v5989_v25 = vld [vmem:[#allocation2 + $0x74] sm:$0x1] }
 0x38a   : > { %v14920_v8 = vpop.f32.mrb[132].mxu1  ;;  %v6500_v16 = vsel %vm11642_vm10, %v6498_v26, %v6499_v1  ;;  %v16049_v5 = vshrl.u32 %v14400_v56, 16  ;;  %v6185_v4 = vshll.u32 %v5988_v40, 16  ;;  %v6798_v10 = vshrl.u32 %v14932_v12, 16  ;;  %v6389_v56 = vld [vmem:[#allocation2 + $0x6c] sm:$0xe] }
 0x38b   : > { %v14922_v37 = vpop.f32.mrb[133].mxu1  ;;  %v14944_v43 = vpop.f32.mrb[164].mxu0  ;;  %v6796_v36 = vsel %vm11648_vm11, %v6791_v9, %v6795_v14  ;;  %v9869_v28 = vcombine.low %v6497_v52, %v6500_v16  ;;  %v6173_v2 = vrot.slane %v6172_v21, 4  ;;  %v6177_v61 = vrot.slane %v6175_v33, 5 }
 0x38c   : > { %v14934_v55 = vpop.f32.mrb[134].mxu1  ;;  %v6181_v32 = vrot.slane %v16049_v5, 4  ;;  %v14952_v20 = vpop.f32.mrb[165].mxu0  ;;  %v9901_v3 = vcombine.low %v6786_v19, %v6796_v36  ;;  %v6187_v6 = vrot.slane %v6185_v4, 5  ;;  %v6801_v46 = vshll.u32 %v14932_v12, 16 }
 0x38d   : > { %v14946_v45 = vpop.f32.mrb[135].mxu1  ;;  %v14957_v39 = vpop.f32.mrb[166].mxu0  ;;  %8775 = vmatprep.mubr.bf16.mxu1 %v9869_v28  ;;  %v6800_v40 = vrot.slane %v6798_v10, 4  ;;  %v6807_v23 = vshll.u32 %v14942_v42, 16  ;;  %v6811_v14 = vshrl.u32 %v14942_v42, 16  ;;  %v6817_v50 = vshll.u32 %v6597_v11, 16 }
 0x38e   : > { %v14960_v34 = vpop.f32.mrb[167].mxu0  ;;  %8936 = vmatprep.mubr.bf16.mxu0 %v9901_v3  ;;  %v6178_v24 = vsel %vm11648_vm11, %v6173_v2, %v6177_v61  ;;  %v6182_v41 = vor.u32 %v6181_v32, %v6177_v61  ;;  %v6803_v1 = vrot.slane %v6801_v46, 5  ;;  %v9886_v52 = vcombine.low %v14932_v12, %v14942_v42  ;;  %v11411_v5 = vld [vmem:[#allocation2 + $0x70] sm:$0xf]  ;;  %v14972_v3 = vld [vmem:[#allocation2 + $0x84] sm:$0xf] }
 0x38f   : > { %8937 = vmatmul.mubr.bf16.gmra.mrb[252].mxu0 %v9885_v47  ;;  %v6809_v26 = vrot.slane %v6807_v23, 5  ;;  %v6813_v19 = vrot.slane %v6811_v14, 4  ;;  %v6819_v9 = vrot.slane %v6817_v50, 5  ;;  %v9758_v21 = vrot.slane %v6389_v56, 9  ;;  %v14982_v14 = vld [vmem:[#allocation2 + $0x88] sm:$0xf] }
 0x390   : > { %v6183_v16 = vrot.slane %v6182_v41, 4  ;;  %v6804_v33 = vor.u32 %v6803_v1, %v6800_v40  ;;  %v6503_v4 = vrot.slane %v11411_v5, 5  ;;  %v6506_v11 = vrot.slane %v5989_v25, 5  ;;  %v6598_v50 = vld [vmem:[#allocation2 + $0x8c] sm:$0x1] }
 0x391   : > { %v6814_v36 = vor.u32 %v6813_v19, %v6809_v26  ;;  %v6196_v28 = vor.u32 %v14446_v48, %v14441_v58  ;;  %v6199_v2 = vshll.u32 %v11411_v5, 16  ;;  %v16050_v32 = vshrl.u32 %v14427_v35, 16  ;;  %v6390_v5 = vld [vmem:[#allocation2 + $0x78] sm:$0xe] }
 0x392   : > { %v6188_v47 = vsel %vm11648_vm11, %v6183_v16, %v6187_v6  ;;  %v6805_v12 = vrot.slane %v6804_v33, 4  ;;  %v6504_v42 = vsel %vm11642_vm10, %v9758_v21, %v6503_v4  ;;  %v6505_v61 = vrot.slane %v6503_v4, 4  ;;  %v6998_v21 = vld [vmem:[#allocation2 + $0x84] sm:$0xe] }
 0x393   : > { %v6205_v10 = vrot.slane %v16050_v32, 4  ;;  %v9853_v46 = vcombine.low %v6178_v24, %v6188_v47  ;;  %v6815_v56 = vrot.slane %v6814_v36, 4  ;;  %v6197_v40 = vrot.slane %v6196_v28, 4 }
 0x394   : > { %v6201_v23 = vrot.slane %v6199_v2, 5  ;;  %v6810_v58 = vsel %vm11648_vm11, %v6805_v12, %v6809_v26  ;;  %v6507_v35 = vsel %vm11642_vm10, %v6505_v61, %v6506_v11  ;;  %v6209_v48 = vshll.u32 %v5989_v25, 16  ;;  %v5990_v2 = vld [vmem:[#allocation2 + $0x80] sm:$0x1] }
 0x395   : > { %v6822_v6 = vshrl.u32 %v14972_v3, 16  ;;  %8776 = vmatmul.mubr.bf16.gmra.mrb[220].mxu1 %v9853_v46  ;;  %v6820_v41 = vsel %vm11648_vm11, %v6815_v56, %v6819_v9  ;;  %v9870_v24 = vcombine.low %v6504_v42, %v6507_v35  ;;  %v6825_v25 = vshll.u32 %v14972_v3, 16 }
 0x396   : > { %v6202_v1 = vsel %vm11648_vm11, %v6197_v40, %v6201_v23  ;;  %v6206_v19 = vor.u32 %v6205_v10, %v6201_v23  ;;  %v9902_v26 = vcombine.low %v6810_v58, %v6820_v41  ;;  %v6211_v16 = vrot.slane %v6209_v48, 5 }
 0x397   : > { %v6824_v33 = vrot.slane %v6822_v6, 4  ;;  %8783 = vmatprep.mubr.bf16.mxu1 %v9870_v24  ;;  %v6831_v36 = vshll.u32 %v14982_v14, 16  ;;  %v6835_v9 = vshrl.u32 %v14982_v14, 16  ;;  %v6841_v28 = vshll.u32 %v6598_v50, 16 }
 0x398   : > { %v6207_v11 = vrot.slane %v6206_v19, 4  ;;  %8944 = vmatprep.mubr.bf16.mxu0 %v9902_v26  ;;  %v6827_v10 = vrot.slane %v6825_v25, 5  ;;  %v9775_v47 = vrot.slane %v6998_v21, 9  ;;  %v7118_v12 = vrot.slane %v14982_v14, 5 }
 0x399   : > { %v14990_v4 = vpop.f32.mrb[168].mxu0  ;;  %v7121_v42 = vrot.slane %v6598_v50, 5  ;;  %8945 = vmatmul.mubr.bf16.gmra.mrb[0].mxu0 %v9886_v52  ;;  %v6833_v40 = vrot.slane %v6831_v36, 5  ;;  %v6837_v23 = vrot.slane %v6835_v9, 4  ;;  %v6843_v58 = vrot.slane %v6841_v28, 5 }
 0x39a   : > { %v14994_v32 = vpop.f32.mrb[169].mxu0  ;;  %v14997_v61 = vpop.f32.mrb[136].mxu1  ;;  %v6212_v56 = vsel %vm11648_vm11, %v6207_v11, %v6211_v16  ;;  %v6828_v41 = vor.u32 %v6827_v10, %v6824_v33  ;;  %v15009_v50 = vsel %vm11642_vm10, %v9775_v47, %v7118_v12  ;;  %v7120_v24 = vrot.slane %v7118_v12, 4  ;;  %v11412_v16 = vld [vmem:[#allocation2 + $0x7c] sm:$0xf] }
 0x39b   : > { %v14999_v46 = vpop.f32.mrb[170].mxu0  ;;  %v15003_v35 = vpop.f32.mrb[137].mxu1  ;;  %v9854_v6 = vcombine.low %v6202_v1, %v6212_v56  ;;  %16051 = vst [vmem:[#allocation11_spill] sm:$0xff] %v15009_v50  ;;  %v6838_v52 = vor.u32 %v6837_v23, %v6833_v40  ;;  %v9887_v21 = vcombine.low %v14972_v3, %v14982_v14  ;;  %v9759_v26 = vrot.slane %v6390_v5, 9  ;;  %v15023_v28 = vld [vmem:[#allocation2 + $0x90] sm:$0xf] }
 0x39c   : > { %v15005_v48 = vpop.f32.mrb[171].mxu0  ;;  %v15011_v19 = vpop.f32.mrb[138].mxu1  ;;  %v6510_v25 = vrot.slane %v11412_v16, 5  ;;  %v6829_v36 = vrot.slane %v6828_v41, 4  ;;  %v15019_v1 = vsel %vm11642_vm10, %v7120_v24, %v7121_v42  ;;  %v6513_v33 = vrot.slane %v5990_v2, 5 }
 0x39d   : > { %v15015_v11 = vpop.f32.mrb[139].mxu1  ;;  %16052 = vst [vmem:[#allocation12_spill] sm:$0xff] %v15019_v1  ;;  %v6220_v9 = vor.u32 %v14470_v15, %v14464_v7  ;;  %8784 = vmatmul.mubr.bf16.gmra.mrb[224].mxu1 %v9854_v6  ;;  %v6839_v10 = vrot.slane %v6838_v52, 4  ;;  %v6223_v42 = vshll.u32 %v11412_v16, 16  ;;  %v16053_v56 = vshrl.u32 %v14454_v59, 16 }
 0x39e   : > { %v6511_v14 = vsel %vm11642_vm10, %v9759_v26, %v6510_v25  ;;  %v6512_v5 = vrot.slane %v6510_v25, 4  ;;  %v6834_v47 = vsel %vm11648_vm11, %v6829_v36, %v6833_v40  ;;  %v15033_v7 = vld [vmem:[#allocation2 + $0x94] sm:$0xf]  ;;  %v6233_v41 = vshll.u32 %v5990_v2, 16  ;;  %v6599_v24 = vld [vmem:[#allocation2 + $0x98] sm:$0x1] }
 0x39f   : > { %v6221_v12 = vrot.slane %v6220_v9, 4  ;;  %v6229_v23 = vrot.slane %v16053_v56, 4  ;;  %v6844_v15 = vsel %vm11648_vm11, %v6839_v10, %v6843_v58  ;;  %v6846_v52 = vshrl.u32 %v15023_v28, 16  ;;  %v6391_v36 = vld [vmem:[#allocation2 + $0x84] sm:$0xe] }
 0x3a0   : > { %v6514_v6 = vsel %vm11642_vm10, %v6512_v5, %v6513_v33  ;;  %v9903_v26 = vcombine.low %v6834_v47, %v6844_v15  ;;  %v6225_v40 = vrot.slane %v6223_v42, 5  ;;  %v6849_v16 = vshll.u32 %v15023_v28, 16  ;;  %v5991_v5 = vld [vmem:[#allocation2 + $0x8c] sm:$0x1] }
 0x3a1   : > { %v9871_v25 = vcombine.low %v6511_v14, %v6514_v6  ;;  %v6235_v59 = vrot.slane %v6233_v41, 5  ;;  %v6848_v9 = vrot.slane %v6846_v52, 4  ;;  %v6855_v56 = vshll.u32 %v15033_v7, 16 }
 0x3a2   : > { %v6859_v3 = vshrl.u32 %v15033_v7, 16  ;;  %8952 = vmatprep.mubr.bf16.mxu0 %v9903_v26  ;;  %v6226_v2 = vsel %vm11648_vm11, %v6221_v12, %v6225_v40  ;;  %v6230_v58 = vor.u32 %v6229_v23, %v6225_v40  ;;  %v6851_v33 = vrot.slane %v6849_v16, 5  ;;  %v16054_v12 = vld [vmem:[#allocation15_spill] sm:$0xff] }
 0x3a3   : > { %8791 = vmatprep.mubr.bf16.mxu1 %v9871_v25  ;;  %v6865_v10 = vshll.u32 %v6599_v24, 16  ;;  %8953 = vmatmul.mubr.bf16.gmra.mrb[4].mxu0 %v9887_v21  ;;  %v6857_v14 = vrot.slane %v6855_v56, 5  ;;  %v9888_v42 = vcombine.low %v15023_v28, %v15033_v7  ;;  %v9760_v15 = vrot.slane %v6391_v36, 9  ;;  %v15053_v7 = vld [vmem:[#allocation2 + $0x9c] sm:$0xf] }
 0x3a4   : > { %v6861_v47 = vrot.slane %v6859_v3, 4  ;;  %v6231_v6 = vrot.slane %v6230_v58, 4  ;;  %v6852_v41 = vor.u32 %v6851_v33, %v6848_v9  ;;  %v6517_v26 = vrot.slane %v11413_v31, 5  ;;  %v15055_v58 = vld [vmem:[#allocation2 + $0xa0] sm:$0xf] }
 0x3a5   : > { %v6867_v52 = vrot.slane %v6865_v10, 5  ;;  %v6520_v18 = vrot.slane %v5991_v5, 5  ;;  %v6244_v23 = vor.u32 %v16054_v12, %v14492_v0  ;;  %v6247_v40 = vshll.u32 %v11413_v31, 16 }
 0x3a6   : > { %v6862_v25 = vor.u32 %v6861_v47, %v6857_v14  ;;  %v6236_v21 = vsel %vm11648_vm11, %v6231_v6, %v6235_v59  ;;  %v6853_v24 = vrot.slane %v6852_v41, 4  ;;  %v6518_v3 = vsel %vm11642_vm10, %v9760_v15, %v6517_v26  ;;  %v16055_v59 = vld [vmem:[#allocation37_spill] sm:$0xff]  ;;  %v6600_v15 = vld [vmem:[#allocation2 + $0xa4] sm:$0x1] }
 0x3a7   : > { %v6519_v28 = vrot.slane %v6517_v26, 4  ;;  %v9855_v16 = vcombine.low %v6226_v2, %v6236_v21  ;;  %v6245_v9 = vrot.slane %v6244_v23, 4  ;;  %v6249_v56 = vrot.slane %v6247_v40, 5  ;;  %v6392_v21 = vld [vmem:[#allocation2 + $0x90] sm:$0xe] }
 0x3a8   : > { %v6863_v36 = vrot.slane %v6862_v25, 4  ;;  %v6858_v0 = vsel %vm11648_vm11, %v6853_v24, %v6857_v14  ;;  %v16056_v33 = vshrl.u32 %v16055_v59, 16  ;;  %v6257_v47 = vshll.u32 %v5991_v5, 16  ;;  %v7000_v25 = vld [vmem:[#allocation2 + $0x9c] sm:$0xe] }
 0x3a9   : > { %v6521_v31 = vsel %vm11642_vm10, %v6519_v28, %v6520_v18  ;;  %8792 = vmatmul.mubr.bf16.gmra.mrb[228].mxu1 %v9855_v16  ;;  %v6250_v26 = vsel %vm11648_vm11, %v6245_v9, %v6249_v56  ;;  %v6870_v14 = vshrl.u32 %v15053_v7, 16  ;;  %v6873_v5 = vshll.u32 %v15053_v7, 16  ;;  %v5992_v9 = vld [vmem:[#allocation2 + $0x98] sm:$0x1] }
 0x3aa   : > { %v6253_v10 = vrot.slane %v16056_v33, 4  ;;  %v15063_v6 = vpop.f32.mrb[140].mxu1  ;;  %v6868_v2 = vsel %vm11648_vm11, %v6863_v36, %v6867_v52  ;;  %v9872_v41 = vcombine.low %v6518_v3, %v6521_v31  ;;  %v6259_v40 = vrot.slane %v6257_v47, 5 }
 0x3ab   : > { %v15070_v12 = vpop.f32.mrb[141].mxu1  ;;  %v9904_v18 = vcombine.low %v6858_v0, %v6868_v2  ;;  %v6872_v52 = vrot.slane %v6870_v14, 4  ;;  %v6879_v3 = vshll.u32 %v15055_v58, 16  ;;  %v6883_v16 = vshrl.u32 %v15055_v58, 16 }
 0x3ac   : > { %v6254_v23 = vor.u32 %v6253_v10, %v6249_v56  ;;  %v15073_v24 = vpop.f32.mrb[172].mxu0  ;;  %v15075_v28 = vpop.f32.mrb[142].mxu1  ;;  %8799 = vmatprep.mubr.bf16.mxu1 %v9872_v41  ;;  %v6889_v36 = vshll.u32 %v6600_v15, 16  ;;  %v6875_v59 = vrot.slane %v6873_v5, 5  ;;  %v9777_v33 = vrot.slane %v7000_v25, 9 }
 0x3ad   : > { %v15079_v31 = vpop.f32.mrb[173].mxu0  ;;  %v15081_v0 = vpop.f32.mrb[143].mxu1  ;;  %8960 = vmatprep.mubr.bf16.mxu0 %v9904_v18  ;;  %v7132_v10 = vrot.slane %v15055_v58, 5  ;;  %v6881_v2 = vrot.slane %v6879_v3, 5  ;;  %v6885_v41 = vrot.slane %v6883_v16, 4  ;;  %v7135_v60 = vrot.slane %v6600_v15, 5 }
 0x3ae   : > { %v6255_v56 = vrot.slane %v6254_v23, 4  ;;  %v15084_v47 = vpop.f32.mrb[174].mxu0  ;;  %8961 = vmatmul.mubr.bf16.gmra.mrb[8].mxu0 %v9888_v42  ;;  %v6891_v14 = vrot.slane %v6889_v36, 5  ;;  %v6876_v50 = vor.u32 %v6875_v59, %v6872_v52  ;;  %v9889_v42 = vcombine.low %v15053_v7, %v15055_v58  ;;  %v11414_v36 = vld [vmem:[#allocation2 + $0x94] sm:$0xf]  ;;  %v16059_v59 = vld [vmem:[#allocation28_spill] sm:$0xff] }
 0x3af   : > { %v15086_v53 = vpop.f32.mrb[175].mxu0  ;;  %v15092_v18 = vsel %vm11642_vm10, %v9777_v33, %v7132_v10  ;;  %v7134_v25 = vrot.slane %v7132_v10, 4  ;;  %v6886_v5 = vor.u32 %v6885_v41, %v6881_v2  ;;  %v9761_v3 = vrot.slane %v6392_v21, 9  ;;  %v16061_v21 = vld [vmem:[#allocation30_spill] sm:$0xff]  ;;  %v16062_v33 = vld [vmem:[#allocation31_spill] sm:$0xff] }
 0x3b0   : > { %v6260_v1 = vsel %vm11648_vm11, %v6255_v56, %v6259_v40  ;;  %16057 = vst [vmem:[#allocation14_spill] sm:$0xff] %v15092_v18  ;;  %v6877_v16 = vrot.slane %v6876_v50, 4  ;;  %v6524_v38 = vrot.slane %v11414_v36, 5  ;;  %v6527_v40 = vrot.slane %v5992_v9, 5 }
 0x3b1   : > { %v9856_v23 = vcombine.low %v6250_v26, %v6260_v1  ;;  %v15098_v15 = vsel %vm11642_vm10, %v7134_v25, %v7135_v60  ;;  %v6887_v52 = vrot.slane %v6886_v5, 4  ;;  %v16060_v1 = vld [vmem:[#allocation29_spill] sm:$0xff]  ;;  %v10670_v7 = vadd.f32 %v14844_v51, %v14839_v27  ;;  %v16064_v5 = vld [vmem:[#allocation8_spill] sm:$0xff]  ;;  %v16065_v27 = vld [vmem:[#allocation39_spill] sm:$0xff] }
 0x3b2   : > { %16058 = vst [vmem:[#allocation9_spill] sm:$0xff] %v15098_v15  ;;  %v10558_v26 = vadd.f32 %v16060_v1, %v16059_v59  ;;  %v6882_v50 = vsel %vm11648_vm11, %v6877_v16, %v6881_v2  ;;  %v6525_v60 = vsel %vm11642_vm10, %v9761_v3, %v6524_v38  ;;  %v6526_v58 = vrot.slane %v6524_v38, 4  ;;  %v15120_v59 = vld [vmem:[#allocation2 + $0xa8] sm:$0xf]  ;;  %v15122_v2 = vld [vmem:[#allocation2 + $0xac] sm:$0xf] }
 0x3b3   : > { %8800 = vmatmul.mubr.bf16.gmra.mrb[232].mxu1 %v9856_v23  ;;  %v10561_v10 = vadd.f32 %v16062_v33, %v16061_v21  ;;  %v6892_v41 = vsel %vm11648_vm11, %v6887_v52, %v6891_v14  ;;  %v10673_v23 = vadd.f32 %v14849_v13, %v14847_v29  ;;  %v6268_v51 = vor.u32 %v16065_v27, %v16064_v5  ;;  %v16067_v1 = vld [vmem:[#allocation17_spill] sm:$0xff]  ;;  %v15128_v52 = vld [vmem:[#allocation2 + $0xb0] sm:$0x1] }
 0x3b4   : > { %v15114_v25 = vadd.f32 %v10670_v7, %v10558_v26  ;;  %16066 = vst [vmem:[#allocation16_spill] sm:$0xff] %v15122_v2  ;;  %v9905_v3 = vcombine.low %v6882_v50, %v6892_v41  ;;  %v6528_v38 = vsel %vm11642_vm10, %v6526_v58, %v6527_v40  ;;  %v6271_v16 = vshll.u32 %v11414_v36, 16  ;;  %16069 = vst [vmem:[#allocation40_spill] sm:$0xff] %v15128_v52  ;;  %v6393_v40 = vld [vmem:[#allocation2 + $0x9c] sm:$0xe] }
 0x3b5   : > { %v16068_v21 = vshrl.u32 %v16067_v1, 16  ;;  %v9873_v26 = vcombine.low %v6525_v60, %v6528_v38  ;;  %v15130_v7 = vadd.f32 %v10673_v23, %v10561_v10  ;;  %v6269_v29 = vrot.slane %v6268_v51, 4 }
 0x3b6   : > { %16063 = vst [vmem:[#allocation6_spill] sm:$0xff] %v15114_v25  ;;  %v6281_v13 = vshll.u32 %v5992_v9, 16  ;;  %8968 = vmatprep.mubr.bf16.mxu0 %v9905_v3  ;;  %v6273_v33 = vrot.slane %v6271_v16, 5  ;;  %v6894_v5 = vshrl.u32 %v15120_v59, 16  ;;  %v6897_v50 = vshll.u32 %v15120_v59, 16 }
 0x3b7   : > { %v6277_v14 = vrot.slane %v16068_v21, 4  ;;  %16070 = vst [vmem:[#allocation32_spill] sm:$0xff] %v15130_v7  ;;  %v6903_v41 = vshll.u32 %v15122_v2, 16  ;;  %8807 = vmatprep.mubr.bf16.mxu1 %v9873_v26  ;;  %8969 = vmatmul.mubr.bf16.gmra.mrb[12].mxu0 %v9889_v42  ;;  %v6907_v58 = vshrl.u32 %v15122_v2, 16  ;;  %v6913_v60 = vshll.u32 %v15128_v52, 16 }
 0x3b8   : > { %v6283_v36 = vrot.slane %v6281_v13, 5  ;;  %v9890_v10 = vcombine.low %v15120_v59, %v15122_v2  ;;  %v5993_v9 = vld [vmem:[#allocation2 + $0xa4] sm:$0x1]  ;;  %v6274_v23 = vsel %vm11648_vm11, %v6269_v29, %v6273_v33  ;;  %v6896_v51 = vrot.slane %v6894_v5, 4  ;;  %v11415_v13 = vld [vmem:[#allocation2 + $0xa0] sm:$0xf] }
 0x3b9   : > { %v6278_v27 = vor.u32 %v6277_v14, %v6273_v33  ;;  %v6899_v3 = vrot.slane %v6897_v50, 5  ;;  %v6905_v38 = vrot.slane %v6903_v41, 5  ;;  %v6909_v16 = vrot.slane %v6907_v58, 4  ;;  %v6989_v2 = vld [vmem:[#allocation2 + $0x18] sm:$0xe] }
 0x3ba   : > { %v6915_v1 = vrot.slane %v6913_v60, 5  ;;  %v9762_v21 = vrot.slane %v6393_v40, 9  ;;  %v6531_v56 = vrot.slane %v11415_v13, 5  ;;  %v6534_v7 = vrot.slane %v5993_v9, 5 }
 0x3bb   : > { %v6279_v42 = vrot.slane %v6278_v27, 4  ;;  %v6900_v26 = vor.u32 %v6899_v3, %v6896_v51  ;;  %v6910_v25 = vor.u32 %v6909_v16, %v6905_v38  ;;  %v10676_v59 = vadd.f32 %v14952_v20, %v14944_v43  ;;  %v16072_v51 = vld [vmem:[#allocation38_spill] sm:$0xff]  ;;  %v15175_v3 = vld [vmem:[#allocation2 + $0xb8] sm:$0xf] }
 0x3bc   : > { %v10564_v15 = vadd.f32 %v14922_v37, %v14920_v8  ;;  %v10679_v14 = vadd.f32 %v14960_v34, %v14957_v39  ;;  %v15147_v29 = vpop.f32.mrb[176].mxu0  ;;  %v6532_v41 = vsel %vm11642_vm10, %v9762_v21, %v6531_v56  ;;  %v6533_v40 = vrot.slane %v6531_v56, 4  ;;  %v15163_v34 = vld [vmem:[#allocation2 + $0xb4] sm:$0xf] }
 0x3bd   : > { %v15149_v33 = vpop.f32.mrb[144].mxu1  ;;  %v6284_v5 = vsel %vm11648_vm11, %v6279_v42, %v6283_v36  ;;  %v6901_v50 = vrot.slane %v6900_v26, 4  ;;  %v15155_v58 = vpop.f32.mrb[177].mxu0  ;;  %v6911_v37 = vrot.slane %v6910_v25, 4  ;;  %v10567_v39 = vadd.f32 %v14946_v45, %v14934_v55 }
 0x3be   : > { %v15157_v43 = vpop.f32.mrb[145].mxu1  ;;  %v9857_v8 = vcombine.low %v6274_v23, %v6284_v5  ;;  %v15159_v20 = vadd.f32 %v10676_v59, %v10564_v15  ;;  %v15165_v60 = vpop.f32.mrb[178].mxu0  ;;  %v6535_v27 = vsel %vm11642_vm10, %v6533_v40, %v6534_v7  ;;  %v16073_v23 = vld [vmem:[#allocation18_spill] sm:$0xff]  ;;  %v6295_v15 = vshll.u32 %v11415_v13, 16  ;;  %v6602_v59 = vld [vmem:[#allocation2 + $0xbc] sm:$0x1] }
 0x3bf   : > { %v15167_v36 = vpop.f32.mrb[146].mxu1  ;;  %v6906_v56 = vsel %vm11648_vm11, %v6901_v50, %v6905_v38  ;;  %v6292_v25 = vor.u32 %v16073_v23, %v16072_v51  ;;  %v15177_v16 = vpop.f32.mrb[179].mxu0  ;;  %v6916_v45 = vsel %vm11648_vm11, %v6911_v37, %v6915_v1  ;;  %v9874_v21 = vcombine.low %v6532_v41, %v6535_v27  ;;  %v16075_v38 = vld [vmem:[#allocation36_spill] sm:$0xff]  ;;  %v7002_v41 = vld [vmem:[#allocation2 + $0xb4] sm:$0xe] }
 0x3c0   : > { %16071 = vst [vmem:[#allocation33_spill] sm:$0xff] %v15159_v20  ;;  %v15179_v55 = vpop.f32.mrb[147].mxu1  ;;  %8808 = vmatmul.mubr.bf16.gmra.mrb[236].mxu1 %v9857_v8  ;;  %v15183_v42 = vadd.f32 %v10679_v14, %v10567_v39  ;;  %v16076_v26 = vshrl.u32 %v16075_v38, 16  ;;  %v9906_v5 = vcombine.low %v6906_v56, %v6916_v45  ;;  %v6297_v13 = vrot.slane %v6295_v15, 5  ;;  %v6394_v45 = vld [vmem:[#allocation2 + $0xa8] sm:$0xe] }
 0x3c1   : > { %v6293_v50 = vrot.slane %v6292_v25, 4  ;;  %v6305_v40 = vshll.u32 %v5993_v9, 16  ;;  %8815 = vmatprep.mubr.bf16.mxu1 %v9874_v21  ;;  %v6918_v51 = vshrl.u32 %v15163_v34, 16  ;;  %v6921_v23 = vshll.u32 %v15163_v34, 16 }
 0x3c2   : > { %16074 = vst [vmem:[#allocation4_spill] sm:$0xff] %v15183_v42  ;;  %v6301_v7 = vrot.slane %v16076_v26, 4  ;;  %v6927_v8 = vshll.u32 %v15175_v3, 16  ;;  %v6931_v1 = vshrl.u32 %v15175_v3, 16  ;;  %8976 = vmatprep.mubr.bf16.mxu0 %v9906_v5  ;;  %v6937_v56 = vshll.u32 %v6602_v59, 16 }
 0x3c3   : > { %v6298_v14 = vsel %vm11648_vm11, %v6293_v50, %v6297_v13  ;;  %v6307_v39 = vrot.slane %v6305_v40, 5  ;;  %8977 = vmatmul.mubr.bf16.gmra.mrb[16].mxu0 %v9890_v10  ;;  %v6920_v27 = vrot.slane %v6918_v51, 4  ;;  %v6923_v9 = vrot.slane %v6921_v23, 5 }
 0x3c4   : > { %v6302_v37 = vor.u32 %v6301_v7, %v6297_v13  ;;  %v6929_v25 = vrot.slane %v6927_v8, 5  ;;  %v6933_v15 = vrot.slane %v6931_v1, 4  ;;  %v6939_v38 = vrot.slane %v6937_v56, 5  ;;  %v5994_v7 = vld [vmem:[#allocation2 + $0xb0] sm:$0x1] }
 0x3c5   : > { %v9779_v26 = vrot.slane %v7002_v41, 9  ;;  %v7146_v42 = vrot.slane %v15175_v3, 5  ;;  %v6924_v20 = vor.u32 %v6923_v9, %v6920_v27  ;;  %v7149_v5 = vrot.slane %v6602_v59, 5 }
 0x3c6   : > { %v6303_v21 = vrot.slane %v6302_v37, 4  ;;  %v6934_v18 = vor.u32 %v6933_v15, %v6929_v25  ;;  %v9891_v50 = vcombine.low %v15163_v34, %v15175_v3  ;;  %v9763_v51 = vrot.slane %v6394_v45, 9  ;;  %v11416_v37 = vld [vmem:[#allocation2 + $0xac] sm:$0xf] }
 0x3c7   : > { %v15200_v13 = vsel %vm11642_vm10, %v9779_v26, %v7146_v42  ;;  %v7148_v40 = vrot.slane %v7146_v42, 4  ;;  %v6925_v1 = vrot.slane %v6924_v20, 4  ;;  %v6538_v59 = vrot.slane %v11416_v37, 5 }
 0x3c8   : > { %v6308_v10 = vsel %vm11648_vm11, %v6303_v21, %v6307_v39  ;;  %16077 = vst [vmem:[#allocation7_spill] sm:$0xff] %v15200_v13  ;;  %v15202_v23 = vpop.f32.mrb[180].mxu0  ;;  %v6935_v41 = vrot.slane %v6934_v18, 4  ;;  %v6541_v39 = vrot.slane %v5994_v7, 5  ;;  %v10682_v42 = vadd.f32 %v14994_v32, %v14990_v4  ;;  %v15228_v32 = vld [vmem:[#allocation2 + $0xc0] sm:$0xf] }
 0x3c9   : > { %v9858_v8 = vcombine.low %v6298_v14, %v6308_v10  ;;  %v15204_v56 = vpop.f32.mrb[148].mxu1  ;;  %v15206_v34 = vpop.f32.mrb[181].mxu0  ;;  %v15210_v3 = vsel %vm11642_vm10, %v7148_v40, %v7149_v5  ;;  %v10570_v27 = vadd.f32 %v15003_v35, %v14997_v61  ;;  %v6930_v20 = vsel %vm11648_vm11, %v6925_v1, %v6929_v25  ;;  %v16080_v10 = vld [vmem:[#allocation20_spill] sm:$0xff]  ;;  %v16081_v40 = vld [vmem:[#allocation21_spill] sm:$0xff]  ;;  %v16082_v1 = vld [vmem:[#allocation19_spill] sm:$0xff] }
 0x3ca   : > { %16078 = vst [vmem:[#allocation5_spill] sm:$0xff] %v15210_v3  ;;  %v15216_v14 = vpop.f32.mrb[149].mxu1  ;;  %v15218_v18 = vpop.f32.mrb[182].mxu0  ;;  %v6940_v9 = vsel %vm11648_vm11, %v6935_v41, %v6939_v38  ;;  %v6539_v4 = vsel %vm11642_vm10, %v9763_v51, %v6538_v59  ;;  %v6540_v21 = vrot.slane %v6538_v59, 4  ;;  %v10685_v25 = vadd.f32 %v15005_v48, %v14999_v46  ;;  %v15246_v3 = vld [vmem:[#allocation2 + $0xc4] sm:$0xf] }
 0x3cb   : > { %8816 = vmatmul.mubr.bf16.gmra.mrb[240].mxu1 %v9858_v8  ;;  %v15230_v61 = vpop.f32.mrb[150].mxu1  ;;  %v15232_v35 = vpop.f32.mrb[183].mxu0  ;;  %v9907_v45 = vcombine.low %v6930_v20, %v6940_v9  ;;  %v15234_v26 = vadd.f32 %v10682_v42, %v10570_v27  ;;  %v10573_v5 = vadd.f32 %v15015_v11, %v15011_v19  ;;  %v6316_v51 = vor.u32 %v16081_v40, %v16080_v10  ;;  %v15250_v46 = vld [vmem:[#allocation2 + $0xc8] sm:$0x1]  ;;  %v6395_v40 = vld [vmem:[#allocation2 + $0xb4] sm:$0xe] }
 0x3cc   : > { %v15238_v38 = vpop.f32.mrb[151].mxu1  ;;  %v6319_v8 = vshll.u32 %v11416_v37, 16  ;;  %v16083_v41 = vshrl.u32 %v16082_v1, 16  ;;  %v6542_v59 = vsel %vm11642_vm10, %v6540_v21, %v6541_v39  ;;  %v6329_v42 = vshll.u32 %v5994_v7, 16 }
 0x3cd   : > { %16079 = vst [vmem:[#allocation3_spill] sm:$0xff] %v15234_v26  ;;  %8984 = vmatprep.mubr.bf16.mxu0 %v9907_v45  ;;  %v6942_v48 = vshrl.u32 %v15228_v32, 16  ;;  %v6945_v19 = vshll.u32 %v15228_v32, 16  ;;  %v9875_v11 = vcombine.low %v6539_v4, %v6542_v59  ;;  %v15254_v27 = vadd.f32 %v10685_v25, %v10573_v5 }
 0x3ce   : > { %v6325_v15 = vrot.slane %v16083_v41, 4  ;;  %8985 = vmatmul.mubr.bf16.gmra.mrb[20].mxu0 %v9891_v50  ;;  %v6317_v37 = vrot.slane %v6316_v51, 4  ;;  %v6321_v20 = vrot.slane %v6319_v8, 5  ;;  %v6951_v45 = vshll.u32 %v15246_v3, 16  ;;  %v5995_v8 = vld [vmem:[#allocation2 + $0xbc] sm:$0x1] }
 0x3cf   : > { %16084 = vst [vmem:[#allocation10_spill] sm:$0xff] %v15254_v27  ;;  %v6944_v9 = vrot.slane %v6942_v48, 4  ;;  %v6947_v10 = vrot.slane %v6945_v19, 5  ;;  %8823 = vmatprep.mubr.bf16.mxu1 %v9875_v11  ;;  %v6331_v39 = vrot.slane %v6329_v42, 5  ;;  %v6955_v21 = vshrl.u32 %v15246_v3, 16 }
 0x3d0   : > { %v15257_v1 = vpop.f32.mrb[184].mxu0  ;;  %v6326_v7 = vor.u32 %v6325_v15, %v6321_v20  ;;  %v6961_v41 = vshll.u32 %v15250_v46, 16  ;;  %v6322_v50 = vsel %vm11648_vm11, %v6317_v37, %v6321_v20  ;;  %v6953_v5 = vrot.slane %v6951_v45, 5  ;;  %v11417_v19 = vld [vmem:[#allocation2 + $0xb8] sm:$0xf] }
 0x3d1   : > { %v15261_v4 = vpop.f32.mrb[185].mxu0  ;;  %v6948_v25 = vor.u32 %v6947_v10, %v6944_v9  ;;  %v9892_v51 = vcombine.low %v15228_v32, %v15246_v3  ;;  %v6957_v15 = vrot.slane %v6955_v21, 4  ;;  %v9764_v42 = vrot.slane %v6395_v40, 9 }
 0x3d2   : > { %v15267_v59 = vpop.f32.mrb[186].mxu0  ;;  %v6327_v48 = vrot.slane %v6326_v7, 4  ;;  %v6545_v11 = vrot.slane %v11417_v19, 5  ;;  %v6963_v13 = vrot.slane %v6961_v41, 5  ;;  %v10688_v37 = vadd.f32 %v15079_v31, %v15073_v24 }
 0x3d3   : > { %v15269_v27 = vpop.f32.mrb[187].mxu0  ;;  %v6949_v26 = vrot.slane %v6948_v25, 4  ;;  %v10576_v20 = vadd.f32 %v15070_v12, %v15063_v6  ;;  %v15275_v9 = vpop.f32.mrb[152].mxu1  ;;  %v6958_v10 = vor.u32 %v6957_v15, %v6953_v5  ;;  %v6548_v40 = vrot.slane %v5995_v8, 5  ;;  %v16087_v15 = vld [vmem:[#allocation23_spill] sm:$0xff] }
 0x3d4   : > { %v6332_v32 = vsel %vm11648_vm11, %v6327_v48, %v6331_v39  ;;  %v6547_v45 = vrot.slane %v6545_v11, 4  ;;  %v15279_v7 = vpop.f32.mrb[153].mxu1  ;;  %v6546_v41 = vsel %vm11642_vm10, %v9764_v42, %v6545_v11  ;;  %v10691_v24 = vadd.f32 %v15086_v53, %v15084_v47  ;;  %v16086_v48 = vld [vmem:[#allocation27_spill] sm:$0xff] }
 0x3d5   : > { %v9859_v21 = vcombine.low %v6322_v50, %v6332_v32  ;;  %v15283_v25 = vadd.f32 %v10688_v37, %v10576_v20  ;;  %v15287_v6 = vpop.f32.mrb[154].mxu1  ;;  %v6959_v12 = vrot.slane %v6958_v10, 4  ;;  %v10579_v39 = vadd.f32 %v15081_v0, %v15075_v28  ;;  %v6396_v32 = vld [vmem:[#allocation2 + $0xc0] sm:$0xe]  ;;  %v16088_v37 = vld [vmem:[#allocation22_spill] sm:$0xff] }
 0x3d6   : > { %v6549_v31 = vsel %vm11642_vm10, %v6547_v45, %v6548_v40  ;;  %v6340_v50 = vor.u32 %v16087_v15, %v16086_v48  ;;  %v15295_v52 = vpop.f32.mrb[155].mxu1  ;;  %v6343_v11 = vshll.u32 %v11417_v19, 16  ;;  %v16089_v53 = vshrl.u32 %v16088_v37, 16  ;;  %v5996_v48 = vld [vmem:[#allocation2 + $0xc8] sm:$0x1] }
 0x3d7   : > { %16085 = vst [vmem:[#allocation13_spill] sm:$0xff] %v15283_v25  ;;  %8824 = vmatmul.mubr.bf16.gmra.mrb[244].mxu1 %v9859_v21  ;;  %v9876_v42 = vcombine.low %v6546_v41, %v6549_v31  ;;  %v6353_v20 = vshll.u32 %v5995_v8, 16  ;;  %v6954_v45 = vsel %vm11648_vm11, %v6949_v26, %v6953_v5  ;;  %v6964_v28 = vsel %vm11648_vm11, %v6959_v12, %v6963_v13  ;;  %v11418_v31 = vld [vmem:[#allocation2 + $0xc4] sm:$0xf] }
 0x3d8   : > { %v6349_v47 = vrot.slane %v16089_v53, 4  ;;  %v15299_v10 = vpop.f32.mrb[188].mxu0  ;;  %v15305_v0 = vadd.f32 %v10691_v24, %v10579_v39  ;;  %v6341_v40 = vrot.slane %v6340_v50, 4  ;;  %v9908_v21 = vcombine.low %v6954_v45, %v6964_v28  ;;  %v16094_v28 = vld [vmem:[#allocation24_spill] sm:$0xff] }
 0x3d9   : > { %v15307_v15 = vpop.f32.mrb[189].mxu0  ;;  %8831 = vmatprep.mubr.bf16.mxu1 %v9876_v42  ;;  %v6345_v19 = vrot.slane %v6343_v11, 5  ;;  %v9765_v41 = vrot.slane %v6396_v32, 9  ;;  %v6552_v8 = vrot.slane %v11418_v31, 5  ;;  %v6355_v53 = vrot.slane %v6353_v20, 5 }
 0x3da   : > { %16090 = vst [vmem:[#allocation15_spill] sm:$0xff] %v15305_v0  ;;  %v15309_v37 = vpop.f32.mrb[190].mxu0  ;;  %v10694_v26 = vadd.f32 %v15155_v58, %v15147_v29  ;;  %v10582_v13 = vadd.f32 %v15157_v43, %v15149_v33  ;;  %v10697_v5 = vadd.f32 %v15177_v16, %v15165_v60  ;;  %8992 = vmatprep.mubr.bf16.mxu0 %v9908_v21  ;;  %v6555_v32 = vrot.slane %v5996_v48, 5  ;;  %v16092_v33 = vld [vmem:[#allocation25_spill] sm:$0xff]  ;;  %v16093_v58 = vld [vmem:[#allocation26_spill] sm:$0xff] }
 0x3db   : > { %v15317_v24 = vpop.f32.mrb[191].mxu0  ;;  %v6350_v12 = vor.u32 %v6349_v47, %v6345_v19  ;;  %v6553_v39 = vsel %vm11642_vm10, %v9765_v41, %v6552_v8  ;;  %v6554_v50 = vrot.slane %v6552_v8, 4  ;;  %v15321_v42 = vpop.f32.mrb[156].mxu1  ;;  %8993 = vmatmul.mubr.bf16.gmra.mrb[24].mxu0 %v9892_v51  ;;  %v10585_v29 = vadd.f32 %v15179_v55, %v15167_v36  ;;  %v15329_v16 = vld [vmem:[#allocation2 + $0xcc] sm:$0xf] }
 0x3dc   : > { %v15323_v11 = vadd.f32 %v10694_v26, %v10582_v13  ;;  %v6364_v43 = vor.u32 %v16093_v58, %v16092_v33  ;;  %v6367_v60 = vshll.u32 %v11418_v31, 16  ;;  %v15331_v47 = vpop.f32.mrb[157].mxu1  ;;  %v16095_v21 = vshrl.u32 %v16094_v28, 16  ;;  %v15337_v8 = vld [vmem:[#allocation2 + $0xd0] sm:$0xf] }
 0x3dd   : > { %v6351_v20 = vrot.slane %v6350_v12, 4  ;;  %v6556_v45 = vsel %vm11642_vm10, %v6554_v50, %v6555_v32  ;;  %v6377_v41 = vshll.u32 %v5996_v48, 16  ;;  %v15339_v26 = vpop.f32.mrb[158].mxu1  ;;  %v6346_v36 = vsel %vm11648_vm11, %v6341_v40, %v6345_v19  ;;  %v6604_v33 = vld [vmem:[#allocation2 + $0xd4] sm:$0x1] }
 0x3de   : > { %16091 = vst [vmem:[#allocation37_spill] sm:$0xff] %v15323_v11  ;;  %v6373_v51 = vrot.slane %v16095_v21, 4  ;;  %v9877_v55 = vcombine.low %v6553_v39, %v6556_v45  ;;  %v15343_v31 = vadd.f32 %v10697_v5, %v10585_v29  ;;  %v6369_v13 = vrot.slane %v6367_v60, 5  ;;  %v15345_v12 = vpop.f32.mrb[159].mxu1  ;;  %v7004_v28 = vld [vmem:[#allocation2 + $0xcc] sm:$0xe] }
 0x3df   : > { %v6356_v50 = vsel %vm11648_vm11, %v6351_v20, %v6355_v53  ;;  %v6365_v32 = vrot.slane %v6364_v43, 4  ;;  %v6966_v48 = vshrl.u32 %v15329_v16, 16  ;;  %v6969_v58 = vshll.u32 %v15329_v16, 16 }
 0x3e0   : > { %16096 = vst [vmem:[#allocation28_spill] sm:$0xff] %v15343_v31  ;;  %v15351_v21 = vpop.f32.mrb[192].mxu0  ;;  %v9860_v11 = vcombine.low %v6346_v36, %v6356_v50  ;;  %v6374_v40 = vor.u32 %v6373_v51, %v6369_v13  ;;  %v6379_v19 = vrot.slane %v6377_v41, 5  ;;  %v6975_v5 = vshll.u32 %v15337_v8, 16 }
 0x3e1   : > { %v15354_v39 = vpop.f32.mrb[193].mxu0  ;;  %v6968_v29 = vrot.slane %v6966_v48, 4  ;;  %v6971_v60 = vrot.slane %v6969_v58, 5  ;;  %v6979_v45 = vshrl.u32 %v15337_v8, 16  ;;  %v6985_v53 = vshll.u32 %v6604_v33, 16 }
 0x3e2   : > { %v15357_v43 = vpop.f32.mrb[194].mxu0  ;;  %8832 = vmatmul.mubr.bf16.gmra.mrb[248].mxu1 %v9860_v11  ;;  %v6375_v20 = vrot.slane %v6374_v40, 4  ;;  %v6977_v31 = vrot.slane %v6975_v5, 5  ;;  %v9781_v0 = vrot.slane %v7004_v28, 9  ;;  %v7160_v25 = vrot.slane %v15337_v8, 5 }
 0x3e3   : > { %v15360_v36 = vpop.f32.mrb[195].mxu0  ;;  %8839 = vmatprep.mubr.bf16.mxu1 %v9877_v55  ;;  %v6972_v51 = vor.u32 %v6971_v60, %v6968_v29  ;;  %v6981_v41 = vrot.slane %v6979_v45, 4  ;;  %v7163_v50 = vrot.slane %v6604_v33, 5  ;;  %v15362_v48 = vpop.f32.mrb[160].mxu1  ;;  %v6370_v58 = vsel %vm11648_vm11, %v6365_v32, %v6369_v13  ;;  %v11419_v32 = vld [vmem:[#allocation2 + $0x1c] sm:$0xf] }
 0x3e4   : > { %v6380_v11 = vsel %vm11648_vm11, %v6375_v20, %v6379_v19  ;;  %v15370_v28 = vsel %vm11642_vm10, %v9781_v0, %v7160_v25  ;;  %v7162_v40 = vrot.slane %v7160_v25, 4  ;;  %v15372_v5 = vpop.f32.mrb[161].mxu1  ;;  %v6987_v33 = vrot.slane %v6985_v53, 5 }
 0x3e5   : > { %v9861_v55 = vcombine.low %v6370_v58, %v6380_v11  ;;  %v6973_v29 = vrot.slane %v6972_v51, 4  ;;  %v6982_v60 = vor.u32 %v6981_v41, %v6977_v31  ;;  %v15374_v45 = vpop.f32.mrb[162].mxu1  ;;  %v9766_v13 = vrot.slane %v6989_v2, 9  ;;  %v11420_v58 = vld [vmem:[#allocation2 + $0x20] sm:$0x1] }
 0x3e6   : > { %v15378_v17 = vsel %vm11642_vm10, %v7162_v40, %v7163_v50  ;;  %v7055_v19 = vrot.slane %v11419_v32, 5  ;;  %v10700_v0 = vadd.f32 %v15206_v34, %v15202_v23  ;;  %v15382_v20 = vpop.f32.mrb[163].mxu1  ;;  %v10588_v41 = vadd.f32 %v15216_v14, %v15204_v56  ;;  %v11421_v56 = vld [vmem:[#allocation2 + $0x34] sm:$0xf] }
 0x3e7   : > { %v6978_v25 = vsel %vm11648_vm11, %v6973_v29, %v6977_v31  ;;  %v6983_v51 = vrot.slane %v6982_v60, 4  ;;  %v9925_v53 = vcombine.low %v15370_v28, %v15378_v17  ;;  %v7058_v11 = vrot.slane %v11420_v58, 5 }
 0x3e8   : > { %v15390_v50 = vpop.f32.mrb[196].mxu0  ;;  %v7057_v2 = vrot.slane %v7055_v19, 4  ;;  %v10703_v23 = vadd.f32 %v15232_v35, %v15218_v18  ;;  %v10591_v34 = vadd.f32 %v15238_v38, %v15230_v61  ;;  %v9893_v29 = vcombine.low %v15329_v16, %v15337_v8  ;;  %v11422_v8 = vld [vmem:[#allocation2 + $0x38] sm:$0x1] }
 0x3e9   : > { %v10723_v40 = vpop.f32.mrb[197].mxu0  ;;  %v6988_v31 = vsel %vm11648_vm11, %v6983_v51, %v6987_v33  ;;  %v15400_v60 = vadd.f32 %v10700_v0, %v10588_v41  ;;  %v7069_v14 = vrot.slane %v11421_v56, 5  ;;  %v7056_v18 = vsel %vm11642_vm10, %v9766_v13, %v7055_v19 }
 0x3ea   : > { %v15402_v32 = vpop.f32.mrb[198].mxu0  ;;  %8840 = vmatmul.mubr.bf16.gmra.mrb[252].mxu1 %v9861_v55  ;;  %v9909_v58 = vcombine.low %v6978_v25, %v6988_v31  ;;  %v7059_v61 = vsel %vm11642_vm10, %v7057_v2, %v7058_v11  ;;  %v15408_v35 = vadd.f32 %v10703_v23, %v10591_v34  ;;  %v7072_v0 = vrot.slane %v11422_v8, 5 }
 0x3eb   : > { %v10726_v38 = vpop.f32.mrb[199].mxu0  ;;  %v9910_v33 = vcombine.low %v7056_v18, %v7059_v61  ;;  %v7071_v16 = vrot.slane %v7069_v14, 4  ;;  %v10706_v51 = vadd.f32 %v15261_v4, %v15257_v1  ;;  %v10610_v41 = vpop.f32.mrb[164].mxu1  ;;  %v10594_v55 = vadd.f32 %v15279_v7, %v15275_v9  ;;  %v11423_v7 = vld [vmem:[#allocation2 + $0x4c] sm:$0xf] }
 0x3ec   : > { %9000 = vmatprep.mubr.bf16.mxu0 %v9909_v58  ;;  %v10709_v13 = vadd.f32 %v15269_v27, %v15267_v59  ;;  %v10597_v19 = vadd.f32 %v15295_v52, %v15287_v6  ;;  %v10611_v25 = vpop.f32.mrb[165].mxu1  ;;  %v9768_v2 = vrot.slane %v6991_v30, 9  ;;  %v10712_v1 = vadd.f32 %v15307_v15, %v15299_v10  ;;  %v11424_v30 = vld [vmem:[#allocation2 + $0x50] sm:$0x1] }
 0x3ed   : > { %11076 = vmatprep.mubr.bf16.mxu1 %v9910_v33  ;;  %9001 = vmatmul.mubr.bf16.gmra.mrb[28].mxu0 %v9893_v29  ;;  %v7073_v11 = vsel %vm11642_vm10, %v7071_v16, %v7072_v0  ;;  %v10613_v4 = vpop.f32.mrb[166].mxu1  ;;  %v15422_v23 = vadd.f32 %v10706_v51, %v10594_v55  ;;  %v7083_v27 = vrot.slane %v11423_v7, 5  ;;  %v10600_v52 = vadd.f32 %v15331_v47, %v15321_v42  ;;  %v11425_v16 = vld [vmem:[#allocation2 + $0x64] sm:$0xf] }
 0x3ee   : > { %v15424_v9 = vadd.f32 %v10709_v13, %v10597_v19  ;;  %v10614_v59 = vpop.f32.mrb[167].mxu1  ;;  %v10715_v6 = vadd.f32 %v15317_v24, %v15309_v37  ;;  %v10603_v34 = vadd.f32 %v15345_v12, %v15339_v26  ;;  %v7070_v10 = vsel %vm11642_vm10, %v9768_v2, %v7069_v14  ;;  %v6993_v26 = vld [vmem:[#allocation2 + $0x48] sm:$0xe] }
 0x3ef   : > { %v15434_v15 = vadd.f32 %v10712_v1, %v10600_v52  ;;  %v9912_v56 = vcombine.low %v7070_v10, %v7073_v11  ;;  %v10718_v42 = vadd.f32 %v15354_v39, %v15351_v21  ;;  %v10606_v47 = vadd.f32 %v15372_v5, %v15362_v48  ;;  %v7003_v10 = vld [vmem:[#allocation2 + $0xc0] sm:$0xe] }
 0x3f0   : > { %v10728_v31 = vpop.f32.mrb[200].mxu0  ;;  %v15436_v58 = vadd.f32 %v10715_v6, %v10603_v34  ;;  %v16097_v24 = vcombine.low %v14697_v49, %v14707_v22  ;;  %v7085_v12 = vrot.slane %v7083_v27, 4  ;;  %v10721_v14 = vadd.f32 %v15360_v36, %v15357_v43 }
 0x3f1   : > { %v10729_v29 = vpop.f32.mrb[201].mxu0  ;;  %v15447_v61 = vadd.f32 %v10718_v42, %v10606_v47  ;;  %v10609_v21 = vadd.f32 %v15382_v20, %v15374_v45  ;;  %v7086_v48 = vrot.slane %v11424_v30, 5  ;;  %v10724_v5 = vadd.f32 %v10723_v40, %v15390_v50 }
 0x3f2   : > { %v10731_v37 = vpop.f32.mrb[202].mxu0  ;;  %11077 = vmatmul.mubr.bf16.vlgmr.msra.gmra.mrb[0].mxu1 %v16097_v24  ;;  %v10612_v33 = vadd.f32 %v10611_v25, %v10610_v41  ;;  %v9770_v22 = vrot.slane %v6993_v26, 9  ;;  %v7097_v8 = vrot.slane %v11425_v16, 5  ;;  %v10727_v45 = vadd.f32 %v10726_v38, %v15402_v32  ;;  %v6995_v32 = vld [vmem:[#allocation2 + $0x60] sm:$0xe] }
 0x3f3   : > { %v10732_v18 = vpop.f32.mrb[203].mxu0  ;;  %11080 = vmatprep.mubr.bf16.mxu1 %v9912_v56  ;;  %v10616_v39 = vpop.f32.mrb[168].mxu1  ;;  %v15452_v0 = vadd.f32 %v10721_v14, %v10609_v21  ;;  %v7087_v36 = vsel %vm11642_vm10, %v7085_v12, %v7086_v48  ;;  %v10615_v20 = vadd.f32 %v10614_v59, %v10613_v4  ;;  %v10730_v13 = vadd.f32 %v10729_v29, %v10728_v31  ;;  %v11426_v29 = vld [vmem:[#allocation2 + $0x68] sm:$0x1] }
 0x3f4   : > { %v10617_v49 = vpop.f32.mrb[169].mxu1  ;;  %v15456_v51 = vadd.f32 %v10724_v5, %v10612_v33  ;;  %v7084_v50 = vsel %vm11642_vm10, %v9770_v22, %v7083_v27  ;;  %v10733_v25 = vadd.f32 %v10732_v18, %v10731_v37  ;;  %v16098_v52 = vcombine.low %v14778_v62, %v14784_v54  ;;  %v11427_v62 = vld [vmem:[#allocation2 + $0x7c] sm:$0xf] }
 0x3f5   : > { %v10619_v43 = vpop.f32.mrb[170].mxu1  ;;  %v15461_v40 = vadd.f32 %v10727_v45, %v10615_v20  ;;  %v10618_v41 = vadd.f32 %v10617_v49, %v10616_v39  ;;  %v9914_v11 = vcombine.low %v7084_v50, %v7087_v36  ;;  %v7099_v38 = vrot.slane %v7097_v8, 4 }
 0x3f6   : > { %v10620_v55 = vpop.f32.mrb[171].mxu1  ;;  %v7100_v56 = vrot.slane %v11426_v29, 5  ;;  %v7153_v47 = vrot.slane %v15246_v3, 5  ;;  %v9772_v37 = vrot.slane %v6995_v32, 9  ;;  %v7111_v54 = vrot.slane %v11427_v62, 5 }
 0x3f7   : > { %v10621_v1 = vadd.f32 %v10620_v55, %v10619_v43  ;;  %v15466_v4 = vadd.f32 %v10730_v13, %v10618_v41  ;;  %v9780_v18 = vrot.slane %v7003_v10, 9  ;;  %v7156_v39 = vrot.slane %v15250_v46, 5  ;;  %v6997_v13 = vld [vmem:[#allocation2 + $0x78] sm:$0xe]  ;;  %v11428_v41 = vld [vmem:[#allocation2 + $0x80] sm:$0x1] }
 0x3f8   : > { %v10734_v19 = vpop.f32.mrb[204].mxu0  ;;  %v7101_v12 = vsel %vm11642_vm10, %v7099_v38, %v7100_v56  ;;  %v7155_v21 = vrot.slane %v7153_v47, 4  ;;  %v7098_v3 = vsel %vm11642_vm10, %v9772_v37, %v7097_v8  ;;  %v16099_v8 = vcombine.low %v14855_v63, %v14859_v44  ;;  %v11429_v32 = vld [vmem:[#allocation2 + $0x94] sm:$0xf]  ;;  %v16101_v37 = vld [vmem:[#allocation35_spill] sm:$0xff] }
 0x3f9   : > { %v10735_v2 = vpop.f32.mrb[205].mxu0  ;;  %v15468_v27 = vadd.f32 %v10733_v25, %v10621_v1  ;;  %v15480_v33 = vsel %vm11642_vm10, %v9780_v18, %v7153_v47  ;;  %v9916_v16 = vcombine.low %v7098_v3, %v7101_v12  ;;  %v7113_v20 = vrot.slane %v7111_v54, 4  ;;  %v16100_v47 = vld [vmem:[#allocation34_spill] sm:$0xff] }
 0x3fa   : > { %v10737_v7 = vpop.f32.mrb[206].mxu0  ;;  %11081 = vmatmul.mubr.bf16.gmra.mrb[4].mxu1 %v16098_v52  ;;  %v10736_v59 = vadd.f32 %v10735_v2, %v10734_v19  ;;  %v15484_v49 = vsel %vm11642_vm10, %v7155_v21, %v7156_v39  ;;  %v7114_v25 = vrot.slane %v11428_v41, 5  ;;  %v7125_v38 = vrot.slane %v11429_v32, 5  ;;  %v6999_v12 = vld [vmem:[#allocation2 + $0x90] sm:$0xe] }
 0x3fb   : > { %v10738_v6 = vpop.f32.mrb[207].mxu0  ;;  %11084 = vmatprep.mubr.bf16.mxu1 %v9914_v11  ;;  %v10622_v34 = vpop.f32.mrb[172].mxu1  ;;  %v9924_v46 = vcombine.low %v15480_v33, %v15484_v49  ;;  %v16102_v62 = vcombine.low %v16100_v47, %v16101_v37  ;;  %v11430_v21 = vld [vmem:[#allocation2 + $0x98] sm:$0x1]  ;;  %v9776_v3 = vrot.slane %v6999_v12, 9 }
 0x3fc   : > { %v10739_v31 = vadd.f32 %v10738_v6, %v10737_v7  ;;  %v10623_v42 = vpop.f32.mrb[173].mxu1  ;;  %v9774_v7 = vrot.slane %v6997_v13, 9  ;;  %v7115_v52 = vsel %vm11642_vm10, %v7113_v20, %v7114_v25  ;;  %v7128_v39 = vrot.slane %v11430_v21, 5 }
 0x3fd   : > { %v10624_v24 = vadd.f32 %v10623_v42, %v10622_v34  ;;  %v10625_v26 = vpop.f32.mrb[174].mxu1  ;;  %v7126_v13 = vsel %vm11642_vm10, %v9776_v3, %v7125_v38 }
 0x3fe   : > { %v10626_v14 = vpop.f32.mrb[175].mxu1  ;;  %v7112_v34 = vsel %vm11642_vm10, %v9774_v7, %v7111_v54 }
 0x3ff   : > { %v15474_v30 = vadd.f32 %v10736_v59, %v10624_v24  ;;  %v10627_v48 = vadd.f32 %v10626_v14, %v10625_v26  ;;  %v9918_v10 = vcombine.low %v7112_v34, %v7115_v52  ;;  %v7127_v24 = vrot.slane %v7125_v38, 4  ;;  %v16107_v34 = vld [vmem:[#allocation40_spill] sm:$0xff] }
 0x400   : > { %v10740_v5 = vpop.f32.mrb[208].mxu0 }
 0x401   : > { %v10741_v22 = vpop.f32.mrb[209].mxu0  ;;  %v15486_v43 = vadd.f32 %v10739_v31, %v10627_v48 }
 0x402   : > { %v10742_v36 = vadd.f32 %v10741_v22, %v10740_v5  ;;  %v10743_v45 = vpop.f32.mrb[210].mxu0  ;;  %11085 = vmatmul.mubr.bf16.gmra.mrb[8].mxu1 %v16099_v8  ;;  %v7129_v22 = vsel %vm11642_vm10, %v7127_v24, %v7128_v39 }
 0x403   : > { %v10744_v55 = vpop.f32.mrb[211].mxu0  ;;  %11088 = vmatprep.mubr.bf16.mxu1 %v9916_v16  ;;  %v10628_v19 = vpop.f32.mrb[176].mxu1  ;;  %v16103_v16 = vld [vmem:[#allocation16_spill] sm:$0xff] }
 0x404   : > { %v10745_v50 = vadd.f32 %v10744_v55, %v10743_v45  ;;  %v10629_v2 = vpop.f32.mrb[177].mxu1 }
 0x405   : > { %v10630_v11 = vadd.f32 %v10629_v2, %v10628_v19  ;;  %v10631_v1 = vpop.f32.mrb[178].mxu1 }
 0x406   : > { %v10632_v59 = vpop.f32.mrb[179].mxu1 }
 0x407   : > { %v15495_v63 = vadd.f32 %v10742_v36, %v10630_v11  ;;  %v10633_v44 = vadd.f32 %v10632_v59, %v10631_v1  ;;  %v7139_v36 = vrot.slane %v16103_v16, 5  ;;  %v16104_v11 = vld [vmem:[#allocation11_spill] sm:$0xff]  ;;  %v16105_v1 = vld [vmem:[#allocation12_spill] sm:$0xff]  ;;  %v7001_v59 = vld [vmem:[#allocation2 + $0xa8] sm:$0xe] }
 0x408   : > { %v10746_v6 = vpop.f32.mrb[212].mxu0  ;;  %v16106_v7 = vcombine.low %v16104_v11, %v16105_v1 }
 0x409   : > { %v10747_v31 = vpop.f32.mrb[213].mxu0  ;;  %v15499_v29 = vadd.f32 %v10745_v50, %v10633_v44  ;;  %v9920_v50 = vcombine.low %v7126_v13, %v7129_v22  ;;  %v7141_v52 = vrot.slane %v7139_v36, 4 }
 0x40a   : > { %v10748_v56 = vadd.f32 %v10747_v31, %v10746_v6  ;;  %v10749_v42 = vpop.f32.mrb[214].mxu0  ;;  %11089 = vmatmul.mubr.bf16.gmra.mrb[12].mxu1 %v16102_v62  ;;  %v7142_v31 = vrot.slane %v16107_v34, 5 }
 0x40b   : > { %v10750_v26 = vpop.f32.mrb[215].mxu0  ;;  %11092 = vmatprep.mubr.bf16.mxu1 %v9918_v10  ;;  %v10634_v14 = vpop.f32.mrb[180].mxu1 }
 0x40c   : > { %v10751_v18 = vadd.f32 %v10750_v26, %v10749_v42  ;;  %v10635_v48 = vpop.f32.mrb[181].mxu1  ;;  %v9778_v42 = vrot.slane %v7001_v59, 9  ;;  %v7143_v47 = vsel %vm11642_vm10, %v7141_v52, %v7142_v31  ;;  %v16112_v52 = vld [vmem:[#allocation5_spill] sm:$0xff] }
 0x40d   : > { %v10636_v54 = vadd.f32 %v10635_v48, %v10634_v14  ;;  %v10637_v5 = vpop.f32.mrb[182].mxu1 }
 0x40e   : > { %v10638_v45 = vpop.f32.mrb[183].mxu1  ;;  %v7140_v12 = vsel %vm11642_vm10, %v9778_v42, %v7139_v36 }
 0x40f   : > { %v15507_v8 = vadd.f32 %v10748_v56, %v10636_v54  ;;  %v10639_v20 = vadd.f32 %v10638_v45, %v10637_v5  ;;  %v16108_v54 = vld [vmem:[#allocation14_spill] sm:$0xff]  ;;  %v16109_v5 = vld [vmem:[#allocation9_spill] sm:$0xff] }
 0x410   : > { %v10752_v55 = vpop.f32.mrb[216].mxu0  ;;  %v16110_v3 = vcombine.low %v16108_v54, %v16109_v5 }
 0x411   : > { %v10753_v19 = vpop.f32.mrb[217].mxu0  ;;  %v15511_v41 = vadd.f32 %v10751_v18, %v10639_v20  ;;  %v9922_v18 = vcombine.low %v7140_v12, %v7143_v47 }
 0x412   : > { %v10754_v25 = vadd.f32 %v10753_v19, %v10752_v55  ;;  %v10755_v2 = vpop.f32.mrb[218].mxu0  ;;  %11093 = vmatmul.mubr.bf16.gmra.mrb[16].mxu1 %v16106_v7  ;;  %v16111_v7 = vld [vmem:[#allocation7_spill] sm:$0xff] }
 0x413   : > { %v10756_v32 = vpop.f32.mrb[219].mxu0  ;;  %11096 = vmatprep.mubr.bf16.mxu1 %v9920_v50  ;;  %v10640_v44 = vpop.f32.mrb[184].mxu1 }
 0x414   : > { %v10757_v6 = vadd.f32 %v10756_v32, %v10755_v2  ;;  %v10641_v10 = vpop.f32.mrb[185].mxu1  ;;  %v16113_v32 = vcombine.low %v16111_v7, %v16112_v52  ;;  %v16118_v52 = vld [vmem:[#allocation3_spill] sm:$0xff] }
 0x415   : > { %v10642_v38 = vadd.f32 %v10641_v10, %v10640_v44  ;;  %v10643_v56 = vpop.f32.mrb[186].mxu1 }
 0x416   : > { %v10644_v37 = vpop.f32.mrb[187].mxu1 }
 0x417   : > { %v15519_v62 = vadd.f32 %v10754_v25, %v10642_v38  ;;  %v10645_v24 = vadd.f32 %v10644_v37, %v10643_v56  ;;  %v16114_v56 = vld [vmem:[#allocation6_spill] sm:$0xff] }
 0x418   : > { %v10758_v26 = vpop.f32.mrb[220].mxu0 }
 0x419   : > { %v10759_v14 = vpop.f32.mrb[221].mxu0  ;;  %v15523_v21 = vadd.f32 %v10757_v6, %v10645_v24 }
 0x41a   : > { %v10760_v39 = vadd.f32 %v10759_v14, %v10758_v26  ;;  %v10761_v48 = vpop.f32.mrb[222].mxu0  ;;  %11097 = vmatmul.mubr.bf16.gmra.mrb[20].mxu1 %v16110_v3  ;;  %v16115_v26 = vld [vmem:[#allocation32_spill] sm:$0xff]  ;;  %v16116_v3 = vld [vmem:[#allocation33_spill] sm:$0xff] }
 0x41b   : > { %v10762_v22 = vpop.f32.mrb[223].mxu0  ;;  %11100 = vmatprep.mubr.bf16.mxu1 %v9922_v18  ;;  %v10646_v16 = vpop.f32.mrb[188].mxu1 }
 0x41c   : > { %v10763_v45 = vadd.f32 %v10762_v22, %v10761_v48  ;;  %v10647_v20 = vpop.f32.mrb[189].mxu1 }
 0x41d   : > { %v10648_v55 = vadd.f32 %v10647_v20, %v10646_v16  ;;  %v10649_v13 = vpop.f32.mrb[190].mxu1 }
 0x41e   : > { %v10650_v19 = vpop.f32.mrb[191].mxu1 }
 0x41f   : > { %v15528_v57 = vadd.f32 %v10760_v39, %v10648_v55  ;;  %v10651_v36 = vadd.f32 %v10650_v19, %v10649_v13 }
 0x420   : > { %v10892_v50 = vpop.f32.mrb[224].mxu0 }
 0x421   : > { %v10893_v25 = vpop.f32.mrb[225].mxu0  ;;  %v15530_v2 = vadd.f32 %v10763_v45, %v10651_v36  ;;  %v16117_v45 = vld [vmem:[#allocation4_spill] sm:$0xff] }
 0x422   : > { %v15532_v11 = vadd.f32 %v10893_v25, %v10892_v50  ;;  %v10895_v1 = vpop.f32.mrb[226].mxu0  ;;  %11101 = vmatmul.mubr.bf16.gmra.mrb[24].mxu1 %v16113_v32 }
 0x423   : > { %v10896_v59 = vpop.f32.mrb[227].mxu0  ;;  %11104 = vmatprep.mubr.bf16.mxu1 %v9924_v46  ;;  %v10780_v44 = vpop.f32.mrb[192].mxu1 }
 0x424   : > { %v15540_v6 = vadd.f32 %v10896_v59, %v10895_v1  ;;  %v10781_v34 = vpop.f32.mrb[193].mxu1 }
 0x425   : > { %v10782_v31 = vadd.f32 %v10781_v34, %v10780_v44  ;;  %v10783_v10 = vpop.f32.mrb[194].mxu1 }
 0x426   : > { %v10784_v38 = vpop.f32.mrb[195].mxu1 }
 0x427   : > { %v15543_v42 = vadd.f32 %v10782_v31, %v16114_v56  ;;  %v10785_v47 = vadd.f32 %v10784_v38, %v10783_v10  ;;  %v16119_v31 = vld [vmem:[#allocation10_spill] sm:$0xff] }
 0x428   : > { %v10898_v37 = vpop.f32.mrb[228].mxu0 }
 0x429   : > { %v10899_v24 = vpop.f32.mrb[229].mxu0  ;;  %v15546_v12 = vadd.f32 %v10785_v47, %v16115_v26 }
 0x42a   : > { %v10900_v14 = vadd.f32 %v10899_v24, %v10898_v37  ;;  %v10901_v18 = vpop.f32.mrb[230].mxu0  ;;  %11105 = vmatmul.mubr.bf16.gmra.mrb[28].mxu1 %v9925_v53 }
 0x42b   : > { %v10902_v33 = vpop.f32.mrb[231].mxu0  ;;  %v10786_v49 = vpop.f32.mrb[196].mxu1 }
 0x42c   : > { %v10903_v46 = vadd.f32 %v10902_v33, %v10901_v18  ;;  %v10787_v39 = vpop.f32.mrb[197].mxu1 }
 0x42d   : > { %v10788_v48 = vadd.f32 %v10787_v39, %v10786_v49  ;;  %v10789_v54 = vpop.f32.mrb[198].mxu1  ;;  %v16120_v39 = vld [vmem:[#allocation13_spill] sm:$0xff] }
 0x42e   : > { %v10790_v5 = vpop.f32.mrb[199].mxu1 }
 0x42f   : > { %v8730_v22 = vadd.f32 %v10788_v48, %v16116_v3  ;;  %v10791_v16 = vadd.f32 %v10790_v5, %v10789_v54 }
 0x430   : > { %v10904_v55 = vpop.f32.mrb[232].mxu0 }
 0x431   : > { %v8733_v20 = vadd.f32 %v10791_v16, %v16117_v45  ;;  %v10905_v13 = vpop.f32.mrb[233].mxu0  ;;  %v15556_v3 = vadd.f32 %v10900_v14, %v8730_v22  ;;  %v16121_v45 = vld [vmem:[#allocation15_spill] sm:$0xff] }
 0x432   : > { %v10906_v19 = vadd.f32 %v10905_v13, %v10904_v55  ;;  %v10907_v36 = vpop.f32.mrb[234].mxu0 }
 0x433   : > { %v10908_v50 = vpop.f32.mrb[235].mxu0 }
 0x434   : > { %v10909_v17 = vadd.f32 %v10908_v50, %v10907_v36 }
 0x435   : > { %v10792_v25 = vpop.f32.mrb[200].mxu1 }
 0x436   : > { %v10793_v28 = vpop.f32.mrb[201].mxu1 }
 0x437   : > { %v10794_v53 = vadd.f32 %v10793_v28, %v10792_v25  ;;  %v10795_v1 = vpop.f32.mrb[202].mxu1 }
 0x438   : > { %v10796_v7 = vpop.f32.mrb[203].mxu1 }
 0x439   : > { %v8738_v32 = vadd.f32 %v10794_v53, %v16118_v52  ;;  %v10797_v59 = vadd.f32 %v10796_v7, %v10795_v1  ;;  %v10910_v44 = vpop.f32.mrb[236].mxu0 }
 0x43a   : > { %v10911_v34 = vpop.f32.mrb[237].mxu0 }
 0x43b   : > { %v8741_v10 = vadd.f32 %v10797_v59, %v16119_v31  ;;  %v10912_v38 = vadd.f32 %v10911_v34, %v10910_v44  ;;  %v10913_v56 = vpop.f32.mrb[238].mxu0  ;;  %v16122_v59 = vld [vmem:[#allocation37_spill] sm:$0xff]  ;;  %v16123_v31 = vld [vmem:[#allocation28_spill] sm:$0xff] }
 0x43c   : > { %v10914_v47 = vpop.f32.mrb[239].mxu0 }
 0x43d   : > { %v10915_v37 = vadd.f32 %v10914_v47, %v10913_v56 }
 0x43f   : > { %v10798_v24 = vpop.f32.mrb[204].mxu1 }
 0x440   : > { %v10799_v26 = vpop.f32.mrb[205].mxu1 }
 0x441   : > { %v10800_v18 = vadd.f32 %v10799_v26, %v10798_v24  ;;  %v10801_v33 = vpop.f32.mrb[206].mxu1  ;;  %v15563_v26 = vadd.f32 %v15532_v11, %v15543_v42  ;;  %v15574_v11 = vadd.f32 %v10906_v19, %v8738_v32 }
 0x442   : > { %v10802_v49 = vpop.f32.mrb[207].mxu1 }
 0x443   : > { %v8746_v48 = vadd.f32 %v10800_v18, %v16120_v39  ;;  %v10803_v54 = vadd.f32 %v10802_v49, %v10801_v33  ;;  %v10916_v5 = vpop.f32.mrb[240].mxu0  ;;  %v15565_v33 = vadd.f32 %v10903_v46, %v8733_v20  ;;  %v15569_v39 = vadd.f32 %v15540_v6, %v15546_v12 }
 0x444   : > { %v10917_v16 = vpop.f32.mrb[241].mxu0  ;;  %v15579_v6 = vadd.f32 %v10909_v17, %v8741_v10 }
 0x445   : > { %v8749_v55 = vadd.f32 %v10803_v54, %v16121_v45  ;;  %v10918_v13 = vadd.f32 %v10917_v16, %v10916_v5  ;;  %v10919_v36 = vpop.f32.mrb[242].mxu0  ;;  %v15571_v54 = vadd.f32 %v10912_v38, %v8746_v48 }
 0x446   : > { %v10920_v50 = vpop.f32.mrb[243].mxu0 }
 0x447   : > { %v10804_v25 = vpop.f32.mrb[208].mxu1  ;;  %v10921_v28 = vadd.f32 %v10920_v50, %v10919_v36  ;;  %v15576_v46 = vadd.f32 %v10915_v37, %v8749_v55 }
 0x448   : > { %v10805_v53 = vpop.f32.mrb[209].mxu1 }
 0x449   : > { %v10806_v1 = vadd.f32 %v10805_v53, %v10804_v25  ;;  %v10807_v7 = vpop.f32.mrb[210].mxu1 }
 0x44a   : > { %v10808_v52 = vpop.f32.mrb[211].mxu1 }
 0x44b   : > { %v8754_v44 = vadd.f32 %v10806_v1, %v16122_v59  ;;  %v10809_v34 = vadd.f32 %v10808_v52, %v10807_v7 }
 0x44d   : > { %v8757_v56 = vadd.f32 %v10809_v34, %v16123_v31  ;;  %v10922_v47 = vpop.f32.mrb[244].mxu0  ;;  %v15583_v32 = vadd.f32 %v10918_v13, %v8754_v44 }
 0x44e   : > { %v10923_v14 = vpop.f32.mrb[245].mxu0 }
 0x44f   : > { %v10924_v22 = vadd.f32 %v10923_v14, %v10922_v47  ;;  %v10925_v24 = vpop.f32.mrb[246].mxu0  ;;  %v15588_v17 = vadd.f32 %v10921_v28, %v8757_v56 }
 0x450   : > { %v10926_v18 = vpop.f32.mrb[247].mxu0 }
 0x451   : > { %v10927_v49 = vadd.f32 %v10926_v18, %v10925_v24 }
 0x453   : > { %v10810_v5 = vpop.f32.mrb[212].mxu1 }
 0x454   : > { %v10811_v16 = vpop.f32.mrb[213].mxu1 }
 0x455   : > { %v10812_v45 = vadd.f32 %v10811_v16, %v10810_v5  ;;  %v10813_v36 = vpop.f32.mrb[214].mxu1 }
 0x456   : > { %v10814_v50 = vpop.f32.mrb[215].mxu1 }
 0x457   : > { %v8762_v25 = vadd.f32 %v10812_v45, %v15400_v60  ;;  %v10815_v53 = vadd.f32 %v10814_v50, %v10813_v36 }
 0x458   : > { %v10928_v42 = vpop.f32.mrb[248].mxu0 }
 0x459   : > { %v8765_v20 = vadd.f32 %v10815_v53, %v15408_v35  ;;  %v10929_v1 = vpop.f32.mrb[249].mxu0  ;;  %v15581_v48 = vadd.f32 %v10924_v22, %v8762_v25 }
 0x45a   : > { %v10930_v12 = vadd.f32 %v10929_v1, %v10928_v42  ;;  %v10931_v38 = vpop.f32.mrb[250].mxu0 }
 0x45b   : > { %v10932_v7 = vpop.f32.mrb[251].mxu0  ;;  %v15586_v35 = vadd.f32 %v10927_v49, %v8765_v20 }
 0x45c   : > { %v10816_v52 = vpop.f32.mrb[216].mxu1  ;;  %v10933_v59 = vadd.f32 %v10932_v7, %v10931_v38 }
 0x45d   : > { %v10817_v34 = vpop.f32.mrb[217].mxu1 }
 0x45e   : > { %v10818_v60 = vadd.f32 %v10817_v34, %v10816_v52  ;;  %v10819_v31 = vpop.f32.mrb[218].mxu1 }
 0x45f   : > { %v10820_v19 = vpop.f32.mrb[219].mxu1 }
 0x460   : > { %v8770_v37 = vadd.f32 %v10818_v60, %v15422_v23  ;;  %v10821_v55 = vadd.f32 %v10820_v19, %v10819_v31 }
 0x462   : > { %v8773_v10 = vadd.f32 %v10821_v55, %v15424_v9  ;;  %v10934_v47 = vpop.f32.mrb[252].mxu0  ;;  %v15591_v16 = vadd.f32 %v10930_v12, %v8770_v37 }
 0x463   : > { %v10935_v14 = vpop.f32.mrb[253].mxu0 }
 0x464   : > { %v10936_v22 = vadd.f32 %v10935_v14, %v10934_v47  ;;  %v10937_v24 = vpop.f32.mrb[254].mxu0  ;;  %v15593_v44 = vadd.f32 %v10933_v59, %v8773_v10 }
 0x465   : > { %v10938_v18 = vpop.f32.mrb[255].mxu0 }
 0x466   : > { %v10939_v5 = vadd.f32 %v10938_v18, %v10937_v24 }
 0x468   : > { %v10822_v45 = vpop.f32.mrb[220].mxu1 }
 0x469   : > { %v10823_v13 = vpop.f32.mrb[221].mxu1 }
 0x46a   : > { %v10824_v23 = vadd.f32 %v10823_v13, %v10822_v45  ;;  %v10825_v36 = vpop.f32.mrb[222].mxu1 }
 0x46b   : > { %v10826_v49 = vpop.f32.mrb[223].mxu1 }
 0x46c   : > { %v8778_v28 = vadd.f32 %v10824_v23, %v15434_v15  ;;  %v10827_v56 = vadd.f32 %v10826_v49, %v10825_v36  ;;  %v10940_v50 = vpop.f32.mrb[0].mxu0 }
 0x46d   : > { %v10941_v9 = vpop.f32.mrb[1].mxu0 }
 0x46e   : > { %v8781_v25 = vadd.f32 %v10827_v56, %v15436_v58  ;;  %v10942_v53 = vadd.f32 %v10941_v9, %v10940_v50  ;;  %v10943_v42 = vpop.f32.mrb[2].mxu0  ;;  %v15597_v20 = vadd.f32 %v10936_v22, %v8778_v28 }
 0x46f   : > { %v10944_v1 = vpop.f32.mrb[3].mxu0 }
 0x470   : > { %v10828_v12 = vpop.f32.mrb[224].mxu1  ;;  %v10945_v38 = vadd.f32 %v10944_v1, %v10943_v42  ;;  %v15599_v7 = vadd.f32 %v10939_v5, %v8781_v25 }
 0x471   : > { %v10829_v52 = vpop.f32.mrb[225].mxu1 }
 0x472   : > { %v10830_v59 = vadd.f32 %v10829_v52, %v10828_v12  ;;  %v10831_v34 = vpop.f32.mrb[226].mxu1 }
 0x473   : > { %v10832_v60 = vpop.f32.mrb[227].mxu1 }
 0x474   : > { %v8786_v15 = vadd.f32 %v10830_v59, %v15447_v61  ;;  %v10833_v31 = vadd.f32 %v10832_v60, %v10831_v34 }
 0x476   : > { %v8789_v19 = vadd.f32 %v10833_v31, %v15452_v0  ;;  %v10946_v37 = vpop.f32.mrb[4].mxu0  ;;  %v15603_v58 = vadd.f32 %v10942_v53, %v8786_v15 }
 0x477   : > { %v10947_v55 = vpop.f32.mrb[5].mxu0 }
 0x478   : > { %v10948_v10 = vadd.f32 %v10947_v55, %v10946_v37  ;;  %v10949_v47 = vpop.f32.mrb[6].mxu0  ;;  %v15605_v14 = vadd.f32 %v10945_v38, %v8789_v19 }
 0x479   : > { %v10950_v22 = vpop.f32.mrb[7].mxu0 }
 0x47a   : > { %v10951_v24 = vadd.f32 %v10950_v22, %v10949_v47 }
 0x47c   : > { %v10834_v18 = vpop.f32.mrb[228].mxu1 }
 0x47d   : > { %v10835_v5 = vpop.f32.mrb[229].mxu1 }
 0x47e   : > { %v10836_v45 = vadd.f32 %v10835_v5, %v10834_v18  ;;  %v10837_v13 = vpop.f32.mrb[230].mxu1 }
 0x47f   : > { %v10838_v23 = vpop.f32.mrb[231].mxu1 }
 0x480   : > { %v8794_v61 = vadd.f32 %v10836_v45, %v15456_v51  ;;  %v10839_v36 = vadd.f32 %v10838_v23, %v10837_v13 }
 0x481   : > { %v10952_v49 = vpop.f32.mrb[8].mxu0 }
 0x482   : > { %v10953_v0 = vpop.f32.mrb[9].mxu0  ;;  %v8797_v28 = vadd.f32 %v10839_v36, %v15461_v40  ;;  %v15609_v9 = vadd.f32 %v10948_v10, %v8794_v61 }
 0x483   : > { %v10954_v56 = vadd.f32 %v10953_v0, %v10952_v49  ;;  %v10955_v50 = vpop.f32.mrb[10].mxu0 }
 0x484   : > { %v10956_v25 = vpop.f32.mrb[11].mxu0  ;;  %v15611_v1 = vadd.f32 %v10951_v24, %v8797_v28 }
 0x485   : > { %v10957_v42 = vadd.f32 %v10956_v25, %v10955_v50 }
 0x486   : > { %v10840_v53 = vpop.f32.mrb[232].mxu1 }
 0x487   : > { %v10841_v12 = vpop.f32.mrb[233].mxu1 }
 0x488   : > { %v10842_v38 = vadd.f32 %v10841_v12, %v10840_v53  ;;  %v10843_v52 = vpop.f32.mrb[234].mxu1 }
 0x489   : > { %v10844_v59 = vpop.f32.mrb[235].mxu1 }
 0x48a   : > { %v8802_v51 = vadd.f32 %v10842_v38, %v15466_v4  ;;  %v10845_v34 = vadd.f32 %v10844_v59, %v10843_v52  ;;  %v10958_v15 = vpop.f32.mrb[12].mxu0 }
 0x48b   : > { %v10959_v31 = vpop.f32.mrb[13].mxu0 }
 0x48c   : > { %v8805_v60 = vadd.f32 %v10845_v34, %v15468_v27  ;;  %v15615_v40 = vadd.f32 %v10954_v56, %v8802_v51  ;;  %v10960_v19 = vadd.f32 %v10959_v31, %v10958_v15  ;;  %v10961_v37 = vpop.f32.mrb[14].mxu0 }
 0x48d   : > { %v10962_v10 = vpop.f32.mrb[15].mxu0 }
 0x48e   : > { %v15617_v55 = vadd.f32 %v10957_v42, %v8805_v60  ;;  %v10963_v47 = vadd.f32 %v10962_v10, %v10961_v37 }
 0x493   : > { %v10846_v22 = vpop.f32.mrb[236].mxu1 }
 0x494   : > { %v10847_v24 = vpop.f32.mrb[237].mxu1 }
 0x495   : > { %v10848_v18 = vadd.f32 %v10847_v24, %v10846_v22  ;;  %v10849_v5 = vpop.f32.mrb[238].mxu1 }
 0x496   : > { %v10850_v45 = vpop.f32.mrb[239].mxu1  ;;  %v10964_v23 = vpop.f32.mrb[16].mxu0 }
 0x497   : > { %v8810_v4 = vadd.f32 %v10848_v18, %v15474_v30  ;;  %v10851_v13 = vadd.f32 %v10850_v45, %v10849_v5  ;;  %v10965_v27 = vpop.f32.mrb[17].mxu0 }
 0x498   : > { %v10966_v36 = vadd.f32 %v10965_v27, %v10964_v23  ;;  %v10967_v49 = vpop.f32.mrb[18].mxu0 }
 0x499   : > { %v8813_v61 = vadd.f32 %v10851_v13, %v15486_v43  ;;  %v15621_v0 = vadd.f32 %v10960_v19, %v8810_v4  ;;  %v10968_v28 = vpop.f32.mrb[19].mxu0 }
 0x49a   : > { %v10969_v56 = vadd.f32 %v10968_v28, %v10967_v49 }
 0x49b   : > { %v15623_v50 = vadd.f32 %v10963_v47, %v8813_v61 }
 0x49e   : > { %v10852_v25 = vpop.f32.mrb[240].mxu1 }
 0x49f   : > { %v10853_v53 = vpop.f32.mrb[241].mxu1 }
 0x4a0   : > { %v10854_v42 = vadd.f32 %v10853_v53, %v10852_v25  ;;  %v10855_v12 = vpop.f32.mrb[242].mxu1 }
 0x4a1   : > { %v10856_v38 = vpop.f32.mrb[243].mxu1  ;;  %v10970_v59 = vpop.f32.mrb[20].mxu0 }
 0x4a2   : > { %v8818_v30 = vadd.f32 %v10854_v42, %v15495_v63  ;;  %v10857_v52 = vadd.f32 %v10856_v38, %v10855_v12  ;;  %v10971_v51 = vpop.f32.mrb[21].mxu0 }
 0x4a3   : > { %v10972_v34 = vadd.f32 %v10971_v51, %v10970_v59  ;;  %v10973_v60 = vpop.f32.mrb[22].mxu0 }
 0x4a4   : > { %v8821_v43 = vadd.f32 %v10857_v52, %v15499_v29  ;;  %v15627_v15 = vadd.f32 %v10966_v36, %v8818_v30  ;;  %v10974_v31 = vpop.f32.mrb[23].mxu0 }
 0x4a5   : > { %v10975_v19 = vadd.f32 %v10974_v31, %v10973_v60 }
 0x4a6   : > { %v15629_v37 = vadd.f32 %v10969_v56, %v8821_v43 }
 0x4aa   : > { %v10858_v10 = vpop.f32.mrb[244].mxu1 }
 0x4ab   : > { %v10859_v47 = vpop.f32.mrb[245].mxu1 }
 0x4ac   : > { %v10860_v22 = vadd.f32 %v10859_v47, %v10858_v10  ;;  %v10861_v24 = vpop.f32.mrb[246].mxu1 }
 0x4ad   : > { %v10862_v18 = vpop.f32.mrb[247].mxu1 }
 0x4ae   : > { %v8826_v63 = vadd.f32 %v10860_v22, %v15507_v8  ;;  %v10863_v5 = vadd.f32 %v10862_v18, %v10861_v24  ;;  %v10976_v45 = vpop.f32.mrb[24].mxu0 }
 0x4af   : > { %v10977_v29 = vpop.f32.mrb[25].mxu0 }
 0x4b0   : > { %v8829_v4 = vadd.f32 %v10863_v5, %v15511_v41  ;;  %v15633_v13 = vadd.f32 %v10972_v34, %v8826_v63  ;;  %v10978_v23 = vadd.f32 %v10977_v29, %v10976_v45  ;;  %v10979_v27 = vpop.f32.mrb[26].mxu0  ;;  %v15650_v5 = vld [vmem:[%s15832_s3 + $0x2] ss:$0 sm:$0xff] }
 0x4b1   : > { %v10980_v61 = vpop.f32.mrb[27].mxu0 }
 0x4b2   : > { %v15635_v36 = vadd.f32 %v10975_v19, %v8829_v4  ;;  %v10981_v49 = vadd.f32 %v10980_v61, %v10979_v27 }
 0x4b5   : > { %v10864_v28 = vpop.f32.mrb[248].mxu1 }
 0x4b6   : > { %v10865_v56 = vpop.f32.mrb[249].mxu1 }
 0x4b7   : > { %v10866_v25 = vadd.f32 %v10865_v56, %v10864_v28  ;;  %v10867_v53 = vpop.f32.mrb[250].mxu1 }
 0x4b8   : > { %v10868_v42 = vpop.f32.mrb[251].mxu1 }
 0x4b9   : > { %v8834_v8 = vadd.f32 %v10866_v25, %v15519_v62  ;;  %v10869_v12 = vadd.f32 %v10868_v42, %v10867_v53  ;;  %v11431_v42 = vld [vmem:[%s11613_s10 + $0x10] sm:$0xff] }
 0x4bb   : > { %v8837_v38 = vadd.f32 %v10869_v12, %v15523_v21  ;;  %v15639_v41 = vadd.f32 %v10978_v23, %v8834_v8 }
 0x4bd   : > { %v10870_v30 = vpop.f32.mrb[252].mxu1  ;;  %v15641_v52 = vadd.f32 %v10981_v49, %v8837_v38 }
 0x4be   : > { %v10871_v59 = vpop.f32.mrb[253].mxu1 }
 0x4bf   : > { %v10872_v51 = vadd.f32 %v10871_v59, %v10870_v30  ;;  %v10873_v43 = vpop.f32.mrb[254].mxu1 }
 0x4c0   : > { %v10982_v34 = vpop.f32.mrb[28].mxu0  ;;  %v10874_v60 = vpop.f32.mrb[255].mxu1 }
 0x4c1   : > { %v8842_v31 = vadd.f32 %v10872_v51, %v15528_v57  ;;  %v10875_v19 = vadd.f32 %v10874_v60, %v10873_v43  ;;  %v10983_v10 = vpop.f32.mrb[29].mxu0  ;;  %v11433_v51 = vld [vmem:[%s11613_s10 + $0x18] sm:$0xff] }
 0x4c2   : > { %v10984_v47 = vadd.f32 %v10983_v10, %v10982_v34  ;;  %v10985_v22 = vpop.f32.mrb[30].mxu0 }
 0x4c3   : > { %v8845_v62 = vadd.f32 %v10875_v19, %v15530_v2  ;;  %v10986_v24 = vpop.f32.mrb[31].mxu0  ;;  %v15658_v2 = vld [vmem:[%s15832_s3 + $0x3] ss:$0 sm:$0xff]  ;;  %v11434_v19 = vld [vmem:[%s11613_s10 + $0x8] sm:$0xff] }
 0x4c4   : > { %v10987_v21 = vadd.f32 %v10986_v24, %v10985_v22  ;;  %v15645_v18 = vadd.f32 %v10984_v47, %v8842_v31 }
 0x4c5   : > { %v11078_v63 = vpop.f32.mrb[0].mxu1 }
 0x4c6   : > { %v9052_v45 = vadd.f32 %v11078_v63, %v15556_v3  ;;  %v9043_v57 = vpop.f32.mrb[1].mxu1  ;;  %v15653_v4 = vadd.f32 %v10987_v21, %v8845_v62 }
 0x4c7   : > { %v9044_v29 = vadd.f32 %v9043_v57, %v15563_v26  ;;  %v11079_v23 = vpop.f32.mrb[2].mxu1 }
 0x4c8   : > { %v9177_v27 = vmul.f32 %v15650_v5, %v9052_v45  ;;  %v9055_v61 = vadd.f32 %v11079_v23, %v15565_v33  ;;  %v9046_v49 = vpop.f32.mrb[3].mxu1  ;;  %v11432_v33 = vld [vmem:[%s11613_s10] sm:$0xff] }
 0x4c9   : > { %v9175_v3 = vmul.f32 %v15650_v5, %v9044_v29  ;;  %v9047_v28 = vadd.f32 %v9046_v49, %v15569_v39 }
 0x4ca   : > { %v9214_v56 = vadd.f32 %v15658_v2, %v9177_v27  ;;  %v9178_v25 = vmul.f32 %v15650_v5, %v9055_v61 }
 0x4cb   : > { %v9212_v53 = vadd.f32 %v15658_v2, %v9175_v3  ;;  %v9176_v26 = vmul.f32 %v15650_v5, %v9047_v28  ;;  %v11436_v3 = vld [vmem:[%s11613_s10 + $0x20] sm:$0xff] }
 0x4cc   : > { %v9246_v8 = vadd.f32 %v11431_v42, %v9214_v56  ;;  %v9215_v12 = vadd.f32 %v15658_v2, %v9178_v25 }
 0x4cd   : > { %v9244_v39 = vadd.f32 %v11432_v33, %v9212_v53  ;;  %v9213_v38 = vadd.f32 %v15658_v2, %v9176_v26  ;;  %v11082_v30 = vpop.f32.mrb[4].mxu1  ;;  %v11437_v53 = vld [vmem:[%s11613_s10 + $0x38] sm:$0xff]  ;;  %v11438_v33 = vld [vmem:[%s11613_s10 + $0x28] sm:$0xff] }
 0x4ce   : > { %v9278_v59 = vmax.f32 %v9246_v8, 0.0  ;;  %v9247_v43 = vadd.f32 %v11433_v51, %v9215_v12  ;;  %v9068_v34 = vadd.f32 %v11082_v30, %v15571_v54  ;;  %v9059_v60 = vpop.f32.mrb[5].mxu1 }
 0x4cf   : > { %v9276_v31 = vmax.f32 %v9244_v39, 0.0  ;;  %v9245_v10 = vadd.f32 %v11434_v19, %v9213_v38  ;;  %v9060_v47 = vadd.f32 %v9059_v60, %v15574_v11  ;;  %v11083_v22 = vpop.f32.mrb[6].mxu1 }
 0x4d0   : > { %9310 = vst [vmem:[%s15676_s11 + $0x10] sm:$0xff] %v9278_v59  ;;  %v9279_v62 = vmax.f32 %v9247_v43, 0.0  ;;  %v9181_v24 = vmul.f32 %v15650_v5, %v9068_v34  ;;  %v9071_v21 = vadd.f32 %v11083_v22, %v15576_v46  ;;  %v9062_v63 = vpop.f32.mrb[7].mxu1  ;;  %v11435_v46 = vld [vmem:[%s11613_s10 + $0x30] sm:$0xff] }
 0x4d1   : > { %9308 = vst [vmem:[%s15676_s11] sm:$0xff] %v9276_v31  ;;  %v9277_v54 = vmax.f32 %v9245_v10, 0.0  ;;  %v9179_v45 = vmul.f32 %v15650_v5, %v9060_v47  ;;  %v9063_v57 = vadd.f32 %v9062_v63, %v15579_v6 }
 0x4d2   : > { %9311 = vst [vmem:[%s15676_s11 + $0x18] sm:$0xff] %v9279_v62  ;;  %v9218_v11 = vadd.f32 %v15658_v2, %v9181_v24  ;;  %v9182_v29 = vmul.f32 %v15650_v5, %v9071_v21  ;;  %v11440_v24 = vld [vmem:[%s11613_s10 + $0x40] sm:$0xff] }
 0x4d3   : > { %9309 = vst [vmem:[%s15676_s11 + $0x8] sm:$0xff] %v9277_v54  ;;  %v9216_v23 = vadd.f32 %v15658_v2, %v9179_v45  ;;  %v9180_v27 = vmul.f32 %v15650_v5, %v9063_v57  ;;  %v11441_v45 = vld [vmem:[%s11613_s10 + $0x58] sm:$0xff] }
 0x4d4   : > { %v9250_v61 = vadd.f32 %v11435_v46, %v9218_v11  ;;  %v9219_v49 = vadd.f32 %v15658_v2, %v9182_v29 }
 0x4d5   : > { %v9248_v28 = vadd.f32 %v11436_v3, %v9216_v23  ;;  %v9217_v6 = vadd.f32 %v15658_v2, %v9180_v27  ;;  %v11086_v56 = vpop.f32.mrb[8].mxu1  ;;  %v11442_v27 = vld [vmem:[%s11613_s10 + $0x48] sm:$0xff] }
 0x4d6   : > { %v9282_v25 = vmax.f32 %v9250_v61, 0.0  ;;  %v9251_v26 = vadd.f32 %v11437_v53, %v9219_v49  ;;  %v9084_v42 = vadd.f32 %v11086_v56, %v15581_v48  ;;  %v9075_v8 = vpop.f32.mrb[9].mxu1 }
 0x4d7   : > { %v9280_v12 = vmax.f32 %v9248_v28, 0.0  ;;  %v9249_v39 = vadd.f32 %v11438_v33, %v9217_v6  ;;  %v9076_v38 = vadd.f32 %v9075_v8, %v15583_v32  ;;  %v11087_v30 = vpop.f32.mrb[10].mxu1 }
 0x4d8   : > { %9314 = vst [vmem:[%s15676_s11 + $0x30] sm:$0xff] %v9282_v25  ;;  %v9283_v59 = vmax.f32 %v9251_v26, 0.0  ;;  %v9185_v51 = vmul.f32 %v15650_v5, %v9084_v42  ;;  %v9087_v43 = vadd.f32 %v11087_v30, %v15586_v35  ;;  %v9078_v34 = vpop.f32.mrb[11].mxu1  ;;  %v11439_v35 = vld [vmem:[%s11613_s10 + $0x50] sm:$0xff] }
 0x4d9   : > { %9312 = vst [vmem:[%s15676_s11 + $0x20] sm:$0xff] %v9280_v12  ;;  %v9281_v48 = vmax.f32 %v9249_v39, 0.0  ;;  %v9183_v60 = vmul.f32 %v15650_v5, %v9076_v38  ;;  %v9079_v31 = vadd.f32 %v9078_v34, %v15588_v17  ;;  %v11444_v39 = vld [vmem:[%s11613_s10 + $0x60] sm:$0xff] }
 0x4da   : > { %9315 = vst [vmem:[%s15676_s11 + $0x38] sm:$0xff] %v9283_v59  ;;  %v9222_v32 = vadd.f32 %v15658_v2, %v9185_v51  ;;  %v9186_v19 = vmul.f32 %v15650_v5, %v9087_v43  ;;  %v11445_v51 = vld [vmem:[%s11613_s10 + $0x78] sm:$0xff] }
 0x4db   : > { %9313 = vst [vmem:[%s15676_s11 + $0x28] sm:$0xff] %v9281_v48  ;;  %v9220_v10 = vadd.f32 %v15658_v2, %v9183_v60  ;;  %v9184_v47 = vmul.f32 %v15650_v5, %v9079_v31  ;;  %v11446_v31 = vld [vmem:[%s11613_s10 + $0x68] sm:$0xff] }
 0x4dc   : > { %v9254_v22 = vadd.f32 %v11439_v35, %v9222_v32  ;;  %v9223_v62 = vadd.f32 %v15658_v2, %v9186_v19 }
 0x4dd   : > { %v9252_v21 = vadd.f32 %v11440_v24, %v9220_v10  ;;  %v9221_v17 = vadd.f32 %v15658_v2, %v9184_v47  ;;  %v11090_v63 = vpop.f32.mrb[12].mxu1 }
 0x4de   : > { %v9286_v54 = vmax.f32 %v9254_v22, 0.0  ;;  %v9255_v57 = vadd.f32 %v11441_v45, %v9223_v62  ;;  %v9100_v11 = vadd.f32 %v11090_v63, %v15597_v20  ;;  %v9091_v29 = vpop.f32.mrb[13].mxu1 }
 0x4df   : > { %v9284_v23 = vmax.f32 %v9252_v21, 0.0  ;;  %v9253_v46 = vadd.f32 %v11442_v27, %v9221_v17  ;;  %v9092_v61 = vadd.f32 %v9091_v29, %v15591_v16  ;;  %v11091_v49 = vpop.f32.mrb[14].mxu1 }
 0x4e0   : > { %9318 = vst [vmem:[%s15676_s11 + $0x50] sm:$0xff] %v9286_v54  ;;  %v9287_v3 = vmax.f32 %v9255_v57, 0.0  ;;  %v9189_v28 = vmul.f32 %v15650_v5, %v9100_v11  ;;  %v9103_v6 = vadd.f32 %v11091_v49, %v15599_v7  ;;  %v9094_v56 = vpop.f32.mrb[15].mxu1  ;;  %v11443_v7 = vld [vmem:[%s11613_s10 + $0x70] sm:$0xff]  ;;  %v11448_v11 = vld [vmem:[%s11613_s10 + $0x80] sm:$0xff] }
 0x4e1   : > { %9316 = vst [vmem:[%s15676_s11 + $0x40] sm:$0xff] %v9284_v23  ;;  %v9285_v20 = vmax.f32 %v9253_v46, 0.0  ;;  %v9187_v25 = vmul.f32 %v15650_v5, %v9092_v61  ;;  %v9095_v53 = vadd.f32 %v9094_v56, %v15593_v44  ;;  %v11449_v46 = vld [vmem:[%s11613_s10 + $0x98] sm:$0xff] }
 0x4e2   : > { %9319 = vst [vmem:[%s15676_s11 + $0x58] sm:$0xff] %v9287_v3  ;;  %v9226_v16 = vadd.f32 %v15658_v2, %v9189_v28  ;;  %v9190_v26 = vmul.f32 %v15650_v5, %v9103_v6  ;;  %v11450_v6 = vld [vmem:[%s11613_s10 + $0x88] sm:$0xff] }
 0x4e3   : > { %9317 = vst [vmem:[%s15676_s11 + $0x48] sm:$0xff] %v9285_v20  ;;  %v9224_v42 = vadd.f32 %v15658_v2, %v9187_v25  ;;  %v9188_v8 = vmul.f32 %v15650_v5, %v9095_v53 }
 0x4e4   : > { %v9258_v12 = vadd.f32 %v11443_v7, %v9226_v16  ;;  %v9227_v33 = vadd.f32 %v15658_v2, %v9190_v26 }
 0x4e5   : > { %v9256_v38 = vadd.f32 %v11444_v39, %v9224_v42  ;;  %v9225_v44 = vadd.f32 %v15658_v2, %v9188_v8  ;;  %v11094_v30 = vpop.f32.mrb[16].mxu1 }
 0x4e6   : > { %v9290_v59 = vmax.f32 %v9258_v12, 0.0  ;;  %v9259_v43 = vadd.f32 %v11445_v51, %v9227_v33  ;;  %v9116_v34 = vadd.f32 %v11094_v30, %v15609_v9  ;;  %v9107_v48 = vpop.f32.mrb[17].mxu1  ;;  %v11452_v30 = vld [vmem:[%s11613_s10 + $0xa0] sm:$0xff] }
 0x4e7   : > { %v9288_v60 = vmax.f32 %v9256_v38, 0.0  ;;  %v9257_v32 = vadd.f32 %v11446_v31, %v9225_v44  ;;  %v9108_v19 = vadd.f32 %v9107_v48, %v15603_v58  ;;  %v11095_v10 = vpop.f32.mrb[18].mxu1 }
 0x4e8   : > { %9322 = vst [vmem:[%s15676_s11 + $0x70] sm:$0xff] %v9290_v59  ;;  %v9291_v47 = vmax.f32 %v9259_v43, 0.0  ;;  %v9193_v35 = vmul.f32 %v15650_v5, %v9116_v34  ;;  %v9119_v22 = vadd.f32 %v11095_v10, %v15611_v1  ;;  %v9110_v62 = vpop.f32.mrb[19].mxu1  ;;  %v11447_v1 = vld [vmem:[%s11613_s10 + $0x90] sm:$0xff]  ;;  %v11453_v34 = vld [vmem:[%s11613_s10 + $0xb8] sm:$0xff] }
 0x4e9   : > { %9320 = vst [vmem:[%s15676_s11 + $0x60] sm:$0xff] %v9288_v60  ;;  %v9289_v9 = vmax.f32 %v9257_v32, 0.0  ;;  %v9191_v24 = vmul.f32 %v15650_v5, %v9108_v19  ;;  %v9111_v21 = vadd.f32 %v9110_v62, %v15605_v14  ;;  %v11454_v19 = vld [vmem:[%s11613_s10 + $0xa8] sm:$0xff] }
 0x4ea   : > { %9323 = vst [vmem:[%s15676_s11 + $0x78] sm:$0xff] %v9291_v47  ;;  %v9230_v58 = vadd.f32 %v15658_v2, %v9193_v35  ;;  %v9194_v17 = vmul.f32 %v15650_v5, %v9119_v22 }
 0x4eb   : > { %9321 = vst [vmem:[%s15676_s11 + $0x68] sm:$0xff] %v9289_v9  ;;  %v9228_v63 = vadd.f32 %v15658_v2, %v9191_v24  ;;  %v9192_v54 = vmul.f32 %v15650_v5, %v9111_v21 }
 0x4ec   : > { %v9262_v45 = vadd.f32 %v11447_v1, %v9230_v58  ;;  %v9231_v57 = vadd.f32 %v15658_v2, %v9194_v17 }
 0x4ed   : > { %v9260_v29 = vadd.f32 %v11448_v11, %v9228_v63  ;;  %v9229_v14 = vadd.f32 %v15658_v2, %v9192_v54  ;;  %v11098_v23 = vpop.f32.mrb[20].mxu1 }
 0x4ee   : > { %v9294_v27 = vmax.f32 %v9262_v45, 0.0  ;;  %v9263_v61 = vadd.f32 %v11449_v46, %v9231_v57  ;;  %v9132_v49 = vadd.f32 %v11098_v23, %v15621_v0  ;;  %v9123_v3 = vpop.f32.mrb[21].mxu1  ;;  %v11456_v57 = vld [vmem:[%s11613_s10 + $0xc0] sm:$0xff]  ;;  %v11457_v23 = vld [vmem:[%s11613_s10 + $0xd8] sm:$0xff] }
 0x4ef   : > { %v9292_v28 = vmax.f32 %v9260_v29, 0.0  ;;  %v9261_v56 = vadd.f32 %v11450_v6, %v9229_v14  ;;  %v9124_v20 = vadd.f32 %v9123_v3, %v15615_v40  ;;  %v11099_v25 = vpop.f32.mrb[22].mxu1  ;;  %v11458_v3 = vld [vmem:[%s11613_s10 + $0xc8] sm:$0xff] }
 0x4f0   : > { %9326 = vst [vmem:[%s15676_s11 + $0x90] sm:$0xff] %v9294_v27  ;;  %v9295_v53 = vmax.f32 %v9263_v61, 0.0  ;;  %v9197_v16 = vmul.f32 %v15650_v5, %v9132_v49  ;;  %v9135_v26 = vadd.f32 %v11099_v25, %v15623_v50  ;;  %v9126_v42 = vpop.f32.mrb[23].mxu1  ;;  %v11451_v50 = vld [vmem:[%s11613_s10 + $0xb0] sm:$0xff] }
 0x4f1   : > { %9324 = vst [vmem:[%s15676_s11 + $0x80] sm:$0xff] %v9292_v28  ;;  %v9293_v0 = vmax.f32 %v9261_v56, 0.0  ;;  %v9195_v8 = vmul.f32 %v15650_v5, %v9124_v20  ;;  %v9127_v7 = vadd.f32 %v9126_v42, %v15617_v55 }
 0x4f2   : > { %9327 = vst [vmem:[%s15676_s11 + $0x98] sm:$0xff] %v9295_v53  ;;  %v9234_v40 = vadd.f32 %v15658_v2, %v9197_v16  ;;  %v9198_v12 = vmul.f32 %v15650_v5, %v9135_v26 }
 0x4f3   : > { %9325 = vst [vmem:[%s15676_s11 + $0x88] sm:$0xff] %v9293_v0  ;;  %v9232_v33 = vadd.f32 %v15658_v2, %v9195_v8  ;;  %v9196_v39 = vmul.f32 %v15650_v5, %v9127_v7  ;;  %v11459_v7 = vld [vmem:[%s11613_s10 + $0xf0] sm:$0xff] }
 0x4f4   : > { %v9266_v38 = vadd.f32 %v11451_v50, %v9234_v40  ;;  %v9235_v44 = vadd.f32 %v15658_v2, %v9198_v12 }
 0x4f5   : > { %v9264_v59 = vadd.f32 %v11452_v30, %v9232_v33  ;;  %v9233_v55 = vadd.f32 %v15658_v2, %v9196_v39  ;;  %v11102_v51 = vpop.f32.mrb[24].mxu1 }
 0x4f6   : > { %v9298_v43 = vmax.f32 %v9266_v38, 0.0  ;;  %v9267_v48 = vadd.f32 %v11453_v34, %v9235_v44  ;;  %v9148_v60 = vadd.f32 %v11102_v51, %v15633_v13  ;;  %v9139_v31 = vpop.f32.mrb[25].mxu1  ;;  %v11461_v38 = vld [vmem:[%s11613_s10 + $0xf8] sm:$0xff] }
 0x4f7   : > { %v9296_v32 = vmax.f32 %v9264_v59, 0.0  ;;  %v9265_v10 = vadd.f32 %v11454_v19, %v9233_v55  ;;  %v9140_v47 = vadd.f32 %v9139_v31, %v15627_v15  ;;  %v11103_v35 = vpop.f32.mrb[26].mxu1  ;;  %v11462_v59 = vld [vmem:[%s11613_s10 + $0xe8] sm:$0xff] }
 0x4f8   : > { %9330 = vst [vmem:[%s15676_s11 + $0xb0] sm:$0xff] %v9298_v43  ;;  %v9299_v22 = vmax.f32 %v9267_v48, 0.0  ;;  %v9201_v62 = vmul.f32 %v15650_v5, %v9148_v60  ;;  %v9151_v9 = vadd.f32 %v11103_v35, %v15635_v36  ;;  %v9142_v24 = vpop.f32.mrb[27].mxu1  ;;  %v11455_v36 = vld [vmem:[%s11613_s10 + $0xd0] sm:$0xff] }
 0x4f9   : > { %9328 = vst [vmem:[%s15676_s11 + $0xa0] sm:$0xff] %v9296_v32  ;;  %v9297_v13 = vmax.f32 %v9265_v10, 0.0  ;;  %v9199_v21 = vmul.f32 %v15650_v5, %v9140_v47  ;;  %v9143_v58 = vadd.f32 %v9142_v24, %v15629_v37 }
 0x4fa   : > { %9331 = vst [vmem:[%s15676_s11 + $0xb8] sm:$0xff] %v9299_v22  ;;  %v9238_v15 = vadd.f32 %v15658_v2, %v9201_v62  ;;  %v9202_v17 = vmul.f32 %v15650_v5, %v9151_v9 }
 0x4fb   : > { %9329 = vst [vmem:[%s15676_s11 + $0xa8] sm:$0xff] %v9297_v13  ;;  %v9236_v63 = vadd.f32 %v15658_v2, %v9199_v21  ;;  %v9200_v54 = vmul.f32 %v15650_v5, %v9143_v58 }
 0x4fc   : > { %v9270_v1 = vadd.f32 %v11455_v36, %v9238_v15  ;;  %v9239_v45 = vadd.f32 %v15658_v2, %v9202_v17 }
 0x4fd   : > { %v9268_v11 = vadd.f32 %v11456_v57, %v9236_v63  ;;  %v9237_v37 = vadd.f32 %v15658_v2, %v9200_v54  ;;  %v11106_v29 = vpop.f32.mrb[28].mxu1 }
 0x4fe   : > { %v9302_v14 = vmax.f32 %v9270_v1, 0.0  ;;  %v9271_v27 = vadd.f32 %v11457_v23, %v9239_v45  ;;  %v9164_v46 = vadd.f32 %v11106_v29, %v15645_v18  ;;  %v9155_v61 = vpop.f32.mrb[29].mxu1 }
 0x4ff   : > { %v9300_v49 = vmax.f32 %v9268_v11, 0.0  ;;  %v9269_v28 = vadd.f32 %v11458_v3, %v9237_v37  ;;  %v9156_v6 = vadd.f32 %v9155_v61, %v15639_v41  ;;  %v11107_v56 = vpop.f32.mrb[30].mxu1 }
 0x500   : > { %9334 = vst [vmem:[%s15676_s11 + $0xd0] sm:$0xff] %v9302_v14  ;;  %v9303_v20 = vmax.f32 %v9271_v27, 0.0  ;;  %v9205_v25 = vmul.f32 %v15650_v5, %v9164_v46  ;;  %v9167_v53 = vadd.f32 %v11107_v56, %v15653_v4  ;;  %v9158_v16 = vpop.f32.mrb[31].mxu1 }
 0x501   : > { %9332 = vst [vmem:[%s15676_s11 + $0xc0] sm:$0xff] %v9300_v49  ;;  %v9301_v18 = vmax.f32 %v9269_v28, 0.0  ;;  %v9203_v26 = vmul.f32 %v15650_v5, %v9156_v6  ;;  %v9159_v42 = vadd.f32 %v9158_v16, %v15641_v52  ;;  %v11460_v52 = vld [vmem:[%s11613_s10 + $0xe0] sm:$0xff] }
 0x502   : > { %9335 = vst [vmem:[%s15676_s11 + $0xd8] sm:$0xff] %v9303_v20  ;;  %v9242_v41 = vadd.f32 %v15658_v2, %v9205_v25  ;;  %v9206_v0 = vmul.f32 %v15650_v5, %v9167_v53 }
 0x503   : > { %9333 = vst [vmem:[%s15676_s11 + $0xc8] sm:$0xff] %v9301_v18  ;;  %v9240_v8 = vadd.f32 %v15658_v2, %v9203_v26  ;;  %v9204_v4 = vmul.f32 %v15650_v5, %v9159_v42 }
 0x504   : > { %v9274_v40 = vadd.f32 %v11459_v7, %v9242_v41  ;;  %v9243_v12 = vadd.f32 %v15658_v2, %v9206_v0 }
 0x505   : > { %v9272_v33 = vadd.f32 %v11460_v52, %v9240_v8  ;;  %v9241_v39 = vadd.f32 %v15658_v2, %v9204_v4 }
 0x506   : > { %v9306_v50 = vmax.f32 %v9274_v40, 0.0  ;;  %v9275_v44 = vadd.f32 %v11461_v38, %v9243_v12 }
 0x507   : > { %v9304_v30 = vmax.f32 %v9272_v33, 0.0  ;;  %v9273_v55 = vadd.f32 %v11462_v59, %v9241_v39 }
 0x508   : > { %9338 = vst [vmem:[%s15676_s11 + $0xf0] sm:$0xff] %v9306_v50  ;;  %v9307_v51 = vmax.f32 %v9275_v44, 0.0 }
 0x509   : > { %9336 = vst [vmem:[%s15676_s11 + $0xe0] sm:$0xff] %v9304_v30  ;;  %v9305_v5 = vmax.f32 %v9273_v55, 0.0 }
 0x50a   : > { %9339 = vst [vmem:[%s15676_s11 + $0xf8] sm:$0xff] %v9307_v51 }
 0x50b   : > { %9337 = vst [vmem:[%s15676_s11 + $0xe8] sm:$0xff] %v9305_v5 }
 0x50c PF: > { %s14_s15 = sadd.s32 1, %s11469_s15  }
 0x50d   : > { %p11_p4 = scmp.ge.s32.totalorder %s14_s15, 4  }
 0x50f   :  { %13 = sbr.rel (!%p11_p4) target bundleno = 1 (0x1), region = 69 }

</bundles_post_ra>
